<compile_context>
chip_gen: v6e
topology: v6e:2x2x1
jax: 0.10.0
libtpu: 0.0.40
codegen_flags: <defaults>
</compile_context>

<pallas_src>
import functools

import jax
import jax.numpy as jnp
from jax.experimental import pallas as pl
from jax.experimental.pallas import tpu as pltpu

F_SIZE = 16
L_SIZE = 32
SIZE = 16
BN_EPS = 1e-5


# ----------------------------------------------------------------------------
# Pallas kernels
# ----------------------------------------------------------------------------
def _post_kernel(x_ref, w_ref, bst_ref, post_ref):
    acc = jnp.dot(x_ref[...], w_ref[...], preferred_element_type=jnp.float32)
    acc = acc + bst_ref[0:1, :]
    post_ref[...] = jnp.maximum(acc, 0.0) * bst_ref[1:2, :] + bst_ref[2:3, :]


def _both_kernel(x_ref, w_ref, bst_ref, raw_ref, post_ref):
    acc = jnp.dot(x_ref[...], w_ref[...], preferred_element_type=jnp.float32)
    raw = acc + bst_ref[0:1, :]
    raw_ref[...] = raw
    post_ref[...] = jnp.maximum(raw, 0.0) * bst_ref[1:2, :] + bst_ref[2:3, :]


def _convt_res_kernel(x_ref, w_ref, b_ref, skip_ref, post_ref):
    acc = jnp.dot(x_ref[...], w_ref[...], preferred_element_type=jnp.float32)
    post_ref[...] = jnp.maximum(acc + b_ref[...] + skip_ref[...], 0.0)


def _convt_res_move_kernel(x_ref, w_ref, b_ref, wm_ref, bm_ref, skip_ref, move_ref):
    acc = jnp.dot(x_ref[...], w_ref[...], preferred_element_type=jnp.float32)
    post = jnp.maximum(acc + b_ref[...] + skip_ref[...], 0.0)
    move_ref[...] = (jnp.dot(post, wm_ref[...], preferred_element_type=jnp.float32)
                     + bm_ref[...])


def _bottleneck_kernel(op_ref, summat_ref, mpf_ref, d7_ref,
                       wop_ref, bstop_ref, wp1_ref, bstp1_ref,
                       wl1_ref, bstl1_ref, wg_ref, bg_ref,
                       latent_ref, gen_ref):
    # opponent branch: relu(conv1d k=1) -> sum over seq (as matmul) -> BN affine
    h = jnp.dot(op_ref[...], wop_ref[...], preferred_element_type=jnp.float32)
    h = jnp.maximum(h + bstop_ref[0:1, :], 0.0)
    hs = jnp.dot(summat_ref[...], h, preferred_element_type=jnp.float32)
    ca = hs * bstop_ref[1:2, :] + bstop_ref[2:3, :]
    # my-player branch: Linear -> relu -> BN affine
    tl = jnp.dot(mpf_ref[...], wp1_ref[...], preferred_element_type=jnp.float32)
    tl = jnp.maximum(tl + bstp1_ref[0:1, :], 0.0) * bstp1_ref[1:2, :] + bstp1_ref[2:3, :]
    # bottleneck 1x1 conv on concat([d_l7_p, ca, tl]) done as 3 partial dots
    c0 = d7_ref.shape[1]
    c1 = ca.shape[1]
    c2 = tl.shape[1]
    lat = (jnp.dot(d7_ref[...], wl1_ref[0:c0, :], preferred_element_type=jnp.float32)
           + jnp.dot(ca, wl1_ref[c0:c0 + c1, :], preferred_element_type=jnp.float32)
           + jnp.dot(tl, wl1_ref[c0 + c1:c0 + c1 + c2, :],
                     preferred_element_type=jnp.float32)
           + bstl1_ref[0:1, :])
    lat = jnp.maximum(lat, 0.0) * bstl1_ref[1:2, :] + bstl1_ref[2:3, :]
    latent_ref[...] = lat
    # all generate heads fused: (B, L_SIZE) @ (L_SIZE, P)
    gen_ref[...] = (jnp.dot(lat, wg_ref[...], preferred_element_type=jnp.float32)
                    + bg_ref[...])


# ----------------------------------------------------------------------------
# Tiled pallas_call wrapper
# ----------------------------------------------------------------------------
def _round_up(x, m):
    return ((x + m - 1) // m) * m


def _pick_tm(mp):
    # cap tm, and prefer >=2 grid steps on big layers so both v7x TCs engage
    if mp <= 256:
        return mp
    for t in (512, 256, 128, 64, 32, 16):
        if mp % t == 0 and mp // t >= 2:
            return t
    return mp


def _mm_call(kernel, x, consts, tiled, out_widths):
    """Tiled-over-M pallas_call.  x:(M,K) becomes a bf16 operand; `consts` are
    whole (per-step broadcast) operands; `tiled` are (M,Ni) f32 operands tiled
    like x; outputs are (M,n) f32 for n in out_widths."""
    m, k = x.shape
    mp = _round_up(m, 16)                      # bf16 sublane tile is 16
    tm = _pick_tm(mp)
    xp = jnp.pad(x.astype(jnp.float32), ((0, mp - m), (0, 0))).astype(jnp.bfloat16)

    in_specs = [pl.BlockSpec((tm, k), lambda i: (i, 0))]
    args = [xp]
    for c in consts:
        in_specs.append(pl.BlockSpec(c.shape, lambda i, nd=c.ndim: (0,) * nd))
        args.append(c)
    for r in tiled:
        nr = r.shape[1]
        rp = jnp.pad(r.astype(jnp.float32), ((0, mp - m), (0, 0)))
        in_specs.append(pl.BlockSpec((tm, nr), lambda i: (i, 0)))
        args.append(rp)

    outs = pl.pallas_call(
        kernel,
        grid=(mp // tm,),
        in_specs=in_specs,
        out_specs=[pl.BlockSpec((tm, n), lambda i: (i, 0)) for n in out_widths],
        out_shape=[jax.ShapeDtypeStruct((mp, n), jnp.float32) for n in out_widths],
        compiler_params=pltpu.CompilerParams(dimension_semantics=("parallel",)),
    )(*args)
    if not isinstance(outs, (list, tuple)):
        outs = [outs]
    return [o[:m] for o in outs]


# ----------------------------------------------------------------------------
# Conv wrappers (im2col / phase-decomposition glue is reshape/slice only)
# ----------------------------------------------------------------------------
def _bst(b, s, t):
    return jnp.stack([b, s, t]).astype(jnp.float32)          # (3, N)


def _im2col_3x3(xp, stride, ho, wo):
    """xp: pre-padded NHWC -> (B*ho*wo, 9*C) patch matrix, (kh, kw, c) order."""
    bsz, _, _, c = xp.shape
    cols = []
    for kh in range(3):
        for kw in range(3):
            cols.append(xp[:, kh:kh + stride * (ho - 1) + 1:stride,
                           kw:kw + stride * (wo - 1) + 1:stride, :])
    patches = jnp.stack(cols, axis=3)                         # (B, ho, wo, 9, C)
    return patches.reshape(bsz * ho * wo, 9 * c)


def conv1x1_both(x, w, b, scale, shift):
    """x NHWC; w torch 1x1 conv weight (Cout, Cin). Returns (raw, post) NHWC."""
    bsz, h, wd, c = x.shape
    cout = w.shape[0]
    raw, post = _mm_call(_both_kernel, x.reshape(bsz * h * wd, c),
                         consts=[w.reshape(cout, c).T.astype(jnp.bfloat16),
                                 _bst(b, scale, shift)],
                         tiled=[], out_widths=[cout, cout])
    return raw.reshape(bsz, h, wd, cout), post.reshape(bsz, h, wd, cout)


def conv3x3_s2_post(x, w, b, scale, shift):
    """3x3, stride 2, pad 1; returns only post = BN(relu(conv)).  NHWC."""
    bsz, h, wd, c = x.shape
    cout = w.shape[0]
    ho, wo = (h + 2 - 3) // 2 + 1, (wd + 2 - 3) // 2 + 1
    xp = jnp.pad(x, ((0, 0), (1, 1), (1, 1), (0, 0)))
    cols = _im2col_3x3(xp, 2, ho, wo)
    w2 = jnp.transpose(w, (2, 3, 1, 0)).reshape(9 * c, cout)
    (post,) = _mm_call(_post_kernel, cols,
                       consts=[w2.astype(jnp.bfloat16), _bst(b, scale, shift)],
                       tiled=[], out_widths=[cout])
    return post.reshape(bsz, ho, wo, cout)


def _convt_phase_operands(x, w_t):
    """x NHWC (B,H,W,Cin); w_t torch ConvTranspose2d weight (Cin,Cout,3,3).
    Returns X_all (B*H*W, 4*Cin) and W_big (4*Cin, 4*Cout) so that
    X_all @ W_big yields the [EE|EO|OE|OO] sub-pixel phases of the stride-2
    transposed conv (padding=1, output_padding=1)."""
    bsz, h, wd, c = x.shape
    co = w_t.shape[1]
    xpad = jnp.pad(x, ((0, 0), (0, 1), (0, 1), (0, 0)))
    b0 = x                               # inp[m, n]
    b1 = xpad[:, :h, 1:wd + 1, :]        # inp[m, n+1]
    b2 = xpad[:, 1:h + 1, :wd, :]        # inp[m+1, n]
    b3 = xpad[:, 1:h + 1, 1:wd + 1, :]   # inp[m+1, n+1]
    x_all = jnp.concatenate([b0, b1, b2, b3], axis=-1).reshape(bsz * h * wd, 4 * c)

    z = jnp.zeros((c, co), w_t.dtype)
    wk = lambda kh, kw: w_t[:, :, kh, kw]
    col_ee = jnp.concatenate([wk(1, 1), z, z, z], axis=0)
    col_eo = jnp.concatenate([wk(1, 2), wk(1, 0), z, z], axis=0)
    col_oe = jnp.concatenate([wk(2, 1), z, wk(0, 1), z], axis=0)
    col_oo = jnp.concatenate([wk(2, 2), wk(2, 0), wk(0, 2), wk(0, 0)], axis=0)
    w_big = jnp.concatenate([col_ee, col_eo, col_oe, col_oo], axis=1)
    return x_all, w_big


def _to_phase_cols(t):
    """(B, 2H, 2W, C) -> (B*H*W, 4*C) with [EE|EO|OE|OO] column blocks."""
    bsz, h2, w2, c = t.shape
    h, wd = h2 // 2, w2 // 2
    t = t.reshape(bsz, h, 2, wd, 2, c).transpose(0, 1, 3, 2, 4, 5)
    return t.reshape(bsz * h * wd, 4 * c)


def _from_phase_cols(y, bsz, h, wd, c):
    """(B*H*W, 4*C) with [EE|EO|OE|OO] columns -> (B, 2H, 2W, C)."""
    y = y.reshape(bsz, h, wd, 2, 2, c).transpose(0, 1, 3, 2, 4, 5)
    return y.reshape(bsz, 2 * h, 2 * wd, c)


def convt_s2_add_relu(x, w_t, b_t, skip, move_w=None, move_b=None):
    """ConvTranspose2d(3, stride=2, pad=1, out_pad=1) + skip + relu, one kernel.
    If move_w/move_b are given, also applies the merged per-player 1x1 move
    head to the activated output and returns the move logits instead."""
    bsz, h, wd, _ = x.shape
    co = w_t.shape[1]
    x_all, w_big = _convt_phase_operands(x, w_t)
    b_big = jnp.tile(b_t.astype(jnp.float32), 4).reshape(1, 4 * co)
    skip_ph = _to_phase_cols(skip)
    if move_w is None:
        (post,) = _mm_call(_convt_res_kernel, x_all,
                           consts=[w_big.astype(jnp.bfloat16), b_big],
                           tiled=[skip_ph], out_widths=[4 * co])
        return _from_phase_cols(post, bsz, h, wd, co)
    nm = move_w.shape[1]
    z = jnp.zeros((co, nm), jnp.float32)
    rows = []
    for p in range(4):
        blocks = [z, z, z, z]
        blocks[p] = move_w.astype(jnp.float32)
        rows.append(jnp.concatenate(blocks, axis=1))
    wm_big = jnp.concatenate(rows, axis=0)                    # (4*Co, 4*nm) blockdiag
    bm_big = jnp.tile(move_b.astype(jnp.float32), 4).reshape(1, 4 * nm)
    (move,) = _mm_call(_convt_res_move_kernel, x_all,
                       consts=[w_big.astype(jnp.bfloat16), b_big, wm_big, bm_big],
                       tiled=[skip_ph], out_widths=[4 * nm])
    return _from_phase_cols(move, bsz, h, wd, nm)


# ----------------------------------------------------------------------------
# Parameters (deterministic, synthetic)
# ----------------------------------------------------------------------------
def _bn_affine(gamma, beta, mean, var, eps=BN_EPS):
    scale = gamma / jnp.sqrt(var + eps)
    shift = beta - mean * scale
    return scale, shift


def init_params(key, num_players, window_size):
    state = {"key": key}

    def nxt():
        state["key"], sub = jax.random.split(state["key"])
        return sub

    def lin(cin, cout):
        return (0.1 * jax.random.normal(nxt(), (cout, cin), jnp.float32),
                0.05 * jax.random.normal(nxt(), (cout,), jnp.float32))

    def conv(cout, cin, k):
        return (0.1 * jax.random.normal(nxt(), (cout, cin, k, k), jnp.float32),
                0.05 * jax.random.normal(nxt(), (cout,), jnp.float32))

    def convT(cin, cout, k):
        return (0.1 * jax.random.normal(nxt(), (cin, cout, k, k), jnp.float32),
                0.05 * jax.random.normal(nxt(), (cout,), jnp.float32))

    def bn(c):
        # freshly-constructed BatchNorm, eval mode: gamma=1, beta=0, mean=0, var=1
        return _bn_affine(jnp.ones((c,), jnp.float32), jnp.zeros((c,), jnp.float32),
                          jnp.zeros((c,), jnp.float32), jnp.ones((c,), jnp.float32))

    ws = window_size
    p = {}
    p["conv1d_op1"] = lin(3 * ws, F_SIZE)          # kernel size 1 == channel matmul
    p["bn_op1"] = bn(F_SIZE)
    p["dense_p1"] = lin(12 * ws, F_SIZE)
    p["bn_p1"] = bn(F_SIZE)
    p["conv2d_1a"] = lin(7 * ws + 6 * (ws - 1), SIZE)
    p["bn_1a"] = bn(SIZE)
    for name in ["1d", "2d", "3d", "4d", "5d", "6d"]:
        p["conv2d_" + name] = conv(SIZE, SIZE, 3)
        p["bn_" + name] = bn(SIZE)
    p["conv2d_l1"] = lin(SIZE + 2 * F_SIZE, L_SIZE)
    p["bn_l1"] = bn(L_SIZE)
    p["conv2dt_2"] = convT(L_SIZE, SIZE, 3)
    for name in ["3", "4", "5", "6", "7"]:
        p["conv2dt_" + name] = convT(SIZE, SIZE, 3)
    p["gen_l3s"] = [lin(L_SIZE, 1) for _ in range(num_players)]
    p["move_l2s"] = [lin(SIZE, 6) for _ in range(num_players)]
    return p


# ----------------------------------------------------------------------------
# Forward pass (mirrors Tower.forward)
# ----------------------------------------------------------------------------
def tower_forward(params, frames_nchw, my_player_features, opponent_features,
                  num_players=1):
    bsz = frames_nchw.shape[0]
    frames = jnp.transpose(frames_nchw, (0, 2, 3, 1))            # -> NHWC
    _, height, width, _ = frames.shape

    # encoder stem: 1x1 conv (raw kept: it is the final decoder skip)
    w1a, b1a = params["conv2d_1a"]
    s1a, t1a = params["bn_1a"]
    d_l2_a_1_pre, x = conv1x1_both(frames, w1a, b1a, s1a, t1a)

    downs = []
    for name in ["1d", "2d", "3d", "4d", "5d", "6d"]:
        wd_, bd_ = params["conv2d_" + name]
        sd_, td_ = params["bn_" + name]
        x = conv3x3_s2_post(x, wd_, bd_, sd_, td_)
        downs.append(x)
    d_l2_p, d_l3_p, d_l4_p, d_l5_p, d_l6_p, d_l7_p = downs

    # bottleneck + both small branches + all gen heads: ONE tiny kernel
    bp = _round_up(bsz, 8)
    seq = opponent_features.shape[1]

    def _padb(a):
        return jnp.pad(a.astype(jnp.float32),
                       ((0, bp - bsz),) + ((0, 0),) * (a.ndim - 1))

    op2d = _padb(opponent_features).reshape(bp * seq, -1)
    summat = jnp.kron(jnp.eye(bp, dtype=jnp.float32),
                      jnp.ones((1, seq), jnp.float32))           # (bp, bp*seq)
    mpf = _padb(my_player_features)
    d7 = _padb(d_l7_p.reshape(bsz, SIZE))

    w_op, b_op = params["conv1d_op1"]
    s_op, t_op = params["bn_op1"]
    w_p1, b_p1 = params["dense_p1"]
    s_p1, t_p1 = params["bn_p1"]
    wl1, bl1 = params["conv2d_l1"]
    sl1, tl1 = params["bn_l1"]
    wg = jnp.concatenate([params["gen_l3s"][i][0] for i in range(num_players)],
                         axis=0).T.astype(jnp.float32)           # (L_SIZE, P)
    bg = jnp.concatenate([params["gen_l3s"][i][1] for i in range(num_players)]
                         ).reshape(1, num_players).astype(jnp.float32)

    latent_p, gen_p = pl.pallas_call(
        _bottleneck_kernel,
        out_shape=[jax.ShapeDtypeStruct((bp, L_SIZE), jnp.float32),
                   jax.ShapeDtypeStruct((bp, num_players), jnp.float32)],
    )(op2d, summat, mpf, d7,
      w_op.T.astype(jnp.float32), _bst(b_op, s_op, t_op),
      w_p1.T.astype(jnp.float32), _bst(b_p1, s_p1, t_p1),
      wl1.T.astype(jnp.float32), _bst(bl1, sl1, tl1),
      wg, bg)
    latent = latent_p[:bsz]                                      # (B, L_SIZE)
    gen = gen_p[:bsz]                                            # (B, P)
    latent4 = latent.reshape(bsz, 1, 1, L_SIZE)

    # decoder: convT + skip + relu, one fused phase-matmul kernel per stage
    skips = [d_l6_p, d_l5_p, d_l4_p, d_l3_p, d_l2_p, d_l2_a_1_pre]
    u = latent4
    for name, skip in zip(["2", "3", "4", "5", "6"], skips[:5]):
        wt, bt = params["conv2dt_" + name]
        u = convt_s2_add_relu(u, wt, bt, skip)
    # final stage + all move heads fused into the same kernel
    wt7, bt7 = params["conv2dt_7"]
    wm = jnp.concatenate([params["move_l2s"][i][0].T for i in range(num_players)],
                         axis=1)                                 # (SIZE, 6*P)
    bm = jnp.concatenate([params["move_l2s"][i][1] for i in range(num_players)])
    move_full = convt_s2_add_relu(u, wt7, bt7, skips[5],
                                  move_w=wm, move_b=bm)          # (B, H, W, 6*P)

    m_logits = jnp.transpose(
        move_full.reshape(bsz, height, width, num_players, 6),
        (3, 0, 4, 1, 2))                                         # (P, B, 6, H, W)
    g_logits = jnp.transpose(gen)[:, :, None]                    # (P, B, 1)
    m_probs = jax.nn.softmax(m_logits, axis=2)
    player_move_logits = [m_logits[i] for i in range(num_players)]
    player_generate_logits = [gen[:, i:i + 1] for i in range(num_players)]
    return (m_logits, g_logits, m_probs, latent,
            player_move_logits, player_generate_logits)


# ----------------------------------------------------------------------------
if __name__ == "__main__":
    key = jax.random.PRNGKey(0)
    num_players, window_size = 2, 1
    bsz, height, width, seq = 2, 64, 64, 8   # spatial 64 so 6 stride-2 convs reach 1x1

    pkey, k1, k2, k3 = jax.random.split(key, 4)
    params = init_params(pkey, num_players, window_size)
    frames = jax.random.normal(
        k1, (bsz, 7 * window_size + 6 * (window_size - 1), height, width), jnp.float32)
    my_player_features = jax.random.normal(k2, (bsz, 12 * window_size), jnp.float32)
    opponent_features = jax.random.normal(k3, (bsz, seq, 3 * window_size), jnp.float32)

    fwd = jax.jit(functools.partial(tower_forward, num_players=num_players))
    outs = fwd(params, frames, my_player_features, opponent_features)
    jax.block_until_ready(outs)

    m_logits, g_logits, m_probs, latent, _, _ = outs
    assert m_logits.shape == (num_players, bsz, 6, height, width)
    assert g_logits.shape == (num_players, bsz, 1)
    assert m_probs.shape == m_logits.shape
    assert latent.shape == (bsz, L_SIZE)
    assert bool(jnp.all(jnp.isfinite(m_probs)))
    print("KERNEL_OK")
</pallas_src>

<mosaic_0001>
module attributes {stable_mosaic.version = 11 : i64} {
  func.func @_both_kernel(%arg0: i32, %arg1: memref<512x7xbf16, #tpu.memory_space<vmem>>, %arg2: memref<7x16xbf16, #tpu.memory_space<vmem>>, %arg3: memref<3x16xf32, #tpu.memory_space<vmem>>, %arg4: memref<512x16xf32, #tpu.memory_space<vmem>>, %arg5: memref<512x16xf32, #tpu.memory_space<vmem>>) attributes {dimension_semantics = [#tpu.dimension_semantics<parallel>], iteration_bounds = array<i64: 16>, scalar_prefetch = 0 : i64, scratch_operands = 0 : i64, tpu.core_type = #tpu.core_type<tc>, window_params = [{transform_indices = @transform_0, window_bounds = array<i64: 512, 7>}, {pipeline_mode = #tpu.pipeline_mode<synchronous>, transform_indices = @transform_1, window_bounds = array<i64: 7, 16>}, {pipeline_mode = #tpu.pipeline_mode<synchronous>, transform_indices = @transform_2, window_bounds = array<i64: 3, 16>}, {transform_indices = @transform_3, window_bounds = array<i64: 512, 16>}, {transform_indices = @transform_4, window_bounds = array<i64: 512, 16>}]} {
    %c0 = arith.constant 0 : index
    %c0_0 = arith.constant 0 : index
    %0 = vector.load %arg1[%c0, %c0_0] : memref<512x7xbf16, #tpu.memory_space<vmem>>, vector<512x7xbf16>
    %c0_1 = arith.constant 0 : index
    %c0_2 = arith.constant 0 : index
    %1 = vector.load %arg2[%c0_1, %c0_2] : memref<7x16xbf16, #tpu.memory_space<vmem>>, vector<7x16xbf16>
    %cst = arith.constant dense<0.000000e+00> : vector<512x16xf32>
    %2 = tpu.matmul %0, %1, %cst {dimension_numbers = #tpu.dot_dimension_numbers<[1], [0], [0], [1], [0, 0, 1, 1], [], []>} : vector<512x7xbf16>, vector<7x16xbf16>, vector<512x16xf32> -> vector<512x16xf32>
    %c0_3 = arith.constant 0 : index
    %c0_4 = arith.constant 0 : index
    %3 = vector.load %arg3[%c0_3, %c0_4] : memref<3x16xf32, #tpu.memory_space<vmem>>, vector<1x16xf32>
    %4 = vector.broadcast %3 : vector<1x16xf32> to vector<512x16xf32>
    %5 = arith.addf %2, %4 : vector<512x16xf32>
    %c0_5 = arith.constant 0 : index
    %c0_6 = arith.constant 0 : index
    %6 = vector.load %arg4[%c0_5, %c0_6] : memref<512x16xf32, #tpu.memory_space<vmem>>, vector<512x16xf32>
    tpu.vector_store %arg4[%c0_5, %c0_6], %5 {strides = array<i32>} : memref<512x16xf32, #tpu.memory_space<vmem>>, vector<512x16xf32>,
    %cst_7 = arith.constant 0.000000e+00 : f32
    %7 = vector.broadcast %cst_7 : f32 to vector<512x16xf32>
    %8 = arith.maximumf %5, %7 : vector<512x16xf32>
    %c1 = arith.constant 1 : index
    %c0_8 = arith.constant 0 : index
    %9 = vector.load %arg3[%c1, %c0_8] : memref<3x16xf32, #tpu.memory_space<vmem>>, vector<1x16xf32>
    %10 = vector.broadcast %9 : vector<1x16xf32> to vector<512x16xf32>
    %11 = arith.mulf %8, %10 : vector<512x16xf32>
    %c2 = arith.constant 2 : index
    %c0_9 = arith.constant 0 : index
    %12 = vector.load %arg3[%c2, %c0_9] : memref<3x16xf32, #tpu.memory_space<vmem>>, vector<1x16xf32>
    %13 = vector.broadcast %12 : vector<1x16xf32> to vector<512x16xf32>
    %14 = arith.addf %11, %13 : vector<512x16xf32>
    %c0_10 = arith.constant 0 : index
    %c0_11 = arith.constant 0 : index
    %15 = vector.load %arg5[%c0_10, %c0_11] : memref<512x16xf32, #tpu.memory_space<vmem>>, vector<512x16xf32>
    tpu.vector_store %arg5[%c0_10, %c0_11], %14 {strides = array<i32>} : memref<512x16xf32, #tpu.memory_space<vmem>>, vector<512x16xf32>,
    return
  }
  func.func @transform_0(%arg0: i32) -> (i32, i32) {
    %c0_i32 = arith.constant 0 : i32
    %c0_i32_0 = arith.constant 0 : i32
    return %arg0, %c0_i32 : i32, i32
  }
  func.func @transform_1(%arg0: i32) -> (i32, i32) {
    %c0_i32 = arith.constant 0 : i32
    %c0_i32_0 = arith.constant 0 : i32
    %c0_i32_1 = arith.constant 0 : i32
    return %c0_i32, %c0_i32_0 : i32, i32
  }
  func.func @transform_2(%arg0: i32) -> (i32, i32) {
    %c0_i32 = arith.constant 0 : i32
    %c0_i32_0 = arith.constant 0 : i32
    %c0_i32_1 = arith.constant 0 : i32
    return %c0_i32, %c0_i32_0 : i32, i32
  }
  func.func @transform_3(%arg0: i32) -> (i32, i32) {
    %c0_i32 = arith.constant 0 : i32
    %c0_i32_0 = arith.constant 0 : i32
    return %arg0, %c0_i32 : i32, i32
  }
  func.func @transform_4(%arg0: i32) -> (i32, i32) {
    %c0_i32 = arith.constant 0 : i32
    %c0_i32_0 = arith.constant 0 : i32
    return %arg0, %c0_i32 : i32, i32
  }
}

module attributes {stable_mosaic.version = 11 : i64} {
  func.func @_post_kernel(%arg0: i32, %arg1: memref<512x144xbf16, #tpu.memory_space<vmem>>, %arg2: memref<144x16xbf16, #tpu.memory_space<vmem>>, %arg3: memref<3x16xf32, #tpu.memory_space<vmem>>, %arg4: memref<512x16xf32, #tpu.memory_space<vmem>>) attributes {dimension_semantics = [#tpu.dimension_semantics<parallel>], iteration_bounds = array<i64: 4>, scalar_prefetch = 0 : i64, scratch_operands = 0 : i64, tpu.core_type = #tpu.core_type<tc>, window_params = [{transform_indices = @transform_0, window_bounds = array<i64: 512, 144>}, {pipeline_mode = #tpu.pipeline_mode<synchronous>, transform_indices = @transform_1, window_bounds = array<i64: 144, 16>}, {pipeline_mode = #tpu.pipeline_mode<synchronous>, transform_indices = @transform_2, window_bounds = array<i64: 3, 16>}, {transform_indices = @transform_3, window_bounds = array<i64: 512, 16>}]} {
    %c0 = arith.constant 0 : index
    %c0_0 = arith.constant 0 : index
    %0 = vector.load %arg1[%c0, %c0_0] : memref<512x144xbf16, #tpu.memory_space<vmem>>, vector<512x144xbf16>
    %c0_1 = arith.constant 0 : index
    %c0_2 = arith.constant 0 : index
    %1 = vector.load %arg2[%c0_1, %c0_2] : memref<144x16xbf16, #tpu.memory_space<vmem>>, vector<144x16xbf16>
    %cst = arith.constant dense<0.000000e+00> : vector<512x16xf32>
    %2 = tpu.matmul %0, %1, %cst {dimension_numbers = #tpu.dot_dimension_numbers<[1], [0], [0], [1], [0, 0, 1, 1], [], []>} : vector<512x144xbf16>, vector<144x16xbf16>, vector<512x16xf32> -> vector<512x16xf32>
    %c0_3 = arith.constant 0 : index
    %c0_4 = arith.constant 0 : index
    %3 = vector.load %arg3[%c0_3, %c0_4] : memref<3x16xf32, #tpu.memory_space<vmem>>, vector<1x16xf32>
    %4 = vector.broadcast %3 : vector<1x16xf32> to vector<512x16xf32>
    %5 = arith.addf %2, %4 : vector<512x16xf32>
    %cst_5 = arith.constant 0.000000e+00 : f32
    %6 = vector.broadcast %cst_5 : f32 to vector<512x16xf32>
    %7 = arith.maximumf %5, %6 : vector<512x16xf32>
    %c1 = arith.constant 1 : index
    %c0_6 = arith.constant 0 : index
    %8 = vector.load %arg3[%c1, %c0_6] : memref<3x16xf32, #tpu.memory_space<vmem>>, vector<1x16xf32>
    %9 = vector.broadcast %8 : vector<1x16xf32> to vector<512x16xf32>
    %10 = arith.mulf %7, %9 : vector<512x16xf32>
    %c2 = arith.constant 2 : index
    %c0_7 = arith.constant 0 : index
    %11 = vector.load %arg3[%c2, %c0_7] : memref<3x16xf32, #tpu.memory_space<vmem>>, vector<1x16xf32>
    %12 = vector.broadcast %11 : vector<1x16xf32> to vector<512x16xf32>
    %13 = arith.addf %10, %12 : vector<512x16xf32>
    %c0_8 = arith.constant 0 : index
    %c0_9 = arith.constant 0 : index
    %14 = vector.load %arg4[%c0_8, %c0_9] : memref<512x16xf32, #tpu.memory_space<vmem>>, vector<512x16xf32>
    tpu.vector_store %arg4[%c0_8, %c0_9], %13 {strides = array<i32>} : memref<512x16xf32, #tpu.memory_space<vmem>>, vector<512x16xf32>,
    return
  }
  func.func @transform_0(%arg0: i32) -> (i32, i32) {
    %c0_i32 = arith.constant 0 : i32
    %c0_i32_0 = arith.constant 0 : i32
    return %arg0, %c0_i32 : i32, i32
  }
  func.func @transform_1(%arg0: i32) -> (i32, i32) {
    %c0_i32 = arith.constant 0 : i32
    %c0_i32_0 = arith.constant 0 : i32
    %c0_i32_1 = arith.constant 0 : i32
    return %c0_i32, %c0_i32_0 : i32, i32
  }
  func.func @transform_2(%arg0: i32) -> (i32, i32) {
    %c0_i32 = arith.constant 0 : i32
    %c0_i32_0 = arith.constant 0 : i32
    %c0_i32_1 = arith.constant 0 : i32
    return %c0_i32, %c0_i32_0 : i32, i32
  }
  func.func @transform_3(%arg0: i32) -> (i32, i32) {
    %c0_i32 = arith.constant 0 : i32
    %c0_i32_0 = arith.constant 0 : i32
    return %arg0, %c0_i32 : i32, i32
  }
}

module attributes {stable_mosaic.version = 11 : i64} {
  func.func @_post_kernel(%arg0: i32, %arg1: memref<256x144xbf16, #tpu.memory_space<vmem>>, %arg2: memref<144x16xbf16, #tpu.memory_space<vmem>>, %arg3: memref<3x16xf32, #tpu.memory_space<vmem>>, %arg4: memref<256x16xf32, #tpu.memory_space<vmem>>) attributes {dimension_semantics = [#tpu.dimension_semantics<parallel>], iteration_bounds = array<i64: 2>, scalar_prefetch = 0 : i64, scratch_operands = 0 : i64, tpu.core_type = #tpu.core_type<tc>, window_params = [{transform_indices = @transform_0, window_bounds = array<i64: 256, 144>}, {pipeline_mode = #tpu.pipeline_mode<synchronous>, transform_indices = @transform_1, window_bounds = array<i64: 144, 16>}, {pipeline_mode = #tpu.pipeline_mode<synchronous>, transform_indices = @transform_2, window_bounds = array<i64: 3, 16>}, {transform_indices = @transform_3, window_bounds = array<i64: 256, 16>}]} {
    %c0 = arith.constant 0 : index
    %c0_0 = arith.constant 0 : index
    %0 = vector.load %arg1[%c0, %c0_0] : memref<256x144xbf16, #tpu.memory_space<vmem>>, vector<256x144xbf16>
    %c0_1 = arith.constant 0 : index
    %c0_2 = arith.constant 0 : index
    %1 = vector.load %arg2[%c0_1, %c0_2] : memref<144x16xbf16, #tpu.memory_space<vmem>>, vector<144x16xbf16>
    %cst = arith.constant dense<0.000000e+00> : vector<256x16xf32>
    %2 = tpu.matmul %0, %1, %cst {dimension_numbers = #tpu.dot_dimension_numbers<[1], [0], [0], [1], [0, 0, 1, 1], [], []>} : vector<256x144xbf16>, vector<144x16xbf16>, vector<256x16xf32> -> vector<256x16xf32>
    %c0_3 = arith.constant 0 : index
    %c0_4 = arith.constant 0 : index
    %3 = vector.load %arg3[%c0_3, %c0_4] : memref<3x16xf32, #tpu.memory_space<vmem>>, vector<1x16xf32>
    %4 = vector.broadcast %3 : vector<1x16xf32> to vector<256x16xf32>
    %5 = arith.addf %2, %4 : vector<256x16xf32>
    %cst_5 = arith.constant 0.000000e+00 : f32
    %6 = vector.broadcast %cst_5 : f32 to vector<256x16xf32>
    %7 = arith.maximumf %5, %6 : vector<256x16xf32>
    %c1 = arith.constant 1 : index
    %c0_6 = arith.constant 0 : index
    %8 = vector.load %arg3[%c1, %c0_6] : memref<3x16xf32, #tpu.memory_space<vmem>>, vector<1x16xf32>
    %9 = vector.broadcast %8 : vector<1x16xf32> to vector<256x16xf32>
    %10 = arith.mulf %7, %9 : vector<256x16xf32>
    %c2 = arith.constant 2 : index
    %c0_7 = arith.constant 0 : index
    %11 = vector.load %arg3[%c2, %c0_7] : memref<3x16xf32, #tpu.memory_space<vmem>>, vector<1x16xf32>
    %12 = vector.broadcast %11 : vector<1x16xf32> to vector<256x16xf32>
    %13 = arith.addf %10, %12 : vector<256x16xf32>
    %c0_8 = arith.constant 0 : index
    %c0_9 = arith.constant 0 : index
    %14 = vector.load %arg4[%c0_8, %c0_9] : memref<256x16xf32, #tpu.memory_space<vmem>>, vector<256x16xf32>
    tpu.vector_store %arg4[%c0_8, %c0_9], %13 {strides = array<i32>} : memref<256x16xf32, #tpu.memory_space<vmem>>, vector<256x16xf32>,
    return
  }
  func.func @transform_0(%arg0: i32) -> (i32, i32) {
    %c0_i32 = arith.constant 0 : i32
    %c0_i32_0 = arith.constant 0 : i32
    return %arg0, %c0_i32 : i32, i32
  }
  func.func @transform_1(%arg0: i32) -> (i32, i32) {
    %c0_i32 = arith.constant 0 : i32
    %c0_i32_0 = arith.constant 0 : i32
    %c0_i32_1 = arith.constant 0 : i32
    return %c0_i32, %c0_i32_0 : i32, i32
  }
  func.func @transform_2(%arg0: i32) -> (i32, i32) {
    %c0_i32 = arith.constant 0 : i32
    %c0_i32_0 = arith.constant 0 : i32
    %c0_i32_1 = arith.constant 0 : i32
    return %c0_i32, %c0_i32_0 : i32, i32
  }
  func.func @transform_3(%arg0: i32) -> (i32, i32) {
    %c0_i32 = arith.constant 0 : i32
    %c0_i32_0 = arith.constant 0 : i32
    return %arg0, %c0_i32 : i32, i32
  }
}

module attributes {stable_mosaic.version = 11 : i64} {
  func.func @_post_kernel(%arg0: i32, %arg1: memref<128x144xbf16, #tpu.memory_space<vmem>>, %arg2: memref<144x16xbf16, #tpu.memory_space<vmem>>, %arg3: memref<3x16xf32, #tpu.memory_space<vmem>>, %arg4: memref<128x16xf32, #tpu.memory_space<vmem>>) attributes {dimension_semantics = [#tpu.dimension_semantics<parallel>], iteration_bounds = array<i64: 1>, scalar_prefetch = 0 : i64, scratch_operands = 0 : i64, tpu.core_type = #tpu.core_type<tc>, window_params = [{transform_indices = @transform_0, window_bounds = array<i64: 128, 144>}, {pipeline_mode = #tpu.pipeline_mode<synchronous>, transform_indices = @transform_1, window_bounds = array<i64: 144, 16>}, {pipeline_mode = #tpu.pipeline_mode<synchronous>, transform_indices = @transform_2, window_bounds = array<i64: 3, 16>}, {transform_indices = @transform_3, window_bounds = array<i64: 128, 16>}]} {
    %c0 = arith.constant 0 : index
    %c0_0 = arith.constant 0 : index
    %0 = vector.load %arg1[%c0, %c0_0] : memref<128x144xbf16, #tpu.memory_space<vmem>>, vector<128x144xbf16>
    %c0_1 = arith.constant 0 : index
    %c0_2 = arith.constant 0 : index
    %1 = vector.load %arg2[%c0_1, %c0_2] : memref<144x16xbf16, #tpu.memory_space<vmem>>, vector<144x16xbf16>
    %cst = arith.constant dense<0.000000e+00> : vector<128x16xf32>
    %2 = tpu.matmul %0, %1, %cst {dimension_numbers = #tpu.dot_dimension_numbers<[1], [0], [0], [1], [0, 0, 1, 1], [], []>} : vector<128x144xbf16>, vector<144x16xbf16>, vector<128x16xf32> -> vector<128x16xf32>
    %c0_3 = arith.constant 0 : index
    %c0_4 = arith.constant 0 : index
    %3 = vector.load %arg3[%c0_3, %c0_4] : memref<3x16xf32, #tpu.memory_space<vmem>>, vector<1x16xf32>
    %4 = vector.broadcast %3 : vector<1x16xf32> to vector<128x16xf32>
    %5 = arith.addf %2, %4 : vector<128x16xf32>
    %cst_5 = arith.constant 0.000000e+00 : f32
    %6 = vector.broadcast %cst_5 : f32 to vector<128x16xf32>
    %7 = arith.maximumf %5, %6 : vector<128x16xf32>
    %c1 = arith.constant 1 : index
    %c0_6 = arith.constant 0 : index
    %8 = vector.load %arg3[%c1, %c0_6] : memref<3x16xf32, #tpu.memory_space<vmem>>, vector<1x16xf32>
    %9 = vector.broadcast %8 : vector<1x16xf32> to vector<128x16xf32>
    %10 = arith.mulf %7, %9 : vector<128x16xf32>
    %c2 = arith.constant 2 : index
    %c0_7 = arith.constant 0 : index
    %11 = vector.load %arg3[%c2, %c0_7] : memref<3x16xf32, #tpu.memory_space<vmem>>, vector<1x16xf32>
    %12 = vector.broadcast %11 : vector<1x16xf32> to vector<128x16xf32>
    %13 = arith.addf %10, %12 : vector<128x16xf32>
    %c0_8 = arith.constant 0 : index
    %c0_9 = arith.constant 0 : index
    %14 = vector.load %arg4[%c0_8, %c0_9] : memref<128x16xf32, #tpu.memory_space<vmem>>, vector<128x16xf32>
    tpu.vector_store %arg4[%c0_8, %c0_9], %13 {strides = array<i32>} : memref<128x16xf32, #tpu.memory_space<vmem>>, vector<128x16xf32>,
    return
  }
  func.func @transform_0(%arg0: i32) -> (i32, i32) {
    %c0_i32 = arith.constant 0 : i32
    %c0_i32_0 = arith.constant 0 : i32
    return %arg0, %c0_i32 : i32, i32
  }
  func.func @transform_1(%arg0: i32) -> (i32, i32) {
    %c0_i32 = arith.constant 0 : i32
    %c0_i32_0 = arith.constant 0 : i32
    %c0_i32_1 = arith.constant 0 : i32
    return %c0_i32, %c0_i32_0 : i32, i32
  }
  func.func @transform_2(%arg0: i32) -> (i32, i32) {
    %c0_i32 = arith.constant 0 : i32
    %c0_i32_0 = arith.constant 0 : i32
    %c0_i32_1 = arith.constant 0 : i32
    return %c0_i32, %c0_i32_0 : i32, i32
  }
  func.func @transform_3(%arg0: i32) -> (i32, i32) {
    %c0_i32 = arith.constant 0 : i32
    %c0_i32_0 = arith.constant 0 : i32
    return %arg0, %c0_i32 : i32, i32
  }
}

module attributes {stable_mosaic.version = 11 : i64} {
  func.func @_post_kernel(%arg0: i32, %arg1: memref<32x144xbf16, #tpu.memory_space<vmem>>, %arg2: memref<144x16xbf16, #tpu.memory_space<vmem>>, %arg3: memref<3x16xf32, #tpu.memory_space<vmem>>, %arg4: memref<32x16xf32, #tpu.memory_space<vmem>>) attributes {dimension_semantics = [#tpu.dimension_semantics<parallel>], iteration_bounds = array<i64: 1>, scalar_prefetch = 0 : i64, scratch_operands = 0 : i64, tpu.core_type = #tpu.core_type<tc>, window_params = [{transform_indices = @transform_0, window_bounds = array<i64: 32, 144>}, {pipeline_mode = #tpu.pipeline_mode<synchronous>, transform_indices = @transform_1, window_bounds = array<i64: 144, 16>}, {pipeline_mode = #tpu.pipeline_mode<synchronous>, transform_indices = @transform_2, window_bounds = array<i64: 3, 16>}, {transform_indices = @transform_3, window_bounds = array<i64: 32, 16>}]} {
    %c0 = arith.constant 0 : index
    %c0_0 = arith.constant 0 : index
    %0 = vector.load %arg1[%c0, %c0_0] : memref<32x144xbf16, #tpu.memory_space<vmem>>, vector<32x144xbf16>
    %c0_1 = arith.constant 0 : index
    %c0_2 = arith.constant 0 : index
    %1 = vector.load %arg2[%c0_1, %c0_2] : memref<144x16xbf16, #tpu.memory_space<vmem>>, vector<144x16xbf16>
    %cst = arith.constant dense<0.000000e+00> : vector<32x16xf32>
    %2 = tpu.matmul %0, %1, %cst {dimension_numbers = #tpu.dot_dimension_numbers<[1], [0], [0], [1], [0, 0, 1, 1], [], []>} : vector<32x144xbf16>, vector<144x16xbf16>, vector<32x16xf32> -> vector<32x16xf32>
    %c0_3 = arith.constant 0 : index
    %c0_4 = arith.constant 0 : index
    %3 = vector.load %arg3[%c0_3, %c0_4] : memref<3x16xf32, #tpu.memory_space<vmem>>, vector<1x16xf32>
    %4 = vector.broadcast %3 : vector<1x16xf32> to vector<32x16xf32>
    %5 = arith.addf %2, %4 : vector<32x16xf32>
    %cst_5 = arith.constant 0.000000e+00 : f32
    %6 = vector.broadcast %cst_5 : f32 to vector<32x16xf32>
    %7 = arith.maximumf %5, %6 : vector<32x16xf32>
    %c1 = arith.constant 1 : index
    %c0_6 = arith.constant 0 : index
    %8 = vector.load %arg3[%c1, %c0_6] : memref<3x16xf32, #tpu.memory_space<vmem>>, vector<1x16xf32>
    %9 = vector.broadcast %8 : vector<1x16xf32> to vector<32x16xf32>
    %10 = arith.mulf %7, %9 : vector<32x16xf32>
    %c2 = arith.constant 2 : index
    %c0_7 = arith.constant 0 : index
    %11 = vector.load %arg3[%c2, %c0_7] : memref<3x16xf32, #tpu.memory_space<vmem>>, vector<1x16xf32>
    %12 = vector.broadcast %11 : vector<1x16xf32> to vector<32x16xf32>
    %13 = arith.addf %10, %12 : vector<32x16xf32>
    %c0_8 = arith.constant 0 : index
    %c0_9 = arith.constant 0 : index
    %14 = vector.load %arg4[%c0_8, %c0_9] : memref<32x16xf32, #tpu.memory_space<vmem>>, vector<32x16xf32>
    tpu.vector_store %arg4[%c0_8, %c0_9], %13 {strides = array<i32>} : memref<32x16xf32, #tpu.memory_space<vmem>>, vector<32x16xf32>,
    return
  }
  func.func @transform_0(%arg0: i32) -> (i32, i32) {
    %c0_i32 = arith.constant 0 : i32
    %c0_i32_0 = arith.constant 0 : i32
    return %arg0, %c0_i32 : i32, i32
  }
  func.func @transform_1(%arg0: i32) -> (i32, i32) {
    %c0_i32 = arith.constant 0 : i32
    %c0_i32_0 = arith.constant 0 : i32
    %c0_i32_1 = arith.constant 0 : i32
    return %c0_i32, %c0_i32_0 : i32, i32
  }
  func.func @transform_2(%arg0: i32) -> (i32, i32) {
    %c0_i32 = arith.constant 0 : i32
    %c0_i32_0 = arith.constant 0 : i32
    %c0_i32_1 = arith.constant 0 : i32
    return %c0_i32, %c0_i32_0 : i32, i32
  }
  func.func @transform_3(%arg0: i32) -> (i32, i32) {
    %c0_i32 = arith.constant 0 : i32
    %c0_i32_0 = arith.constant 0 : i32
    return %arg0, %c0_i32 : i32, i32
  }
}

module attributes {stable_mosaic.version = 11 : i64} {
  func.func @_post_kernel(%arg0: i32, %arg1: memref<16x144xbf16, #tpu.memory_space<vmem>>, %arg2: memref<144x16xbf16, #tpu.memory_space<vmem>>, %arg3: memref<3x16xf32, #tpu.memory_space<vmem>>, %arg4: memref<16x16xf32, #tpu.memory_space<vmem>>) attributes {dimension_semantics = [#tpu.dimension_semantics<parallel>], iteration_bounds = array<i64: 1>, scalar_prefetch = 0 : i64, scratch_operands = 0 : i64, tpu.core_type = #tpu.core_type<tc>, window_params = [{transform_indices = @transform_0, window_bounds = array<i64: 16, 144>}, {pipeline_mode = #tpu.pipeline_mode<synchronous>, transform_indices = @transform_1, window_bounds = array<i64: 144, 16>}, {pipeline_mode = #tpu.pipeline_mode<synchronous>, transform_indices = @transform_2, window_bounds = array<i64: 3, 16>}, {transform_indices = @transform_3, window_bounds = array<i64: 16, 16>}]} {
    %c0 = arith.constant 0 : index
    %c0_0 = arith.constant 0 : index
    %0 = vector.load %arg1[%c0, %c0_0] : memref<16x144xbf16, #tpu.memory_space<vmem>>, vector<16x144xbf16>
    %c0_1 = arith.constant 0 : index
    %c0_2 = arith.constant 0 : index
    %1 = vector.load %arg2[%c0_1, %c0_2] : memref<144x16xbf16, #tpu.memory_space<vmem>>, vector<144x16xbf16>
    %cst = arith.constant dense<0.000000e+00> : vector<16x16xf32>
    %2 = tpu.matmul %0, %1, %cst {dimension_numbers = #tpu.dot_dimension_numbers<[1], [0], [0], [1], [0, 0, 1, 1], [], []>} : vector<16x144xbf16>, vector<144x16xbf16>, vector<16x16xf32> -> vector<16x16xf32>
    %c0_3 = arith.constant 0 : index
    %c0_4 = arith.constant 0 : index
    %3 = vector.load %arg3[%c0_3, %c0_4] : memref<3x16xf32, #tpu.memory_space<vmem>>, vector<1x16xf32>
    %4 = vector.broadcast %3 : vector<1x16xf32> to vector<16x16xf32>
    %5 = arith.addf %2, %4 : vector<16x16xf32>
    %cst_5 = arith.constant 0.000000e+00 : f32
    %6 = vector.broadcast %cst_5 : f32 to vector<16x16xf32>
    %7 = arith.maximumf %5, %6 : vector<16x16xf32>
    %c1 = arith.constant 1 : index
    %c0_6 = arith.constant 0 : index
    %8 = vector.load %arg3[%c1, %c0_6] : memref<3x16xf32, #tpu.memory_space<vmem>>, vector<1x16xf32>
    %9 = vector.broadcast %8 : vector<1x16xf32> to vector<16x16xf32>
    %10 = arith.mulf %7, %9 : vector<16x16xf32>
    %c2 = arith.constant 2 : index
    %c0_7 = arith.constant 0 : index
    %11 = vector.load %arg3[%c2, %c0_7] : memref<3x16xf32, #tpu.memory_space<vmem>>, vector<1x16xf32>
    %12 = vector.broadcast %11 : vector<1x16xf32> to vector<16x16xf32>
    %13 = arith.addf %10, %12 : vector<16x16xf32>
    %c0_8 = arith.constant 0 : index
    %c0_9 = arith.constant 0 : index
    %14 = vector.load %arg4[%c0_8, %c0_9] : memref<16x16xf32, #tpu.memory_space<vmem>>, vector<16x16xf32>
    tpu.vector_store %arg4[%c0_8, %c0_9], %13 {strides = array<i32>} : memref<16x16xf32, #tpu.memory_space<vmem>>, vector<16x16xf32>,
    return
  }
  func.func @transform_0(%arg0: i32) -> (i32, i32) {
    %c0_i32 = arith.constant 0 : i32
    %c0_i32_0 = arith.constant 0 : i32
    return %arg0, %c0_i32 : i32, i32
  }
  func.func @transform_1(%arg0: i32) -> (i32, i32) {
    %c0_i32 = arith.constant 0 : i32
    %c0_i32_0 = arith.constant 0 : i32
    %c0_i32_1 = arith.constant 0 : i32
    return %c0_i32, %c0_i32_0 : i32, i32
  }
  func.func @transform_2(%arg0: i32) -> (i32, i32) {
    %c0_i32 = arith.constant 0 : i32
    %c0_i32_0 = arith.constant 0 : i32
    %c0_i32_1 = arith.constant 0 : i32
    return %c0_i32, %c0_i32_0 : i32, i32
  }
  func.func @transform_3(%arg0: i32) -> (i32, i32) {
    %c0_i32 = arith.constant 0 : i32
    %c0_i32_0 = arith.constant 0 : i32
    return %arg0, %c0_i32 : i32, i32
  }
}

module attributes {stable_mosaic.version = 11 : i64} {
  func.func @_bottleneck_kernel(%arg0: memref<64x3xf32, #tpu.memory_space<vmem>>, %arg1: memref<8x64xf32, #tpu.memory_space<vmem>>, %arg2: memref<8x12xf32, #tpu.memory_space<vmem>>, %arg3: memref<8x16xf32, #tpu.memory_space<vmem>>, %arg4: memref<3x16xf32, #tpu.memory_space<vmem>>, %arg5: memref<3x16xf32, #tpu.memory_space<vmem>>, %arg6: memref<12x16xf32, #tpu.memory_space<vmem>>, %arg7: memref<3x16xf32, #tpu.memory_space<vmem>>, %arg8: memref<48x32xf32, #tpu.memory_space<vmem>>, %arg9: memref<3x32xf32, #tpu.memory_space<vmem>>, %arg10: memref<32x2xf32, #tpu.memory_space<vmem>>, %arg11: memref<1x2xf32, #tpu.memory_space<vmem>>, %arg12: memref<8x32xf32, #tpu.memory_space<vmem>>, %arg13: memref<8x2xf32, #tpu.memory_space<vmem>>) attributes {dimension_semantics = [], scalar_prefetch = 0 : i64, scratch_operands = 0 : i64, tpu.core_type = #tpu.core_type<tc>} {
    %c0 = arith.constant 0 : index
    %c0_0 = arith.constant 0 : index
    %0 = vector.load %arg0[%c0, %c0_0] : memref<64x3xf32, #tpu.memory_space<vmem>>, vector<64x3xf32>
    %c0_1 = arith.constant 0 : index
    %c0_2 = arith.constant 0 : index
    %1 = vector.load %arg4[%c0_1, %c0_2] : memref<3x16xf32, #tpu.memory_space<vmem>>, vector<3x16xf32>
    %cst = arith.constant dense<0.000000e+00> : vector<64x16xf32>
    %2 = tpu.matmul %0, %1, %cst {dimension_numbers = #tpu.dot_dimension_numbers<[1], [0], [0], [1], [0, 0, 1, 1], [], []>} : vector<64x3xf32>, vector<3x16xf32>, vector<64x16xf32> -> vector<64x16xf32>
    %c0_3 = arith.constant 0 : index
    %c0_4 = arith.constant 0 : index
    %3 = vector.load %arg5[%c0_3, %c0_4] : memref<3x16xf32, #tpu.memory_space<vmem>>, vector<1x16xf32>
    %4 = vector.broadcast %3 : vector<1x16xf32> to vector<64x16xf32>
    %5 = arith.addf %2, %4 : vector<64x16xf32>
    %cst_5 = arith.constant 0.000000e+00 : f32
    %6 = vector.broadcast %cst_5 : f32 to vector<64x16xf32>
    %7 = arith.maximumf %5, %6 : vector<64x16xf32>
    %c0_6 = arith.constant 0 : index
    %c0_7 = arith.constant 0 : index
    %8 = vector.load %arg1[%c0_6, %c0_7] : memref<8x64xf32, #tpu.memory_space<vmem>>, vector<8x64xf32>
    %cst_8 = arith.constant dense<0.000000e+00> : vector<8x16xf32>
    %9 = tpu.matmul %8, %7, %cst_8 {dimension_numbers = #tpu.dot_dimension_numbers<[1], [0], [0], [1], [0, 0, 1, 1], [], []>} : vector<8x64xf32>, vector<64x16xf32>, vector<8x16xf32> -> vector<8x16xf32>
    %c1 = arith.constant 1 : index
    %c0_9 = arith.constant 0 : index
    %10 = vector.load %arg5[%c1, %c0_9] : memref<3x16xf32, #tpu.memory_space<vmem>>, vector<1x16xf32>
    %11 = vector.broadcast %10 : vector<1x16xf32> to vector<8x16xf32>
    %12 = arith.mulf %9, %11 : vector<8x16xf32>
    %c2 = arith.constant 2 : index
    %c0_10 = arith.constant 0 : index
    %13 = vector.load %arg5[%c2, %c0_10] : memref<3x16xf32, #tpu.memory_space<vmem>>, vector<1x16xf32>
    %14 = vector.broadcast %13 : vector<1x16xf32> to vector<8x16xf32>
    %15 = arith.addf %12, %14 : vector<8x16xf32>
    %c0_11 = arith.constant 0 : index
    %c0_12 = arith.constant 0 : index
    %16 = vector.load %arg2[%c0_11, %c0_12] : memref<8x12xf32, #tpu.memory_space<vmem>>, vector<8x12xf32>
    %c0_13 = arith.constant 0 : index
    %c0_14 = arith.constant 0 : index
    %17 = vector.load %arg6[%c0_13, %c0_14] : memref<12x16xf32, #tpu.memory_space<vmem>>, vector<12x16xf32>
    %cst_15 = arith.constant dense<0.000000e+00> : vector<8x16xf32>
    %18 = tpu.matmul %16, %17, %cst_15 {dimension_numbers = #tpu.dot_dimension_numbers<[1], [0], [0], [1], [0, 0, 1, 1], [], []>} : vector<8x12xf32>, vector<12x16xf32>, vector<8x16xf32> -> vector<8x16xf32>
    %c0_16 = arith.constant 0 : index
    %c0_17 = arith.constant 0 : index
    %19 = vector.load %arg7[%c0_16, %c0_17] : memref<3x16xf32, #tpu.memory_space<vmem>>, vector<1x16xf32>
    %20 = vector.broadcast %19 : vector<1x16xf32> to vector<8x16xf32>
    %21 = arith.addf %18, %20 : vector<8x16xf32>
    %cst_18 = arith.constant 0.000000e+00 : f32
    %22 = vector.broadcast %cst_18 : f32 to vector<8x16xf32>
    %23 = arith.maximumf %21, %22 : vector<8x16xf32>
    %c1_19 = arith.constant 1 : index
    %c0_20 = arith.constant 0 : index
    %24 = vector.load %arg7[%c1_19, %c0_20] : memref<3x16xf32, #tpu.memory_space<vmem>>, vector<1x16xf32>
    %25 = vector.broadcast %24 : vector<1x16xf32> to vector<8x16xf32>
    %26 = arith.mulf %23, %25 : vector<8x16xf32>
    %c2_21 = arith.constant 2 : index
    %c0_22 = arith.constant 0 : index
    %27 = vector.load %arg7[%c2_21, %c0_22] : memref<3x16xf32, #tpu.memory_space<vmem>>, vector<1x16xf32>
    %28 = vector.broadcast %27 : vector<1x16xf32> to vector<8x16xf32>
    %29 = arith.addf %26, %28 : vector<8x16xf32>
    %c0_23 = arith.constant 0 : index
    %c0_24 = arith.constant 0 : index
    %30 = vector.load %arg3[%c0_23, %c0_24] : memref<8x16xf32, #tpu.memory_space<vmem>>, vector<8x16xf32>
    %c0_25 = arith.constant 0 : index
    %c0_26 = arith.constant 0 : index
    %31 = vector.load %arg8[%c0_25, %c0_26] : memref<48x32xf32, #tpu.memory_space<vmem>>, vector<16x32xf32>
    %cst_27 = arith.constant dense<0.000000e+00> : vector<8x32xf32>
    %32 = tpu.matmul %30, %31, %cst_27 {dimension_numbers = #tpu.dot_dimension_numbers<[1], [0], [0], [1], [0, 0, 1, 1], [], []>} : vector<8x16xf32>, vector<16x32xf32>, vector<8x32xf32> -> vector<8x32xf32>
    %c16 = arith.constant 16 : index
    %c0_28 = arith.constant 0 : index
    %33 = vector.load %arg8[%c16, %c0_28] : memref<48x32xf32, #tpu.memory_space<vmem>>, vector<16x32xf32>
    %cst_29 = arith.constant dense<0.000000e+00> : vector<8x32xf32>
    %34 = tpu.matmul %15, %33, %cst_29 {dimension_numbers = #tpu.dot_dimension_numbers<[1], [0], [0], [1], [0, 0, 1, 1], [], []>} : vector<8x16xf32>, vector<16x32xf32>, vector<8x32xf32> -> vector<8x32xf32>
    %35 = arith.addf %32, %34 : vector<8x32xf32>
    %c32 = arith.constant 32 : index
    %c0_30 = arith.constant 0 : index
    %36 = vector.load %arg8[%c32, %c0_30] : memref<48x32xf32, #tpu.memory_space<vmem>>, vector<16x32xf32>
    %cst_31 = arith.constant dense<0.000000e+00> : vector<8x32xf32>
    %37 = tpu.matmul %29, %36, %cst_31 {dimension_numbers = #tpu.dot_dimension_numbers<[1], [0], [0], [1], [0, 0, 1, 1], [], []>} : vector<8x16xf32>, vector<16x32xf32>, vector<8x32xf32> -> vector<8x32xf32>
    %38 = arith.addf %35, %37 : vector<8x32xf32>
    %c0_32 = arith.constant 0 : index
    %c0_33 = arith.constant 0 : index
    %39 = vector.load %arg9[%c0_32, %c0_33] : memref<3x32xf32, #tpu.memory_space<vmem>>, vector<1x32xf32>
    %40 = vector.broadcast %39 : vector<1x32xf32> to vector<8x32xf32>
    %41 = arith.addf %38, %40 : vector<8x32xf32>
    %cst_34 = arith.constant 0.000000e+00 : f32
    %42 = vector.broadcast %cst_34 : f32 to vector<8x32xf32>
    %43 = arith.maximumf %41, %42 : vector<8x32xf32>
    %c1_35 = arith.constant 1 : index
    %c0_36 = arith.constant 0 : index
    %44 = vector.load %arg9[%c1_35, %c0_36] : memref<3x32xf32, #tpu.memory_space<vmem>>, vector<1x32xf32>
    %45 = vector.broadcast %44 : vector<1x32xf32> to vector<8x32xf32>
    %46 = arith.mulf %43, %45 : vector<8x32xf32>
    %c2_37 = arith.constant 2 : index
    %c0_38 = arith.constant 0 : index
    %47 = vector.load %arg9[%c2_37, %c0_38] : memref<3x32xf32, #tpu.memory_space<vmem>>, vector<1x32xf32>
    %48 = vector.broadcast %47 : vector<1x32xf32> to vector<8x32xf32>
    %49 = arith.addf %46, %48 : vector<8x32xf32>
    %c0_39 = arith.constant 0 : index
    %c0_40 = arith.constant 0 : index
    %50 = vector.load %arg12[%c0_39, %c0_40] : memref<8x32xf32, #tpu.memory_space<vmem>>, vector<8x32xf32>
    tpu.vector_store %arg12[%c0_39, %c0_40], %49 {strides = array<i32>} : memref<8x32xf32, #tpu.memory_space<vmem>>, vector<8x32xf32>,
    %c0_41 = arith.constant 0 : index
    %c0_42 = arith.constant 0 : index
    %51 = vector.load %arg10[%c0_41, %c0_42] : memref<32x2xf32, #tpu.memory_space<vmem>>, vector<32x2xf32>
    %cst_43 = arith.constant dense<0.000000e+00> : vector<8x2xf32>
    %52 = tpu.matmul %49, %51, %cst_43 {dimension_numbers = #tpu.dot_dimension_numbers<[1], [0], [0], [1], [0, 0, 1, 1], [], []>} : vector<8x32xf32>, vector<32x2xf32>, vector<8x2xf32> -> vector<8x2xf32>
    %c0_44 = arith.constant 0 : index
    %c0_45 = arith.constant 0 : index
    %53 = vector.load %arg11[%c0_44, %c0_45] : memref<1x2xf32, #tpu.memory_space<vmem>>, vector<1x2xf32>
    %54 = vector.broadcast %53 : vector<1x2xf32> to vector<8x2xf32>
    %55 = arith.addf %52, %54 : vector<8x2xf32>
    %c0_46 = arith.constant 0 : index
    %c0_47 = arith.constant 0 : index
    %56 = vector.load %arg13[%c0_46, %c0_47] : memref<8x2xf32, #tpu.memory_space<vmem>>, vector<8x2xf32>
    tpu.vector_store %arg13[%c0_46, %c0_47], %55 {strides = array<i32>} : memref<8x2xf32, #tpu.memory_space<vmem>>, vector<8x2xf32>,
    return
  }
}

module attributes {stable_mosaic.version = 11 : i64} {
  func.func @_convt_res_kernel(%arg0: i32, %arg1: memref<16x128xbf16, #tpu.memory_space<vmem>>, %arg2: memref<128x64xbf16, #tpu.memory_space<vmem>>, %arg3: memref<1x64xf32, #tpu.memory_space<vmem>>, %arg4: memref<16x64xf32, #tpu.memory_space<vmem>>, %arg5: memref<16x64xf32, #tpu.memory_space<vmem>>) attributes {dimension_semantics = [#tpu.dimension_semantics<parallel>], iteration_bounds = array<i64: 1>, scalar_prefetch = 0 : i64, scratch_operands = 0 : i64, tpu.core_type = #tpu.core_type<tc>, window_params = [{transform_indices = @transform_0, window_bounds = array<i64: 16, 128>}, {pipeline_mode = #tpu.pipeline_mode<synchronous>, transform_indices = @transform_1, window_bounds = array<i64: 128, 64>}, {pipeline_mode = #tpu.pipeline_mode<synchronous>, transform_indices = @transform_2, window_bounds = array<i64: 1, 64>}, {transform_indices = @transform_3, window_bounds = array<i64: 16, 64>}, {transform_indices = @transform_4, window_bounds = array<i64: 16, 64>}]} {
    %c0 = arith.constant 0 : index
    %c0_0 = arith.constant 0 : index
    %0 = vector.load %arg1[%c0, %c0_0] : memref<16x128xbf16, #tpu.memory_space<vmem>>, vector<16x128xbf16>
    %c0_1 = arith.constant 0 : index
    %c0_2 = arith.constant 0 : index
    %1 = vector.load %arg2[%c0_1, %c0_2] : memref<128x64xbf16, #tpu.memory_space<vmem>>, vector<128x64xbf16>
    %cst = arith.constant dense<0.000000e+00> : vector<16x64xf32>
    %2 = tpu.matmul %0, %1, %cst {dimension_numbers = #tpu.dot_dimension_numbers<[1], [0], [0], [1], [0, 0, 1, 1], [], []>} : vector<16x128xbf16>, vector<128x64xbf16>, vector<16x64xf32> -> vector<16x64xf32>
    %c0_3 = arith.constant 0 : index
    %c0_4 = arith.constant 0 : index
    %3 = vector.load %arg3[%c0_3, %c0_4] : memref<1x64xf32, #tpu.memory_space<vmem>>, vector<1x64xf32>
    %4 = vector.broadcast %3 : vector<1x64xf32> to vector<16x64xf32>
    %5 = arith.addf %2, %4 : vector<16x64xf32>
    %c0_5 = arith.constant 0 : index
    %c0_6 = arith.constant 0 : index
    %6 = vector.load %arg4[%c0_5, %c0_6] : memref<16x64xf32, #tpu.memory_space<vmem>>, vector<16x64xf32>
    %7 = arith.addf %5, %6 : vector<16x64xf32>
    %cst_7 = arith.constant 0.000000e+00 : f32
    %8 = vector.broadcast %cst_7 : f32 to vector<16x64xf32>
    %9 = arith.maximumf %7, %8 : vector<16x64xf32>
    %c0_8 = arith.constant 0 : index
    %c0_9 = arith.constant 0 : index
    %10 = vector.load %arg5[%c0_8, %c0_9] : memref<16x64xf32, #tpu.memory_space<vmem>>, vector<16x64xf32>
    tpu.vector_store %arg5[%c0_8, %c0_9], %9 {strides = array<i32>} : memref<16x64xf32, #tpu.memory_space<vmem>>, vector<16x64xf32>,
    return
  }
  func.func @transform_0(%arg0: i32) -> (i32, i32) {
    %c0_i32 = arith.constant 0 : i32
    %c0_i32_0 = arith.constant 0 : i32
    return %arg0, %c0_i32 : i32, i32
  }
  func.func @transform_1(%arg0: i32) -> (i32, i32) {
    %c0_i32 = arith.constant 0 : i32
    %c0_i32_0 = arith.constant 0 : i32
    %c0_i32_1 = arith.constant 0 : i32
    return %c0_i32, %c0_i32_0 : i32, i32
  }
  func.func @transform_2(%arg0: i32) -> (i32, i32) {
    %c0_i32 = arith.constant 0 : i32
    %c0_i32_0 = arith.constant 0 : i32
    %c0_i32_1 = arith.constant 0 : i32
    return %c0_i32, %c0_i32_0 : i32, i32
  }
  func.func @transform_3(%arg0: i32) -> (i32, i32) {
    %c0_i32 = arith.constant 0 : i32
    %c0_i32_0 = arith.constant 0 : i32
    return %arg0, %c0_i32 : i32, i32
  }
  func.func @transform_4(%arg0: i32) -> (i32, i32) {
    %c0_i32 = arith.constant 0 : i32
    %c0_i32_0 = arith.constant 0 : i32
    return %arg0, %c0_i32 : i32, i32
  }
}

module attributes {stable_mosaic.version = 11 : i64} {
  func.func @_convt_res_kernel(%arg0: i32, %arg1: memref<16x64xbf16, #tpu.memory_space<vmem>>, %arg2: memref<64x64xbf16, #tpu.memory_space<vmem>>, %arg3: memref<1x64xf32, #tpu.memory_space<vmem>>, %arg4: memref<16x64xf32, #tpu.memory_space<vmem>>, %arg5: memref<16x64xf32, #tpu.memory_space<vmem>>) attributes {dimension_semantics = [#tpu.dimension_semantics<parallel>], iteration_bounds = array<i64: 1>, scalar_prefetch = 0 : i64, scratch_operands = 0 : i64, tpu.core_type = #tpu.core_type<tc>, window_params = [{transform_indices = @transform_0, window_bounds = array<i64: 16, 64>}, {pipeline_mode = #tpu.pipeline_mode<synchronous>, transform_indices = @transform_1, window_bounds = array<i64: 64, 64>}, {pipeline_mode = #tpu.pipeline_mode<synchronous>, transform_indices = @transform_2, window_bounds = array<i64: 1, 64>}, {transform_indices = @transform_3, window_bounds = array<i64: 16, 64>}, {transform_indices = @transform_4, window_bounds = array<i64: 16, 64>}]} {
    %c0 = arith.constant 0 : index
    %c0_0 = arith.constant 0 : index
    %0 = vector.load %arg1[%c0, %c0_0] : memref<16x64xbf16, #tpu.memory_space<vmem>>, vector<16x64xbf16>
    %c0_1 = arith.constant 0 : index
    %c0_2 = arith.constant 0 : index
    %1 = vector.load %arg2[%c0_1, %c0_2] : memref<64x64xbf16, #tpu.memory_space<vmem>>, vector<64x64xbf16>
    %cst = arith.constant dense<0.000000e+00> : vector<16x64xf32>
    %2 = tpu.matmul %0, %1, %cst {dimension_numbers = #tpu.dot_dimension_numbers<[1], [0], [0], [1], [0, 0, 1, 1], [], []>} : vector<16x64xbf16>, vector<64x64xbf16>, vector<16x64xf32> -> vector<16x64xf32>
    %c0_3 = arith.constant 0 : index
    %c0_4 = arith.constant 0 : index
    %3 = vector.load %arg3[%c0_3, %c0_4] : memref<1x64xf32, #tpu.memory_space<vmem>>, vector<1x64xf32>
    %4 = vector.broadcast %3 : vector<1x64xf32> to vector<16x64xf32>
    %5 = arith.addf %2, %4 : vector<16x64xf32>
    %c0_5 = arith.constant 0 : index
    %c0_6 = arith.constant 0 : index
    %6 = vector.load %arg4[%c0_5, %c0_6] : memref<16x64xf32, #tpu.memory_space<vmem>>, vector<16x64xf32>
    %7 = arith.addf %5, %6 : vector<16x64xf32>
    %cst_7 = arith.constant 0.000000e+00 : f32
    %8 = vector.broadcast %cst_7 : f32 to vector<16x64xf32>
    %9 = arith.maximumf %7, %8 : vector<16x64xf32>
    %c0_8 = arith.constant 0 : index
    %c0_9 = arith.constant 0 : index
    %10 = vector.load %arg5[%c0_8, %c0_9] : memref<16x64xf32, #tpu.memory_space<vmem>>, vector<16x64xf32>
    tpu.vector_store %arg5[%c0_8, %c0_9], %9 {strides = array<i32>} : memref<16x64xf32, #tpu.memory_space<vmem>>, vector<16x64xf32>,
    return
  }
  func.func @transform_0(%arg0: i32) -> (i32, i32) {
    %c0_i32 = arith.constant 0 : i32
    %c0_i32_0 = arith.constant 0 : i32
    return %arg0, %c0_i32 : i32, i32
  }
  func.func @transform_1(%arg0: i32) -> (i32, i32) {
    %c0_i32 = arith.constant 0 : i32
    %c0_i32_0 = arith.constant 0 : i32
    %c0_i32_1 = arith.constant 0 : i32
    return %c0_i32, %c0_i32_0 : i32, i32
  }
  func.func @transform_2(%arg0: i32) -> (i32, i32) {
    %c0_i32 = arith.constant 0 : i32
    %c0_i32_0 = arith.constant 0 : i32
    %c0_i32_1 = arith.constant 0 : i32
    return %c0_i32, %c0_i32_0 : i32, i32
  }
  func.func @transform_3(%arg0: i32) -> (i32, i32) {
    %c0_i32 = arith.constant 0 : i32
    %c0_i32_0 = arith.constant 0 : i32
    return %arg0, %c0_i32 : i32, i32
  }
  func.func @transform_4(%arg0: i32) -> (i32, i32) {
    %c0_i32 = arith.constant 0 : i32
    %c0_i32_0 = arith.constant 0 : i32
    return %arg0, %c0_i32 : i32, i32
  }
}

module attributes {stable_mosaic.version = 11 : i64} {
  func.func @_convt_res_kernel(%arg0: i32, %arg1: memref<32x64xbf16, #tpu.memory_space<vmem>>, %arg2: memref<64x64xbf16, #tpu.memory_space<vmem>>, %arg3: memref<1x64xf32, #tpu.memory_space<vmem>>, %arg4: memref<32x64xf32, #tpu.memory_space<vmem>>, %arg5: memref<32x64xf32, #tpu.memory_space<vmem>>) attributes {dimension_semantics = [#tpu.dimension_semantics<parallel>], iteration_bounds = array<i64: 1>, scalar_prefetch = 0 : i64, scratch_operands = 0 : i64, tpu.core_type = #tpu.core_type<tc>, window_params = [{transform_indices = @transform_0, window_bounds = array<i64: 32, 64>}, {pipeline_mode = #tpu.pipeline_mode<synchronous>, transform_indices = @transform_1, window_bounds = array<i64: 64, 64>}, {pipeline_mode = #tpu.pipeline_mode<synchronous>, transform_indices = @transform_2, window_bounds = array<i64: 1, 64>}, {transform_indices = @transform_3, window_bounds = array<i64: 32, 64>}, {transform_indices = @transform_4, window_bounds = array<i64: 32, 64>}]} {
    %c0 = arith.constant 0 : index
    %c0_0 = arith.constant 0 : index
    %0 = vector.load %arg1[%c0, %c0_0] : memref<32x64xbf16, #tpu.memory_space<vmem>>, vector<32x64xbf16>
    %c0_1 = arith.constant 0 : index
    %c0_2 = arith.constant 0 : index
    %1 = vector.load %arg2[%c0_1, %c0_2] : memref<64x64xbf16, #tpu.memory_space<vmem>>, vector<64x64xbf16>
    %cst = arith.constant dense<0.000000e+00> : vector<32x64xf32>
    %2 = tpu.matmul %0, %1, %cst {dimension_numbers = #tpu.dot_dimension_numbers<[1], [0], [0], [1], [0, 0, 1, 1], [], []>} : vector<32x64xbf16>, vector<64x64xbf16>, vector<32x64xf32> -> vector<32x64xf32>
    %c0_3 = arith.constant 0 : index
    %c0_4 = arith.constant 0 : index
    %3 = vector.load %arg3[%c0_3, %c0_4] : memref<1x64xf32, #tpu.memory_space<vmem>>, vector<1x64xf32>
    %4 = vector.broadcast %3 : vector<1x64xf32> to vector<32x64xf32>
    %5 = arith.addf %2, %4 : vector<32x64xf32>
    %c0_5 = arith.constant 0 : index
    %c0_6 = arith.constant 0 : index
    %6 = vector.load %arg4[%c0_5, %c0_6] : memref<32x64xf32, #tpu.memory_space<vmem>>, vector<32x64xf32>
    %7 = arith.addf %5, %6 : vector<32x64xf32>
    %cst_7 = arith.constant 0.000000e+00 : f32
    %8 = vector.broadcast %cst_7 : f32 to vector<32x64xf32>
    %9 = arith.maximumf %7, %8 : vector<32x64xf32>
    %c0_8 = arith.constant 0 : index
    %c0_9 = arith.constant 0 : index
    %10 = vector.load %arg5[%c0_8, %c0_9] : memref<32x64xf32, #tpu.memory_space<vmem>>, vector<32x64xf32>
    tpu.vector_store %arg5[%c0_8, %c0_9], %9 {strides = array<i32>} : memref<32x64xf32, #tpu.memory_space<vmem>>, vector<32x64xf32>,
    return
  }
  func.func @transform_0(%arg0: i32) -> (i32, i32) {
    %c0_i32 = arith.constant 0 : i32
    %c0_i32_0 = arith.constant 0 : i32
    return %arg0, %c0_i32 : i32, i32
  }
  func.func @transform_1(%arg0: i32) -> (i32, i32) {
    %c0_i32 = arith.constant 0 : i32
    %c0_i32_0 = arith.constant 0 : i32
    %c0_i32_1 = arith.constant 0 : i32
    return %c0_i32, %c0_i32_0 : i32, i32
  }
  func.func @transform_2(%arg0: i32) -> (i32, i32) {
    %c0_i32 = arith.constant 0 : i32
    %c0_i32_0 = arith.constant 0 : i32
    %c0_i32_1 = arith.constant 0 : i32
    return %c0_i32, %c0_i32_0 : i32, i32
  }
  func.func @transform_3(%arg0: i32) -> (i32, i32) {
    %c0_i32 = arith.constant 0 : i32
    %c0_i32_0 = arith.constant 0 : i32
    return %arg0, %c0_i32 : i32, i32
  }
  func.func @transform_4(%arg0: i32) -> (i32, i32) {
    %c0_i32 = arith.constant 0 : i32
    %c0_i32_0 = arith.constant 0 : i32
    return %arg0, %c0_i32 : i32, i32
  }
}

module attributes {stable_mosaic.version = 11 : i64} {
  func.func @_convt_res_kernel(%arg0: i32, %arg1: memref<128x64xbf16, #tpu.memory_space<vmem>>, %arg2: memref<64x64xbf16, #tpu.memory_space<vmem>>, %arg3: memref<1x64xf32, #tpu.memory_space<vmem>>, %arg4: memref<128x64xf32, #tpu.memory_space<vmem>>, %arg5: memref<128x64xf32, #tpu.memory_space<vmem>>) attributes {dimension_semantics = [#tpu.dimension_semantics<parallel>], iteration_bounds = array<i64: 1>, scalar_prefetch = 0 : i64, scratch_operands = 0 : i64, tpu.core_type = #tpu.core_type<tc>, window_params = [{transform_indices = @transform_0, window_bounds = array<i64: 128, 64>}, {pipeline_mode = #tpu.pipeline_mode<synchronous>, transform_indices = @transform_1, window_bounds = array<i64: 64, 64>}, {pipeline_mode = #tpu.pipeline_mode<synchronous>, transform_indices = @transform_2, window_bounds = array<i64: 1, 64>}, {transform_indices = @transform_3, window_bounds = array<i64: 128, 64>}, {transform_indices = @transform_4, window_bounds = array<i64: 128, 64>}]} {
    %c0 = arith.constant 0 : index
    %c0_0 = arith.constant 0 : index
    %0 = vector.load %arg1[%c0, %c0_0] : memref<128x64xbf16, #tpu.memory_space<vmem>>, vector<128x64xbf16>
    %c0_1 = arith.constant 0 : index
    %c0_2 = arith.constant 0 : index
    %1 = vector.load %arg2[%c0_1, %c0_2] : memref<64x64xbf16, #tpu.memory_space<vmem>>, vector<64x64xbf16>
    %cst = arith.constant dense<0.000000e+00> : vector<128x64xf32>
    %2 = tpu.matmul %0, %1, %cst {dimension_numbers = #tpu.dot_dimension_numbers<[1], [0], [0], [1], [0, 0, 1, 1], [], []>} : vector<128x64xbf16>, vector<64x64xbf16>, vector<128x64xf32> -> vector<128x64xf32>
    %c0_3 = arith.constant 0 : index
    %c0_4 = arith.constant 0 : index
    %3 = vector.load %arg3[%c0_3, %c0_4] : memref<1x64xf32, #tpu.memory_space<vmem>>, vector<1x64xf32>
    %4 = vector.broadcast %3 : vector<1x64xf32> to vector<128x64xf32>
    %5 = arith.addf %2, %4 : vector<128x64xf32>
    %c0_5 = arith.constant 0 : index
    %c0_6 = arith.constant 0 : index
    %6 = vector.load %arg4[%c0_5, %c0_6] : memref<128x64xf32, #tpu.memory_space<vmem>>, vector<128x64xf32>
    %7 = arith.addf %5, %6 : vector<128x64xf32>
    %cst_7 = arith.constant 0.000000e+00 : f32
    %8 = vector.broadcast %cst_7 : f32 to vector<128x64xf32>
    %9 = arith.maximumf %7, %8 : vector<128x64xf32>
    %c0_8 = arith.constant 0 : index
    %c0_9 = arith.constant 0 : index
    %10 = vector.load %arg5[%c0_8, %c0_9] : memref<128x64xf32, #tpu.memory_space<vmem>>, vector<128x64xf32>
    tpu.vector_store %arg5[%c0_8, %c0_9], %9 {strides = array<i32>} : memref<128x64xf32, #tpu.memory_space<vmem>>, vector<128x64xf32>,
    return
  }
  func.func @transform_0(%arg0: i32) -> (i32, i32) {
    %c0_i32 = arith.constant 0 : i32
    %c0_i32_0 = arith.constant 0 : i32
    return %arg0, %c0_i32 : i32, i32
  }
  func.func @transform_1(%arg0: i32) -> (i32, i32) {
    %c0_i32 = arith.constant 0 : i32
    %c0_i32_0 = arith.constant 0 : i32
    %c0_i32_1 = arith.constant 0 : i32
    return %c0_i32, %c0_i32_0 : i32, i32
  }
  func.func @transform_2(%arg0: i32) -> (i32, i32) {
    %c0_i32 = arith.constant 0 : i32
    %c0_i32_0 = arith.constant 0 : i32
    %c0_i32_1 = arith.constant 0 : i32
    return %c0_i32, %c0_i32_0 : i32, i32
  }
  func.func @transform_3(%arg0: i32) -> (i32, i32) {
    %c0_i32 = arith.constant 0 : i32
    %c0_i32_0 = arith.constant 0 : i32
    return %arg0, %c0_i32 : i32, i32
  }
  func.func @transform_4(%arg0: i32) -> (i32, i32) {
    %c0_i32 = arith.constant 0 : i32
    %c0_i32_0 = arith.constant 0 : i32
    return %arg0, %c0_i32 : i32, i32
  }
}

module attributes {stable_mosaic.version = 11 : i64} {
  func.func @_convt_res_kernel(%arg0: i32, %arg1: memref<256x64xbf16, #tpu.memory_space<vmem>>, %arg2: memref<64x64xbf16, #tpu.memory_space<vmem>>, %arg3: memref<1x64xf32, #tpu.memory_space<vmem>>, %arg4: memref<256x64xf32, #tpu.memory_space<vmem>>, %arg5: memref<256x64xf32, #tpu.memory_space<vmem>>) attributes {dimension_semantics = [#tpu.dimension_semantics<parallel>], iteration_bounds = array<i64: 2>, scalar_prefetch = 0 : i64, scratch_operands = 0 : i64, tpu.core_type = #tpu.core_type<tc>, window_params = [{transform_indices = @transform_0, window_bounds = array<i64: 256, 64>}, {pipeline_mode = #tpu.pipeline_mode<synchronous>, transform_indices = @transform_1, window_bounds = array<i64: 64, 64>}, {pipeline_mode = #tpu.pipeline_mode<synchronous>, transform_indices = @transform_2, window_bounds = array<i64: 1, 64>}, {transform_indices = @transform_3, window_bounds = array<i64: 256, 64>}, {transform_indices = @transform_4, window_bounds = array<i64: 256, 64>}]} {
    %c0 = arith.constant 0 : index
    %c0_0 = arith.constant 0 : index
    %0 = vector.load %arg1[%c0, %c0_0] : memref<256x64xbf16, #tpu.memory_space<vmem>>, vector<256x64xbf16>
    %c0_1 = arith.constant 0 : index
    %c0_2 = arith.constant 0 : index
    %1 = vector.load %arg2[%c0_1, %c0_2] : memref<64x64xbf16, #tpu.memory_space<vmem>>, vector<64x64xbf16>
    %cst = arith.constant dense<0.000000e+00> : vector<256x64xf32>
    %2 = tpu.matmul %0, %1, %cst {dimension_numbers = #tpu.dot_dimension_numbers<[1], [0], [0], [1], [0, 0, 1, 1], [], []>} : vector<256x64xbf16>, vector<64x64xbf16>, vector<256x64xf32> -> vector<256x64xf32>
    %c0_3 = arith.constant 0 : index
    %c0_4 = arith.constant 0 : index
    %3 = vector.load %arg3[%c0_3, %c0_4] : memref<1x64xf32, #tpu.memory_space<vmem>>, vector<1x64xf32>
    %4 = vector.broadcast %3 : vector<1x64xf32> to vector<256x64xf32>
    %5 = arith.addf %2, %4 : vector<256x64xf32>
    %c0_5 = arith.constant 0 : index
    %c0_6 = arith.constant 0 : index
    %6 = vector.load %arg4[%c0_5, %c0_6] : memref<256x64xf32, #tpu.memory_space<vmem>>, vector<256x64xf32>
    %7 = arith.addf %5, %6 : vector<256x64xf32>
    %cst_7 = arith.constant 0.000000e+00 : f32
    %8 = vector.broadcast %cst_7 : f32 to vector<256x64xf32>
    %9 = arith.maximumf %7, %8 : vector<256x64xf32>
    %c0_8 = arith.constant 0 : index
    %c0_9 = arith.constant 0 : index
    %10 = vector.load %arg5[%c0_8, %c0_9] : memref<256x64xf32, #tpu.memory_space<vmem>>, vector<256x64xf32>
    tpu.vector_store %arg5[%c0_8, %c0_9], %9 {strides = array<i32>} : memref<256x64xf32, #tpu.memory_space<vmem>>, vector<256x64xf32>,
    return
  }
  func.func @transform_0(%arg0: i32) -> (i32, i32) {
    %c0_i32 = arith.constant 0 : i32
    %c0_i32_0 = arith.constant 0 : i32
    return %arg0, %c0_i32 : i32, i32
  }
  func.func @transform_1(%arg0: i32) -> (i32, i32) {
    %c0_i32 = arith.constant 0 : i32
    %c0_i32_0 = arith.constant 0 : i32
    %c0_i32_1 = arith.constant 0 : i32
    return %c0_i32, %c0_i32_0 : i32, i32
  }
  func.func @transform_2(%arg0: i32) -> (i32, i32) {
    %c0_i32 = arith.constant 0 : i32
    %c0_i32_0 = arith.constant 0 : i32
    %c0_i32_1 = arith.constant 0 : i32
    return %c0_i32, %c0_i32_0 : i32, i32
  }
  func.func @transform_3(%arg0: i32) -> (i32, i32) {
    %c0_i32 = arith.constant 0 : i32
    %c0_i32_0 = arith.constant 0 : i32
    return %arg0, %c0_i32 : i32, i32
  }
  func.func @transform_4(%arg0: i32) -> (i32, i32) {
    %c0_i32 = arith.constant 0 : i32
    %c0_i32_0 = arith.constant 0 : i32
    return %arg0, %c0_i32 : i32, i32
  }
}

module attributes {stable_mosaic.version = 11 : i64} {
  func.func @_convt_res_move_kernel(%arg0: i32, %arg1: memref<512x64xbf16, #tpu.memory_space<vmem>>, %arg2: memref<64x64xbf16, #tpu.memory_space<vmem>>, %arg3: memref<1x64xf32, #tpu.memory_space<vmem>>, %arg4: memref<64x48xf32, #tpu.memory_space<vmem>>, %arg5: memref<1x48xf32, #tpu.memory_space<vmem>>, %arg6: memref<512x64xf32, #tpu.memory_space<vmem>>, %arg7: memref<512x48xf32, #tpu.memory_space<vmem>>) attributes {dimension_semantics = [#tpu.dimension_semantics<parallel>], iteration_bounds = array<i64: 4>, scalar_prefetch = 0 : i64, scratch_operands = 0 : i64, tpu.core_type = #tpu.core_type<tc>, window_params = [{transform_indices = @transform_0, window_bounds = array<i64: 512, 64>}, {pipeline_mode = #tpu.pipeline_mode<synchronous>, transform_indices = @transform_1, window_bounds = array<i64: 64, 64>}, {pipeline_mode = #tpu.pipeline_mode<synchronous>, transform_indices = @transform_2, window_bounds = array<i64: 1, 64>}, {pipeline_mode = #tpu.pipeline_mode<synchronous>, transform_indices = @transform_3, window_bounds = array<i64: 64, 48>}, {pipeline_mode = #tpu.pipeline_mode<synchronous>, transform_indices = @transform_4, window_bounds = array<i64: 1, 48>}, {transform_indices = @transform_5, window_bounds = array<i64: 512, 64>}, {transform_indices = @transform_6, window_bounds = array<i64: 512, 48>}]} {
    %c0 = arith.constant 0 : index
    %c0_0 = arith.constant 0 : index
    %0 = vector.load %arg1[%c0, %c0_0] : memref<512x64xbf16, #tpu.memory_space<vmem>>, vector<512x64xbf16>
    %c0_1 = arith.constant 0 : index
    %c0_2 = arith.constant 0 : index
    %1 = vector.load %arg2[%c0_1, %c0_2] : memref<64x64xbf16, #tpu.memory_space<vmem>>, vector<64x64xbf16>
    %cst = arith.constant dense<0.000000e+00> : vector<512x64xf32>
    %2 = tpu.matmul %0, %1, %cst {dimension_numbers = #tpu.dot_dimension_numbers<[1], [0], [0], [1], [0, 0, 1, 1], [], []>} : vector<512x64xbf16>, vector<64x64xbf16>, vector<512x64xf32> -> vector<512x64xf32>
    %c0_3 = arith.constant 0 : index
    %c0_4 = arith.constant 0 : index
    %3 = vector.load %arg3[%c0_3, %c0_4] : memref<1x64xf32, #tpu.memory_space<vmem>>, vector<1x64xf32>
    %4 = vector.broadcast %3 : vector<1x64xf32> to vector<512x64xf32>
    %5 = arith.addf %2, %4 : vector<512x64xf32>
    %c0_5 = arith.constant 0 : index
    %c0_6 = arith.constant 0 : index
    %6 = vector.load %arg6[%c0_5, %c0_6] : memref<512x64xf32, #tpu.memory_space<vmem>>, vector<512x64xf32>
    %7 = arith.addf %5, %6 : vector<512x64xf32>
    %cst_7 = arith.constant 0.000000e+00 : f32
    %8 = vector.broadcast %cst_7 : f32 to vector<512x64xf32>
    %9 = arith.maximumf %7, %8 : vector<512x64xf32>
    %c0_8 = arith.constant 0 : index
    %c0_9 = arith.constant 0 : index
    %10 = vector.load %arg4[%c0_8, %c0_9] : memref<64x48xf32, #tpu.memory_space<vmem>>, vector<64x48xf32>
    %cst_10 = arith.constant dense<0.000000e+00> : vector<512x48xf32>
    %11 = tpu.matmul %9, %10, %cst_10 {dimension_numbers = #tpu.dot_dimension_numbers<[1], [0], [0], [1], [0, 0, 1, 1], [], []>} : vector<512x64xf32>, vector<64x48xf32>, vector<512x48xf32> -> vector<512x48xf32>
    %c0_11 = arith.constant 0 : index
    %c0_12 = arith.constant 0 : index
    %12 = vector.load %arg5[%c0_11, %c0_12] : memref<1x48xf32, #tpu.memory_space<vmem>>, vector<1x48xf32>
    %13 = vector.broadcast %12 : vector<1x48xf32> to vector<512x48xf32>
    %14 = arith.addf %11, %13 : vector<512x48xf32>
    %c0_13 = arith.constant 0 : index
    %c0_14 = arith.constant 0 : index
    %15 = vector.load %arg7[%c0_13, %c0_14] : memref<512x48xf32, #tpu.memory_space<vmem>>, vector<512x48xf32>
    tpu.vector_store %arg7[%c0_13, %c0_14], %14 {strides = array<i32>} : memref<512x48xf32, #tpu.memory_space<vmem>>, vector<512x48xf32>,
    return
  }
  func.func @transform_0(%arg0: i32) -> (i32, i32) {
    %c0_i32 = arith.constant 0 : i32
    %c0_i32_0 = arith.constant 0 : i32
    return %arg0, %c0_i32 : i32, i32
  }
  func.func @transform_1(%arg0: i32) -> (i32, i32) {
    %c0_i32 = arith.constant 0 : i32
    %c0_i32_0 = arith.constant 0 : i32
    %c0_i32_1 = arith.constant 0 : i32
    return %c0_i32, %c0_i32_0 : i32, i32
  }
  func.func @transform_2(%arg0: i32) -> (i32, i32) {
    %c0_i32 = arith.constant 0 : i32
    %c0_i32_0 = arith.constant 0 : i32
    %c0_i32_1 = arith.constant 0 : i32
    return %c0_i32, %c0_i32_0 : i32, i32
  }
  func.func @transform_3(%arg0: i32) -> (i32, i32) {
    %c0_i32 = arith.constant 0 : i32
    %c0_i32_0 = arith.constant 0 : i32
    %c0_i32_1 = arith.constant 0 : i32
    return %c0_i32, %c0_i32_0 : i32, i32
  }
  func.func @transform_4(%arg0: i32) -> (i32, i32) {
    %c0_i32 = arith.constant 0 : i32
    %c0_i32_0 = arith.constant 0 : i32
    %c0_i32_1 = arith.constant 0 : i32
    return %c0_i32, %c0_i32_0 : i32, i32
  }
  func.func @transform_5(%arg0: i32) -> (i32, i32) {
    %c0_i32 = arith.constant 0 : i32
    %c0_i32_0 = arith.constant 0 : i32
    return %arg0, %c0_i32 : i32, i32
  }
  func.func @transform_6(%arg0: i32) -> (i32, i32) {
    %c0_i32 = arith.constant 0 : i32
    %c0_i32_0 = arith.constant 0 : i32
    return %arg0, %c0_i32 : i32, i32
  }
}

</mosaic_0001>

<bundles_post_ra>
// kernel: tile.68
= control target key start
LH: loop header
LB: loop body
LE: loop exit
PB: predicated region body
PF: predicated region fallthrough
CT: control target
= control target key end

     0   :  { %s22_s0 = inlined_call_operand.vmem [shape: f32[12], index: 0, kind: input, shape index: {}]   ;;  %s23_s1 = inlined_call_operand.vmem [shape: f32[4,12], index: 1, kind: output, shape index: {}]  }
   0x1   :  { %v4_v0 = vld [vmem:[%s22_s0] ss:$0 sm:$0xff] }
   0x2   :  { %5 = vst [vmem:[%s23_s1] sm:$0xf] %v4_v0 }

// kernel: tile.69
= control target key start
LH: loop header
LB: loop body
LE: loop exit
PB: predicated region body
PF: predicated region fallthrough
CT: control target
= control target key end

     0   :  { %vm8_vm0 = vcmask 97280   ;;  %s40_s8 = smov 12   ;;  %s41_s9 = smov 24   ;;  %vm14_vm1 = vcmask 392480   ;;  %vm20_vm2 = vcmask 294080   ;;  %vm26_vm3 = vcmask 195680   ;;  %s58_s0 = inlined_call_operand.vmem [shape: f32[4,12], index: 0, kind: input, shape index: {}]   ;;  %s59_s1 = inlined_call_operand.vmem [shape: f32[1,48], index: 1, kind: output, shape index: {}]  }
   0x1   :  { %v5_v0 = vld [vmem:[%s58_s0] sm:$0xf]  ;;  %s39_s0 = smov 36  }
   0x2   :  { %6 = vst [vmem:[#allocation1] sm:$0xf] %v5_v0 }
   0x9   :  { %v11_v1 = vld [vmem:[#allocation1 + $0x3] sm:$0x1]   ;;  %v23_v2 = vld [vmem:[#allocation1 + $0x1] sm:$0x1]   ;;  %v7_v3 = vld [vmem:[#allocation1] sm:$0x1]  }
   0xa   :  { %12 = vrot.lane.b32.xlu0 %v11_v1, %s39_s0  ;;  %24 = vrot.lane.b32.xlu1 %v23_v2, %s40_s8  ;;  %v17_v4 = vld [vmem:[#allocation1 + $0x2] sm:$0x1]   ;;  %9 = vst.msk [vmem:[#allocation0] sm:$0x1] %vm8_vm0, %v7_v3  }
   0xe   :  { %18 = vrot.lane.b32.xlu0 %v17_v4, %s41_s9 }
  0x7c   :  { %v13_v5 = vpop.permute.xlu0 %12   ;;  %v25_v6 = vpop.permute.xlu1 %24  }
  0x7d   :  { %15 = vst.msk [vmem:[#allocation0] sm:$0x1] %vm14_vm1, %v13_v5  }
  0x80   :  { %v19_v7 = vpop.permute.xlu0 %18  }
  0x81   :  { %21 = vst.msk [vmem:[#allocation0] sm:$0x1] %vm20_vm2, %v19_v7  }
  0x82   :  { %27 = vst.msk [vmem:[#allocation0] sm:$0x1] %vm26_vm3, %v25_v6  }
  0x89   :  { %v32_v8 = vld [vmem:[#allocation0] sm:$0x1] }
  0x8a   :  { %35 = vst [vmem:[%s59_s1] sm:$0x1] %v32_v8 }

// kernel: tile.38
= control target key start
LH: loop header
LB: loop body
LE: loop exit
PB: predicated region body
PF: predicated region fallthrough
CT: control target
= control target key end

     0   :  { %2 = vsyncpa [#allocation1], 0  ;;  %s42_s6 = smov [#allocation0]   ;;  %s59_s0 = inlined_call_operand.hbm [shape: f32[16], index: 0, kind: input, shape index: {}]   ;;  %s60_s1 = inlined_call_operand.vmem [shape: f32[4,16], index: 1, kind: output, shape index: {}]  }
   0x1   :  { %s9_s7 = sshll.u32 %s42_s6, 4  ;;  %s10_s7 = int_to_ptr.vmem [resolvable:$true] %s9_s7 }
   0x2   :  { %s28_s8 = scalar_lea.vmem %s10_s7, 16  ;;  %s32_s9 = scalar_lea.vmem %s10_s7, 32 }
   0x3   :  { %p29_p0 = scmp.ne.s32.totalorder %s10_s7, %s28_s8  ;;  %p33_p1 = scmp.lt.s32.totalorder %s10_s7, %s10_s7 }
   0x4   :  { %p34_p2 = scmp.lt.s32.totalorder %s32_s9, %s28_s8 }
   0x6   :  { %p35_p3 = por %p34_p2, %p33_p1 }
   0x8   :  { %p36_p4 = pnand %p35_p3, %p29_p0 }
   0xa   :  { %39 = shalt.err (!%p36_p4)
}
   0xb   :  { %12 = dma.hbm_to_vmem [thread:$0]  %s59_s0, 16, %s10_s7, [#allocation1]  }
   0xc   :  { %40 = dma.done.wait [#allocation1], 16  }
   0xd   :  { %41 = vsyncadd [#allocation1], 4294967280  ;;  %v16_v0 = vld [vmem:[#allocation0] ss:$0 sm:$0xff] }
   0xe   :  { %17 = vst [vmem:[%s60_s1] sm:$0xf] %v16_v0 }
   0xf   :  { %18 = vsyncpa [#allocation1], 1 }

// kernel: tile.39
= control target key start
LH: loop header
LB: loop body
LE: loop exit
PB: predicated region body
PF: predicated region fallthrough
CT: control target
= control target key end

     0   :  { %vm8_vm0 = vcmask 130048   ;;  %s40_s8 = smov 16   ;;  %s41_s9 = smov 32   ;;  %vm14_vm1 = vcmask 523648   ;;  %vm20_vm2 = vcmask 392448   ;;  %vm26_vm3 = vcmask 261248   ;;  %s58_s0 = inlined_call_operand.vmem [shape: f32[4,16], index: 0, kind: input, shape index: {}]   ;;  %s59_s1 = inlined_call_operand.vmem [shape: f32[1,64], index: 1, kind: output, shape index: {}]  }
   0x1   :  { %v5_v0 = vld [vmem:[%s58_s0] sm:$0xf]  ;;  %s39_s0 = smov 48  }
   0x2   :  { %6 = vst [vmem:[#allocation1] sm:$0xf] %v5_v0 }
   0x9   :  { %v11_v1 = vld [vmem:[#allocation1 + $0x3] sm:$0x1]   ;;  %v23_v2 = vld [vmem:[#allocation1 + $0x1] sm:$0x1]   ;;  %v7_v3 = vld [vmem:[#allocation1] sm:$0x1]  }
   0xa   :  { %12 = vrot.lane.b32.xlu0 %v11_v1, %s39_s0  ;;  %24 = vrot.lane.b32.xlu1 %v23_v2, %s40_s8  ;;  %v17_v4 = vld [vmem:[#allocation1 + $0x2] sm:$0x1]   ;;  %9 = vst.msk [vmem:[#allocation0] sm:$0x1] %vm8_vm0, %v7_v3  }
   0xe   :  { %18 = vrot.lane.b32.xlu0 %v17_v4, %s41_s9 }
  0x7c   :  { %v13_v5 = vpop.permute.xlu0 %12   ;;  %v25_v6 = vpop.permute.xlu1 %24  }
  0x7d   :  { %15 = vst.msk [vmem:[#allocation0] sm:$0x1] %vm14_vm1, %v13_v5  }
  0x80   :  { %v19_v7 = vpop.permute.xlu0 %18  }
  0x81   :  { %21 = vst.msk [vmem:[#allocation0] sm:$0x1] %vm20_vm2, %v19_v7  }
  0x82   :  { %27 = vst.msk [vmem:[#allocation0] sm:$0x1] %vm26_vm3, %v25_v6  }
  0x89   :  { %v32_v8 = vld [vmem:[#allocation0] sm:$0x1] }
  0x8a   :  { %35 = vst [vmem:[%s59_s1] sm:$0x1] %v32_v8 }

// kernel: tower_forward.14
= control target key start
LH: loop header
LB: loop body
LE: loop exit
PB: predicated region body
PF: predicated region fallthrough
CT: control target
= control target key end

     0   :  { %s1516_s15 = smov 0   ;;  %s2076_s0 = inlined_call_operand.vmem [shape: bf16[8192,7], index: 0, kind: input, shape index: {}]   ;;  %s2077_s1 = inlined_call_operand.vmem [shape: bf16[7,16], index: 1, kind: input, shape index: {}]   ;;  %s2078_s2 = inlined_call_operand.vmem [shape: f32[3,16], index: 2, kind: input, shape index: {}]   ;;  %s2079_s3 = inlined_call_operand.vmem [shape: f32[8192,16], index: 3, kind: output, shape index: {0}]   ;;  %s2080_s4 = inlined_call_operand.vmem [shape: f32[8192,16], index: 4, kind: output, shape index: {1}]  }
   0x1 LB: > { %s1260_s16 = sadd.s32 4294967295, %s1488_s15   ;;  %p1264_p0 = scmp.ge.s32.totalorder %s1488_s15, 1  ;;  %s1488_s15 = sphi %s1516_s15, %s15_s15  }
   0x2   : > { %p166_p1 = scmp.lt.s32.totalorder %s1488_s15, 17 }
   0x4   : > { %p167_p2 = pnand %p1264_p0, %p166_p1 }
   0x5   : > { %s1265_s19 = sshll.u32 (!%p167_p2), %s1260_s16, 6 }
   0x6   : > { %170 = sbr.rel (%p167_p2) target bundleno = 285 (0x11d), region = 32  ;;  %p198_p3 = scmp.lt.s32.totalorder (!%p167_p2), %s1265_s19, 1023 }
   0xb   : > { %v280_v0 = vld [vmem:[%s2077_s1] sm:$0xf]  ;;  %vm543_vm0 = vcmask 1042432   ;;  %vm544_vm1 = vcmask 1043456   ;;  %v1490_v1 = vmov 65535   ;;  %s2082_s19 = smov (!%p198_p3, %s1265_s19), 1023 }
   0xc   : > { %v545_v2 = vsel %vm543_vm0, 4294967295, %v1490_v1  ;;  %s1266_s20 = sshll.u32 %s2082_s19, 2  ;;  %vm446_vm2 = vcmask 56320   ;;  %s1268_s24 = sshll.u32 %s2082_s19, 3  ;;  %v1603_v37 = vld [vmem:[%s2078_s2] ss:$0 sm:$0xff] }
   0xd   : > { %v546_v3 = vsel %vm544_vm1, %v545_v2, 0  ;;  %s1533_s23 = scalar_lea.vmem %s2076_s0, %s1266_s20  ;;  %s1608_s29 = scalar_lea.vmem %s2079_s3, %s1268_s24  ;;  %vm839_vm3 = vcmask 130048   ;;  %v1614_v41 = vld [vmem:[%s2078_s2 + $0x1] ss:$0 sm:$0xff]  ;;  %v1623_v47 = vld [vmem:[%s2078_s2 + $0x2] ss:$0 sm:$0xff] }
   0xe   : > { %v548_v4 = vand.u32 %v546_v3, %v280_v0  ;;  %v1450_v5 = vld [vmem:[%s1533_s23] sm:$0xff]   ;;  %v1452_v7 = vld [vmem:[%s1533_s23 + $0x8] sm:$0xff]   ;;  %v1454_v9 = vld [vmem:[%s1533_s23 + $0x10] sm:$0xff]   ;;  %s1635_s10 = scalar_lea.vmem %s2080_s4, %s1268_s24 }
   0xf   : > { %v1451_v6 = vld [vmem:[%s1533_s23 + $0x80] sm:$0xff]   ;;  %1375 = vmatprep.mubr.msk.bf16.mxu0 %vm446_vm2, %v1450_v5  ;;  %v1453_v8 = vld [vmem:[%s1533_s23 + $0x88] sm:$0xff]   ;;  %v1455_v10 = vld [vmem:[%s1533_s23 + $0x90] sm:$0xff]  }
  0x10   : > { %1373 = vmatprep.subr.bf16.mxu0 %v548_v4  ;;  %1439 = vmatprep.subr.bf16.mxu1 %v548_v4  ;;  %v1456_v11 = vld [vmem:[%s1533_s23 + $0x18] sm:$0xff]   ;;  %v1458_v13 = vld [vmem:[%s1533_s23 + $0x20] sm:$0xff]   ;;  %v1460_v15 = vld [vmem:[%s1533_s23 + $0x28] sm:$0xff]  }
  0x11   : > { %1374 = vmatpush3.bf16.msra.mxu0 %v548_v4  ;;  %1440 = vmatpush3.bf16.msra.mxu1 %v548_v4  ;;  %v1457_v12 = vld [vmem:[%s1533_s23 + $0x98] sm:$0xff]   ;;  %v1459_v14 = vld [vmem:[%s1533_s23 + $0xa0] sm:$0xff]   ;;  %v1461_v16 = vld [vmem:[%s1533_s23 + $0xa8] sm:$0xff]  }
  0x12   : > { %1407 = vmatprep.mubr.msk.bf16.mxu1 %vm446_vm2, %v1451_v6  ;;  %v1462_v17 = vld [vmem:[%s1533_s23 + $0x30] sm:$0xff]   ;;  %v1464_v19 = vld [vmem:[%s1533_s23 + $0x38] sm:$0xff]   ;;  %v1466_v21 = vld [vmem:[%s1533_s23 + $0x40] sm:$0xff]  }
  0x13   : > { %v1463_v18 = vld [vmem:[%s1533_s23 + $0xb0] sm:$0xff]   ;;  %v1465_v20 = vld [vmem:[%s1533_s23 + $0xb8] sm:$0xff]   ;;  %v1467_v22 = vld [vmem:[%s1533_s23 + $0xc0] sm:$0xff]  }
  0x14   : > { %1376 = vmatmul.mubr.msk.bf16.vlgmr.msra.gmra.mxu0 %vm446_vm2, %v1452_v7  ;;  %1408 = vmatmul.mubr.msk.bf16.vlgmr.msra.gmra.mxu1 %vm446_vm2, %v1453_v8  ;;  %v1468_v23 = vld [vmem:[%s1533_s23 + $0x48] sm:$0xff]   ;;  %v1470_v25 = vld [vmem:[%s1533_s23 + $0x50] sm:$0xff]   ;;  %v1472_v27 = vld [vmem:[%s1533_s23 + $0x58] sm:$0xff]  }
  0x15   : > { %1379 = vmatprep.mubr.msk.bf16.mxu0 %vm446_vm2, %v1454_v9  ;;  %1411 = vmatprep.mubr.msk.bf16.mxu1 %vm446_vm2, %v1455_v10  ;;  %v1469_v24 = vld [vmem:[%s1533_s23 + $0xc8] sm:$0xff]   ;;  %v1471_v26 = vld [vmem:[%s1533_s23 + $0xd0] sm:$0xff]   ;;  %v1473_v28 = vld [vmem:[%s1533_s23 + $0xd8] sm:$0xff]  }
  0x16   : > { %v1474_v29 = vld [vmem:[%s1533_s23 + $0x60] sm:$0xff]   ;;  %v1476_v31 = vld [vmem:[%s1533_s23 + $0x68] sm:$0xff]   ;;  %v1478_v33 = vld [vmem:[%s1533_s23 + $0x70] sm:$0xff]  }
  0x17   : > { %v1475_v30 = vld [vmem:[%s1533_s23 + $0xe0] sm:$0xff]   ;;  %v1477_v32 = vld [vmem:[%s1533_s23 + $0xe8] sm:$0xff]   ;;  %v1479_v34 = vld [vmem:[%s1533_s23 + $0xf0] sm:$0xff]  }
  0x18   : > { %v1480_v35 = vld [vmem:[%s1533_s23 + $0x78] sm:$0xff]  }
  0x19   : > { %v1481_v36 = vld [vmem:[%s1533_s23 + $0xf8] sm:$0xff]  }
  0x1c   : > { %1380 = vmatmul.mubr.msk.bf16.gmra.mxu0 %vm446_vm2, %v1456_v11  ;;  %1412 = vmatmul.mubr.msk.bf16.gmra.mxu1 %vm446_vm2, %v1457_v12 }
  0x1d   : > { %1383 = vmatprep.mubr.msk.bf16.mxu0 %vm446_vm2, %v1458_v13  ;;  %1415 = vmatprep.mubr.msk.bf16.mxu1 %vm446_vm2, %v1459_v14 }
  0x24   : > { %1384 = vmatmul.mubr.msk.bf16.gmra.mxu0 %vm446_vm2, %v1460_v15  ;;  %1416 = vmatmul.mubr.msk.bf16.gmra.mxu1 %vm446_vm2, %v1461_v16 }
  0x25   : > { %1387 = vmatprep.mubr.msk.bf16.mxu0 %vm446_vm2, %v1462_v17  ;;  %1419 = vmatprep.mubr.msk.bf16.mxu1 %vm446_vm2, %v1463_v18 }
  0x2c   : > { %1388 = vmatmul.mubr.msk.bf16.gmra.mxu0 %vm446_vm2, %v1464_v19  ;;  %1420 = vmatmul.mubr.msk.bf16.gmra.mxu1 %vm446_vm2, %v1465_v20 }
  0x2d   : > { %1391 = vmatprep.mubr.msk.bf16.mxu0 %vm446_vm2, %v1466_v21  ;;  %1423 = vmatprep.mubr.msk.bf16.mxu1 %vm446_vm2, %v1467_v22 }
  0x34   : > { %1392 = vmatmul.mubr.msk.bf16.gmra.mxu0 %vm446_vm2, %v1468_v23  ;;  %1424 = vmatmul.mubr.msk.bf16.gmra.mxu1 %vm446_vm2, %v1469_v24 }
  0x35   : > { %1395 = vmatprep.mubr.msk.bf16.mxu0 %vm446_vm2, %v1470_v25  ;;  %1427 = vmatprep.mubr.msk.bf16.mxu1 %vm446_vm2, %v1471_v26 }
  0x3c   : > { %1396 = vmatmul.mubr.msk.bf16.gmra.mxu0 %vm446_vm2, %v1472_v27  ;;  %1428 = vmatmul.mubr.msk.bf16.gmra.mxu1 %vm446_vm2, %v1473_v28 }
  0x3d   : > { %1399 = vmatprep.mubr.msk.bf16.mxu0 %vm446_vm2, %v1474_v29  ;;  %1431 = vmatprep.mubr.msk.bf16.mxu1 %vm446_vm2, %v1475_v30 }
  0x44   : > { %1400 = vmatmul.mubr.msk.bf16.gmra.mxu0 %vm446_vm2, %v1476_v31  ;;  %1432 = vmatmul.mubr.msk.bf16.gmra.mxu1 %vm446_vm2, %v1477_v32 }
  0x45   : > { %1403 = vmatprep.mubr.msk.bf16.mxu0 %vm446_vm2, %v1478_v33  ;;  %1435 = vmatprep.mubr.msk.bf16.mxu1 %vm446_vm2, %v1479_v34 }
  0x4c   : > { %1404 = vmatmul.mubr.msk.bf16.gmra.mxu0 %vm446_vm2, %v1480_v35  ;;  %1436 = vmatmul.mubr.msk.bf16.gmra.mxu1 %vm446_vm2, %v1481_v36 }
  0xd4   : > { %v1377_v38 = vpop.f32.mrf.mxu0  ;;  %v1409_v40 = vpop.f32.mrf.mxu1 }
  0xd5   : > { %v593_v39 = vadd.f32 %v1377_v38, %v1603_v37  ;;  %v721_v42 = vadd.f32 %v1409_v40, %v1603_v37 }
  0xd6   : > { %v584_v43 = vpop.f32.mrf.mxu0  ;;  %v712_v46 = vpop.f32.mrf.mxu1 }
  0xd7   : > { %842 = vst.msk [vmem:[%s1608_s29 + $0x10] sm:$0xff] %vm839_vm3, %v593_v39  ;;  %v906_v44 = vmax.f32 %v593_v39, 0.0  ;;  %v585_v45 = vadd.f32 %v1603_v37, %v584_v43  ;;  %874 = vst.msk [vmem:[%s1608_s29 + $0x110] sm:$0xff] %vm839_vm3, %v721_v42  ;;  %v938_v48 = vmax.f32 %v721_v42, 0.0  ;;  %v713_v49 = vadd.f32 %v1603_v37, %v712_v46 }
  0xd8   : > { %v1378_v50 = vpop.f32.mrf.mxu0  ;;  %v1410_v54 = vpop.f32.mrf.mxu1 }
  0xd9   : > { %v975_v51 = vmul.f32 %v1614_v41, %v906_v44  ;;  %840 = vst.msk [vmem:[%s1608_s29] sm:$0xff] %vm839_vm3, %v585_v45  ;;  %v904_v52 = vmax.f32 %v585_v45, 0.0  ;;  %v596_v53 = vadd.f32 %v1378_v50, %v1603_v37  ;;  %v1007_v55 = vmul.f32 %v1614_v41, %v938_v48  ;;  %872 = vst.msk [vmem:[%s1608_s29 + $0x100] sm:$0xff] %vm839_vm3, %v713_v49 }
  0xda   : > { %v936_v56 = vmax.f32 %v713_v49, 0.0  ;;  %v724_v57 = vadd.f32 %v1410_v54, %v1603_v37  ;;  %v587_v58 = vpop.f32.mrf.mxu0  ;;  %v715_v63 = vpop.f32.mrf.mxu1 }
  0xdb   : > { %v1044_v59 = vadd.f32 %v1623_v47, %v975_v51  ;;  %v973_v60 = vmul.f32 %v1614_v41, %v904_v52  ;;  %843 = vst.msk [vmem:[%s1608_s29 + $0x18] sm:$0xff] %vm839_vm3, %v596_v53  ;;  %v907_v61 = vmax.f32 %v596_v53, 0.0  ;;  %v588_v62 = vadd.f32 %v1603_v37, %v587_v58 }
  0xdc   : > { %v1076_v0 = vadd.f32 %v1623_v47, %v1007_v55  ;;  %v1005_v1 = vmul.f32 %v1614_v41, %v936_v56  ;;  %875 = vst.msk [vmem:[%s1608_s29 + $0x118] sm:$0xff] %vm839_vm3, %v724_v57  ;;  %v939_v2 = vmax.f32 %v724_v57, 0.0  ;;  %v716_v3 = vadd.f32 %v1603_v37, %v715_v63  ;;  %v1381_v4 = vpop.f32.mrf.mxu0  ;;  %v1413_v9 = vpop.f32.mrf.mxu1 }
  0xdd   : > { %1108 = vst.msk [vmem:[%s1635_s10 + $0x10] sm:$0xff] %vm839_vm3, %v1044_v59  ;;  %v1042_v5 = vadd.f32 %v1623_v47, %v973_v60  ;;  %v976_v6 = vmul.f32 %v1614_v41, %v907_v61  ;;  %841 = vst.msk [vmem:[%s1608_s29 + $0x8] sm:$0xff] %vm839_vm3, %v588_v62  ;;  %v905_v7 = vmax.f32 %v588_v62, 0.0  ;;  %v609_v8 = vadd.f32 %v1381_v4, %v1603_v37 }
  0xde   : > { %1140 = vst.msk [vmem:[%s1635_s10 + $0x110] sm:$0xff] %vm839_vm3, %v1076_v0  ;;  %v1074_v10 = vadd.f32 %v1623_v47, %v1005_v1  ;;  %v1008_v11 = vmul.f32 %v1614_v41, %v939_v2  ;;  %873 = vst.msk [vmem:[%s1608_s29 + $0x108] sm:$0xff] %vm839_vm3, %v716_v3  ;;  %v937_v12 = vmax.f32 %v716_v3, 0.0  ;;  %v737_v13 = vadd.f32 %v1413_v9, %v1603_v37  ;;  %v600_v14 = vpop.f32.mrf.mxu0  ;;  %v728_v19 = vpop.f32.mrf.mxu1 }
  0xdf   : > { %1106 = vst.msk [vmem:[%s1635_s10] sm:$0xff] %vm839_vm3, %v1042_v5  ;;  %v1045_v15 = vadd.f32 %v1623_v47, %v976_v6  ;;  %v974_v16 = vmul.f32 %v1614_v41, %v905_v7  ;;  %846 = vst.msk [vmem:[%s1608_s29 + $0x30] sm:$0xff] %vm839_vm3, %v609_v8  ;;  %v910_v17 = vmax.f32 %v609_v8, 0.0  ;;  %v601_v18 = vadd.f32 %v1603_v37, %v600_v14 }
  0xe0   : > { %1138 = vst.msk [vmem:[%s1635_s10 + $0x100] sm:$0xff] %vm839_vm3, %v1074_v10  ;;  %v1077_v20 = vadd.f32 %v1623_v47, %v1008_v11  ;;  %v1006_v21 = vmul.f32 %v1614_v41, %v937_v12  ;;  %878 = vst.msk [vmem:[%s1608_s29 + $0x130] sm:$0xff] %vm839_vm3, %v737_v13  ;;  %v942_v22 = vmax.f32 %v737_v13, 0.0  ;;  %v729_v23 = vadd.f32 %v1603_v37, %v728_v19  ;;  %v1382_v24 = vpop.f32.mrf.mxu0  ;;  %v1414_v29 = vpop.f32.mrf.mxu1 }
  0xe1   : > { %1109 = vst.msk [vmem:[%s1635_s10 + $0x18] sm:$0xff] %vm839_vm3, %v1045_v15  ;;  %v1043_v25 = vadd.f32 %v1623_v47, %v974_v16  ;;  %v979_v26 = vmul.f32 %v1614_v41, %v910_v17  ;;  %844 = vst.msk [vmem:[%s1608_s29 + $0x20] sm:$0xff] %vm839_vm3, %v601_v18  ;;  %v908_v27 = vmax.f32 %v601_v18, 0.0  ;;  %v612_v28 = vadd.f32 %v1382_v24, %v1603_v37 }
  0xe2   : > { %1141 = vst.msk [vmem:[%s1635_s10 + $0x118] sm:$0xff] %vm839_vm3, %v1077_v20  ;;  %v1075_v30 = vadd.f32 %v1623_v47, %v1006_v21  ;;  %v1011_v31 = vmul.f32 %v1614_v41, %v942_v22  ;;  %876 = vst.msk [vmem:[%s1608_s29 + $0x120] sm:$0xff] %vm839_vm3, %v729_v23  ;;  %v940_v32 = vmax.f32 %v729_v23, 0.0  ;;  %v740_v33 = vadd.f32 %v1414_v29, %v1603_v37  ;;  %v603_v34 = vpop.f32.mrf.mxu0  ;;  %v731_v40 = vpop.f32.mrf.mxu1 }
  0xe3   : > { %1107 = vst.msk [vmem:[%s1635_s10 + $0x8] sm:$0xff] %vm839_vm3, %v1043_v25  ;;  %v1048_v35 = vadd.f32 %v1623_v47, %v979_v26  ;;  %v977_v36 = vmul.f32 %v1614_v41, %v908_v27  ;;  %847 = vst.msk [vmem:[%s1608_s29 + $0x38] sm:$0xff] %vm839_vm3, %v612_v28  ;;  %v911_v38 = vmax.f32 %v612_v28, 0.0  ;;  %v604_v39 = vadd.f32 %v1603_v37, %v603_v34 }
  0xe4   : > { %1139 = vst.msk [vmem:[%s1635_s10 + $0x108] sm:$0xff] %vm839_vm3, %v1075_v30  ;;  %v1080_v42 = vadd.f32 %v1623_v47, %v1011_v31  ;;  %v1009_v43 = vmul.f32 %v1614_v41, %v940_v32  ;;  %879 = vst.msk [vmem:[%s1608_s29 + $0x138] sm:$0xff] %vm839_vm3, %v740_v33  ;;  %v943_v44 = vmax.f32 %v740_v33, 0.0  ;;  %v732_v45 = vadd.f32 %v1603_v37, %v731_v40  ;;  %v1385_v46 = vpop.f32.mrf.mxu0  ;;  %v1417_v52 = vpop.f32.mrf.mxu1 }
  0xe5   : > { %1112 = vst.msk [vmem:[%s1635_s10 + $0x30] sm:$0xff] %vm839_vm3, %v1048_v35  ;;  %v1046_v48 = vadd.f32 %v1623_v47, %v977_v36  ;;  %v980_v49 = vmul.f32 %v1614_v41, %v911_v38  ;;  %845 = vst.msk [vmem:[%s1608_s29 + $0x28] sm:$0xff] %vm839_vm3, %v604_v39  ;;  %v909_v50 = vmax.f32 %v604_v39, 0.0  ;;  %v625_v51 = vadd.f32 %v1385_v46, %v1603_v37 }
  0xe6   : > { %1144 = vst.msk [vmem:[%s1635_s10 + $0x130] sm:$0xff] %vm839_vm3, %v1080_v42  ;;  %v1078_v53 = vadd.f32 %v1623_v47, %v1009_v43  ;;  %v1012_v54 = vmul.f32 %v1614_v41, %v943_v44  ;;  %877 = vst.msk [vmem:[%s1608_s29 + $0x128] sm:$0xff] %vm839_vm3, %v732_v45  ;;  %v941_v55 = vmax.f32 %v732_v45, 0.0  ;;  %v753_v56 = vadd.f32 %v1417_v52, %v1603_v37  ;;  %v616_v57 = vpop.f32.mrf.mxu0  ;;  %v744_v62 = vpop.f32.mrf.mxu1 }
  0xe7   : > { %1110 = vst.msk [vmem:[%s1635_s10 + $0x20] sm:$0xff] %vm839_vm3, %v1046_v48  ;;  %v1049_v58 = vadd.f32 %v1623_v47, %v980_v49  ;;  %v978_v59 = vmul.f32 %v1614_v41, %v909_v50  ;;  %850 = vst.msk [vmem:[%s1608_s29 + $0x50] sm:$0xff] %vm839_vm3, %v625_v51  ;;  %v914_v60 = vmax.f32 %v625_v51, 0.0  ;;  %v617_v61 = vadd.f32 %v1603_v37, %v616_v57 }
  0xe8   : > { %1142 = vst.msk [vmem:[%s1635_s10 + $0x120] sm:$0xff] %vm839_vm3, %v1078_v53  ;;  %v1081_v63 = vadd.f32 %v1623_v47, %v1012_v54  ;;  %v1010_v0 = vmul.f32 %v1614_v41, %v941_v55  ;;  %882 = vst.msk [vmem:[%s1608_s29 + $0x150] sm:$0xff] %vm839_vm3, %v753_v56  ;;  %v946_v1 = vmax.f32 %v753_v56, 0.0  ;;  %v745_v2 = vadd.f32 %v1603_v37, %v744_v62  ;;  %v1386_v3 = vpop.f32.mrf.mxu0  ;;  %v1418_v8 = vpop.f32.mrf.mxu1 }
  0xe9   : > { %1113 = vst.msk [vmem:[%s1635_s10 + $0x38] sm:$0xff] %vm839_vm3, %v1049_v58  ;;  %v1047_v4 = vadd.f32 %v1623_v47, %v978_v59  ;;  %v983_v5 = vmul.f32 %v1614_v41, %v914_v60  ;;  %848 = vst.msk [vmem:[%s1608_s29 + $0x40] sm:$0xff] %vm839_vm3, %v617_v61  ;;  %v912_v6 = vmax.f32 %v617_v61, 0.0  ;;  %v628_v7 = vadd.f32 %v1386_v3, %v1603_v37 }
  0xea   : > { %1145 = vst.msk [vmem:[%s1635_s10 + $0x138] sm:$0xff] %vm839_vm3, %v1081_v63  ;;  %v1079_v9 = vadd.f32 %v1623_v47, %v1010_v0  ;;  %v1015_v10 = vmul.f32 %v1614_v41, %v946_v1  ;;  %880 = vst.msk [vmem:[%s1608_s29 + $0x140] sm:$0xff] %vm839_vm3, %v745_v2  ;;  %v944_v11 = vmax.f32 %v745_v2, 0.0  ;;  %v756_v12 = vadd.f32 %v1418_v8, %v1603_v37  ;;  %v619_v13 = vpop.f32.mrf.mxu0  ;;  %v747_v18 = vpop.f32.mrf.mxu1 }
  0xeb   : > { %1111 = vst.msk [vmem:[%s1635_s10 + $0x28] sm:$0xff] %vm839_vm3, %v1047_v4  ;;  %v1052_v14 = vadd.f32 %v1623_v47, %v983_v5  ;;  %v981_v15 = vmul.f32 %v1614_v41, %v912_v6  ;;  %851 = vst.msk [vmem:[%s1608_s29 + $0x58] sm:$0xff] %vm839_vm3, %v628_v7  ;;  %v915_v16 = vmax.f32 %v628_v7, 0.0  ;;  %v620_v17 = vadd.f32 %v1603_v37, %v619_v13 }
  0xec   : > { %1143 = vst.msk [vmem:[%s1635_s10 + $0x128] sm:$0xff] %vm839_vm3, %v1079_v9  ;;  %v1084_v19 = vadd.f32 %v1623_v47, %v1015_v10  ;;  %v1013_v20 = vmul.f32 %v1614_v41, %v944_v11  ;;  %883 = vst.msk [vmem:[%s1608_s29 + $0x158] sm:$0xff] %vm839_vm3, %v756_v12  ;;  %v947_v21 = vmax.f32 %v756_v12, 0.0  ;;  %v748_v22 = vadd.f32 %v1603_v37, %v747_v18  ;;  %v1389_v23 = vpop.f32.mrf.mxu0  ;;  %v1421_v28 = vpop.f32.mrf.mxu1 }
  0xed   : > { %1116 = vst.msk [vmem:[%s1635_s10 + $0x50] sm:$0xff] %vm839_vm3, %v1052_v14  ;;  %v1050_v24 = vadd.f32 %v1623_v47, %v981_v15  ;;  %v984_v25 = vmul.f32 %v1614_v41, %v915_v16  ;;  %849 = vst.msk [vmem:[%s1608_s29 + $0x48] sm:$0xff] %vm839_vm3, %v620_v17  ;;  %v913_v26 = vmax.f32 %v620_v17, 0.0  ;;  %v641_v27 = vadd.f32 %v1389_v23, %v1603_v37 }
  0xee   : > { %1148 = vst.msk [vmem:[%s1635_s10 + $0x150] sm:$0xff] %vm839_vm3, %v1084_v19  ;;  %v1082_v29 = vadd.f32 %v1623_v47, %v1013_v20  ;;  %v1016_v30 = vmul.f32 %v1614_v41, %v947_v21  ;;  %881 = vst.msk [vmem:[%s1608_s29 + $0x148] sm:$0xff] %vm839_vm3, %v748_v22  ;;  %v945_v31 = vmax.f32 %v748_v22, 0.0  ;;  %v769_v32 = vadd.f32 %v1421_v28, %v1603_v37  ;;  %v632_v33 = vpop.f32.mrf.mxu0  ;;  %v760_v39 = vpop.f32.mrf.mxu1 }
  0xef   : > { %1114 = vst.msk [vmem:[%s1635_s10 + $0x40] sm:$0xff] %vm839_vm3, %v1050_v24  ;;  %v1053_v34 = vadd.f32 %v1623_v47, %v984_v25  ;;  %v982_v35 = vmul.f32 %v1614_v41, %v913_v26  ;;  %854 = vst.msk [vmem:[%s1608_s29 + $0x70] sm:$0xff] %vm839_vm3, %v641_v27  ;;  %v918_v36 = vmax.f32 %v641_v27, 0.0  ;;  %v633_v38 = vadd.f32 %v1603_v37, %v632_v33 }
  0xf0   : > { %1146 = vst.msk [vmem:[%s1635_s10 + $0x140] sm:$0xff] %vm839_vm3, %v1082_v29  ;;  %v1085_v40 = vadd.f32 %v1623_v47, %v1016_v30  ;;  %v1014_v42 = vmul.f32 %v1614_v41, %v945_v31  ;;  %886 = vst.msk [vmem:[%s1608_s29 + $0x170] sm:$0xff] %vm839_vm3, %v769_v32  ;;  %v950_v43 = vmax.f32 %v769_v32, 0.0  ;;  %v761_v44 = vadd.f32 %v1603_v37, %v760_v39  ;;  %v1390_v45 = vpop.f32.mrf.mxu0  ;;  %v1422_v51 = vpop.f32.mrf.mxu1 }
  0xf1   : > { %1117 = vst.msk [vmem:[%s1635_s10 + $0x58] sm:$0xff] %vm839_vm3, %v1053_v34  ;;  %v1051_v46 = vadd.f32 %v1623_v47, %v982_v35  ;;  %v987_v48 = vmul.f32 %v1614_v41, %v918_v36  ;;  %852 = vst.msk [vmem:[%s1608_s29 + $0x60] sm:$0xff] %vm839_vm3, %v633_v38  ;;  %v916_v49 = vmax.f32 %v633_v38, 0.0  ;;  %v644_v50 = vadd.f32 %v1390_v45, %v1603_v37 }
  0xf2   : > { %1149 = vst.msk [vmem:[%s1635_s10 + $0x158] sm:$0xff] %vm839_vm3, %v1085_v40  ;;  %v1083_v52 = vadd.f32 %v1623_v47, %v1014_v42  ;;  %v1019_v53 = vmul.f32 %v1614_v41, %v950_v43  ;;  %884 = vst.msk [vmem:[%s1608_s29 + $0x160] sm:$0xff] %vm839_vm3, %v761_v44  ;;  %v948_v54 = vmax.f32 %v761_v44, 0.0  ;;  %v772_v55 = vadd.f32 %v1422_v51, %v1603_v37  ;;  %v635_v56 = vpop.f32.mrf.mxu0  ;;  %v763_v61 = vpop.f32.mrf.mxu1 }
  0xf3   : > { %1115 = vst.msk [vmem:[%s1635_s10 + $0x48] sm:$0xff] %vm839_vm3, %v1051_v46  ;;  %v1056_v57 = vadd.f32 %v1623_v47, %v987_v48  ;;  %v985_v58 = vmul.f32 %v1614_v41, %v916_v49  ;;  %855 = vst.msk [vmem:[%s1608_s29 + $0x78] sm:$0xff] %vm839_vm3, %v644_v50  ;;  %v919_v59 = vmax.f32 %v644_v50, 0.0  ;;  %v636_v60 = vadd.f32 %v1603_v37, %v635_v56 }
  0xf4   : > { %1147 = vst.msk [vmem:[%s1635_s10 + $0x148] sm:$0xff] %vm839_vm3, %v1083_v52  ;;  %v1088_v62 = vadd.f32 %v1623_v47, %v1019_v53  ;;  %v1017_v63 = vmul.f32 %v1614_v41, %v948_v54  ;;  %887 = vst.msk [vmem:[%s1608_s29 + $0x178] sm:$0xff] %vm839_vm3, %v772_v55  ;;  %v951_v0 = vmax.f32 %v772_v55, 0.0  ;;  %v764_v1 = vadd.f32 %v1603_v37, %v763_v61  ;;  %v1393_v2 = vpop.f32.mrf.mxu0  ;;  %v1425_v7 = vpop.f32.mrf.mxu1 }
  0xf5   : > { %1120 = vst.msk [vmem:[%s1635_s10 + $0x70] sm:$0xff] %vm839_vm3, %v1056_v57  ;;  %v1054_v3 = vadd.f32 %v1623_v47, %v985_v58  ;;  %v988_v4 = vmul.f32 %v1614_v41, %v919_v59  ;;  %853 = vst.msk [vmem:[%s1608_s29 + $0x68] sm:$0xff] %vm839_vm3, %v636_v60  ;;  %v917_v5 = vmax.f32 %v636_v60, 0.0  ;;  %v657_v6 = vadd.f32 %v1393_v2, %v1603_v37 }
  0xf6   : > { %1152 = vst.msk [vmem:[%s1635_s10 + $0x170] sm:$0xff] %vm839_vm3, %v1088_v62  ;;  %v1086_v8 = vadd.f32 %v1623_v47, %v1017_v63  ;;  %v1020_v9 = vmul.f32 %v1614_v41, %v951_v0  ;;  %885 = vst.msk [vmem:[%s1608_s29 + $0x168] sm:$0xff] %vm839_vm3, %v764_v1  ;;  %v949_v10 = vmax.f32 %v764_v1, 0.0  ;;  %v785_v11 = vadd.f32 %v1425_v7, %v1603_v37  ;;  %v648_v12 = vpop.f32.mrf.mxu0  ;;  %v776_v17 = vpop.f32.mrf.mxu1 }
  0xf7   : > { %1118 = vst.msk [vmem:[%s1635_s10 + $0x60] sm:$0xff] %vm839_vm3, %v1054_v3  ;;  %v1057_v13 = vadd.f32 %v1623_v47, %v988_v4  ;;  %v986_v14 = vmul.f32 %v1614_v41, %v917_v5  ;;  %858 = vst.msk [vmem:[%s1608_s29 + $0x90] sm:$0xff] %vm839_vm3, %v657_v6  ;;  %v922_v15 = vmax.f32 %v657_v6, 0.0  ;;  %v649_v16 = vadd.f32 %v1603_v37, %v648_v12 }
  0xf8   : > { %1150 = vst.msk [vmem:[%s1635_s10 + $0x160] sm:$0xff] %vm839_vm3, %v1086_v8  ;;  %v1089_v18 = vadd.f32 %v1623_v47, %v1020_v9  ;;  %v1018_v19 = vmul.f32 %v1614_v41, %v949_v10  ;;  %890 = vst.msk [vmem:[%s1608_s29 + $0x190] sm:$0xff] %vm839_vm3, %v785_v11  ;;  %v954_v20 = vmax.f32 %v785_v11, 0.0  ;;  %v777_v21 = vadd.f32 %v1603_v37, %v776_v17  ;;  %v1394_v22 = vpop.f32.mrf.mxu0  ;;  %v1426_v27 = vpop.f32.mrf.mxu1 }
  0xf9   : > { %1121 = vst.msk [vmem:[%s1635_s10 + $0x78] sm:$0xff] %vm839_vm3, %v1057_v13  ;;  %v1055_v23 = vadd.f32 %v1623_v47, %v986_v14  ;;  %v991_v24 = vmul.f32 %v1614_v41, %v922_v15  ;;  %856 = vst.msk [vmem:[%s1608_s29 + $0x80] sm:$0xff] %vm839_vm3, %v649_v16  ;;  %v920_v25 = vmax.f32 %v649_v16, 0.0  ;;  %v660_v26 = vadd.f32 %v1394_v22, %v1603_v37 }
  0xfa   : > { %1153 = vst.msk [vmem:[%s1635_s10 + $0x178] sm:$0xff] %vm839_vm3, %v1089_v18  ;;  %v1087_v28 = vadd.f32 %v1623_v47, %v1018_v19  ;;  %v1023_v29 = vmul.f32 %v1614_v41, %v954_v20  ;;  %888 = vst.msk [vmem:[%s1608_s29 + $0x180] sm:$0xff] %vm839_vm3, %v777_v21  ;;  %v952_v30 = vmax.f32 %v777_v21, 0.0  ;;  %v788_v31 = vadd.f32 %v1426_v27, %v1603_v37  ;;  %v651_v32 = vpop.f32.mrf.mxu0  ;;  %v779_v38 = vpop.f32.mrf.mxu1 }
  0xfb   : > { %1119 = vst.msk [vmem:[%s1635_s10 + $0x68] sm:$0xff] %vm839_vm3, %v1055_v23  ;;  %v1060_v33 = vadd.f32 %v1623_v47, %v991_v24  ;;  %v989_v34 = vmul.f32 %v1614_v41, %v920_v25  ;;  %859 = vst.msk [vmem:[%s1608_s29 + $0x98] sm:$0xff] %vm839_vm3, %v660_v26  ;;  %v923_v35 = vmax.f32 %v660_v26, 0.0  ;;  %v652_v36 = vadd.f32 %v1603_v37, %v651_v32 }
  0xfc   : > { %1151 = vst.msk [vmem:[%s1635_s10 + $0x168] sm:$0xff] %vm839_vm3, %v1087_v28  ;;  %v1092_v39 = vadd.f32 %v1623_v47, %v1023_v29  ;;  %v1021_v40 = vmul.f32 %v1614_v41, %v952_v30  ;;  %891 = vst.msk [vmem:[%s1608_s29 + $0x198] sm:$0xff] %vm839_vm3, %v788_v31  ;;  %v955_v42 = vmax.f32 %v788_v31, 0.0  ;;  %v780_v43 = vadd.f32 %v1603_v37, %v779_v38  ;;  %v1397_v44 = vpop.f32.mrf.mxu0  ;;  %v1429_v50 = vpop.f32.mrf.mxu1 }
  0xfd   : > { %1124 = vst.msk [vmem:[%s1635_s10 + $0x90] sm:$0xff] %vm839_vm3, %v1060_v33  ;;  %v1058_v45 = vadd.f32 %v1623_v47, %v989_v34  ;;  %v992_v46 = vmul.f32 %v1614_v41, %v923_v35  ;;  %857 = vst.msk [vmem:[%s1608_s29 + $0x88] sm:$0xff] %vm839_vm3, %v652_v36  ;;  %v921_v48 = vmax.f32 %v652_v36, 0.0  ;;  %v673_v49 = vadd.f32 %v1397_v44, %v1603_v37 }
  0xfe   : > { %1156 = vst.msk [vmem:[%s1635_s10 + $0x190] sm:$0xff] %vm839_vm3, %v1092_v39  ;;  %v1090_v51 = vadd.f32 %v1623_v47, %v1021_v40  ;;  %v1024_v52 = vmul.f32 %v1614_v41, %v955_v42  ;;  %889 = vst.msk [vmem:[%s1608_s29 + $0x188] sm:$0xff] %vm839_vm3, %v780_v43  ;;  %v953_v53 = vmax.f32 %v780_v43, 0.0  ;;  %v801_v54 = vadd.f32 %v1429_v50, %v1603_v37  ;;  %v664_v55 = vpop.f32.mrf.mxu0  ;;  %v792_v60 = vpop.f32.mrf.mxu1 }
  0xff   : > { %1122 = vst.msk [vmem:[%s1635_s10 + $0x80] sm:$0xff] %vm839_vm3, %v1058_v45  ;;  %v1061_v56 = vadd.f32 %v1623_v47, %v992_v46  ;;  %v990_v57 = vmul.f32 %v1614_v41, %v921_v48  ;;  %862 = vst.msk [vmem:[%s1608_s29 + $0xb0] sm:$0xff] %vm839_vm3, %v673_v49  ;;  %v926_v58 = vmax.f32 %v673_v49, 0.0  ;;  %v665_v59 = vadd.f32 %v1603_v37, %v664_v55 }
 0x100   : > { %1154 = vst.msk [vmem:[%s1635_s10 + $0x180] sm:$0xff] %vm839_vm3, %v1090_v51  ;;  %v1093_v61 = vadd.f32 %v1623_v47, %v1024_v52  ;;  %v1022_v62 = vmul.f32 %v1614_v41, %v953_v53  ;;  %894 = vst.msk [vmem:[%s1608_s29 + $0x1b0] sm:$0xff] %vm839_vm3, %v801_v54  ;;  %v958_v63 = vmax.f32 %v801_v54, 0.0  ;;  %v793_v0 = vadd.f32 %v1603_v37, %v792_v60  ;;  %v1398_v1 = vpop.f32.mrf.mxu0  ;;  %v1430_v6 = vpop.f32.mrf.mxu1 }
 0x101   : > { %1125 = vst.msk [vmem:[%s1635_s10 + $0x98] sm:$0xff] %vm839_vm3, %v1061_v56  ;;  %v1059_v2 = vadd.f32 %v1623_v47, %v990_v57  ;;  %v995_v3 = vmul.f32 %v1614_v41, %v926_v58  ;;  %860 = vst.msk [vmem:[%s1608_s29 + $0xa0] sm:$0xff] %vm839_vm3, %v665_v59  ;;  %v924_v4 = vmax.f32 %v665_v59, 0.0  ;;  %v676_v5 = vadd.f32 %v1398_v1, %v1603_v37 }
 0x102   : > { %1157 = vst.msk [vmem:[%s1635_s10 + $0x198] sm:$0xff] %vm839_vm3, %v1093_v61  ;;  %v1091_v7 = vadd.f32 %v1623_v47, %v1022_v62  ;;  %v1027_v8 = vmul.f32 %v1614_v41, %v958_v63  ;;  %892 = vst.msk [vmem:[%s1608_s29 + $0x1a0] sm:$0xff] %vm839_vm3, %v793_v0  ;;  %v956_v9 = vmax.f32 %v793_v0, 0.0  ;;  %v804_v10 = vadd.f32 %v1430_v6, %v1603_v37  ;;  %v667_v11 = vpop.f32.mrf.mxu0  ;;  %v795_v16 = vpop.f32.mrf.mxu1 }
 0x103   : > { %1123 = vst.msk [vmem:[%s1635_s10 + $0x88] sm:$0xff] %vm839_vm3, %v1059_v2  ;;  %v1064_v12 = vadd.f32 %v1623_v47, %v995_v3  ;;  %v993_v13 = vmul.f32 %v1614_v41, %v924_v4  ;;  %863 = vst.msk [vmem:[%s1608_s29 + $0xb8] sm:$0xff] %vm839_vm3, %v676_v5  ;;  %v927_v14 = vmax.f32 %v676_v5, 0.0  ;;  %v668_v15 = vadd.f32 %v1603_v37, %v667_v11 }
 0x104   : > { %1155 = vst.msk [vmem:[%s1635_s10 + $0x188] sm:$0xff] %vm839_vm3, %v1091_v7  ;;  %v1096_v17 = vadd.f32 %v1623_v47, %v1027_v8  ;;  %v1025_v18 = vmul.f32 %v1614_v41, %v956_v9  ;;  %895 = vst.msk [vmem:[%s1608_s29 + $0x1b8] sm:$0xff] %vm839_vm3, %v804_v10  ;;  %v959_v19 = vmax.f32 %v804_v10, 0.0  ;;  %v796_v20 = vadd.f32 %v1603_v37, %v795_v16  ;;  %v1401_v21 = vpop.f32.mrf.mxu0  ;;  %v1433_v26 = vpop.f32.mrf.mxu1 }
 0x105   : > { %1128 = vst.msk [vmem:[%s1635_s10 + $0xb0] sm:$0xff] %vm839_vm3, %v1064_v12  ;;  %v1062_v22 = vadd.f32 %v1623_v47, %v993_v13  ;;  %v996_v23 = vmul.f32 %v1614_v41, %v927_v14  ;;  %861 = vst.msk [vmem:[%s1608_s29 + $0xa8] sm:$0xff] %vm839_vm3, %v668_v15  ;;  %v925_v24 = vmax.f32 %v668_v15, 0.0  ;;  %v689_v25 = vadd.f32 %v1401_v21, %v1603_v37 }
 0x106   : > { %1160 = vst.msk [vmem:[%s1635_s10 + $0x1b0] sm:$0xff] %vm839_vm3, %v1096_v17  ;;  %v1094_v27 = vadd.f32 %v1623_v47, %v1025_v18  ;;  %v1028_v28 = vmul.f32 %v1614_v41, %v959_v19  ;;  %893 = vst.msk [vmem:[%s1608_s29 + $0x1a8] sm:$0xff] %vm839_vm3, %v796_v20  ;;  %v957_v29 = vmax.f32 %v796_v20, 0.0  ;;  %v817_v30 = vadd.f32 %v1433_v26, %v1603_v37  ;;  %v680_v31 = vpop.f32.mrf.mxu0  ;;  %v808_v36 = vpop.f32.mrf.mxu1 }
 0x107   : > { %1126 = vst.msk [vmem:[%s1635_s10 + $0xa0] sm:$0xff] %vm839_vm3, %v1062_v22  ;;  %v1065_v32 = vadd.f32 %v1623_v47, %v996_v23  ;;  %v994_v33 = vmul.f32 %v1614_v41, %v925_v24  ;;  %866 = vst.msk [vmem:[%s1608_s29 + $0xd0] sm:$0xff] %vm839_vm3, %v689_v25  ;;  %v930_v34 = vmax.f32 %v689_v25, 0.0  ;;  %v681_v35 = vadd.f32 %v1603_v37, %v680_v31 }
 0x108   : > { %1158 = vst.msk [vmem:[%s1635_s10 + $0x1a0] sm:$0xff] %vm839_vm3, %v1094_v27  ;;  %v1097_v38 = vadd.f32 %v1623_v47, %v1028_v28  ;;  %v1026_v39 = vmul.f32 %v1614_v41, %v957_v29  ;;  %898 = vst.msk [vmem:[%s1608_s29 + $0x1d0] sm:$0xff] %vm839_vm3, %v817_v30  ;;  %v962_v40 = vmax.f32 %v817_v30, 0.0  ;;  %v809_v42 = vadd.f32 %v1603_v37, %v808_v36  ;;  %v1402_v43 = vpop.f32.mrf.mxu0  ;;  %v1434_v49 = vpop.f32.mrf.mxu1 }
 0x109   : > { %1129 = vst.msk [vmem:[%s1635_s10 + $0xb8] sm:$0xff] %vm839_vm3, %v1065_v32  ;;  %v1063_v44 = vadd.f32 %v1623_v47, %v994_v33  ;;  %v999_v45 = vmul.f32 %v1614_v41, %v930_v34  ;;  %864 = vst.msk [vmem:[%s1608_s29 + $0xc0] sm:$0xff] %vm839_vm3, %v681_v35  ;;  %v928_v46 = vmax.f32 %v681_v35, 0.0  ;;  %v692_v48 = vadd.f32 %v1402_v43, %v1603_v37 }
 0x10a   : > { %1161 = vst.msk [vmem:[%s1635_s10 + $0x1b8] sm:$0xff] %vm839_vm3, %v1097_v38  ;;  %v1095_v50 = vadd.f32 %v1623_v47, %v1026_v39  ;;  %v1031_v51 = vmul.f32 %v1614_v41, %v962_v40  ;;  %896 = vst.msk [vmem:[%s1608_s29 + $0x1c0] sm:$0xff] %vm839_vm3, %v809_v42  ;;  %v960_v52 = vmax.f32 %v809_v42, 0.0  ;;  %v820_v53 = vadd.f32 %v1434_v49, %v1603_v37  ;;  %v683_v54 = vpop.f32.mrf.mxu0  ;;  %v811_v59 = vpop.f32.mrf.mxu1 }
 0x10b   : > { %1127 = vst.msk [vmem:[%s1635_s10 + $0xa8] sm:$0xff] %vm839_vm3, %v1063_v44  ;;  %v1068_v55 = vadd.f32 %v1623_v47, %v999_v45  ;;  %v997_v56 = vmul.f32 %v1614_v41, %v928_v46  ;;  %867 = vst.msk [vmem:[%s1608_s29 + $0xd8] sm:$0xff] %vm839_vm3, %v692_v48  ;;  %v931_v57 = vmax.f32 %v692_v48, 0.0  ;;  %v684_v58 = vadd.f32 %v1603_v37, %v683_v54 }
 0x10c   : > { %1159 = vst.msk [vmem:[%s1635_s10 + $0x1a8] sm:$0xff] %vm839_vm3, %v1095_v50  ;;  %v1100_v60 = vadd.f32 %v1623_v47, %v1031_v51  ;;  %v1029_v61 = vmul.f32 %v1614_v41, %v960_v52  ;;  %899 = vst.msk [vmem:[%s1608_s29 + $0x1d8] sm:$0xff] %vm839_vm3, %v820_v53  ;;  %v963_v62 = vmax.f32 %v820_v53, 0.0  ;;  %v812_v63 = vadd.f32 %v1603_v37, %v811_v59  ;;  %v1405_v0 = vpop.f32.mrf.mxu0  ;;  %v1437_v5 = vpop.f32.mrf.mxu1 }
 0x10d   : > { %1132 = vst.msk [vmem:[%s1635_s10 + $0xd0] sm:$0xff] %vm839_vm3, %v1068_v55  ;;  %v1066_v1 = vadd.f32 %v1623_v47, %v997_v56  ;;  %v1000_v2 = vmul.f32 %v1614_v41, %v931_v57  ;;  %865 = vst.msk [vmem:[%s1608_s29 + $0xc8] sm:$0xff] %vm839_vm3, %v684_v58  ;;  %v929_v3 = vmax.f32 %v684_v58, 0.0  ;;  %v705_v4 = vadd.f32 %v1405_v0, %v1603_v37 }
 0x10e   : > { %1164 = vst.msk [vmem:[%s1635_s10 + $0x1d0] sm:$0xff] %vm839_vm3, %v1100_v60  ;;  %v1098_v6 = vadd.f32 %v1623_v47, %v1029_v61  ;;  %v1032_v7 = vmul.f32 %v1614_v41, %v963_v62  ;;  %897 = vst.msk [vmem:[%s1608_s29 + $0x1c8] sm:$0xff] %vm839_vm3, %v812_v63  ;;  %v961_v8 = vmax.f32 %v812_v63, 0.0  ;;  %v833_v9 = vadd.f32 %v1437_v5, %v1603_v37  ;;  %v696_v10 = vpop.f32.mrf.mxu0  ;;  %v824_v15 = vpop.f32.mrf.mxu1 }
 0x10f   : > { %1130 = vst.msk [vmem:[%s1635_s10 + $0xc0] sm:$0xff] %vm839_vm3, %v1066_v1  ;;  %v1069_v11 = vadd.f32 %v1623_v47, %v1000_v2  ;;  %v998_v12 = vmul.f32 %v1614_v41, %v929_v3  ;;  %870 = vst.msk [vmem:[%s1608_s29 + $0xf0] sm:$0xff] %vm839_vm3, %v705_v4  ;;  %v934_v13 = vmax.f32 %v705_v4, 0.0  ;;  %v697_v14 = vadd.f32 %v1603_v37, %v696_v10 }
 0x110   : > { %1162 = vst.msk [vmem:[%s1635_s10 + $0x1c0] sm:$0xff] %vm839_vm3, %v1098_v6  ;;  %v1101_v16 = vadd.f32 %v1623_v47, %v1032_v7  ;;  %v1030_v17 = vmul.f32 %v1614_v41, %v961_v8  ;;  %902 = vst.msk [vmem:[%s1608_s29 + $0x1f0] sm:$0xff] %vm839_vm3, %v833_v9  ;;  %v966_v18 = vmax.f32 %v833_v9, 0.0  ;;  %v825_v19 = vadd.f32 %v1603_v37, %v824_v15  ;;  %v1406_v20 = vpop.f32.mrf.mxu0  ;;  %v1438_v25 = vpop.f32.mrf.mxu1 }
 0x111   : > { %1133 = vst.msk [vmem:[%s1635_s10 + $0xd8] sm:$0xff] %vm839_vm3, %v1069_v11  ;;  %v1067_v21 = vadd.f32 %v1623_v47, %v998_v12  ;;  %v1003_v22 = vmul.f32 %v1614_v41, %v934_v13  ;;  %868 = vst.msk [vmem:[%s1608_s29 + $0xe0] sm:$0xff] %vm839_vm3, %v697_v14  ;;  %v932_v23 = vmax.f32 %v697_v14, 0.0  ;;  %v708_v24 = vadd.f32 %v1406_v20, %v1603_v37 }
 0x112   : > { %1165 = vst.msk [vmem:[%s1635_s10 + $0x1d8] sm:$0xff] %vm839_vm3, %v1101_v16  ;;  %v1099_v26 = vadd.f32 %v1623_v47, %v1030_v17  ;;  %v1035_v27 = vmul.f32 %v1614_v41, %v966_v18  ;;  %900 = vst.msk [vmem:[%s1608_s29 + $0x1e0] sm:$0xff] %vm839_vm3, %v825_v19  ;;  %v964_v28 = vmax.f32 %v825_v19, 0.0  ;;  %v836_v29 = vadd.f32 %v1438_v25, %v1603_v37  ;;  %v699_v30 = vpop.f32.mrf.mxu0  ;;  %v827_v35 = vpop.f32.mrf.mxu1 }
 0x113   : > { %1131 = vst.msk [vmem:[%s1635_s10 + $0xc8] sm:$0xff] %vm839_vm3, %v1067_v21  ;;  %v1072_v31 = vadd.f32 %v1623_v47, %v1003_v22  ;;  %v1001_v32 = vmul.f32 %v1614_v41, %v932_v23  ;;  %871 = vst.msk [vmem:[%s1608_s29 + $0xf8] sm:$0xff] %vm839_vm3, %v708_v24  ;;  %v935_v33 = vmax.f32 %v708_v24, 0.0  ;;  %v700_v34 = vadd.f32 %v1603_v37, %v699_v30 }
 0x114   : > { %1163 = vst.msk [vmem:[%s1635_s10 + $0x1c8] sm:$0xff] %vm839_vm3, %v1099_v26  ;;  %v1104_v36 = vadd.f32 %v1623_v47, %v1035_v27  ;;  %v1033_v38 = vmul.f32 %v1614_v41, %v964_v28  ;;  %903 = vst.msk [vmem:[%s1608_s29 + $0x1f8] sm:$0xff] %vm839_vm3, %v836_v29  ;;  %v967_v39 = vmax.f32 %v836_v29, 0.0  ;;  %v828_v40 = vadd.f32 %v1603_v37, %v827_v35 }
 0x115   : > { %1136 = vst.msk [vmem:[%s1635_s10 + $0xf0] sm:$0xff] %vm839_vm3, %v1072_v31  ;;  %v1070_v42 = vadd.f32 %v1623_v47, %v1001_v32  ;;  %v1004_v43 = vmul.f32 %v1614_v41, %v935_v33  ;;  %869 = vst.msk [vmem:[%s1608_s29 + $0xe8] sm:$0xff] %vm839_vm3, %v700_v34  ;;  %v933_v44 = vmax.f32 %v700_v34, 0.0 }
 0x116   : > { %1168 = vst.msk [vmem:[%s1635_s10 + $0x1f0] sm:$0xff] %vm839_vm3, %v1104_v36  ;;  %v1102_v45 = vadd.f32 %v1623_v47, %v1033_v38  ;;  %v1036_v46 = vmul.f32 %v1614_v41, %v967_v39  ;;  %901 = vst.msk [vmem:[%s1608_s29 + $0x1e8] sm:$0xff] %vm839_vm3, %v828_v40  ;;  %v965_v37 = vmax.f32 %v828_v40, 0.0 }
 0x117   : > { %1134 = vst.msk [vmem:[%s1635_s10 + $0xe0] sm:$0xff] %vm839_vm3, %v1070_v42  ;;  %v1073_v48 = vadd.f32 %v1623_v47, %v1004_v43  ;;  %v1002_v49 = vmul.f32 %v1614_v41, %v933_v44 }
 0x118   : > { %1166 = vst.msk [vmem:[%s1635_s10 + $0x1e0] sm:$0xff] %vm839_vm3, %v1102_v45  ;;  %v1105_v50 = vadd.f32 %v1623_v47, %v1036_v46  ;;  %v1034_v51 = vmul.f32 %v1614_v41, %v965_v37 }
 0x119   : > { %1137 = vst.msk [vmem:[%s1635_s10 + $0xf8] sm:$0xff] %vm839_vm3, %v1073_v48  ;;  %v1071_v52 = vadd.f32 %v1623_v47, %v1002_v49 }
 0x11a   : > { %1169 = vst.msk [vmem:[%s1635_s10 + $0x1f8] sm:$0xff] %vm839_vm3, %v1105_v50  ;;  %v1103_v53 = vadd.f32 %v1623_v47, %v1034_v51 }
 0x11b   : > { %1135 = vst.msk [vmem:[%s1635_s10 + $0xe8] sm:$0xff] %vm839_vm3, %v1071_v52 }
 0x11c   : > { %1167 = vst.msk [vmem:[%s1635_s10 + $0x1e8] sm:$0xff] %vm839_vm3, %v1103_v53 }
 0x11d PF: > { %s15_s15 = sadd.s32 1, %s1488_s15  }
 0x11e   : > { %p12_p4 = scmp.ge.s32.totalorder %s15_s15, 18  }
 0x120   :  { %14 = sbr.rel (!%p12_p4) target bundleno = 1 (0x1), region = 74 }

// kernel: tower_forward.15
= control target key start
LH: loop header
LB: loop body
LE: loop exit
PB: predicated region body
PF: predicated region fallthrough
CT: control target
= control target key end

     0   :  { %s1597_s12 = smov 0   ;;  %s2083_s0 = inlined_call_operand.vmem [shape: bf16[2048,144], index: 0, kind: input, shape index: {}]   ;;  %s2084_s1 = inlined_call_operand.vmem [shape: bf16[144,16], index: 1, kind: input, shape index: {}]   ;;  %s2085_s2 = inlined_call_operand.vmem [shape: f32[3,16], index: 2, kind: input, shape index: {}]   ;;  %s2086_s3 = inlined_call_operand.vmem [shape: f32[2048,16], index: 3, kind: output, shape index: {}]  }
   0x1 LB: > { %s1315_s13 = sadd.s32 4294967295, %s1574_s12   ;;  %p1319_p0 = scmp.ge.s32.totalorder %s1574_s12, 1  ;;  %s1574_s12 = sphi %s1597_s12, %s13_s12  }
   0x2   : > { %p139_p1 = scmp.lt.s32.totalorder %s1574_s12, 5 }
   0x4   : > { %p140_p2 = pnand %p1319_p0, %p139_p1 }
   0x5   : > { %s1320_s16 = sshll.u32 (!%p140_p2), %s1315_s13, 6 }
   0x6   : > { %143 = sbr.rel (%p140_p2) target bundleno = 374 (0x176), region = 32  ;;  %p165_p3 = scmp.lt.s32.totalorder (!%p140_p2), %s1320_s16, 255 }
   0xb   : > { %v1463_v0 = vld [vmem:[%s2084_s1 + $0x38] sm:$0xff]   ;;  %v1576_v1 = vmov 0   ;;  %v1464_v2 = vld [vmem:[%s2084_s1 + $0x30] sm:$0xff]   ;;  %s2088_s16 = smov (!%p165_p3, %s1320_s16), 255  ;;  %v1465_v3 = vld [vmem:[%s2084_s1 + $0x28] sm:$0xff]   ;;  %vm607_vm0 = vcmask 130048  }
   0xc   : > { %704 = vmatprep.subr.bf16.mxu0 %v1576_v1  ;;  %1436 = vmatprep.subr.bf16.mxu1 %v1576_v1  ;;  %s1435_s21 = sshll.u32 %s2088_s16, 3  ;;  %v1466_v4 = vld [vmem:[%s2084_s1 + $0x20] sm:$0xff]   ;;  %v1467_v7 = vld [vmem:[%s2084_s1 + $0x18] sm:$0xff]   ;;  %v1468_v8 = vld [vmem:[%s2084_s1 + $0x10] sm:$0xff]  }
   0xd   : > { %705 = vmatpush1.bf16.msra.mxu0 %v1463_v0  ;;  %1445 = vmatpush1.bf16.msra.mxu1 %v1463_v0  ;;  %s1622_s24 = scalar_lea.vmem %s2083_s0, %s1435_s21  ;;  %v1469_v9 = vld [vmem:[%s2084_s1 + $0x8] sm:$0xff]   ;;  %v1470_v10 = vld [vmem:[%s2084_s1] sm:$0xff]   ;;  %s1764_s20 = scalar_lea.vmem %s2086_s3, %s1435_s21 }
   0xe   : > { %706 = vmatprep.subr.bf16.mxu0 %v1576_v1  ;;  %1437 = vmatprep.subr.bf16.mxu1 %v1576_v1  ;;  %v1474_v5 = vld [vmem:[%s1622_s24 + $0x4] ss:$8 sps:$4 sm:$0xff]   ;;  %v1472_v12 = vld [vmem:[%s1622_s24] ss:$8 sps:$4 sm:$0xff]   ;;  %v1478_v14 = vld [vmem:[%s1622_s24 + $0x14] ss:$8 sps:$4 sm:$0xff]  }
   0xf   : > { %v1477_v6 = vld [vmem:[%s1622_s24 + $0x104] ss:$8 sps:$4 sm:$0xff]   ;;  %1399 = vmatprep.mubr.msk.bf16.mxu0 %vm607_vm0, %v1474_v5  ;;  %v1475_v13 = vld [vmem:[%s1622_s24 + $0x100] ss:$8 sps:$4 sm:$0xff]   ;;  %v1480_v15 = vld [vmem:[%s1622_s24 + $0x114] ss:$8 sps:$4 sm:$0xff]  }
  0x10   : > { %1415 = vmatprep.mubr.msk.bf16.mxu1 %vm607_vm0, %v1477_v6  ;;  %v1471_v11 = vld [vmem:[%s2084_s1 + $0x40] sm:$0xff]   ;;  %v1482_v16 = vld [vmem:[%s1622_s24 + $0x10] ss:$8 sps:$4 sm:$0xff]   ;;  %v1490_v22 = vld [vmem:[%s1622_s24 + $0x34] ss:$8 sps:$4 sm:$0xff]  }
  0x11   : > { %707 = vmatpush1.bf16.msra.mxu0 %v1464_v2  ;;  %1446 = vmatpush1.bf16.msra.mxu1 %v1464_v2  ;;  %v1483_v17 = vld [vmem:[%s1622_s24 + $0x110] ss:$8 sps:$4 sm:$0xff]   ;;  %v1484_v18 = vld [vmem:[%s1622_s24 + $0x24] ss:$8 sps:$4 sm:$0xff]   ;;  %v1488_v20 = vld [vmem:[%s1622_s24 + $0x20] ss:$8 sps:$4 sm:$0xff]  }
  0x12   : > { %708 = vmatprep.subr.bf16.mxu0 %v1576_v1  ;;  %1438 = vmatprep.subr.bf16.mxu1 %v1576_v1  ;;  %v1486_v19 = vld [vmem:[%s1622_s24 + $0x124] ss:$8 sps:$4 sm:$0xff]   ;;  %v1489_v21 = vld [vmem:[%s1622_s24 + $0x120] ss:$8 sps:$4 sm:$0xff]   ;;  %v1492_v23 = vld [vmem:[%s1622_s24 + $0x134] ss:$8 sps:$4 sm:$0xff]  }
  0x13   : > { %v1494_v24 = vld [vmem:[%s1622_s24 + $0x30] ss:$8 sps:$4 sm:$0xff]   ;;  %v1496_v26 = vld [vmem:[%s1622_s24 + $0x44] ss:$8 sps:$4 sm:$0xff]   ;;  %v1500_v28 = vld [vmem:[%s1622_s24 + $0x40] ss:$8 sps:$4 sm:$0xff]  }
  0x14   : > { %v1495_v25 = vld [vmem:[%s1622_s24 + $0x130] ss:$8 sps:$4 sm:$0xff]   ;;  %v1498_v27 = vld [vmem:[%s1622_s24 + $0x144] ss:$8 sps:$4 sm:$0xff]   ;;  %v1501_v29 = vld [vmem:[%s1622_s24 + $0x140] ss:$8 sps:$4 sm:$0xff]  }
  0x15   : > { %709 = vmatpush1.bf16.msra.mxu0 %v1465_v3  ;;  %1447 = vmatpush1.bf16.msra.mxu1 %v1465_v3  ;;  %v1502_v30 = vld [vmem:[%s1622_s24 + $0x54] ss:$8 sps:$4 sm:$0xff]   ;;  %v1506_v32 = vld [vmem:[%s1622_s24 + $0x50] ss:$8 sps:$4 sm:$0xff]   ;;  %v1508_v34 = vld [vmem:[%s1622_s24 + $0x64] ss:$8 sps:$4 sm:$0xff]  }
  0x16   : > { %710 = vmatprep.subr.bf16.mxu0 %v1576_v1  ;;  %1439 = vmatprep.subr.bf16.mxu1 %v1576_v1  ;;  %v1504_v31 = vld [vmem:[%s1622_s24 + $0x154] ss:$8 sps:$4 sm:$0xff]   ;;  %v1507_v33 = vld [vmem:[%s1622_s24 + $0x150] ss:$8 sps:$4 sm:$0xff]   ;;  %v1510_v35 = vld [vmem:[%s1622_s24 + $0x164] ss:$8 sps:$4 sm:$0xff]  }
  0x17   : > { %v1512_v36 = vld [vmem:[%s1622_s24 + $0x60] ss:$8 sps:$4 sm:$0xff]   ;;  %v1514_v38 = vld [vmem:[%s1622_s24 + $0x74] ss:$8 sps:$4 sm:$0xff]   ;;  %v1518_v40 = vld [vmem:[%s1622_s24 + $0x70] ss:$8 sps:$4 sm:$0xff]  }
  0x18   : > { %v1513_v37 = vld [vmem:[%s1622_s24 + $0x160] ss:$8 sps:$4 sm:$0xff]   ;;  %v1516_v39 = vld [vmem:[%s1622_s24 + $0x174] ss:$8 sps:$4 sm:$0xff]   ;;  %v1519_v41 = vld [vmem:[%s1622_s24 + $0x170] ss:$8 sps:$4 sm:$0xff]  }
  0x19   : > { %711 = vmatpush1.bf16.msra.mxu0 %v1466_v4  ;;  %1448 = vmatpush1.bf16.msra.mxu1 %v1466_v4  ;;  %v1520_v42 = vld [vmem:[%s1622_s24 + $0x84] ss:$8 sps:$4 sm:$0xff]   ;;  %v1524_v44 = vld [vmem:[%s1622_s24 + $0x80] ss:$8 sps:$4 sm:$0xff]   ;;  %v1526_v46 = vld [vmem:[%s1622_s24 + $0x94] ss:$8 sps:$4 sm:$0xff]  }
  0x1a   : > { %712 = vmatprep.subr.bf16.mxu0 %v1576_v1  ;;  %1440 = vmatprep.subr.bf16.mxu1 %v1576_v1  ;;  %v1522_v43 = vld [vmem:[%s1622_s24 + $0x184] ss:$8 sps:$4 sm:$0xff]   ;;  %v1525_v45 = vld [vmem:[%s1622_s24 + $0x180] ss:$8 sps:$4 sm:$0xff]   ;;  %v1528_v47 = vld [vmem:[%s1622_s24 + $0x194] ss:$8 sps:$4 sm:$0xff]  }
  0x1b   : > { %v1530_v48 = vld [vmem:[%s1622_s24 + $0x90] ss:$8 sps:$4 sm:$0xff]   ;;  %v1532_v50 = vld [vmem:[%s1622_s24 + $0xa4] ss:$8 sps:$4 sm:$0xff]   ;;  %v1536_v52 = vld [vmem:[%s1622_s24 + $0xa0] ss:$8 sps:$4 sm:$0xff]  }
  0x1c   : > { %v1531_v49 = vld [vmem:[%s1622_s24 + $0x190] ss:$8 sps:$4 sm:$0xff]   ;;  %v1534_v51 = vld [vmem:[%s1622_s24 + $0x1a4] ss:$8 sps:$4 sm:$0xff]   ;;  %v1537_v53 = vld [vmem:[%s1622_s24 + $0x1a0] ss:$8 sps:$4 sm:$0xff]  }
  0x1d   : > { %713 = vmatpush1.bf16.msra.mxu0 %v1467_v7  ;;  %1449 = vmatpush1.bf16.msra.mxu1 %v1467_v7  ;;  %v1538_v54 = vld [vmem:[%s1622_s24 + $0xb4] ss:$8 sps:$4 sm:$0xff]   ;;  %v1542_v56 = vld [vmem:[%s1622_s24 + $0xb0] ss:$8 sps:$4 sm:$0xff]   ;;  %v1544_v58 = vld [vmem:[%s1622_s24 + $0xc4] ss:$8 sps:$4 sm:$0xff]  }
  0x1e   : > { %714 = vmatprep.subr.bf16.mxu0 %v1576_v1  ;;  %1441 = vmatprep.subr.bf16.mxu1 %v1576_v1  ;;  %v1540_v55 = vld [vmem:[%s1622_s24 + $0x1b4] ss:$8 sps:$4 sm:$0xff]   ;;  %v1543_v57 = vld [vmem:[%s1622_s24 + $0x1b0] ss:$8 sps:$4 sm:$0xff]   ;;  %v1546_v59 = vld [vmem:[%s1622_s24 + $0x1c4] ss:$8 sps:$4 sm:$0xff]  }
  0x1f   : > { %v1548_v60 = vld [vmem:[%s1622_s24 + $0xc0] ss:$8 sps:$4 sm:$0xff]   ;;  %v1550_v62 = vld [vmem:[%s1622_s24 + $0xd4] ss:$8 sps:$4 sm:$0xff]   ;;  %v1554_v0 = vld [vmem:[%s1622_s24 + $0xd0] ss:$8 sps:$4 sm:$0xff]  }
  0x20   : > { %v1549_v61 = vld [vmem:[%s1622_s24 + $0x1c0] ss:$8 sps:$4 sm:$0xff]   ;;  %v1552_v63 = vld [vmem:[%s1622_s24 + $0x1d4] ss:$8 sps:$4 sm:$0xff]   ;;  %v1556_v2 = vld [vmem:[%s1622_s24 + $0xe4] ss:$8 sps:$4 sm:$0xff]  }
  0x21   : > { %715 = vmatpush1.bf16.msra.mxu0 %v1468_v8  ;;  %1450 = vmatpush1.bf16.msra.mxu1 %v1468_v8  ;;  %v1558_v3 = vld [vmem:[%s1622_s24 + $0x1e4] ss:$8 sps:$4 sm:$0xff]   ;;  %v1560_v4 = vld [vmem:[%s1622_s24 + $0xe0] ss:$8 sps:$4 sm:$0xff]   ;;  %v1562_v6 = vld [vmem:[%s1622_s24 + $0xf4] ss:$8 sps:$4 sm:$0xff]  }
  0x22   : > { %716 = vmatprep.subr.bf16.mxu0 %v1576_v1  ;;  %1442 = vmatprep.subr.bf16.mxu1 %v1576_v1  ;;  %v1561_v5 = vld [vmem:[%s1622_s24 + $0x1e0] ss:$8 sps:$4 sm:$0xff]   ;;  %v1564_v7 = vld [vmem:[%s1622_s24 + $0x1f4] ss:$8 sps:$4 sm:$0xff]   ;;  %v1566_v8 = vld [vmem:[%s1622_s24 + $0xf0] ss:$8 sps:$4 sm:$0xff]  }
  0x25   : > { %717 = vmatpush1.bf16.msra.mxu0 %v1469_v9  ;;  %1451 = vmatpush1.bf16.msra.mxu1 %v1469_v9  ;;  %v1567_v9 = vld [vmem:[%s1622_s24 + $0x1f0] ss:$8 sps:$4 sm:$0xff]  }
  0x26   : > { %718 = vmatprep.subr.bf16.mxu0 %v1576_v1  ;;  %1443 = vmatprep.subr.bf16.mxu1 %v1576_v1 }
  0x29   : > { %719 = vmatpush1.bf16.msra.mxu0 %v1470_v10  ;;  %1452 = vmatpush1.bf16.msra.mxu1 %v1470_v10  ;;  %v1741_v10 = vld [vmem:[%s2085_s2] ss:$0 sm:$0xff] }
  0x2a   : > { %734 = vmatprep.subr.bf16.mxu0 %v1576_v1  ;;  %1444 = vmatprep.subr.bf16.mxu1 %v1576_v1  ;;  %v1555_v1 = vld [vmem:[%s1622_s24 + $0x1d0] ss:$8 sps:$4 sm:$0xff]  }
  0x2d   : > { %735 = vmatpush2.bf16.msra.mxu0 %v1471_v11  ;;  %1453 = vmatpush2.bf16.msra.mxu1 %v1471_v11 }
  0x30   : > { %737 = vmatmul.mubr.bf16.vlgmr.msra.gmra.mxu0 %v1472_v12  ;;  %865 = vmatmul.mubr.bf16.vlgmr.msra.gmra.mxu1 %v1475_v13 }
  0x31   : > { %1400 = vmatprep.mubr.msk.bf16.mxu0 %vm607_vm0, %v1478_v14  ;;  %1416 = vmatprep.mubr.msk.bf16.mxu1 %vm607_vm0, %v1480_v15  ;;  %v1748_v15 = vld [vmem:[%s2085_s2 + $0x1] ss:$0 sm:$0xff] }
  0x38   : > { %745 = vmatmul.mubr.bf16.gmra.mxu0 %v1482_v16  ;;  %873 = vmatmul.mubr.bf16.gmra.mxu1 %v1483_v17 }
  0x39   : > { %1401 = vmatprep.mubr.msk.bf16.mxu0 %vm607_vm0, %v1484_v18  ;;  %1417 = vmatprep.mubr.msk.bf16.mxu1 %vm607_vm0, %v1486_v19 }
  0x40   : > { %753 = vmatmul.mubr.bf16.gmra.mxu0 %v1488_v20  ;;  %881 = vmatmul.mubr.bf16.gmra.mxu1 %v1489_v21  ;;  %v1753_v20 = vld [vmem:[%s2085_s2 + $0x2] ss:$0 sm:$0xff] }
  0x41   : > { %1402 = vmatprep.mubr.msk.bf16.mxu0 %vm607_vm0, %v1490_v22  ;;  %1418 = vmatprep.mubr.msk.bf16.mxu1 %vm607_vm0, %v1492_v23 }
  0x48   : > { %761 = vmatmul.mubr.bf16.gmra.mxu0 %v1494_v24  ;;  %889 = vmatmul.mubr.bf16.gmra.mxu1 %v1495_v25 }
  0x49   : > { %1403 = vmatprep.mubr.msk.bf16.mxu0 %vm607_vm0, %v1496_v26  ;;  %1419 = vmatprep.mubr.msk.bf16.mxu1 %vm607_vm0, %v1498_v27 }
  0x50   : > { %769 = vmatmul.mubr.bf16.gmra.mxu0 %v1500_v28  ;;  %897 = vmatmul.mubr.bf16.gmra.mxu1 %v1501_v29 }
  0x51   : > { %1404 = vmatprep.mubr.msk.bf16.mxu0 %vm607_vm0, %v1502_v30  ;;  %1420 = vmatprep.mubr.msk.bf16.mxu1 %vm607_vm0, %v1504_v31 }
  0x58   : > { %777 = vmatmul.mubr.bf16.gmra.mxu0 %v1506_v32  ;;  %905 = vmatmul.mubr.bf16.gmra.mxu1 %v1507_v33 }
  0x59   : > { %1405 = vmatprep.mubr.msk.bf16.mxu0 %vm607_vm0, %v1508_v34  ;;  %1421 = vmatprep.mubr.msk.bf16.mxu1 %vm607_vm0, %v1510_v35 }
  0x60   : > { %785 = vmatmul.mubr.bf16.gmra.mxu0 %v1512_v36  ;;  %913 = vmatmul.mubr.bf16.gmra.mxu1 %v1513_v37 }
  0x61   : > { %1406 = vmatprep.mubr.msk.bf16.mxu0 %vm607_vm0, %v1514_v38  ;;  %1422 = vmatprep.mubr.msk.bf16.mxu1 %vm607_vm0, %v1516_v39 }
  0x68   : > { %793 = vmatmul.mubr.bf16.gmra.mxu0 %v1518_v40  ;;  %921 = vmatmul.mubr.bf16.gmra.mxu1 %v1519_v41 }
  0x69   : > { %1407 = vmatprep.mubr.msk.bf16.mxu0 %vm607_vm0, %v1520_v42  ;;  %1423 = vmatprep.mubr.msk.bf16.mxu1 %vm607_vm0, %v1522_v43 }
  0x70   : > { %801 = vmatmul.mubr.bf16.gmra.mxu0 %v1524_v44  ;;  %929 = vmatmul.mubr.bf16.gmra.mxu1 %v1525_v45 }
  0x71   : > { %1408 = vmatprep.mubr.msk.bf16.mxu0 %vm607_vm0, %v1526_v46  ;;  %1424 = vmatprep.mubr.msk.bf16.mxu1 %vm607_vm0, %v1528_v47 }
  0x78   : > { %809 = vmatmul.mubr.bf16.gmra.mxu0 %v1530_v48  ;;  %937 = vmatmul.mubr.bf16.gmra.mxu1 %v1531_v49 }
  0x79   : > { %1409 = vmatprep.mubr.msk.bf16.mxu0 %vm607_vm0, %v1532_v50  ;;  %1425 = vmatprep.mubr.msk.bf16.mxu1 %vm607_vm0, %v1534_v51 }
  0x80   : > { %817 = vmatmul.mubr.bf16.gmra.mxu0 %v1536_v52  ;;  %945 = vmatmul.mubr.bf16.gmra.mxu1 %v1537_v53 }
  0x81   : > { %1410 = vmatprep.mubr.msk.bf16.mxu0 %vm607_vm0, %v1538_v54  ;;  %1426 = vmatprep.mubr.msk.bf16.mxu1 %vm607_vm0, %v1540_v55 }
  0x88   : > { %825 = vmatmul.mubr.bf16.gmra.mxu0 %v1542_v56  ;;  %953 = vmatmul.mubr.bf16.gmra.mxu1 %v1543_v57 }
  0x89   : > { %1411 = vmatprep.mubr.msk.bf16.mxu0 %vm607_vm0, %v1544_v58  ;;  %1427 = vmatprep.mubr.msk.bf16.mxu1 %vm607_vm0, %v1546_v59 }
  0x90   : > { %833 = vmatmul.mubr.bf16.gmra.mxu0 %v1548_v60  ;;  %961 = vmatmul.mubr.bf16.gmra.mxu1 %v1549_v61 }
  0x91   : > { %1412 = vmatprep.mubr.msk.bf16.mxu0 %vm607_vm0, %v1550_v62  ;;  %1428 = vmatprep.mubr.msk.bf16.mxu1 %vm607_vm0, %v1552_v63 }
  0x98   : > { %841 = vmatmul.mubr.bf16.gmra.mxu0 %v1554_v0  ;;  %969 = vmatmul.mubr.bf16.gmra.mxu1 %v1555_v1 }
  0x99   : > { %1413 = vmatprep.mubr.msk.bf16.mxu0 %vm607_vm0, %v1556_v2  ;;  %1429 = vmatprep.mubr.msk.bf16.mxu1 %vm607_vm0, %v1558_v3 }
  0xa0   : > { %849 = vmatmul.mubr.bf16.gmra.mxu0 %v1560_v4  ;;  %977 = vmatmul.mubr.bf16.gmra.mxu1 %v1561_v5 }
  0xa1   : > { %1414 = vmatprep.mubr.msk.bf16.mxu0 %vm607_vm0, %v1562_v6  ;;  %1430 = vmatprep.mubr.msk.bf16.mxu1 %vm607_vm0, %v1564_v7 }
  0xa8   : > { %857 = vmatmul.mubr.bf16.gmra.mxu0 %v1566_v8  ;;  %985 = vmatmul.mubr.bf16.gmra.mxu1 %v1567_v9 }
  0xf0   : > { %v738_v11 = vpop.f32.mrf.mxu0  ;;  %v866_v12 = vpop.f32.mrf.mxu1 }
  0xf1   : > { %v739_v13 = vadd.f32 %v1741_v10, %v738_v11  ;;  %v867_v14 = vadd.f32 %v1741_v10, %v866_v12 }
  0xf2   : > { %v740_v16 = vpop.f32.mrf.mxu0  ;;  %v868_v17 = vpop.f32.mrf.mxu1 }
  0xf3   : > { %v993_v18 = vmax.f32 %v739_v13, 0.0  ;;  %v1025_v19 = vmax.f32 %v867_v14, 0.0 }
  0xf4   : > { %v741_v21 = vpop.f32.mrf.mxu0  ;;  %v869_v22 = vpop.f32.mrf.mxu1 }
  0xf5   : > { %v1062_v23 = vmul.f32 %v1748_v15, %v993_v18  ;;  %v1094_v24 = vmul.f32 %v1748_v15, %v1025_v19  ;;  %v742_v25 = vadd.f32 %v1741_v10, %v741_v21  ;;  %v870_v26 = vadd.f32 %v1741_v10, %v869_v22 }
  0xf6   : > { %v743_v27 = vpop.f32.mrf.mxu0  ;;  %v871_v28 = vpop.f32.mrf.mxu1 }
  0xf7   : > { %v1131_v29 = vadd.f32 %v1753_v20, %v1062_v23  ;;  %v1163_v30 = vadd.f32 %v1753_v20, %v1094_v24  ;;  %v994_v31 = vmax.f32 %v742_v25, 0.0  ;;  %v1026_v32 = vmax.f32 %v870_v26, 0.0 }
  0xf8   : > { %v746_v33 = vpop.f32.mrf.mxu0  ;;  %v874_v34 = vpop.f32.mrf.mxu1 }
  0xf9   : > { %1195 = vst.msk [vmem:[%s1764_s20] sm:$0xff] %vm607_vm0, %v1131_v29  ;;  %1227 = vst.msk [vmem:[%s1764_s20 + $0x100] sm:$0xff] %vm607_vm0, %v1163_v30  ;;  %v1063_v35 = vmul.f32 %v1748_v15, %v994_v31  ;;  %v1095_v36 = vmul.f32 %v1748_v15, %v1026_v32  ;;  %v747_v37 = vadd.f32 %v1741_v10, %v746_v33 }
  0xfa   : > { %v875_v38 = vadd.f32 %v1741_v10, %v874_v34  ;;  %v748_v39 = vpop.f32.mrf.mxu0  ;;  %v876_v40 = vpop.f32.mrf.mxu1 }
  0xfb   : > { %v1132_v41 = vadd.f32 %v1753_v20, %v1063_v35  ;;  %v1164_v42 = vadd.f32 %v1753_v20, %v1095_v36  ;;  %v995_v43 = vmax.f32 %v747_v37, 0.0 }
  0xfc   : > { %v1027_v44 = vmax.f32 %v875_v38, 0.0  ;;  %v749_v45 = vpop.f32.mrf.mxu0  ;;  %v877_v46 = vpop.f32.mrf.mxu1 }
  0xfd   : > { %1196 = vst.msk [vmem:[%s1764_s20 + $0x8] sm:$0xff] %vm607_vm0, %v1132_v41  ;;  %1228 = vst.msk [vmem:[%s1764_s20 + $0x108] sm:$0xff] %vm607_vm0, %v1164_v42  ;;  %v1064_v47 = vmul.f32 %v1748_v15, %v995_v43  ;;  %v750_v49 = vadd.f32 %v1741_v10, %v749_v45  ;;  %v878_v50 = vadd.f32 %v1741_v10, %v877_v46 }
  0xfe   : > { %v1096_v48 = vmul.f32 %v1748_v15, %v1027_v44  ;;  %v751_v51 = vpop.f32.mrf.mxu0  ;;  %v879_v52 = vpop.f32.mrf.mxu1 }
  0xff   : > { %v1133_v53 = vadd.f32 %v1753_v20, %v1064_v47  ;;  %v996_v55 = vmax.f32 %v750_v49, 0.0  ;;  %v1028_v56 = vmax.f32 %v878_v50, 0.0 }
 0x100   : > { %v1165_v54 = vadd.f32 %v1753_v20, %v1096_v48  ;;  %v754_v57 = vpop.f32.mrf.mxu0  ;;  %v882_v58 = vpop.f32.mrf.mxu1 }
 0x101   : > { %1197 = vst.msk [vmem:[%s1764_s20 + $0x10] sm:$0xff] %vm607_vm0, %v1133_v53  ;;  %v1065_v59 = vmul.f32 %v1748_v15, %v996_v55  ;;  %v1097_v60 = vmul.f32 %v1748_v15, %v1028_v56  ;;  %v755_v61 = vadd.f32 %v1741_v10, %v754_v57  ;;  %v883_v62 = vadd.f32 %v1741_v10, %v882_v58 }
 0x102   : > { %1229 = vst.msk [vmem:[%s1764_s20 + $0x110] sm:$0xff] %vm607_vm0, %v1165_v54  ;;  %v756_v63 = vpop.f32.mrf.mxu0  ;;  %v884_v0 = vpop.f32.mrf.mxu1 }
 0x103   : > { %v1134_v1 = vadd.f32 %v1753_v20, %v1065_v59  ;;  %v1166_v2 = vadd.f32 %v1753_v20, %v1097_v60  ;;  %v997_v3 = vmax.f32 %v755_v61, 0.0  ;;  %v1029_v4 = vmax.f32 %v883_v62, 0.0 }
 0x104   : > { %v757_v5 = vpop.f32.mrf.mxu0  ;;  %v885_v6 = vpop.f32.mrf.mxu1 }
 0x105   : > { %1198 = vst.msk [vmem:[%s1764_s20 + $0x18] sm:$0xff] %vm607_vm0, %v1134_v1  ;;  %1230 = vst.msk [vmem:[%s1764_s20 + $0x118] sm:$0xff] %vm607_vm0, %v1166_v2  ;;  %v1066_v7 = vmul.f32 %v1748_v15, %v997_v3  ;;  %v1098_v8 = vmul.f32 %v1748_v15, %v1029_v4  ;;  %v758_v9 = vadd.f32 %v1741_v10, %v757_v5 }
 0x106   : > { %v886_v11 = vadd.f32 %v1741_v10, %v885_v6  ;;  %v759_v12 = vpop.f32.mrf.mxu0  ;;  %v887_v13 = vpop.f32.mrf.mxu1 }
 0x107   : > { %v1135_v14 = vadd.f32 %v1753_v20, %v1066_v7  ;;  %v1167_v16 = vadd.f32 %v1753_v20, %v1098_v8  ;;  %v998_v17 = vmax.f32 %v758_v9, 0.0 }
 0x108   : > { %v1030_v18 = vmax.f32 %v886_v11, 0.0  ;;  %v762_v19 = vpop.f32.mrf.mxu0  ;;  %v890_v21 = vpop.f32.mrf.mxu1 }
 0x109   : > { %1199 = vst.msk [vmem:[%s1764_s20 + $0x20] sm:$0xff] %vm607_vm0, %v1135_v14  ;;  %1231 = vst.msk [vmem:[%s1764_s20 + $0x120] sm:$0xff] %vm607_vm0, %v1167_v16  ;;  %v1067_v22 = vmul.f32 %v1748_v15, %v998_v17  ;;  %v763_v24 = vadd.f32 %v1741_v10, %v762_v19  ;;  %v891_v25 = vadd.f32 %v1741_v10, %v890_v21 }
 0x10a   : > { %v1099_v23 = vmul.f32 %v1748_v15, %v1030_v18  ;;  %v764_v26 = vpop.f32.mrf.mxu0  ;;  %v892_v27 = vpop.f32.mrf.mxu1 }
 0x10b   : > { %v1136_v28 = vadd.f32 %v1753_v20, %v1067_v22  ;;  %v999_v30 = vmax.f32 %v763_v24, 0.0  ;;  %v1031_v31 = vmax.f32 %v891_v25, 0.0 }
 0x10c   : > { %v1168_v29 = vadd.f32 %v1753_v20, %v1099_v23  ;;  %v765_v32 = vpop.f32.mrf.mxu0  ;;  %v893_v33 = vpop.f32.mrf.mxu1 }
 0x10d   : > { %1200 = vst.msk [vmem:[%s1764_s20 + $0x28] sm:$0xff] %vm607_vm0, %v1136_v28  ;;  %v1068_v34 = vmul.f32 %v1748_v15, %v999_v30  ;;  %v1100_v35 = vmul.f32 %v1748_v15, %v1031_v31  ;;  %v766_v36 = vadd.f32 %v1741_v10, %v765_v32  ;;  %v894_v37 = vadd.f32 %v1741_v10, %v893_v33 }
 0x10e   : > { %1232 = vst.msk [vmem:[%s1764_s20 + $0x128] sm:$0xff] %vm607_vm0, %v1168_v29  ;;  %v767_v38 = vpop.f32.mrf.mxu0  ;;  %v895_v39 = vpop.f32.mrf.mxu1 }
 0x10f   : > { %v1137_v40 = vadd.f32 %v1753_v20, %v1068_v34  ;;  %v1169_v41 = vadd.f32 %v1753_v20, %v1100_v35  ;;  %v1000_v42 = vmax.f32 %v766_v36, 0.0  ;;  %v1032_v43 = vmax.f32 %v894_v37, 0.0 }
 0x110   : > { %v770_v44 = vpop.f32.mrf.mxu0  ;;  %v898_v45 = vpop.f32.mrf.mxu1 }
 0x111   : > { %1201 = vst.msk [vmem:[%s1764_s20 + $0x30] sm:$0xff] %vm607_vm0, %v1137_v40  ;;  %1233 = vst.msk [vmem:[%s1764_s20 + $0x130] sm:$0xff] %vm607_vm0, %v1169_v41  ;;  %v1069_v46 = vmul.f32 %v1748_v15, %v1000_v42  ;;  %v1101_v47 = vmul.f32 %v1748_v15, %v1032_v43  ;;  %v771_v48 = vadd.f32 %v1741_v10, %v770_v44 }
 0x112   : > { %v899_v49 = vadd.f32 %v1741_v10, %v898_v45  ;;  %v772_v50 = vpop.f32.mrf.mxu0  ;;  %v900_v51 = vpop.f32.mrf.mxu1 }
 0x113   : > { %v1138_v52 = vadd.f32 %v1753_v20, %v1069_v46  ;;  %v1170_v53 = vadd.f32 %v1753_v20, %v1101_v47  ;;  %v1001_v54 = vmax.f32 %v771_v48, 0.0 }
 0x114   : > { %v1033_v55 = vmax.f32 %v899_v49, 0.0  ;;  %v773_v56 = vpop.f32.mrf.mxu0  ;;  %v901_v57 = vpop.f32.mrf.mxu1 }
 0x115   : > { %1202 = vst.msk [vmem:[%s1764_s20 + $0x38] sm:$0xff] %vm607_vm0, %v1138_v52  ;;  %1234 = vst.msk [vmem:[%s1764_s20 + $0x138] sm:$0xff] %vm607_vm0, %v1170_v53  ;;  %v1070_v58 = vmul.f32 %v1748_v15, %v1001_v54  ;;  %v774_v60 = vadd.f32 %v1741_v10, %v773_v56  ;;  %v902_v61 = vadd.f32 %v1741_v10, %v901_v57 }
 0x116   : > { %v1102_v59 = vmul.f32 %v1748_v15, %v1033_v55  ;;  %v775_v62 = vpop.f32.mrf.mxu0  ;;  %v903_v63 = vpop.f32.mrf.mxu1 }
 0x117   : > { %v1139_v0 = vadd.f32 %v1753_v20, %v1070_v58  ;;  %v1002_v2 = vmax.f32 %v774_v60, 0.0  ;;  %v1034_v3 = vmax.f32 %v902_v61, 0.0 }
 0x118   : > { %v1171_v1 = vadd.f32 %v1753_v20, %v1102_v59  ;;  %v778_v4 = vpop.f32.mrf.mxu0  ;;  %v906_v5 = vpop.f32.mrf.mxu1 }
 0x119   : > { %1203 = vst.msk [vmem:[%s1764_s20 + $0x40] sm:$0xff] %vm607_vm0, %v1139_v0  ;;  %v1071_v6 = vmul.f32 %v1748_v15, %v1002_v2  ;;  %v1103_v7 = vmul.f32 %v1748_v15, %v1034_v3  ;;  %v779_v8 = vadd.f32 %v1741_v10, %v778_v4  ;;  %v907_v9 = vadd.f32 %v1741_v10, %v906_v5 }
 0x11a   : > { %1235 = vst.msk [vmem:[%s1764_s20 + $0x140] sm:$0xff] %vm607_vm0, %v1171_v1  ;;  %v780_v11 = vpop.f32.mrf.mxu0  ;;  %v908_v12 = vpop.f32.mrf.mxu1 }
 0x11b   : > { %v1140_v13 = vadd.f32 %v1753_v20, %v1071_v6  ;;  %v1172_v14 = vadd.f32 %v1753_v20, %v1103_v7  ;;  %v1003_v16 = vmax.f32 %v779_v8, 0.0  ;;  %v1035_v17 = vmax.f32 %v907_v9, 0.0 }
 0x11c   : > { %v781_v18 = vpop.f32.mrf.mxu0  ;;  %v909_v19 = vpop.f32.mrf.mxu1 }
 0x11d   : > { %1204 = vst.msk [vmem:[%s1764_s20 + $0x48] sm:$0xff] %vm607_vm0, %v1140_v13  ;;  %1236 = vst.msk [vmem:[%s1764_s20 + $0x148] sm:$0xff] %vm607_vm0, %v1172_v14  ;;  %v1072_v21 = vmul.f32 %v1748_v15, %v1003_v16  ;;  %v1104_v22 = vmul.f32 %v1748_v15, %v1035_v17  ;;  %v782_v23 = vadd.f32 %v1741_v10, %v781_v18 }
 0x11e   : > { %v910_v24 = vadd.f32 %v1741_v10, %v909_v19  ;;  %v783_v25 = vpop.f32.mrf.mxu0  ;;  %v911_v26 = vpop.f32.mrf.mxu1 }
 0x11f   : > { %v1141_v27 = vadd.f32 %v1753_v20, %v1072_v21  ;;  %v1173_v28 = vadd.f32 %v1753_v20, %v1104_v22  ;;  %v1004_v29 = vmax.f32 %v782_v23, 0.0 }
 0x120   : > { %v1036_v30 = vmax.f32 %v910_v24, 0.0  ;;  %v786_v31 = vpop.f32.mrf.mxu0  ;;  %v914_v32 = vpop.f32.mrf.mxu1 }
 0x121   : > { %1205 = vst.msk [vmem:[%s1764_s20 + $0x50] sm:$0xff] %vm607_vm0, %v1141_v27  ;;  %1237 = vst.msk [vmem:[%s1764_s20 + $0x150] sm:$0xff] %vm607_vm0, %v1173_v28  ;;  %v1073_v33 = vmul.f32 %v1748_v15, %v1004_v29  ;;  %v787_v35 = vadd.f32 %v1741_v10, %v786_v31  ;;  %v915_v36 = vadd.f32 %v1741_v10, %v914_v32 }
 0x122   : > { %v1105_v34 = vmul.f32 %v1748_v15, %v1036_v30  ;;  %v788_v37 = vpop.f32.mrf.mxu0  ;;  %v916_v38 = vpop.f32.mrf.mxu1 }
 0x123   : > { %v1142_v39 = vadd.f32 %v1753_v20, %v1073_v33  ;;  %v1005_v41 = vmax.f32 %v787_v35, 0.0  ;;  %v1037_v42 = vmax.f32 %v915_v36, 0.0 }
 0x124   : > { %v1174_v40 = vadd.f32 %v1753_v20, %v1105_v34  ;;  %v789_v43 = vpop.f32.mrf.mxu0  ;;  %v917_v44 = vpop.f32.mrf.mxu1 }
 0x125   : > { %1206 = vst.msk [vmem:[%s1764_s20 + $0x58] sm:$0xff] %vm607_vm0, %v1142_v39  ;;  %v1074_v45 = vmul.f32 %v1748_v15, %v1005_v41  ;;  %v1106_v46 = vmul.f32 %v1748_v15, %v1037_v42  ;;  %v790_v47 = vadd.f32 %v1741_v10, %v789_v43  ;;  %v918_v48 = vadd.f32 %v1741_v10, %v917_v44 }
 0x126   : > { %1238 = vst.msk [vmem:[%s1764_s20 + $0x158] sm:$0xff] %vm607_vm0, %v1174_v40  ;;  %v791_v49 = vpop.f32.mrf.mxu0  ;;  %v919_v50 = vpop.f32.mrf.mxu1 }
 0x127   : > { %v1143_v51 = vadd.f32 %v1753_v20, %v1074_v45  ;;  %v1175_v52 = vadd.f32 %v1753_v20, %v1106_v46  ;;  %v1006_v53 = vmax.f32 %v790_v47, 0.0  ;;  %v1038_v54 = vmax.f32 %v918_v48, 0.0 }
 0x128   : > { %v794_v55 = vpop.f32.mrf.mxu0  ;;  %v922_v56 = vpop.f32.mrf.mxu1 }
 0x129   : > { %1207 = vst.msk [vmem:[%s1764_s20 + $0x60] sm:$0xff] %vm607_vm0, %v1143_v51  ;;  %1239 = vst.msk [vmem:[%s1764_s20 + $0x160] sm:$0xff] %vm607_vm0, %v1175_v52  ;;  %v1075_v57 = vmul.f32 %v1748_v15, %v1006_v53  ;;  %v1107_v58 = vmul.f32 %v1748_v15, %v1038_v54  ;;  %v795_v59 = vadd.f32 %v1741_v10, %v794_v55 }
 0x12a   : > { %v923_v60 = vadd.f32 %v1741_v10, %v922_v56  ;;  %v796_v61 = vpop.f32.mrf.mxu0  ;;  %v924_v62 = vpop.f32.mrf.mxu1 }
 0x12b   : > { %v1144_v63 = vadd.f32 %v1753_v20, %v1075_v57  ;;  %v1176_v0 = vadd.f32 %v1753_v20, %v1107_v58  ;;  %v1007_v1 = vmax.f32 %v795_v59, 0.0 }
 0x12c   : > { %v1039_v2 = vmax.f32 %v923_v60, 0.0  ;;  %v797_v3 = vpop.f32.mrf.mxu0  ;;  %v925_v4 = vpop.f32.mrf.mxu1 }
 0x12d   : > { %1208 = vst.msk [vmem:[%s1764_s20 + $0x68] sm:$0xff] %vm607_vm0, %v1144_v63  ;;  %1240 = vst.msk [vmem:[%s1764_s20 + $0x168] sm:$0xff] %vm607_vm0, %v1176_v0  ;;  %v1076_v5 = vmul.f32 %v1748_v15, %v1007_v1  ;;  %v798_v7 = vadd.f32 %v1741_v10, %v797_v3  ;;  %v926_v8 = vadd.f32 %v1741_v10, %v925_v4 }
 0x12e   : > { %v1108_v6 = vmul.f32 %v1748_v15, %v1039_v2  ;;  %v799_v9 = vpop.f32.mrf.mxu0  ;;  %v927_v11 = vpop.f32.mrf.mxu1 }
 0x12f   : > { %v1145_v12 = vadd.f32 %v1753_v20, %v1076_v5  ;;  %v1008_v14 = vmax.f32 %v798_v7, 0.0  ;;  %v1040_v16 = vmax.f32 %v926_v8, 0.0 }
 0x130   : > { %v1177_v13 = vadd.f32 %v1753_v20, %v1108_v6  ;;  %v802_v17 = vpop.f32.mrf.mxu0  ;;  %v930_v18 = vpop.f32.mrf.mxu1 }
 0x131   : > { %1209 = vst.msk [vmem:[%s1764_s20 + $0x70] sm:$0xff] %vm607_vm0, %v1145_v12  ;;  %v1077_v19 = vmul.f32 %v1748_v15, %v1008_v14  ;;  %v1109_v21 = vmul.f32 %v1748_v15, %v1040_v16  ;;  %v803_v22 = vadd.f32 %v1741_v10, %v802_v17  ;;  %v931_v23 = vadd.f32 %v1741_v10, %v930_v18 }
 0x132   : > { %1241 = vst.msk [vmem:[%s1764_s20 + $0x170] sm:$0xff] %vm607_vm0, %v1177_v13  ;;  %v804_v24 = vpop.f32.mrf.mxu0  ;;  %v932_v25 = vpop.f32.mrf.mxu1 }
 0x133   : > { %v1146_v26 = vadd.f32 %v1753_v20, %v1077_v19  ;;  %v1178_v27 = vadd.f32 %v1753_v20, %v1109_v21  ;;  %v1009_v28 = vmax.f32 %v803_v22, 0.0  ;;  %v1041_v29 = vmax.f32 %v931_v23, 0.0 }
 0x134   : > { %v805_v30 = vpop.f32.mrf.mxu0  ;;  %v933_v31 = vpop.f32.mrf.mxu1 }
 0x135   : > { %1210 = vst.msk [vmem:[%s1764_s20 + $0x78] sm:$0xff] %vm607_vm0, %v1146_v26  ;;  %1242 = vst.msk [vmem:[%s1764_s20 + $0x178] sm:$0xff] %vm607_vm0, %v1178_v27  ;;  %v1078_v32 = vmul.f32 %v1748_v15, %v1009_v28  ;;  %v1110_v33 = vmul.f32 %v1748_v15, %v1041_v29  ;;  %v806_v34 = vadd.f32 %v1741_v10, %v805_v30 }
 0x136   : > { %v934_v35 = vadd.f32 %v1741_v10, %v933_v31  ;;  %v807_v36 = vpop.f32.mrf.mxu0  ;;  %v935_v37 = vpop.f32.mrf.mxu1 }
 0x137   : > { %v1147_v38 = vadd.f32 %v1753_v20, %v1078_v32  ;;  %v1179_v39 = vadd.f32 %v1753_v20, %v1110_v33  ;;  %v1010_v40 = vmax.f32 %v806_v34, 0.0 }
 0x138   : > { %v1042_v41 = vmax.f32 %v934_v35, 0.0  ;;  %v810_v42 = vpop.f32.mrf.mxu0  ;;  %v938_v43 = vpop.f32.mrf.mxu1 }
 0x139   : > { %1211 = vst.msk [vmem:[%s1764_s20 + $0x80] sm:$0xff] %vm607_vm0, %v1147_v38  ;;  %1243 = vst.msk [vmem:[%s1764_s20 + $0x180] sm:$0xff] %vm607_vm0, %v1179_v39  ;;  %v1079_v44 = vmul.f32 %v1748_v15, %v1010_v40  ;;  %v811_v46 = vadd.f32 %v1741_v10, %v810_v42  ;;  %v939_v47 = vadd.f32 %v1741_v10, %v938_v43 }
 0x13a   : > { %v1111_v45 = vmul.f32 %v1748_v15, %v1042_v41  ;;  %v812_v48 = vpop.f32.mrf.mxu0  ;;  %v940_v49 = vpop.f32.mrf.mxu1 }
 0x13b   : > { %v1148_v50 = vadd.f32 %v1753_v20, %v1079_v44  ;;  %v1011_v52 = vmax.f32 %v811_v46, 0.0  ;;  %v1043_v53 = vmax.f32 %v939_v47, 0.0 }
 0x13c   : > { %v1180_v51 = vadd.f32 %v1753_v20, %v1111_v45  ;;  %v813_v54 = vpop.f32.mrf.mxu0  ;;  %v941_v55 = vpop.f32.mrf.mxu1 }
 0x13d   : > { %1212 = vst.msk [vmem:[%s1764_s20 + $0x88] sm:$0xff] %vm607_vm0, %v1148_v50  ;;  %v1080_v56 = vmul.f32 %v1748_v15, %v1011_v52  ;;  %v1112_v57 = vmul.f32 %v1748_v15, %v1043_v53  ;;  %v814_v58 = vadd.f32 %v1741_v10, %v813_v54  ;;  %v942_v59 = vadd.f32 %v1741_v10, %v941_v55 }
 0x13e   : > { %1244 = vst.msk [vmem:[%s1764_s20 + $0x188] sm:$0xff] %vm607_vm0, %v1180_v51  ;;  %v815_v60 = vpop.f32.mrf.mxu0  ;;  %v943_v61 = vpop.f32.mrf.mxu1 }
 0x13f   : > { %v1149_v62 = vadd.f32 %v1753_v20, %v1080_v56  ;;  %v1181_v63 = vadd.f32 %v1753_v20, %v1112_v57  ;;  %v1012_v0 = vmax.f32 %v814_v58, 0.0  ;;  %v1044_v1 = vmax.f32 %v942_v59, 0.0 }
 0x140   : > { %v818_v2 = vpop.f32.mrf.mxu0  ;;  %v946_v3 = vpop.f32.mrf.mxu1 }
 0x141   : > { %1213 = vst.msk [vmem:[%s1764_s20 + $0x90] sm:$0xff] %vm607_vm0, %v1149_v62  ;;  %1245 = vst.msk [vmem:[%s1764_s20 + $0x190] sm:$0xff] %vm607_vm0, %v1181_v63  ;;  %v1081_v4 = vmul.f32 %v1748_v15, %v1012_v0  ;;  %v1113_v5 = vmul.f32 %v1748_v15, %v1044_v1  ;;  %v819_v6 = vadd.f32 %v1741_v10, %v818_v2 }
 0x142   : > { %v947_v7 = vadd.f32 %v1741_v10, %v946_v3  ;;  %v820_v8 = vpop.f32.mrf.mxu0  ;;  %v948_v9 = vpop.f32.mrf.mxu1 }
 0x143   : > { %v1150_v11 = vadd.f32 %v1753_v20, %v1081_v4  ;;  %v1182_v12 = vadd.f32 %v1753_v20, %v1113_v5  ;;  %v1013_v13 = vmax.f32 %v819_v6, 0.0 }
 0x144   : > { %v1045_v14 = vmax.f32 %v947_v7, 0.0  ;;  %v821_v16 = vpop.f32.mrf.mxu0  ;;  %v949_v17 = vpop.f32.mrf.mxu1 }
 0x145   : > { %1214 = vst.msk [vmem:[%s1764_s20 + $0x98] sm:$0xff] %vm607_vm0, %v1150_v11  ;;  %1246 = vst.msk [vmem:[%s1764_s20 + $0x198] sm:$0xff] %vm607_vm0, %v1182_v12  ;;  %v1082_v18 = vmul.f32 %v1748_v15, %v1013_v13  ;;  %v822_v21 = vadd.f32 %v1741_v10, %v821_v16  ;;  %v950_v22 = vadd.f32 %v1741_v10, %v949_v17 }
 0x146   : > { %v1114_v19 = vmul.f32 %v1748_v15, %v1045_v14  ;;  %v823_v23 = vpop.f32.mrf.mxu0  ;;  %v951_v24 = vpop.f32.mrf.mxu1 }
 0x147   : > { %v1151_v25 = vadd.f32 %v1753_v20, %v1082_v18  ;;  %v1014_v27 = vmax.f32 %v822_v21, 0.0  ;;  %v1046_v28 = vmax.f32 %v950_v22, 0.0 }
 0x148   : > { %v1183_v26 = vadd.f32 %v1753_v20, %v1114_v19  ;;  %v826_v29 = vpop.f32.mrf.mxu0  ;;  %v954_v30 = vpop.f32.mrf.mxu1 }
 0x149   : > { %1215 = vst.msk [vmem:[%s1764_s20 + $0xa0] sm:$0xff] %vm607_vm0, %v1151_v25  ;;  %v1083_v31 = vmul.f32 %v1748_v15, %v1014_v27  ;;  %v1115_v32 = vmul.f32 %v1748_v15, %v1046_v28  ;;  %v827_v33 = vadd.f32 %v1741_v10, %v826_v29  ;;  %v955_v34 = vadd.f32 %v1741_v10, %v954_v30 }
 0x14a   : > { %1247 = vst.msk [vmem:[%s1764_s20 + $0x1a0] sm:$0xff] %vm607_vm0, %v1183_v26  ;;  %v828_v35 = vpop.f32.mrf.mxu0  ;;  %v956_v36 = vpop.f32.mrf.mxu1 }
 0x14b   : > { %v1152_v37 = vadd.f32 %v1753_v20, %v1083_v31  ;;  %v1184_v38 = vadd.f32 %v1753_v20, %v1115_v32  ;;  %v1015_v39 = vmax.f32 %v827_v33, 0.0  ;;  %v1047_v40 = vmax.f32 %v955_v34, 0.0 }
 0x14c   : > { %v829_v41 = vpop.f32.mrf.mxu0  ;;  %v957_v42 = vpop.f32.mrf.mxu1 }
 0x14d   : > { %1216 = vst.msk [vmem:[%s1764_s20 + $0xa8] sm:$0xff] %vm607_vm0, %v1152_v37  ;;  %1248 = vst.msk [vmem:[%s1764_s20 + $0x1a8] sm:$0xff] %vm607_vm0, %v1184_v38  ;;  %v1084_v43 = vmul.f32 %v1748_v15, %v1015_v39  ;;  %v1116_v44 = vmul.f32 %v1748_v15, %v1047_v40  ;;  %v830_v45 = vadd.f32 %v1741_v10, %v829_v41 }
 0x14e   : > { %v958_v46 = vadd.f32 %v1741_v10, %v957_v42  ;;  %v831_v47 = vpop.f32.mrf.mxu0  ;;  %v959_v48 = vpop.f32.mrf.mxu1 }
 0x14f   : > { %v1153_v49 = vadd.f32 %v1753_v20, %v1084_v43  ;;  %v1185_v50 = vadd.f32 %v1753_v20, %v1116_v44  ;;  %v1016_v51 = vmax.f32 %v830_v45, 0.0 }
 0x150   : > { %v1048_v52 = vmax.f32 %v958_v46, 0.0  ;;  %v834_v53 = vpop.f32.mrf.mxu0  ;;  %v962_v54 = vpop.f32.mrf.mxu1 }
 0x151   : > { %1217 = vst.msk [vmem:[%s1764_s20 + $0xb0] sm:$0xff] %vm607_vm0, %v1153_v49  ;;  %1249 = vst.msk [vmem:[%s1764_s20 + $0x1b0] sm:$0xff] %vm607_vm0, %v1185_v50  ;;  %v1085_v55 = vmul.f32 %v1748_v15, %v1016_v51  ;;  %v835_v57 = vadd.f32 %v1741_v10, %v834_v53  ;;  %v963_v58 = vadd.f32 %v1741_v10, %v962_v54 }
 0x152   : > { %v1117_v56 = vmul.f32 %v1748_v15, %v1048_v52  ;;  %v836_v59 = vpop.f32.mrf.mxu0  ;;  %v964_v60 = vpop.f32.mrf.mxu1 }
 0x153   : > { %v1154_v61 = vadd.f32 %v1753_v20, %v1085_v55  ;;  %v1017_v63 = vmax.f32 %v835_v57, 0.0  ;;  %v1049_v0 = vmax.f32 %v963_v58, 0.0 }
 0x154   : > { %v1186_v62 = vadd.f32 %v1753_v20, %v1117_v56  ;;  %v837_v1 = vpop.f32.mrf.mxu0  ;;  %v965_v2 = vpop.f32.mrf.mxu1 }
 0x155   : > { %1218 = vst.msk [vmem:[%s1764_s20 + $0xb8] sm:$0xff] %vm607_vm0, %v1154_v61  ;;  %v1086_v3 = vmul.f32 %v1748_v15, %v1017_v63  ;;  %v1118_v4 = vmul.f32 %v1748_v15, %v1049_v0  ;;  %v838_v5 = vadd.f32 %v1741_v10, %v837_v1  ;;  %v966_v6 = vadd.f32 %v1741_v10, %v965_v2 }
 0x156   : > { %1250 = vst.msk [vmem:[%s1764_s20 + $0x1b8] sm:$0xff] %vm607_vm0, %v1186_v62  ;;  %v839_v7 = vpop.f32.mrf.mxu0  ;;  %v967_v8 = vpop.f32.mrf.mxu1 }
 0x157   : > { %v1155_v9 = vadd.f32 %v1753_v20, %v1086_v3  ;;  %v1187_v11 = vadd.f32 %v1753_v20, %v1118_v4  ;;  %v1018_v12 = vmax.f32 %v838_v5, 0.0  ;;  %v1050_v13 = vmax.f32 %v966_v6, 0.0 }
 0x158   : > { %v842_v14 = vpop.f32.mrf.mxu0  ;;  %v970_v16 = vpop.f32.mrf.mxu1 }
 0x159   : > { %1219 = vst.msk [vmem:[%s1764_s20 + $0xc0] sm:$0xff] %vm607_vm0, %v1155_v9  ;;  %1251 = vst.msk [vmem:[%s1764_s20 + $0x1c0] sm:$0xff] %vm607_vm0, %v1187_v11  ;;  %v1087_v17 = vmul.f32 %v1748_v15, %v1018_v12  ;;  %v1119_v18 = vmul.f32 %v1748_v15, %v1050_v13  ;;  %v843_v19 = vadd.f32 %v1741_v10, %v842_v14 }
 0x15a   : > { %v971_v21 = vadd.f32 %v1741_v10, %v970_v16  ;;  %v844_v22 = vpop.f32.mrf.mxu0  ;;  %v972_v23 = vpop.f32.mrf.mxu1 }
 0x15b   : > { %v1156_v24 = vadd.f32 %v1753_v20, %v1087_v17  ;;  %v1188_v25 = vadd.f32 %v1753_v20, %v1119_v18  ;;  %v1019_v26 = vmax.f32 %v843_v19, 0.0 }
 0x15c   : > { %v1051_v27 = vmax.f32 %v971_v21, 0.0  ;;  %v845_v28 = vpop.f32.mrf.mxu0  ;;  %v973_v29 = vpop.f32.mrf.mxu1 }
 0x15d   : > { %1220 = vst.msk [vmem:[%s1764_s20 + $0xc8] sm:$0xff] %vm607_vm0, %v1156_v24  ;;  %1252 = vst.msk [vmem:[%s1764_s20 + $0x1c8] sm:$0xff] %vm607_vm0, %v1188_v25  ;;  %v1088_v30 = vmul.f32 %v1748_v15, %v1019_v26  ;;  %v846_v32 = vadd.f32 %v1741_v10, %v845_v28  ;;  %v974_v33 = vadd.f32 %v1741_v10, %v973_v29 }
 0x15e   : > { %v1120_v31 = vmul.f32 %v1748_v15, %v1051_v27  ;;  %v847_v34 = vpop.f32.mrf.mxu0  ;;  %v975_v35 = vpop.f32.mrf.mxu1 }
 0x15f   : > { %v1157_v36 = vadd.f32 %v1753_v20, %v1088_v30  ;;  %v1020_v38 = vmax.f32 %v846_v32, 0.0  ;;  %v1052_v39 = vmax.f32 %v974_v33, 0.0 }
 0x160   : > { %v1189_v37 = vadd.f32 %v1753_v20, %v1120_v31  ;;  %v850_v40 = vpop.f32.mrf.mxu0  ;;  %v978_v41 = vpop.f32.mrf.mxu1 }
 0x161   : > { %1221 = vst.msk [vmem:[%s1764_s20 + $0xd0] sm:$0xff] %vm607_vm0, %v1157_v36  ;;  %v1089_v42 = vmul.f32 %v1748_v15, %v1020_v38  ;;  %v1121_v43 = vmul.f32 %v1748_v15, %v1052_v39  ;;  %v851_v44 = vadd.f32 %v1741_v10, %v850_v40  ;;  %v979_v45 = vadd.f32 %v1741_v10, %v978_v41 }
 0x162   : > { %1253 = vst.msk [vmem:[%s1764_s20 + $0x1d0] sm:$0xff] %vm607_vm0, %v1189_v37  ;;  %v852_v46 = vpop.f32.mrf.mxu0  ;;  %v980_v47 = vpop.f32.mrf.mxu1 }
 0x163   : > { %v1158_v48 = vadd.f32 %v1753_v20, %v1089_v42  ;;  %v1190_v49 = vadd.f32 %v1753_v20, %v1121_v43  ;;  %v1021_v50 = vmax.f32 %v851_v44, 0.0  ;;  %v1053_v51 = vmax.f32 %v979_v45, 0.0 }
 0x164   : > { %v853_v52 = vpop.f32.mrf.mxu0  ;;  %v981_v53 = vpop.f32.mrf.mxu1 }
 0x165   : > { %1222 = vst.msk [vmem:[%s1764_s20 + $0xd8] sm:$0xff] %vm607_vm0, %v1158_v48  ;;  %1254 = vst.msk [vmem:[%s1764_s20 + $0x1d8] sm:$0xff] %vm607_vm0, %v1190_v49  ;;  %v1090_v54 = vmul.f32 %v1748_v15, %v1021_v50  ;;  %v1122_v55 = vmul.f32 %v1748_v15, %v1053_v51  ;;  %v854_v56 = vadd.f32 %v1741_v10, %v853_v52 }
 0x166   : > { %v982_v57 = vadd.f32 %v1741_v10, %v981_v53  ;;  %v855_v58 = vpop.f32.mrf.mxu0  ;;  %v983_v59 = vpop.f32.mrf.mxu1 }
 0x167   : > { %v1159_v60 = vadd.f32 %v1753_v20, %v1090_v54  ;;  %v1191_v61 = vadd.f32 %v1753_v20, %v1122_v55  ;;  %v1022_v62 = vmax.f32 %v854_v56, 0.0 }
 0x168   : > { %v1054_v63 = vmax.f32 %v982_v57, 0.0  ;;  %v858_v0 = vpop.f32.mrf.mxu0  ;;  %v986_v1 = vpop.f32.mrf.mxu1 }
 0x169   : > { %1223 = vst.msk [vmem:[%s1764_s20 + $0xe0] sm:$0xff] %vm607_vm0, %v1159_v60  ;;  %1255 = vst.msk [vmem:[%s1764_s20 + $0x1e0] sm:$0xff] %vm607_vm0, %v1191_v61  ;;  %v1091_v2 = vmul.f32 %v1748_v15, %v1022_v62  ;;  %v859_v4 = vadd.f32 %v1741_v10, %v858_v0  ;;  %v987_v5 = vadd.f32 %v1741_v10, %v986_v1 }
 0x16a   : > { %v1123_v3 = vmul.f32 %v1748_v15, %v1054_v63  ;;  %v860_v6 = vpop.f32.mrf.mxu0  ;;  %v988_v7 = vpop.f32.mrf.mxu1 }
 0x16b   : > { %v1160_v8 = vadd.f32 %v1753_v20, %v1091_v2  ;;  %v1023_v11 = vmax.f32 %v859_v4, 0.0  ;;  %v1055_v12 = vmax.f32 %v987_v5, 0.0 }
 0x16c   : > { %v1192_v9 = vadd.f32 %v1753_v20, %v1123_v3  ;;  %v861_v13 = vpop.f32.mrf.mxu0  ;;  %v989_v14 = vpop.f32.mrf.mxu1 }
 0x16d   : > { %1224 = vst.msk [vmem:[%s1764_s20 + $0xe8] sm:$0xff] %vm607_vm0, %v1160_v8  ;;  %v1092_v16 = vmul.f32 %v1748_v15, %v1023_v11  ;;  %v1124_v17 = vmul.f32 %v1748_v15, %v1055_v12  ;;  %v862_v18 = vadd.f32 %v1741_v10, %v861_v13  ;;  %v990_v19 = vadd.f32 %v1741_v10, %v989_v14 }
 0x16e   : > { %1256 = vst.msk [vmem:[%s1764_s20 + $0x1e8] sm:$0xff] %vm607_vm0, %v1192_v9  ;;  %v863_v21 = vpop.f32.mrf.mxu0  ;;  %v991_v22 = vpop.f32.mrf.mxu1 }
 0x16f   : > { %v1161_v23 = vadd.f32 %v1753_v20, %v1092_v16  ;;  %v1193_v24 = vadd.f32 %v1753_v20, %v1124_v17  ;;  %v1024_v25 = vmax.f32 %v862_v18, 0.0  ;;  %v1056_v26 = vmax.f32 %v990_v19, 0.0 }
 0x171   : > { %1225 = vst.msk [vmem:[%s1764_s20 + $0xf0] sm:$0xff] %vm607_vm0, %v1161_v23  ;;  %1257 = vst.msk [vmem:[%s1764_s20 + $0x1f0] sm:$0xff] %vm607_vm0, %v1193_v24  ;;  %v1093_v27 = vmul.f32 %v1748_v15, %v1024_v25  ;;  %v1125_v28 = vmul.f32 %v1748_v15, %v1056_v26 }
 0x173   : > { %v1162_v29 = vadd.f32 %v1753_v20, %v1093_v27  ;;  %v1194_v10 = vadd.f32 %v1753_v20, %v1125_v28 }
 0x175   : > { %1226 = vst.msk [vmem:[%s1764_s20 + $0xf8] sm:$0xff] %vm607_vm0, %v1162_v29  ;;  %1258 = vst.msk [vmem:[%s1764_s20 + $0x1f8] sm:$0xff] %vm607_vm0, %v1194_v10 }
 0x176 PF: > { %s13_s12 = sadd.s32 1, %s1574_s12  }
 0x177   : > { %p10_p4 = scmp.ge.s32.totalorder %s13_s12, 6  }
 0x179   :  { %12 = sbr.rel (!%p10_p4) target bundleno = 1 (0x1), region = 62 }

// kernel: tower_forward.16
= control target key start
LH: loop header
LB: loop body
LE: loop exit
PB: predicated region body
PF: predicated region fallthrough
CT: control target
= control target key end

     0   :  { %s1021_s12 = smov 0   ;;  %s1299_s0 = inlined_call_operand.vmem [shape: bf16[512,144], index: 0, kind: input, shape index: {}]   ;;  %s1300_s1 = inlined_call_operand.vmem [shape: bf16[144,16], index: 1, kind: input, shape index: {}]   ;;  %s1301_s2 = inlined_call_operand.vmem [shape: f32[3,16], index: 2, kind: input, shape index: {}]   ;;  %s1302_s3 = inlined_call_operand.vmem [shape: f32[512,16], index: 3, kind: output, shape index: {}]  }
   0x1 LB: > { %s835_s13 = sadd.s32 4294967295, %s998_s12   ;;  %p839_p0 = scmp.ge.s32.totalorder %s998_s12, 1  ;;  %s998_s12 = sphi %s1021_s12, %s13_s12  }
   0x2   : > { %p139_p1 = scmp.lt.s32.totalorder %s998_s12, 3 }
   0x4   : > { %p140_p2 = pnand %p839_p0, %p139_p1 }
   0x5   : > { %s840_s16 = sshll.u32 (!%p140_p2), %s835_s13, 5 }
   0x6   : > { %143 = sbr.rel (%p140_p2) target bundleno = 310 (0x136), region = 32  ;;  %p165_p3 = scmp.lt.s32.totalorder (!%p140_p2), %s840_s16, 63 }
   0xb   : > { %v935_v0 = vld [vmem:[%s1300_s1 + $0x38] sm:$0xff]   ;;  %v1000_v1 = vmov 0   ;;  %v936_v2 = vld [vmem:[%s1300_s1 + $0x30] sm:$0xff]   ;;  %s1304_s16 = smov (!%p165_p3, %s840_s16), 63  ;;  %v937_v3 = vld [vmem:[%s1300_s1 + $0x28] sm:$0xff]   ;;  %vm431_vm0 = vcmask 130048  }
   0xc   : > { %480 = vmatprep.subr.bf16.mxu0 %v1000_v1  ;;  %908 = vmatprep.subr.bf16.mxu1 %v1000_v1  ;;  %s907_s21 = sshll.u32 %s1304_s16, 3  ;;  %v938_v4 = vld [vmem:[%s1300_s1 + $0x20] sm:$0xff]   ;;  %v939_v7 = vld [vmem:[%s1300_s1 + $0x18] sm:$0xff]   ;;  %v940_v8 = vld [vmem:[%s1300_s1 + $0x10] sm:$0xff]  }
   0xd   : > { %481 = vmatpush1.bf16.msra.mxu0 %v935_v0  ;;  %917 = vmatpush1.bf16.msra.mxu1 %v935_v0  ;;  %s1046_s24 = scalar_lea.vmem %s1299_s0, %s907_s21  ;;  %v941_v9 = vld [vmem:[%s1300_s1 + $0x8] sm:$0xff]   ;;  %v942_v10 = vld [vmem:[%s1300_s1] sm:$0xff]   ;;  %s1140_s20 = scalar_lea.vmem %s1302_s3, %s907_s21 }
   0xe   : > { %482 = vmatprep.subr.bf16.mxu0 %v1000_v1  ;;  %909 = vmatprep.subr.bf16.mxu1 %v1000_v1  ;;  %v946_v5 = vld [vmem:[%s1046_s24 + $0x4] ss:$8 sps:$4 sm:$0xff]   ;;  %v944_v12 = vld [vmem:[%s1046_s24] ss:$8 sps:$4 sm:$0xff]   ;;  %v950_v14 = vld [vmem:[%s1046_s24 + $0x14] ss:$8 sps:$4 sm:$0xff]  }
   0xf   : > { %v949_v6 = vld [vmem:[%s1046_s24 + $0x84] ss:$8 sps:$4 sm:$0xff]   ;;  %887 = vmatprep.mubr.msk.bf16.mxu0 %vm431_vm0, %v946_v5  ;;  %v947_v13 = vld [vmem:[%s1046_s24 + $0x80] ss:$8 sps:$4 sm:$0xff]   ;;  %v952_v15 = vld [vmem:[%s1046_s24 + $0x94] ss:$8 sps:$4 sm:$0xff]  }
  0x10   : > { %895 = vmatprep.mubr.msk.bf16.mxu1 %vm431_vm0, %v949_v6  ;;  %v943_v11 = vld [vmem:[%s1300_s1 + $0x40] sm:$0xff]   ;;  %v954_v16 = vld [vmem:[%s1046_s24 + $0x10] ss:$8 sps:$4 sm:$0xff]   ;;  %v962_v22 = vld [vmem:[%s1046_s24 + $0x34] ss:$8 sps:$4 sm:$0xff]  }
  0x11   : > { %483 = vmatpush1.bf16.msra.mxu0 %v936_v2  ;;  %918 = vmatpush1.bf16.msra.mxu1 %v936_v2  ;;  %v955_v17 = vld [vmem:[%s1046_s24 + $0x90] ss:$8 sps:$4 sm:$0xff]   ;;  %v956_v18 = vld [vmem:[%s1046_s24 + $0x24] ss:$8 sps:$4 sm:$0xff]   ;;  %v960_v20 = vld [vmem:[%s1046_s24 + $0x20] ss:$8 sps:$4 sm:$0xff]  }
  0x12   : > { %484 = vmatprep.subr.bf16.mxu0 %v1000_v1  ;;  %910 = vmatprep.subr.bf16.mxu1 %v1000_v1  ;;  %v958_v19 = vld [vmem:[%s1046_s24 + $0xa4] ss:$8 sps:$4 sm:$0xff]   ;;  %v961_v21 = vld [vmem:[%s1046_s24 + $0xa0] ss:$8 sps:$4 sm:$0xff]   ;;  %v964_v23 = vld [vmem:[%s1046_s24 + $0xb4] ss:$8 sps:$4 sm:$0xff]  }
  0x13   : > { %v966_v24 = vld [vmem:[%s1046_s24 + $0x30] ss:$8 sps:$4 sm:$0xff]   ;;  %v968_v26 = vld [vmem:[%s1046_s24 + $0x44] ss:$8 sps:$4 sm:$0xff]   ;;  %v972_v28 = vld [vmem:[%s1046_s24 + $0x40] ss:$8 sps:$4 sm:$0xff]  }
  0x14   : > { %v967_v25 = vld [vmem:[%s1046_s24 + $0xb0] ss:$8 sps:$4 sm:$0xff]   ;;  %v970_v27 = vld [vmem:[%s1046_s24 + $0xc4] ss:$8 sps:$4 sm:$0xff]   ;;  %v973_v29 = vld [vmem:[%s1046_s24 + $0xc0] ss:$8 sps:$4 sm:$0xff]  }
  0x15   : > { %485 = vmatpush1.bf16.msra.mxu0 %v937_v3  ;;  %919 = vmatpush1.bf16.msra.mxu1 %v937_v3  ;;  %v974_v30 = vld [vmem:[%s1046_s24 + $0x54] ss:$8 sps:$4 sm:$0xff]   ;;  %v978_v32 = vld [vmem:[%s1046_s24 + $0x50] ss:$8 sps:$4 sm:$0xff]   ;;  %v980_v34 = vld [vmem:[%s1046_s24 + $0x64] ss:$8 sps:$4 sm:$0xff]  }
  0x16   : > { %486 = vmatprep.subr.bf16.mxu0 %v1000_v1  ;;  %911 = vmatprep.subr.bf16.mxu1 %v1000_v1  ;;  %v976_v31 = vld [vmem:[%s1046_s24 + $0xd4] ss:$8 sps:$4 sm:$0xff]   ;;  %v979_v33 = vld [vmem:[%s1046_s24 + $0xd0] ss:$8 sps:$4 sm:$0xff]   ;;  %v982_v35 = vld [vmem:[%s1046_s24 + $0xe4] ss:$8 sps:$4 sm:$0xff]  }
  0x17   : > { %v984_v36 = vld [vmem:[%s1046_s24 + $0x60] ss:$8 sps:$4 sm:$0xff]   ;;  %v986_v38 = vld [vmem:[%s1046_s24 + $0x74] ss:$8 sps:$4 sm:$0xff]   ;;  %v990_v40 = vld [vmem:[%s1046_s24 + $0x70] ss:$8 sps:$4 sm:$0xff]  }
  0x18   : > { %v985_v37 = vld [vmem:[%s1046_s24 + $0xe0] ss:$8 sps:$4 sm:$0xff]   ;;  %v988_v39 = vld [vmem:[%s1046_s24 + $0xf4] ss:$8 sps:$4 sm:$0xff]   ;;  %v991_v41 = vld [vmem:[%s1046_s24 + $0xf0] ss:$8 sps:$4 sm:$0xff]  }
  0x19   : > { %487 = vmatpush1.bf16.msra.mxu0 %v938_v4  ;;  %920 = vmatpush1.bf16.msra.mxu1 %v938_v4  ;;  %v1117_v42 = vld [vmem:[%s1301_s2] ss:$0 sm:$0xff]  ;;  %v1124_v47 = vld [vmem:[%s1301_s2 + $0x1] ss:$0 sm:$0xff]  ;;  %v1129_v52 = vld [vmem:[%s1301_s2 + $0x2] ss:$0 sm:$0xff] }
  0x1a   : > { %488 = vmatprep.subr.bf16.mxu0 %v1000_v1  ;;  %912 = vmatprep.subr.bf16.mxu1 %v1000_v1 }
  0x1d   : > { %489 = vmatpush1.bf16.msra.mxu0 %v939_v7  ;;  %921 = vmatpush1.bf16.msra.mxu1 %v939_v7 }
  0x1e   : > { %490 = vmatprep.subr.bf16.mxu0 %v1000_v1  ;;  %913 = vmatprep.subr.bf16.mxu1 %v1000_v1 }
  0x21   : > { %491 = vmatpush1.bf16.msra.mxu0 %v940_v8  ;;  %922 = vmatpush1.bf16.msra.mxu1 %v940_v8 }
  0x22   : > { %492 = vmatprep.subr.bf16.mxu0 %v1000_v1  ;;  %914 = vmatprep.subr.bf16.mxu1 %v1000_v1 }
  0x25   : > { %493 = vmatpush1.bf16.msra.mxu0 %v941_v9  ;;  %923 = vmatpush1.bf16.msra.mxu1 %v941_v9 }
  0x26   : > { %494 = vmatprep.subr.bf16.mxu0 %v1000_v1  ;;  %915 = vmatprep.subr.bf16.mxu1 %v1000_v1 }
  0x29   : > { %495 = vmatpush1.bf16.msra.mxu0 %v942_v10  ;;  %924 = vmatpush1.bf16.msra.mxu1 %v942_v10 }
  0x2a   : > { %510 = vmatprep.subr.bf16.mxu0 %v1000_v1  ;;  %916 = vmatprep.subr.bf16.mxu1 %v1000_v1 }
  0x2d   : > { %511 = vmatpush2.bf16.msra.mxu0 %v943_v11  ;;  %925 = vmatpush2.bf16.msra.mxu1 %v943_v11 }
  0x30   : > { %513 = vmatmul.mubr.bf16.vlgmr.msra.gmra.mxu0 %v944_v12  ;;  %577 = vmatmul.mubr.bf16.vlgmr.msra.gmra.mxu1 %v947_v13 }
  0x31   : > { %888 = vmatprep.mubr.msk.bf16.mxu0 %vm431_vm0, %v950_v14  ;;  %896 = vmatprep.mubr.msk.bf16.mxu1 %vm431_vm0, %v952_v15 }
  0x38   : > { %521 = vmatmul.mubr.bf16.gmra.mxu0 %v954_v16  ;;  %585 = vmatmul.mubr.bf16.gmra.mxu1 %v955_v17 }
  0x39   : > { %889 = vmatprep.mubr.msk.bf16.mxu0 %vm431_vm0, %v956_v18  ;;  %897 = vmatprep.mubr.msk.bf16.mxu1 %vm431_vm0, %v958_v19 }
  0x40   : > { %529 = vmatmul.mubr.bf16.gmra.mxu0 %v960_v20  ;;  %593 = vmatmul.mubr.bf16.gmra.mxu1 %v961_v21 }
  0x41   : > { %890 = vmatprep.mubr.msk.bf16.mxu0 %vm431_vm0, %v962_v22  ;;  %898 = vmatprep.mubr.msk.bf16.mxu1 %vm431_vm0, %v964_v23 }
  0x48   : > { %537 = vmatmul.mubr.bf16.gmra.mxu0 %v966_v24  ;;  %601 = vmatmul.mubr.bf16.gmra.mxu1 %v967_v25 }
  0x49   : > { %891 = vmatprep.mubr.msk.bf16.mxu0 %vm431_vm0, %v968_v26  ;;  %899 = vmatprep.mubr.msk.bf16.mxu1 %vm431_vm0, %v970_v27 }
  0x50   : > { %545 = vmatmul.mubr.bf16.gmra.mxu0 %v972_v28  ;;  %609 = vmatmul.mubr.bf16.gmra.mxu1 %v973_v29 }
  0x51   : > { %892 = vmatprep.mubr.msk.bf16.mxu0 %vm431_vm0, %v974_v30  ;;  %900 = vmatprep.mubr.msk.bf16.mxu1 %vm431_vm0, %v976_v31 }
  0x58   : > { %553 = vmatmul.mubr.bf16.gmra.mxu0 %v978_v32  ;;  %617 = vmatmul.mubr.bf16.gmra.mxu1 %v979_v33 }
  0x59   : > { %893 = vmatprep.mubr.msk.bf16.mxu0 %vm431_vm0, %v980_v34  ;;  %901 = vmatprep.mubr.msk.bf16.mxu1 %vm431_vm0, %v982_v35 }
  0x60   : > { %561 = vmatmul.mubr.bf16.gmra.mxu0 %v984_v36  ;;  %625 = vmatmul.mubr.bf16.gmra.mxu1 %v985_v37 }
  0x61   : > { %894 = vmatprep.mubr.msk.bf16.mxu0 %vm431_vm0, %v986_v38  ;;  %902 = vmatprep.mubr.msk.bf16.mxu1 %vm431_vm0, %v988_v39 }
  0x68   : > { %569 = vmatmul.mubr.bf16.gmra.mxu0 %v990_v40  ;;  %633 = vmatmul.mubr.bf16.gmra.mxu1 %v991_v41 }
  0xf0   : > { %v514_v43 = vpop.f32.mrf.mxu0  ;;  %v578_v44 = vpop.f32.mrf.mxu1 }
  0xf1   : > { %v515_v45 = vadd.f32 %v1117_v42, %v514_v43  ;;  %v579_v46 = vadd.f32 %v1117_v42, %v578_v44 }
  0xf2   : > { %v516_v48 = vpop.f32.mrf.mxu0  ;;  %v580_v49 = vpop.f32.mrf.mxu1 }
  0xf3   : > { %v641_v50 = vmax.f32 %v515_v45, 0.0  ;;  %v657_v51 = vmax.f32 %v579_v46, 0.0 }
  0xf4   : > { %v517_v53 = vpop.f32.mrf.mxu0  ;;  %v581_v54 = vpop.f32.mrf.mxu1 }
  0xf5   : > { %v678_v55 = vmul.f32 %v1124_v47, %v641_v50  ;;  %v694_v56 = vmul.f32 %v1124_v47, %v657_v51  ;;  %v518_v57 = vadd.f32 %v1117_v42, %v517_v53  ;;  %v582_v58 = vadd.f32 %v1117_v42, %v581_v54 }
  0xf6   : > { %v519_v59 = vpop.f32.mrf.mxu0  ;;  %v583_v60 = vpop.f32.mrf.mxu1 }
  0xf7   : > { %v715_v61 = vadd.f32 %v1129_v52, %v678_v55  ;;  %v731_v62 = vadd.f32 %v1129_v52, %v694_v56  ;;  %v642_v63 = vmax.f32 %v518_v57, 0.0  ;;  %v658_v0 = vmax.f32 %v582_v58, 0.0 }
  0xf8   : > { %v522_v1 = vpop.f32.mrf.mxu0  ;;  %v586_v2 = vpop.f32.mrf.mxu1 }
  0xf9   : > { %747 = vst.msk [vmem:[%s1140_s20] sm:$0xff] %vm431_vm0, %v715_v61  ;;  %763 = vst.msk [vmem:[%s1140_s20 + $0x80] sm:$0xff] %vm431_vm0, %v731_v62  ;;  %v679_v3 = vmul.f32 %v1124_v47, %v642_v63  ;;  %v695_v4 = vmul.f32 %v1124_v47, %v658_v0  ;;  %v523_v5 = vadd.f32 %v1117_v42, %v522_v1 }
  0xfa   : > { %v587_v6 = vadd.f32 %v1117_v42, %v586_v2  ;;  %v524_v7 = vpop.f32.mrf.mxu0  ;;  %v588_v8 = vpop.f32.mrf.mxu1 }
  0xfb   : > { %v716_v9 = vadd.f32 %v1129_v52, %v679_v3  ;;  %v732_v10 = vadd.f32 %v1129_v52, %v695_v4  ;;  %v643_v11 = vmax.f32 %v523_v5, 0.0 }
  0xfc   : > { %v659_v12 = vmax.f32 %v587_v6, 0.0  ;;  %v525_v13 = vpop.f32.mrf.mxu0  ;;  %v589_v14 = vpop.f32.mrf.mxu1 }
  0xfd   : > { %748 = vst.msk [vmem:[%s1140_s20 + $0x8] sm:$0xff] %vm431_vm0, %v716_v9  ;;  %764 = vst.msk [vmem:[%s1140_s20 + $0x88] sm:$0xff] %vm431_vm0, %v732_v10  ;;  %v680_v15 = vmul.f32 %v1124_v47, %v643_v11  ;;  %v526_v17 = vadd.f32 %v1117_v42, %v525_v13  ;;  %v590_v18 = vadd.f32 %v1117_v42, %v589_v14 }
  0xfe   : > { %v696_v16 = vmul.f32 %v1124_v47, %v659_v12  ;;  %v527_v19 = vpop.f32.mrf.mxu0  ;;  %v591_v20 = vpop.f32.mrf.mxu1 }
  0xff   : > { %v717_v21 = vadd.f32 %v1129_v52, %v680_v15  ;;  %v644_v23 = vmax.f32 %v526_v17, 0.0  ;;  %v660_v24 = vmax.f32 %v590_v18, 0.0 }
 0x100   : > { %v733_v22 = vadd.f32 %v1129_v52, %v696_v16  ;;  %v530_v25 = vpop.f32.mrf.mxu0  ;;  %v594_v26 = vpop.f32.mrf.mxu1 }
 0x101   : > { %749 = vst.msk [vmem:[%s1140_s20 + $0x10] sm:$0xff] %vm431_vm0, %v717_v21  ;;  %v681_v27 = vmul.f32 %v1124_v47, %v644_v23  ;;  %v697_v28 = vmul.f32 %v1124_v47, %v660_v24  ;;  %v531_v29 = vadd.f32 %v1117_v42, %v530_v25  ;;  %v595_v30 = vadd.f32 %v1117_v42, %v594_v26 }
 0x102   : > { %765 = vst.msk [vmem:[%s1140_s20 + $0x90] sm:$0xff] %vm431_vm0, %v733_v22  ;;  %v532_v31 = vpop.f32.mrf.mxu0  ;;  %v596_v32 = vpop.f32.mrf.mxu1 }
 0x103   : > { %v718_v33 = vadd.f32 %v1129_v52, %v681_v27  ;;  %v734_v34 = vadd.f32 %v1129_v52, %v697_v28  ;;  %v645_v35 = vmax.f32 %v531_v29, 0.0  ;;  %v661_v36 = vmax.f32 %v595_v30, 0.0 }
 0x104   : > { %v533_v37 = vpop.f32.mrf.mxu0  ;;  %v597_v38 = vpop.f32.mrf.mxu1 }
 0x105   : > { %750 = vst.msk [vmem:[%s1140_s20 + $0x18] sm:$0xff] %vm431_vm0, %v718_v33  ;;  %766 = vst.msk [vmem:[%s1140_s20 + $0x98] sm:$0xff] %vm431_vm0, %v734_v34  ;;  %v682_v39 = vmul.f32 %v1124_v47, %v645_v35  ;;  %v698_v40 = vmul.f32 %v1124_v47, %v661_v36  ;;  %v534_v41 = vadd.f32 %v1117_v42, %v533_v37 }
 0x106   : > { %v598_v43 = vadd.f32 %v1117_v42, %v597_v38  ;;  %v535_v44 = vpop.f32.mrf.mxu0  ;;  %v599_v45 = vpop.f32.mrf.mxu1 }
 0x107   : > { %v719_v46 = vadd.f32 %v1129_v52, %v682_v39  ;;  %v735_v48 = vadd.f32 %v1129_v52, %v698_v40  ;;  %v646_v49 = vmax.f32 %v534_v41, 0.0 }
 0x108   : > { %v662_v50 = vmax.f32 %v598_v43, 0.0  ;;  %v538_v51 = vpop.f32.mrf.mxu0  ;;  %v602_v53 = vpop.f32.mrf.mxu1 }
 0x109   : > { %751 = vst.msk [vmem:[%s1140_s20 + $0x20] sm:$0xff] %vm431_vm0, %v719_v46  ;;  %767 = vst.msk [vmem:[%s1140_s20 + $0xa0] sm:$0xff] %vm431_vm0, %v735_v48  ;;  %v683_v54 = vmul.f32 %v1124_v47, %v646_v49  ;;  %v539_v56 = vadd.f32 %v1117_v42, %v538_v51  ;;  %v603_v57 = vadd.f32 %v1117_v42, %v602_v53 }
 0x10a   : > { %v699_v55 = vmul.f32 %v1124_v47, %v662_v50  ;;  %v540_v58 = vpop.f32.mrf.mxu0  ;;  %v604_v59 = vpop.f32.mrf.mxu1 }
 0x10b   : > { %v720_v60 = vadd.f32 %v1129_v52, %v683_v54  ;;  %v647_v62 = vmax.f32 %v539_v56, 0.0  ;;  %v663_v63 = vmax.f32 %v603_v57, 0.0 }
 0x10c   : > { %v736_v61 = vadd.f32 %v1129_v52, %v699_v55  ;;  %v541_v0 = vpop.f32.mrf.mxu0  ;;  %v605_v1 = vpop.f32.mrf.mxu1 }
 0x10d   : > { %752 = vst.msk [vmem:[%s1140_s20 + $0x28] sm:$0xff] %vm431_vm0, %v720_v60  ;;  %v684_v2 = vmul.f32 %v1124_v47, %v647_v62  ;;  %v700_v3 = vmul.f32 %v1124_v47, %v663_v63  ;;  %v542_v4 = vadd.f32 %v1117_v42, %v541_v0  ;;  %v606_v5 = vadd.f32 %v1117_v42, %v605_v1 }
 0x10e   : > { %768 = vst.msk [vmem:[%s1140_s20 + $0xa8] sm:$0xff] %vm431_vm0, %v736_v61  ;;  %v543_v6 = vpop.f32.mrf.mxu0  ;;  %v607_v7 = vpop.f32.mrf.mxu1 }
 0x10f   : > { %v721_v8 = vadd.f32 %v1129_v52, %v684_v2  ;;  %v737_v9 = vadd.f32 %v1129_v52, %v700_v3  ;;  %v648_v10 = vmax.f32 %v542_v4, 0.0  ;;  %v664_v11 = vmax.f32 %v606_v5, 0.0 }
 0x110   : > { %v546_v12 = vpop.f32.mrf.mxu0  ;;  %v610_v13 = vpop.f32.mrf.mxu1 }
 0x111   : > { %753 = vst.msk [vmem:[%s1140_s20 + $0x30] sm:$0xff] %vm431_vm0, %v721_v8  ;;  %769 = vst.msk [vmem:[%s1140_s20 + $0xb0] sm:$0xff] %vm431_vm0, %v737_v9  ;;  %v685_v14 = vmul.f32 %v1124_v47, %v648_v10  ;;  %v701_v15 = vmul.f32 %v1124_v47, %v664_v11  ;;  %v547_v16 = vadd.f32 %v1117_v42, %v546_v12 }
 0x112   : > { %v611_v17 = vadd.f32 %v1117_v42, %v610_v13  ;;  %v548_v18 = vpop.f32.mrf.mxu0  ;;  %v612_v19 = vpop.f32.mrf.mxu1 }
 0x113   : > { %v722_v20 = vadd.f32 %v1129_v52, %v685_v14  ;;  %v738_v21 = vadd.f32 %v1129_v52, %v701_v15  ;;  %v649_v22 = vmax.f32 %v547_v16, 0.0 }
 0x114   : > { %v665_v23 = vmax.f32 %v611_v17, 0.0  ;;  %v549_v24 = vpop.f32.mrf.mxu0  ;;  %v613_v25 = vpop.f32.mrf.mxu1 }
 0x115   : > { %754 = vst.msk [vmem:[%s1140_s20 + $0x38] sm:$0xff] %vm431_vm0, %v722_v20  ;;  %770 = vst.msk [vmem:[%s1140_s20 + $0xb8] sm:$0xff] %vm431_vm0, %v738_v21  ;;  %v686_v26 = vmul.f32 %v1124_v47, %v649_v22  ;;  %v550_v28 = vadd.f32 %v1117_v42, %v549_v24  ;;  %v614_v29 = vadd.f32 %v1117_v42, %v613_v25 }
 0x116   : > { %v702_v27 = vmul.f32 %v1124_v47, %v665_v23  ;;  %v551_v30 = vpop.f32.mrf.mxu0  ;;  %v615_v31 = vpop.f32.mrf.mxu1 }
 0x117   : > { %v723_v32 = vadd.f32 %v1129_v52, %v686_v26  ;;  %v650_v34 = vmax.f32 %v550_v28, 0.0  ;;  %v666_v35 = vmax.f32 %v614_v29, 0.0 }
 0x118   : > { %v739_v33 = vadd.f32 %v1129_v52, %v702_v27  ;;  %v554_v36 = vpop.f32.mrf.mxu0  ;;  %v618_v37 = vpop.f32.mrf.mxu1 }
 0x119   : > { %755 = vst.msk [vmem:[%s1140_s20 + $0x40] sm:$0xff] %vm431_vm0, %v723_v32  ;;  %v687_v38 = vmul.f32 %v1124_v47, %v650_v34  ;;  %v703_v39 = vmul.f32 %v1124_v47, %v666_v35  ;;  %v555_v40 = vadd.f32 %v1117_v42, %v554_v36  ;;  %v619_v41 = vadd.f32 %v1117_v42, %v618_v37 }
 0x11a   : > { %771 = vst.msk [vmem:[%s1140_s20 + $0xc0] sm:$0xff] %vm431_vm0, %v739_v33  ;;  %v556_v43 = vpop.f32.mrf.mxu0  ;;  %v620_v44 = vpop.f32.mrf.mxu1 }
 0x11b   : > { %v724_v45 = vadd.f32 %v1129_v52, %v687_v38  ;;  %v740_v46 = vadd.f32 %v1129_v52, %v703_v39  ;;  %v651_v48 = vmax.f32 %v555_v40, 0.0  ;;  %v667_v49 = vmax.f32 %v619_v41, 0.0 }
 0x11c   : > { %v557_v50 = vpop.f32.mrf.mxu0  ;;  %v621_v51 = vpop.f32.mrf.mxu1 }
 0x11d   : > { %756 = vst.msk [vmem:[%s1140_s20 + $0x48] sm:$0xff] %vm431_vm0, %v724_v45  ;;  %772 = vst.msk [vmem:[%s1140_s20 + $0xc8] sm:$0xff] %vm431_vm0, %v740_v46  ;;  %v688_v53 = vmul.f32 %v1124_v47, %v651_v48  ;;  %v704_v54 = vmul.f32 %v1124_v47, %v667_v49  ;;  %v558_v55 = vadd.f32 %v1117_v42, %v557_v50 }
 0x11e   : > { %v622_v56 = vadd.f32 %v1117_v42, %v621_v51  ;;  %v559_v57 = vpop.f32.mrf.mxu0  ;;  %v623_v58 = vpop.f32.mrf.mxu1 }
 0x11f   : > { %v725_v59 = vadd.f32 %v1129_v52, %v688_v53  ;;  %v741_v60 = vadd.f32 %v1129_v52, %v704_v54  ;;  %v652_v61 = vmax.f32 %v558_v55, 0.0 }
 0x120   : > { %v668_v62 = vmax.f32 %v622_v56, 0.0  ;;  %v562_v63 = vpop.f32.mrf.mxu0  ;;  %v626_v0 = vpop.f32.mrf.mxu1 }
 0x121   : > { %757 = vst.msk [vmem:[%s1140_s20 + $0x50] sm:$0xff] %vm431_vm0, %v725_v59  ;;  %773 = vst.msk [vmem:[%s1140_s20 + $0xd0] sm:$0xff] %vm431_vm0, %v741_v60  ;;  %v689_v1 = vmul.f32 %v1124_v47, %v652_v61  ;;  %v563_v3 = vadd.f32 %v1117_v42, %v562_v63  ;;  %v627_v4 = vadd.f32 %v1117_v42, %v626_v0 }
 0x122   : > { %v705_v2 = vmul.f32 %v1124_v47, %v668_v62  ;;  %v564_v5 = vpop.f32.mrf.mxu0  ;;  %v628_v6 = vpop.f32.mrf.mxu1 }
 0x123   : > { %v726_v7 = vadd.f32 %v1129_v52, %v689_v1  ;;  %v653_v9 = vmax.f32 %v563_v3, 0.0  ;;  %v669_v10 = vmax.f32 %v627_v4, 0.0 }
 0x124   : > { %v742_v8 = vadd.f32 %v1129_v52, %v705_v2  ;;  %v565_v11 = vpop.f32.mrf.mxu0  ;;  %v629_v12 = vpop.f32.mrf.mxu1 }
 0x125   : > { %758 = vst.msk [vmem:[%s1140_s20 + $0x58] sm:$0xff] %vm431_vm0, %v726_v7  ;;  %v690_v13 = vmul.f32 %v1124_v47, %v653_v9  ;;  %v706_v14 = vmul.f32 %v1124_v47, %v669_v10  ;;  %v566_v15 = vadd.f32 %v1117_v42, %v565_v11  ;;  %v630_v16 = vadd.f32 %v1117_v42, %v629_v12 }
 0x126   : > { %774 = vst.msk [vmem:[%s1140_s20 + $0xd8] sm:$0xff] %vm431_vm0, %v742_v8  ;;  %v567_v17 = vpop.f32.mrf.mxu0  ;;  %v631_v18 = vpop.f32.mrf.mxu1 }
 0x127   : > { %v727_v19 = vadd.f32 %v1129_v52, %v690_v13  ;;  %v743_v20 = vadd.f32 %v1129_v52, %v706_v14  ;;  %v654_v21 = vmax.f32 %v566_v15, 0.0  ;;  %v670_v22 = vmax.f32 %v630_v16, 0.0 }
 0x128   : > { %v570_v23 = vpop.f32.mrf.mxu0  ;;  %v634_v24 = vpop.f32.mrf.mxu1 }
 0x129   : > { %759 = vst.msk [vmem:[%s1140_s20 + $0x60] sm:$0xff] %vm431_vm0, %v727_v19  ;;  %775 = vst.msk [vmem:[%s1140_s20 + $0xe0] sm:$0xff] %vm431_vm0, %v743_v20  ;;  %v691_v25 = vmul.f32 %v1124_v47, %v654_v21  ;;  %v707_v26 = vmul.f32 %v1124_v47, %v670_v22  ;;  %v571_v27 = vadd.f32 %v1117_v42, %v570_v23 }
 0x12a   : > { %v635_v28 = vadd.f32 %v1117_v42, %v634_v24  ;;  %v572_v29 = vpop.f32.mrf.mxu0  ;;  %v636_v30 = vpop.f32.mrf.mxu1 }
 0x12b   : > { %v728_v31 = vadd.f32 %v1129_v52, %v691_v25  ;;  %v744_v32 = vadd.f32 %v1129_v52, %v707_v26  ;;  %v655_v33 = vmax.f32 %v571_v27, 0.0 }
 0x12c   : > { %v671_v34 = vmax.f32 %v635_v28, 0.0  ;;  %v573_v35 = vpop.f32.mrf.mxu0  ;;  %v637_v36 = vpop.f32.mrf.mxu1 }
 0x12d   : > { %760 = vst.msk [vmem:[%s1140_s20 + $0x68] sm:$0xff] %vm431_vm0, %v728_v31  ;;  %776 = vst.msk [vmem:[%s1140_s20 + $0xe8] sm:$0xff] %vm431_vm0, %v744_v32  ;;  %v692_v37 = vmul.f32 %v1124_v47, %v655_v33  ;;  %v574_v39 = vadd.f32 %v1117_v42, %v573_v35  ;;  %v638_v40 = vadd.f32 %v1117_v42, %v637_v36 }
 0x12e   : > { %v708_v38 = vmul.f32 %v1124_v47, %v671_v34  ;;  %v575_v41 = vpop.f32.mrf.mxu0  ;;  %v639_v43 = vpop.f32.mrf.mxu1 }
 0x12f   : > { %v729_v44 = vadd.f32 %v1129_v52, %v692_v37  ;;  %v656_v46 = vmax.f32 %v574_v39, 0.0  ;;  %v672_v48 = vmax.f32 %v638_v40, 0.0 }
 0x130   : > { %v745_v45 = vadd.f32 %v1129_v52, %v708_v38 }
 0x131   : > { %761 = vst.msk [vmem:[%s1140_s20 + $0x70] sm:$0xff] %vm431_vm0, %v729_v44  ;;  %v693_v49 = vmul.f32 %v1124_v47, %v656_v46  ;;  %v709_v50 = vmul.f32 %v1124_v47, %v672_v48 }
 0x132   : > { %777 = vst.msk [vmem:[%s1140_s20 + $0xf0] sm:$0xff] %vm431_vm0, %v745_v45 }
 0x133   : > { %v730_v51 = vadd.f32 %v1129_v52, %v693_v49  ;;  %v746_v42 = vadd.f32 %v1129_v52, %v709_v50 }
 0x135   : > { %762 = vst.msk [vmem:[%s1140_s20 + $0x78] sm:$0xff] %vm431_vm0, %v730_v51  ;;  %778 = vst.msk [vmem:[%s1140_s20 + $0xf8] sm:$0xff] %vm431_vm0, %v746_v42 }
 0x136 PF: > { %s13_s12 = sadd.s32 1, %s998_s12  }
 0x137   : > { %p10_p4 = scmp.ge.s32.totalorder %s13_s12, 4  }
 0x139   :  { %12 = sbr.rel (!%p10_p4) target bundleno = 1 (0x1), region = 62 }

// kernel: tower_forward.17
= control target key start
LH: loop header
LB: loop body
LE: loop exit
PB: predicated region body
PF: predicated region fallthrough
CT: control target
= control target key end

     0   :  { %v468_v0 = vmov 0   ;;  %vm180_vm0 = vcmask 130048   ;;  %s699_s1 = inlined_call_operand.vmem [shape: bf16[144,16], index: 1, kind: input, shape index: {}]   ;;  %s700_s0 = inlined_call_operand.vmem [shape: bf16[128,144], index: 0, kind: input, shape index: {}]   ;;  %s701_s2 = inlined_call_operand.vmem [shape: f32[3,16], index: 2, kind: input, shape index: {}]   ;;  %s702_s3 = inlined_call_operand.vmem [shape: f32[128,16], index: 3, kind: output, shape index: {}]  }
   0x1   :  { %205 = vmatprep.subr.bf16.mxu0 %v468_v0  ;;  %416 = vmatprep.subr.bf16.mxu1 %v468_v0  ;;  %v435_v1 = vld [vmem:[%s699_s1 + $0x38] sm:$0xff]   ;;  %v436_v2 = vld [vmem:[%s699_s1 + $0x30] sm:$0xff]   ;;  %v437_v3 = vld [vmem:[%s699_s1 + $0x28] sm:$0xff]  }
   0x2   :  { %206 = vmatpush1.bf16.msra.mxu0 %v435_v1  ;;  %425 = vmatpush1.bf16.msra.mxu1 %v435_v1  ;;  %v438_v4 = vld [vmem:[%s699_s1 + $0x20] sm:$0xff]   ;;  %v439_v7 = vld [vmem:[%s699_s1 + $0x18] sm:$0xff]   ;;  %v440_v8 = vld [vmem:[%s699_s1 + $0x10] sm:$0xff]  }
   0x3   :  { %207 = vmatprep.subr.bf16.mxu0 %v468_v0  ;;  %417 = vmatprep.subr.bf16.mxu1 %v468_v0  ;;  %v446_v5 = vld [vmem:[%s700_s0 + $0x4] ss:$8 sps:$4 sm:$0xff]   ;;  %v444_v12 = vld [vmem:[%s700_s0] ss:$8 sps:$4 sm:$0xff]   ;;  %v450_v14 = vld [vmem:[%s700_s0 + $0x14] ss:$8 sps:$4 sm:$0xff]  }
   0x4   :  { %v449_v6 = vld [vmem:[%s700_s0 + $0x44] ss:$8 sps:$4 sm:$0xff]   ;;  %406 = vmatprep.mubr.msk.bf16.mxu0 %vm180_vm0, %v446_v5  ;;  %v447_v13 = vld [vmem:[%s700_s0 + $0x40] ss:$8 sps:$4 sm:$0xff]   ;;  %v452_v15 = vld [vmem:[%s700_s0 + $0x54] ss:$8 sps:$4 sm:$0xff]  }
   0x5   :  { %410 = vmatprep.mubr.msk.bf16.mxu1 %vm180_vm0, %v449_v6  ;;  %v441_v9 = vld [vmem:[%s699_s1 + $0x8] sm:$0xff]   ;;  %v442_v10 = vld [vmem:[%s699_s1] sm:$0xff]   ;;  %v454_v16 = vld [vmem:[%s700_s0 + $0x10] ss:$8 sps:$4 sm:$0xff]  }
   0x6   :  { %208 = vmatpush1.bf16.msra.mxu0 %v436_v2  ;;  %426 = vmatpush1.bf16.msra.mxu1 %v436_v2  ;;  %v443_v11 = vld [vmem:[%s699_s1 + $0x40] sm:$0xff]   ;;  %v455_v17 = vld [vmem:[%s700_s0 + $0x50] ss:$8 sps:$4 sm:$0xff]   ;;  %v462_v22 = vld [vmem:[%s700_s0 + $0x34] ss:$8 sps:$4 sm:$0xff]  }
   0x7   :  { %209 = vmatprep.subr.bf16.mxu0 %v468_v0  ;;  %418 = vmatprep.subr.bf16.mxu1 %v468_v0  ;;  %v456_v18 = vld [vmem:[%s700_s0 + $0x24] ss:$8 sps:$4 sm:$0xff]   ;;  %v460_v20 = vld [vmem:[%s700_s0 + $0x20] ss:$8 sps:$4 sm:$0xff]   ;;  %v464_v23 = vld [vmem:[%s700_s0 + $0x74] ss:$8 sps:$4 sm:$0xff]  }
   0x8   :  { %v458_v19 = vld [vmem:[%s700_s0 + $0x64] ss:$8 sps:$4 sm:$0xff]   ;;  %v461_v21 = vld [vmem:[%s700_s0 + $0x60] ss:$8 sps:$4 sm:$0xff]   ;;  %v466_v24 = vld [vmem:[%s700_s0 + $0x30] ss:$8 sps:$4 sm:$0xff]  }
   0x9   :  { %v467_v25 = vld [vmem:[%s700_s0 + $0x70] ss:$8 sps:$4 sm:$0xff]   ;;  %v575_v26 = vld [vmem:[%s701_s2] ss:$0 sm:$0xff]  ;;  %v582_v31 = vld [vmem:[%s701_s2 + $0x1] ss:$0 sm:$0xff] }
   0xa   :  { %210 = vmatpush1.bf16.msra.mxu0 %v437_v3  ;;  %427 = vmatpush1.bf16.msra.mxu1 %v437_v3  ;;  %v587_v36 = vld [vmem:[%s701_s2 + $0x2] ss:$0 sm:$0xff] }
   0xb   :  { %211 = vmatprep.subr.bf16.mxu0 %v468_v0  ;;  %419 = vmatprep.subr.bf16.mxu1 %v468_v0 }
   0xe   :  { %212 = vmatpush1.bf16.msra.mxu0 %v438_v4  ;;  %428 = vmatpush1.bf16.msra.mxu1 %v438_v4 }
   0xf   :  { %213 = vmatprep.subr.bf16.mxu0 %v468_v0  ;;  %420 = vmatprep.subr.bf16.mxu1 %v468_v0 }
  0x12   :  { %214 = vmatpush1.bf16.msra.mxu0 %v439_v7  ;;  %429 = vmatpush1.bf16.msra.mxu1 %v439_v7 }
  0x13   :  { %215 = vmatprep.subr.bf16.mxu0 %v468_v0  ;;  %421 = vmatprep.subr.bf16.mxu1 %v468_v0 }
  0x16   :  { %216 = vmatpush1.bf16.msra.mxu0 %v440_v8  ;;  %430 = vmatpush1.bf16.msra.mxu1 %v440_v8 }
  0x17   :  { %217 = vmatprep.subr.bf16.mxu0 %v468_v0  ;;  %422 = vmatprep.subr.bf16.mxu1 %v468_v0 }
  0x1a   :  { %218 = vmatpush1.bf16.msra.mxu0 %v441_v9  ;;  %431 = vmatpush1.bf16.msra.mxu1 %v441_v9 }
  0x1b   :  { %219 = vmatprep.subr.bf16.mxu0 %v468_v0  ;;  %423 = vmatprep.subr.bf16.mxu1 %v468_v0 }
  0x1e   :  { %220 = vmatpush1.bf16.msra.mxu0 %v442_v10  ;;  %432 = vmatpush1.bf16.msra.mxu1 %v442_v10 }
  0x1f   :  { %235 = vmatprep.subr.bf16.mxu0 %v468_v0  ;;  %424 = vmatprep.subr.bf16.mxu1 %v468_v0 }
  0x22   :  { %236 = vmatpush2.bf16.msra.mxu0 %v443_v11  ;;  %433 = vmatpush2.bf16.msra.mxu1 %v443_v11 }
  0x25   :  { %238 = vmatmul.mubr.bf16.vlgmr.msra.gmra.mxu0 %v444_v12  ;;  %270 = vmatmul.mubr.bf16.vlgmr.msra.gmra.mxu1 %v447_v13 }
  0x26   :  { %407 = vmatprep.mubr.msk.bf16.mxu0 %vm180_vm0, %v450_v14  ;;  %411 = vmatprep.mubr.msk.bf16.mxu1 %vm180_vm0, %v452_v15 }
  0x2d   :  { %246 = vmatmul.mubr.bf16.gmra.mxu0 %v454_v16  ;;  %278 = vmatmul.mubr.bf16.gmra.mxu1 %v455_v17 }
  0x2e   :  { %408 = vmatprep.mubr.msk.bf16.mxu0 %vm180_vm0, %v456_v18  ;;  %412 = vmatprep.mubr.msk.bf16.mxu1 %vm180_vm0, %v458_v19 }
  0x35   :  { %254 = vmatmul.mubr.bf16.gmra.mxu0 %v460_v20  ;;  %286 = vmatmul.mubr.bf16.gmra.mxu1 %v461_v21 }
  0x36   :  { %409 = vmatprep.mubr.msk.bf16.mxu0 %vm180_vm0, %v462_v22  ;;  %413 = vmatprep.mubr.msk.bf16.mxu1 %vm180_vm0, %v464_v23 }
  0x3d   :  { %262 = vmatmul.mubr.bf16.gmra.mxu0 %v466_v24  ;;  %294 = vmatmul.mubr.bf16.gmra.mxu1 %v467_v25 }
  0xe5   :  { %v239_v27 = vpop.f32.mrf.mxu0  ;;  %v271_v28 = vpop.f32.mrf.mxu1 }
  0xe6   :  { %v240_v29 = vadd.f32 %v575_v26, %v239_v27  ;;  %v272_v30 = vadd.f32 %v575_v26, %v271_v28 }
  0xe7   :  { %v241_v32 = vpop.f32.mrf.mxu0  ;;  %v273_v33 = vpop.f32.mrf.mxu1 }
  0xe8   :  { %v302_v34 = vmax.f32 %v240_v29, 0.0  ;;  %v310_v35 = vmax.f32 %v272_v30, 0.0 }
  0xe9   :  { %v242_v37 = vpop.f32.mrf.mxu0  ;;  %v274_v38 = vpop.f32.mrf.mxu1 }
  0xea   :  { %v323_v39 = vmul.f32 %v582_v31, %v302_v34  ;;  %v331_v40 = vmul.f32 %v582_v31, %v310_v35  ;;  %v243_v41 = vadd.f32 %v575_v26, %v242_v37  ;;  %v275_v42 = vadd.f32 %v575_v26, %v274_v38 }
  0xeb   :  { %v244_v43 = vpop.f32.mrf.mxu0  ;;  %v276_v44 = vpop.f32.mrf.mxu1 }
  0xec   :  { %v344_v45 = vadd.f32 %v587_v36, %v323_v39  ;;  %v352_v46 = vadd.f32 %v587_v36, %v331_v40  ;;  %v303_v47 = vmax.f32 %v243_v41, 0.0  ;;  %v311_v48 = vmax.f32 %v275_v42, 0.0 }
  0xed   :  { %v247_v49 = vpop.f32.mrf.mxu0  ;;  %v279_v50 = vpop.f32.mrf.mxu1 }
  0xee   :  { %360 = vst.msk [vmem:[%s702_s3] sm:$0xff] %vm180_vm0, %v344_v45  ;;  %368 = vst.msk [vmem:[%s702_s3 + $0x40] sm:$0xff] %vm180_vm0, %v352_v46  ;;  %v324_v51 = vmul.f32 %v582_v31, %v303_v47  ;;  %v332_v52 = vmul.f32 %v582_v31, %v311_v48  ;;  %v248_v53 = vadd.f32 %v575_v26, %v247_v49 }
  0xef   :  { %v280_v54 = vadd.f32 %v575_v26, %v279_v50  ;;  %v249_v55 = vpop.f32.mrf.mxu0  ;;  %v281_v56 = vpop.f32.mrf.mxu1 }
  0xf0   :  { %v345_v57 = vadd.f32 %v587_v36, %v324_v51  ;;  %v353_v58 = vadd.f32 %v587_v36, %v332_v52  ;;  %v304_v59 = vmax.f32 %v248_v53, 0.0 }
  0xf1   :  { %v312_v60 = vmax.f32 %v280_v54, 0.0  ;;  %v250_v61 = vpop.f32.mrf.mxu0  ;;  %v282_v62 = vpop.f32.mrf.mxu1 }
  0xf2   :  { %361 = vst.msk [vmem:[%s702_s3 + $0x8] sm:$0xff] %vm180_vm0, %v345_v57  ;;  %369 = vst.msk [vmem:[%s702_s3 + $0x48] sm:$0xff] %vm180_vm0, %v353_v58  ;;  %v325_v63 = vmul.f32 %v582_v31, %v304_v59  ;;  %v251_v1 = vadd.f32 %v575_v26, %v250_v61  ;;  %v283_v2 = vadd.f32 %v575_v26, %v282_v62 }
  0xf3   :  { %v333_v0 = vmul.f32 %v582_v31, %v312_v60  ;;  %v252_v3 = vpop.f32.mrf.mxu0  ;;  %v284_v4 = vpop.f32.mrf.mxu1 }
  0xf4   :  { %v346_v5 = vadd.f32 %v587_v36, %v325_v63  ;;  %v305_v7 = vmax.f32 %v251_v1, 0.0  ;;  %v313_v8 = vmax.f32 %v283_v2, 0.0 }
  0xf5   :  { %v354_v6 = vadd.f32 %v587_v36, %v333_v0  ;;  %v255_v9 = vpop.f32.mrf.mxu0  ;;  %v287_v10 = vpop.f32.mrf.mxu1 }
  0xf6   :  { %362 = vst.msk [vmem:[%s702_s3 + $0x10] sm:$0xff] %vm180_vm0, %v346_v5  ;;  %v326_v11 = vmul.f32 %v582_v31, %v305_v7  ;;  %v334_v12 = vmul.f32 %v582_v31, %v313_v8  ;;  %v256_v13 = vadd.f32 %v575_v26, %v255_v9  ;;  %v288_v14 = vadd.f32 %v575_v26, %v287_v10 }
  0xf7   :  { %370 = vst.msk [vmem:[%s702_s3 + $0x50] sm:$0xff] %vm180_vm0, %v354_v6  ;;  %v257_v15 = vpop.f32.mrf.mxu0  ;;  %v289_v16 = vpop.f32.mrf.mxu1 }
  0xf8   :  { %v347_v17 = vadd.f32 %v587_v36, %v326_v11  ;;  %v355_v18 = vadd.f32 %v587_v36, %v334_v12  ;;  %v306_v19 = vmax.f32 %v256_v13, 0.0  ;;  %v314_v20 = vmax.f32 %v288_v14, 0.0 }
  0xf9   :  { %v258_v21 = vpop.f32.mrf.mxu0  ;;  %v290_v22 = vpop.f32.mrf.mxu1 }
  0xfa   :  { %363 = vst.msk [vmem:[%s702_s3 + $0x18] sm:$0xff] %vm180_vm0, %v347_v17  ;;  %371 = vst.msk [vmem:[%s702_s3 + $0x58] sm:$0xff] %vm180_vm0, %v355_v18  ;;  %v327_v23 = vmul.f32 %v582_v31, %v306_v19  ;;  %v335_v24 = vmul.f32 %v582_v31, %v314_v20  ;;  %v259_v25 = vadd.f32 %v575_v26, %v258_v21 }
  0xfb   :  { %v291_v27 = vadd.f32 %v575_v26, %v290_v22  ;;  %v260_v28 = vpop.f32.mrf.mxu0  ;;  %v292_v29 = vpop.f32.mrf.mxu1 }
  0xfc   :  { %v348_v30 = vadd.f32 %v587_v36, %v327_v23  ;;  %v356_v32 = vadd.f32 %v587_v36, %v335_v24  ;;  %v307_v33 = vmax.f32 %v259_v25, 0.0 }
  0xfd   :  { %v315_v34 = vmax.f32 %v291_v27, 0.0  ;;  %v263_v35 = vpop.f32.mrf.mxu0  ;;  %v295_v37 = vpop.f32.mrf.mxu1 }
  0xfe   :  { %364 = vst.msk [vmem:[%s702_s3 + $0x20] sm:$0xff] %vm180_vm0, %v348_v30  ;;  %372 = vst.msk [vmem:[%s702_s3 + $0x60] sm:$0xff] %vm180_vm0, %v356_v32  ;;  %v328_v38 = vmul.f32 %v582_v31, %v307_v33  ;;  %v264_v40 = vadd.f32 %v575_v26, %v263_v35  ;;  %v296_v41 = vadd.f32 %v575_v26, %v295_v37 }
  0xff   :  { %v336_v39 = vmul.f32 %v582_v31, %v315_v34  ;;  %v265_v42 = vpop.f32.mrf.mxu0  ;;  %v297_v43 = vpop.f32.mrf.mxu1 }
 0x100   :  { %v349_v44 = vadd.f32 %v587_v36, %v328_v38  ;;  %v308_v46 = vmax.f32 %v264_v40, 0.0  ;;  %v316_v47 = vmax.f32 %v296_v41, 0.0 }
 0x101   :  { %v357_v45 = vadd.f32 %v587_v36, %v336_v39  ;;  %v266_v48 = vpop.f32.mrf.mxu0  ;;  %v298_v49 = vpop.f32.mrf.mxu1 }
 0x102   :  { %365 = vst.msk [vmem:[%s702_s3 + $0x28] sm:$0xff] %vm180_vm0, %v349_v44  ;;  %v329_v50 = vmul.f32 %v582_v31, %v308_v46  ;;  %v337_v51 = vmul.f32 %v582_v31, %v316_v47  ;;  %v267_v52 = vadd.f32 %v575_v26, %v266_v48  ;;  %v299_v53 = vadd.f32 %v575_v26, %v298_v49 }
 0x103   :  { %373 = vst.msk [vmem:[%s702_s3 + $0x68] sm:$0xff] %vm180_vm0, %v357_v45  ;;  %v268_v54 = vpop.f32.mrf.mxu0  ;;  %v300_v55 = vpop.f32.mrf.mxu1 }
 0x104   :  { %v350_v56 = vadd.f32 %v587_v36, %v329_v50  ;;  %v358_v57 = vadd.f32 %v587_v36, %v337_v51  ;;  %v309_v58 = vmax.f32 %v267_v52, 0.0  ;;  %v317_v59 = vmax.f32 %v299_v53, 0.0 }
 0x106   :  { %366 = vst.msk [vmem:[%s702_s3 + $0x30] sm:$0xff] %vm180_vm0, %v350_v56  ;;  %374 = vst.msk [vmem:[%s702_s3 + $0x70] sm:$0xff] %vm180_vm0, %v358_v57  ;;  %v330_v26 = vmul.f32 %v582_v31, %v309_v58  ;;  %v338_v60 = vmul.f32 %v582_v31, %v317_v59 }
 0x108   :  { %v351_v61 = vadd.f32 %v587_v36, %v330_v26  ;;  %v359_v62 = vadd.f32 %v587_v36, %v338_v60 }
 0x10a   :  { %367 = vst.msk [vmem:[%s702_s3 + $0x38] sm:$0xff] %vm180_vm0, %v351_v61  ;;  %375 = vst.msk [vmem:[%s702_s3 + $0x78] sm:$0xff] %vm180_vm0, %v359_v62 }

// kernel: tower_forward.18
= control target key start
LH: loop header
LB: loop body
LE: loop exit
PB: predicated region body
PF: predicated region fallthrough
CT: control target
= control target key end

     0   :  { %v252_v0 = vmov 0   ;;  %vm114_vm0 = vcmask 130048   ;;  %s339_s1 = inlined_call_operand.vmem [shape: bf16[144,16], index: 1, kind: input, shape index: {}]   ;;  %s340_s0 = inlined_call_operand.vmem [shape: bf16[32,144], index: 0, kind: input, shape index: {}]   ;;  %s341_s2 = inlined_call_operand.vmem [shape: f32[3,16], index: 2, kind: input, shape index: {}]   ;;  %s342_s3 = inlined_call_operand.vmem [shape: f32[32,16], index: 3, kind: output, shape index: {}]  }
   0x1   :  { %121 = vmatprep.subr.bf16.mxu0 %v252_v0  ;;  %218 = vmatprep.subr.bf16.mxu1 %v252_v0  ;;  %v237_v1 = vld [vmem:[%s339_s1 + $0x38] sm:$0xff]   ;;  %v238_v2 = vld [vmem:[%s339_s1 + $0x30] sm:$0xff]   ;;  %v239_v3 = vld [vmem:[%s339_s1 + $0x28] sm:$0xff]  }
   0x2   :  { %122 = vmatpush1.bf16.msra.mxu0 %v237_v1  ;;  %227 = vmatpush1.bf16.msra.mxu1 %v237_v1  ;;  %v240_v4 = vld [vmem:[%s339_s1 + $0x20] sm:$0xff]   ;;  %v251_v6 = vld [vmem:[%s340_s0 + $0x14] ss:$8 sps:$4 sm:$0xff]   ;;  %v243_v9 = vld [vmem:[%s339_s1 + $0x8] sm:$0xff]  }
   0x3   :  { %123 = vmatprep.subr.bf16.mxu0 %v252_v0  ;;  %219 = vmatprep.subr.bf16.mxu1 %v252_v0  ;;  %v248_v5 = vld [vmem:[%s340_s0 + $0x4] ss:$8 sps:$4 sm:$0xff]   ;;  %v241_v7 = vld [vmem:[%s339_s1 + $0x18] sm:$0xff]   ;;  %v242_v8 = vld [vmem:[%s339_s1 + $0x10] sm:$0xff]  }
   0x4   :  { %214 = vmatprep.mubr.msk.bf16.mxu0 %vm114_vm0, %v248_v5  ;;  %215 = vmatprep.mubr.msk.bf16.mxu1 %vm114_vm0, %v251_v6  ;;  %v244_v10 = vld [vmem:[%s339_s1] sm:$0xff]   ;;  %v249_v13 = vld [vmem:[%s340_s0 + $0x10] ss:$8 sps:$4 sm:$0xff]  }
   0x5   :  { %v245_v11 = vld [vmem:[%s339_s1 + $0x40] sm:$0xff]  }
   0x6   :  { %124 = vmatpush1.bf16.msra.mxu0 %v238_v2  ;;  %228 = vmatpush1.bf16.msra.mxu1 %v238_v2  ;;  %v246_v12 = vld [vmem:[%s340_s0] ss:$8 sps:$4 sm:$0xff]  }
   0x7   :  { %125 = vmatprep.subr.bf16.mxu0 %v252_v0  ;;  %220 = vmatprep.subr.bf16.mxu1 %v252_v0  ;;  %v200_v14 = vld [vmem:[%s341_s2] ss:$0 sm:$0xff]  ;;  %v216_v19 = vld [vmem:[%s341_s2 + $0x1] ss:$0 sm:$0xff]  ;;  %v217_v24 = vld [vmem:[%s341_s2 + $0x2] ss:$0 sm:$0xff] }
   0xa   :  { %126 = vmatpush1.bf16.msra.mxu0 %v239_v3  ;;  %229 = vmatpush1.bf16.msra.mxu1 %v239_v3 }
   0xb   :  { %127 = vmatprep.subr.bf16.mxu0 %v252_v0  ;;  %221 = vmatprep.subr.bf16.mxu1 %v252_v0 }
   0xe   :  { %128 = vmatpush1.bf16.msra.mxu0 %v240_v4  ;;  %230 = vmatpush1.bf16.msra.mxu1 %v240_v4 }
   0xf   :  { %129 = vmatprep.subr.bf16.mxu0 %v252_v0  ;;  %222 = vmatprep.subr.bf16.mxu1 %v252_v0 }
  0x12   :  { %130 = vmatpush1.bf16.msra.mxu0 %v241_v7  ;;  %231 = vmatpush1.bf16.msra.mxu1 %v241_v7 }
  0x13   :  { %131 = vmatprep.subr.bf16.mxu0 %v252_v0  ;;  %223 = vmatprep.subr.bf16.mxu1 %v252_v0 }
  0x16   :  { %132 = vmatpush1.bf16.msra.mxu0 %v242_v8  ;;  %232 = vmatpush1.bf16.msra.mxu1 %v242_v8 }
  0x17   :  { %133 = vmatprep.subr.bf16.mxu0 %v252_v0  ;;  %224 = vmatprep.subr.bf16.mxu1 %v252_v0 }
  0x1a   :  { %134 = vmatpush1.bf16.msra.mxu0 %v243_v9  ;;  %233 = vmatpush1.bf16.msra.mxu1 %v243_v9 }
  0x1b   :  { %135 = vmatprep.subr.bf16.mxu0 %v252_v0  ;;  %225 = vmatprep.subr.bf16.mxu1 %v252_v0 }
  0x1e   :  { %136 = vmatpush1.bf16.msra.mxu0 %v244_v10  ;;  %234 = vmatpush1.bf16.msra.mxu1 %v244_v10 }
  0x1f   :  { %151 = vmatprep.subr.bf16.mxu0 %v252_v0  ;;  %226 = vmatprep.subr.bf16.mxu1 %v252_v0 }
  0x22   :  { %152 = vmatpush2.bf16.msra.mxu0 %v245_v11  ;;  %235 = vmatpush2.bf16.msra.mxu1 %v245_v11 }
  0x25   :  { %154 = vmatmul.mubr.bf16.vlgmr.msra.gmra.mxu0 %v246_v12  ;;  %162 = vmatmul.mubr.bf16.vlgmr.msra.gmra.mxu1 %v249_v13 }
  0xe5   :  { %v155_v15 = vpop.f32.mrf.mxu0  ;;  %v163_v16 = vpop.f32.mrf.mxu1 }
  0xe6   :  { %v156_v17 = vadd.f32 %v200_v14, %v155_v15  ;;  %v164_v18 = vadd.f32 %v200_v14, %v163_v16 }
  0xe7   :  { %v157_v20 = vpop.f32.mrf.mxu0  ;;  %v165_v21 = vpop.f32.mrf.mxu1 }
  0xe8   :  { %v170_v22 = vmax.f32 %v156_v17, 0.0  ;;  %v172_v23 = vmax.f32 %v164_v18, 0.0 }
  0xe9   :  { %v158_v25 = vpop.f32.mrf.mxu0  ;;  %v166_v26 = vpop.f32.mrf.mxu1 }
  0xea   :  { %v179_v27 = vmul.f32 %v216_v19, %v170_v22  ;;  %v181_v28 = vmul.f32 %v216_v19, %v172_v23  ;;  %v159_v29 = vadd.f32 %v200_v14, %v158_v25  ;;  %v167_v30 = vadd.f32 %v200_v14, %v166_v26 }
  0xeb   :  { %v160_v31 = vpop.f32.mrf.mxu0  ;;  %v168_v32 = vpop.f32.mrf.mxu1 }
  0xec   :  { %v188_v33 = vadd.f32 %v217_v24, %v179_v27  ;;  %v190_v34 = vadd.f32 %v217_v24, %v181_v28  ;;  %v171_v35 = vmax.f32 %v159_v29, 0.0  ;;  %v173_v36 = vmax.f32 %v167_v30, 0.0 }
  0xee   :  { %192 = vst.msk [vmem:[%s342_s3] sm:$0xff] %vm114_vm0, %v188_v33  ;;  %194 = vst.msk [vmem:[%s342_s3 + $0x10] sm:$0xff] %vm114_vm0, %v190_v34  ;;  %v180_v37 = vmul.f32 %v216_v19, %v171_v35  ;;  %v182_v38 = vmul.f32 %v216_v19, %v173_v36 }
  0xf0   :  { %v189_v39 = vadd.f32 %v217_v24, %v180_v37  ;;  %v191_v40 = vadd.f32 %v217_v24, %v182_v38 }
  0xf2   :  { %193 = vst.msk [vmem:[%s342_s3 + $0x8] sm:$0xff] %vm114_vm0, %v189_v39  ;;  %195 = vst.msk [vmem:[%s342_s3 + $0x18] sm:$0xff] %vm114_vm0, %v191_v40 }

// kernel: tower_forward.19
= control target key start
LH: loop header
LB: loop body
LE: loop exit
PB: predicated region body
PF: predicated region fallthrough
CT: control target
= control target key end

     0   :  { %v198_v0 = vmov 0   ;;  %vm103_vm0 = vcmask 130048   ;;  %s270_s1 = inlined_call_operand.vmem [shape: bf16[144,16], index: 1, kind: input, shape index: {}]   ;;  %s271_s0 = inlined_call_operand.vmem [shape: bf16[16,144], index: 0, kind: input, shape index: {}]   ;;  %s272_s2 = inlined_call_operand.vmem [shape: f32[3,16], index: 2, kind: input, shape index: {}]   ;;  %s273_s3 = inlined_call_operand.vmem [shape: f32[16,16], index: 3, kind: output, shape index: {}]  }
   0x1   :  { %107 = vmatprep.subr.bf16.mxu0 %v198_v0  ;;  %v186_v1 = vld [vmem:[%s270_s1 + $0x38] sm:$0xff]   ;;  %v187_v2 = vld [vmem:[%s270_s1 + $0x30] sm:$0xff]   ;;  %v188_v3 = vld [vmem:[%s270_s1 + $0x28] sm:$0xff]  }
   0x2   :  { %108 = vmatpush1.bf16.msra.mxu0 %v186_v1  ;;  %v189_v4 = vld [vmem:[%s270_s1 + $0x20] sm:$0xff]   ;;  %v190_v6 = vld [vmem:[%s270_s1 + $0x18] sm:$0xff]   ;;  %v191_v7 = vld [vmem:[%s270_s1 + $0x10] sm:$0xff]  }
   0x3   :  { %109 = vmatprep.subr.bf16.mxu0 %v198_v0  ;;  %v197_v5 = vld [vmem:[%s271_s0 + $0x4] ss:$8 sps:$4 sm:$0xff]   ;;  %v195_v11 = vld [vmem:[%s271_s0] ss:$8 sps:$4 sm:$0xff]  }
   0x4   :  { %182 = vmatprep.mubr.msk.bf16.mxu0 %vm103_vm0, %v197_v5  ;;  %v192_v8 = vld [vmem:[%s270_s1 + $0x8] sm:$0xff]   ;;  %v193_v9 = vld [vmem:[%s270_s1] sm:$0xff]  }
   0x5   :  { %v194_v10 = vld [vmem:[%s270_s1 + $0x40] sm:$0xff]  }
   0x6   :  { %110 = vmatpush1.bf16.msra.mxu0 %v187_v2  ;;  %v170_v12 = vld [vmem:[%s272_s2] ss:$0 sm:$0xff]  ;;  %v183_v15 = vld [vmem:[%s272_s2 + $0x1] ss:$0 sm:$0xff]  ;;  %v184_v18 = vld [vmem:[%s272_s2 + $0x2] ss:$0 sm:$0xff] }
   0x7   :  { %111 = vmatprep.subr.bf16.mxu0 %v198_v0 }
   0xa   :  { %112 = vmatpush1.bf16.msra.mxu0 %v188_v3 }
   0xb   :  { %113 = vmatprep.subr.bf16.mxu0 %v198_v0 }
   0xe   :  { %114 = vmatpush1.bf16.msra.mxu0 %v189_v4 }
   0xf   :  { %115 = vmatprep.subr.bf16.mxu0 %v198_v0 }
  0x12   :  { %116 = vmatpush1.bf16.msra.mxu0 %v190_v6 }
  0x13   :  { %117 = vmatprep.subr.bf16.mxu0 %v198_v0 }
  0x16   :  { %118 = vmatpush1.bf16.msra.mxu0 %v191_v7 }
  0x17   :  { %119 = vmatprep.subr.bf16.mxu0 %v198_v0 }
  0x1a   :  { %120 = vmatpush1.bf16.msra.mxu0 %v192_v8 }
  0x1b   :  { %121 = vmatprep.subr.bf16.mxu0 %v198_v0 }
  0x1e   :  { %122 = vmatpush1.bf16.msra.mxu0 %v193_v9 }
  0x1f   :  { %137 = vmatprep.subr.bf16.mxu0 %v198_v0 }
  0x22   :  { %138 = vmatpush2.bf16.msra.mxu0 %v194_v10 }
  0x25   :  { %140 = vmatmul.mubr.bf16.vlgmr.msra.gmra.mxu0 %v195_v11 }
  0xe5   :  { %v141_v13 = vpop.f32.mrf.mxu0 }
  0xe6   :  { %v142_v14 = vadd.f32 %v170_v12, %v141_v13 }
  0xe7   :  { %v143_v16 = vpop.f32.mrf.mxu0 }
  0xe8   :  { %v148_v17 = vmax.f32 %v142_v14, 0.0 }
  0xe9   :  { %v144_v19 = vpop.f32.mrf.mxu0 }
  0xea   :  { %v155_v20 = vmul.f32 %v183_v15, %v148_v17  ;;  %v145_v21 = vadd.f32 %v170_v12, %v144_v19 }
  0xeb   :  { %v146_v22 = vpop.f32.mrf.mxu0 }
  0xec   :  { %v162_v23 = vadd.f32 %v184_v18, %v155_v20  ;;  %v149_v24 = vmax.f32 %v145_v21, 0.0 }
  0xee   :  { %164 = vst.msk [vmem:[%s273_s3] sm:$0xff] %vm103_vm0, %v162_v23  ;;  %v156_v25 = vmul.f32 %v183_v15, %v149_v24 }
  0xf0   :  { %v163_v26 = vadd.f32 %v184_v18, %v156_v25 }
  0xf2   :  { %165 = vst.msk [vmem:[%s273_s3 + $0x8] sm:$0xff] %vm103_vm0, %v163_v26 }

// kernel: tower_forward.21
= control target key start
LH: loop header
LB: loop body
LE: loop exit
PB: predicated region body
PF: predicated region fallthrough
CT: control target
= control target key end

     0   :  { %vm82_vm0 = vcmask 1042432   ;;  %vm57_vm1 = vcmask 23552   ;;  %v863_v9 = vmov 0.0   ;;  %vm298_vm2 = vcmask 1043456   ;;  %s1086_s4 = inlined_call_operand.vmem [shape: f32[3,16], index: 4, kind: input, shape index: {}]   ;;  %s1087_s0 = inlined_call_operand.vmem [shape: f32[64,3], index: 0, kind: input, shape index: {}]   ;;  %s1088_s6 = inlined_call_operand.vmem [shape: f32[12,16], index: 6, kind: input, shape index: {}]   ;;  %s1089_s2 = inlined_call_operand.vmem [shape: f32[8,12], index: 2, kind: input, shape index: {}]   ;;  %s1090_s5 = inlined_call_operand.vmem [shape: f32[3,16], index: 5, kind: input, shape index: {}]   ;;  %s1091_s1 = inlined_call_operand.vmem [shape: f32[8,64], index: 1, kind: input, shape index: {}]   ;;  %s1092_s7 = inlined_call_operand.vmem [shape: f32[3,16], index: 7, kind: input, shape index: {}]   ;;  %s1093_s8 = inlined_call_operand.vmem [shape: f32[48,32], index: 8, kind: input, shape index: {}]   ;;  %s1094_s3 = inlined_call_operand.vmem [shape: f32[8,16], index: 3, kind: input, shape index: {}]   ;;  %s1095_s10 = inlined_call_operand.vmem [shape: f32[32,2], index: 10, kind: input, shape index: {}]   ;;  %s1096_s9 = inlined_call_operand.vmem [shape: f32[3,32], index: 9, kind: input, shape index: {}]   ;;  %s1097_s12 = inlined_call_operand.vmem [shape: f32[8,32], index: 12, kind: output, shape index: {0}]   ;;  %s1098_s11 = inlined_call_operand.vmem [shape: f32[1,2], index: 11, kind: input, shape index: {}]   ;;  %s1099_s13 = inlined_call_operand.vmem [shape: f32[8,2], index: 13, kind: output, shape index: {1}]  }
   0x1   :  { %v51_v0 = vld [vmem:[%s1086_s4] sm:$0x7]  ;;  %v44_v2 = vld [vmem:[%s1087_s0 + $0x8] sm:$0xff]  ;;  %v45_v3 = vld [vmem:[%s1087_s0 + $0x10] sm:$0xff]  ;;  %822 = vmatprep.subr.mxu0 %v863_v9  ;;  %vm864_vm3 = vmmov 0   ;;  %vm294_vm4 = vcmask 97280  }
   0x2   :  { %v43_v1 = vld [vmem:[%s1087_s0] sm:$0xff]  ;;  %789 = vmatprep.subr.msk.mxu1 %vm82_vm0, %v51_v0  ;;  %v46_v4 = vld [vmem:[%s1087_s0 + $0x18] sm:$0xff]  ;;  %v48_v6 = vld [vmem:[%s1087_s0 + $0x28] sm:$0xff]  ;;  %826 = vmatprep.mubr.msk.f32.mxu0 %vm864_vm3, %v863_v9  ;;  %vm200_vm5 = vcmask 523264   ;;  %vm390_vm6 = vcmask 130048   ;;  %vm632_vm7 = vcmask 261120  }
   0x3   :  { %791 = vmatprep.mubr.msk.f32.mxu1 %vm57_vm1, %v43_v1  ;;  %790 = vmatpush3.msk.msra.mxu1 %vm82_vm0, %v51_v0  ;;  %v47_v5 = vld [vmem:[%s1087_s0 + $0x20] sm:$0xff]  ;;  %v49_v7 = vld [vmem:[%s1087_s0 + $0x30] sm:$0xff]  ;;  %v50_v8 = vld [vmem:[%s1087_s0 + $0x38] sm:$0xff]  ;;  %vm718_vm8 = vcmask 15360  }
   0x4   :  { %792 = vmatmul.mubr.msk.f32.vlgmr.msra.gmra.mxu1 %vm57_vm1, %v44_v2  ;;  %803 = vmatprep.subr.mxu1 %v863_v9  ;;  %v288_v10 = vld [vmem:[%s1088_s6 + $0x8] sm:$0xf]  ;;  %v287_v11 = vld [vmem:[%s1088_s6] sm:$0xff]  ;;  %v389_v41 = vld [vmem:[%s1093_s8 + $0x18] sm:$0xff] }
   0x5   :  { %794 = vmatprep.mubr.msk.f32.mxu1 %vm57_vm1, %v45_v3  ;;  %823 = vmatpush3.msk.msra.mxu0 %vm298_vm2, %v288_v10  ;;  %v286_v12 = vld [vmem:[%s1089_s2] sm:$0xff]  ;;  %v388_v45 = vld [vmem:[%s1093_s8 + $0x10] sm:$0xff]  ;;  %v538_v48 = vld [vmem:[%s1093_s8 + $0x28] sm:$0xff] }
   0x6   :  { %824 = vmatprep.subr.mxu0 %v863_v9  ;;  %v728_v19 = vld [vmem:[%s1090_s5] ss:$0 sm:$0xff]  ;;  %v744_v43 = vld [vmem:[%s1092_s7 + $0x1] ss:$0 sm:$0xff]  ;;  %v745_v47 = vld [vmem:[%s1092_s7 + $0x2] ss:$0 sm:$0xff] }
   0x7   :  { %825 = vmatpush3.msra.mxu0 %v287_v11  ;;  %v199_v38 = vld [vmem:[%s1091_s1] sm:$0xff]  ;;  %v387_v58 = vld [vmem:[%s1093_s8 + $0x8] sm:$0xff]  ;;  %v637_v63 = vld [vmem:[%s1095_s10 + $0x18] sm:$0xff] }
   0x8   :  { %795 = vmatmul.mubr.msk.f32.gmra.mxu1 %vm57_vm1, %v46_v4  ;;  %829 = vmatprep.subr.mxu0 %v863_v9  ;;  %v741_v39 = vld [vmem:[%s1092_s7] ss:$0 sm:$0xff]  ;;  %v739_v52 = vld [vmem:[%s1090_s5 + $0x1] ss:$0 sm:$0xff]  ;;  %v740_v54 = vld [vmem:[%s1090_s5 + $0x2] ss:$0 sm:$0xff] }
   0x9   :  { %797 = vmatprep.mubr.msk.f32.mxu1 %vm57_vm1, %v47_v5  ;;  %827 = vmatmul.mubr.msk.f32.vlgmr.msra.gmra.mxu0 %vm294_vm4, %v286_v12  ;;  %v537_v50 = vld [vmem:[%s1093_s8 + $0x20] sm:$0xff]  ;;  %v636_v0 = vld [vmem:[%s1095_s10 + $0x10] sm:$0xff]  ;;  %v635_v1 = vld [vmem:[%s1095_s10 + $0x8] sm:$0xff] }
   0xa   :  { %833 = vmatprep.mubr.msk.f32.mxu0 %vm864_vm3, %v863_v9  ;;  %830 = vmatpush3.msra.mxu0 %v389_v41  ;;  %v386_v59 = vld [vmem:[%s1093_s8] sm:$0xff] }
   0xb   :  { %831 = vmatprep.subr.mxu0 %v863_v9  ;;  %v385_v60 = vld [vmem:[%s1094_s3] sm:$0xff] }
   0xc   :  { %798 = vmatmul.mubr.msk.f32.gmra.mxu1 %vm57_vm1, %v48_v6  ;;  %832 = vmatpush3.msra.mxu0 %v388_v45  ;;  %v634_v2 = vld [vmem:[%s1095_s10] sm:$0xff] }
   0xd   :  { %800 = vmatprep.mubr.msk.f32.mxu1 %vm57_vm1, %v49_v7  ;;  %836 = vmatprep.subr.mxu0 %v863_v9  ;;  %v749_v7 = vld [vmem:[%s1096_s9] ss:$0 sm:$0xff] }
  0x10   :  { %801 = vmatmul.mubr.msk.f32.gmra.mxu1 %vm57_vm1, %v50_v8 }
  0x11   :  { %819 = vmatprep.mubr.msk.f32.mxu1 %vm864_vm3, %v863_v9 }
  0xc4   :  { %v793_v13 = vpop.f32.mrf.mxu1 }
  0xc5   :  { %v158_v32 = vadd.f32 %v793_v13, %v728_v19  ;;  %v751_v13 = vld [vmem:[%s1096_s9 + $0x2] ss:$0 sm:$0xff] }
  0xc6   :  { %v152_v14 = vpop.f32.mrf.mxu1 }
  0xc7   :  { %v153_v34 = vadd.f32 %v728_v19, %v152_v14  ;;  %v192_v36 = vmax.f32 %v158_v32, 0.0 }
  0xc8   :  { %v796_v15 = vpop.f32.mrf.mxu1 }
  0xc9   :  { %v168_v28 = vadd.f32 %v796_v15, %v728_v19  ;;  %v191_v37 = vmax.f32 %v153_v34, 0.0  ;;  %v368_v40 = vpop.f32.mrf.mxu0 }
  0xca   :  { %v162_v16 = vpop.f32.mrf.mxu1  ;;  %v369_v42 = vadd.f32 %v741_v39, %v368_v40 }
  0xcb   :  { %v163_v30 = vadd.f32 %v728_v19, %v162_v16  ;;  %v194_v33 = vmax.f32 %v168_v28, 0.0  ;;  %v828_v44 = vpop.f32.mrf.mxu0  ;;  %v752_v16 = vld [vmem:[%s1098_s11] ss:$0 sm:$0xff] }
  0xcc   :  { %v799_v17 = vpop.f32.mrf.mxu1  ;;  %v372_v46 = vmax.f32 %v369_v42, 0.0 }
  0xcd   :  { %v178_v23 = vadd.f32 %v799_v17, %v728_v19  ;;  %v193_v35 = vmax.f32 %v163_v30, 0.0 }
  0xce   :  { %v172_v18 = vpop.f32.mrf.mxu1  ;;  %v378_v49 = vmul.f32 %v744_v43, %v372_v46 }
  0xcf   :  { %v173_v26 = vadd.f32 %v728_v19, %v172_v18  ;;  %v196_v29 = vmax.f32 %v178_v23, 0.0 }
  0xd0   :  { %v802_v20 = vpop.f32.mrf.mxu1  ;;  %v384_v51 = vadd.f32 %v745_v47, %v378_v49 }
  0xd1   :  { %v188_v21 = vadd.f32 %v802_v20, %v728_v19  ;;  %v195_v31 = vmax.f32 %v173_v26, 0.0 }
  0xd2   :  { %v182_v22 = vpop.f32.mrf.mxu1 }
  0xd3   :  { %v198_v24 = vmax.f32 %v188_v21, 0.0  ;;  %v183_v25 = vadd.f32 %v728_v19, %v182_v22 }
  0xd5   :  { %v197_v27 = vmax.f32 %v183_v25, 0.0  ;;  %804 = vmatpush3.msra.mxu1 %v198_v24 }
  0xd6   :  { %805 = vmatprep.subr.mxu1 %v863_v9 }
  0xd7   :  { %806 = vmatpush3.msra.mxu1 %v197_v27 }
  0xd8   :  { %807 = vmatprep.subr.mxu1 %v863_v9 }
  0xd9   :  { %808 = vmatpush3.msra.mxu1 %v196_v29 }
  0xda   :  { %809 = vmatprep.subr.mxu1 %v863_v9 }
  0xdb   :  { %810 = vmatpush3.msra.mxu1 %v195_v31 }
  0xdc   :  { %811 = vmatprep.subr.mxu1 %v863_v9 }
  0xdd   :  { %812 = vmatpush3.msra.mxu1 %v194_v33 }
  0xde   :  { %813 = vmatprep.subr.mxu1 %v863_v9 }
  0xdf   :  { %814 = vmatpush3.msra.mxu1 %v193_v35 }
  0xe0   :  { %815 = vmatprep.subr.mxu1 %v863_v9 }
  0xe1   :  { %816 = vmatpush3.msra.mxu1 %v192_v36 }
  0xe2   :  { %817 = vmatprep.subr.mxu1 %v863_v9 }
  0xe3   :  { %818 = vmatpush3.msra.mxu1 %v191_v37 }
  0xe4   :  { %820 = vmatmul.mubr.msk.f32.vlgmr.msra.gmra.mxu1 %vm200_vm5, %v199_v38  ;;  %843 = vmatprep.subr.mxu1 %v863_v9 }
  0xe5   :  { %847 = vmatprep.mubr.msk.f32.mxu1 %vm864_vm3, %v863_v9  ;;  %844 = vmatpush3.msra.mxu1 %v538_v48 }
  0xe6   :  { %845 = vmatprep.subr.mxu1 %v863_v9 }
  0xe7   :  { %846 = vmatpush3.msra.mxu1 %v537_v50 }
  0xe8   :  { %848 = vmatmul.mubr.msk.f32.vlgmr.msra.gmra.mxu1 %vm390_vm6, %v384_v51 }
 0x1a4   :  { %v270_v53 = vpop.f32.mrf.mxu1 }
 0x1a5   :  { %v279_v55 = vmul.f32 %v739_v52, %v270_v53 }
 0x1a6   :  { %v821_v56 = vpop.f32.mrf.mxu1 }
 0x1a7   :  { %v285_v57 = vadd.f32 %v740_v54, %v279_v55 }
 0x1a8   :  { %v608_v61 = vpop.f32.mrf.mxu1 }
 0x1a9   :  { %834 = vmatmul.mubr.msk.f32.vlgmr.msra.gmra.mxu0 %vm390_vm6, %v285_v57 }
 0x1aa   :  { %837 = vmatpush3.msra.mxu0 %v387_v58  ;;  %840 = vmatprep.mubr.msk.f32.mxu0 %vm864_vm3, %v863_v9  ;;  %v849_v62 = vpop.f32.mrf.mxu1 }
 0x1ab   :  { %838 = vmatprep.subr.mxu0 %v863_v9 }
 0x1ac   :  { %839 = vmatpush3.msra.mxu0 %v386_v59 }
 0x1ad   :  { %841 = vmatmul.mubr.msk.f32.vlgmr.msra.gmra.mxu0 %vm390_vm6, %v385_v60  ;;  %850 = vmatprep.subr.mxu0 %v863_v9 }
 0x1ae   :  { %858 = vmatprep.mubr.msk.f32.mxu0 %vm864_vm3, %v863_v9  ;;  %851 = vmatpush3.msra.mxu0 %v637_v63 }
 0x1af   :  { %852 = vmatprep.subr.mxu0 %v863_v9 }
 0x1b0   :  { %853 = vmatpush3.msra.mxu0 %v636_v0 }
 0x1b1   :  { %854 = vmatprep.subr.mxu0 %v863_v9 }
 0x1b2   :  { %855 = vmatpush3.msra.mxu0 %v635_v1 }
 0x1b3   :  { %856 = vmatprep.subr.mxu0 %v863_v9  ;;  %v750_v9 = vld [vmem:[%s1096_s9 + $0x1] ss:$0 sm:$0xff] }
 0x1b4   :  { %857 = vmatpush3.msra.mxu0 %v634_v2 }
 0x269   :  { %v460_v3 = vpop.f32.mrf.mxu0 }
 0x26b   :  { %v835_v4 = vpop.f32.mrf.mxu0 }
 0x26d   :  { %v533_v5 = vpop.f32.mrf.mxu0 }
 0x26e   :  { %v534_v6 = vadd.f32 %v533_v5, %v460_v3 }
 0x26f   :  { %v842_v8 = vpop.f32.mrf.mxu0 }
 0x270   :  { %v612_v10 = vadd.f32 %v608_v61, %v534_v6 }
 0x272   :  { %v618_v11 = vadd.f32 %v749_v7, %v612_v10 }
 0x274   :  { %v619_v12 = vmax.f32 %v618_v11, 0.0 }
 0x276   :  { %v625_v14 = vmul.f32 %v750_v9, %v619_v12 }
 0x278   :  { %v631_v15 = vadd.f32 %v751_v13, %v625_v14 }
 0x27a   :  { %633 = vst.msk [vmem:[%s1097_s12] sm:$0xff] %vm632_vm7, %v631_v15  ;;  %859 = vmatmul.mubr.msk.f32.vlgmr.msra.gmra.mxu0 %vm632_vm7, %v631_v15 }
 0x33a   :  { %v714_v17 = vpop.f32.mrf.mxu0 }
 0x33b   :  { %v715_v18 = vadd.f32 %v752_v16, %v714_v17 }
 0x33c   :  { %v860_v19 = vpop.f32.mrf.mxu0 }
 0x33d   :  { %719 = vst.msk [vmem:[%s1099_s13] sm:$0xff] %vm718_vm8, %v715_v18 }

// kernel: tower_forward.22
= control target key start
LH: loop header
LB: loop body
LE: loop exit
PB: predicated region body
PF: predicated region fallthrough
CT: control target
= control target key end

     0   :  { %v201_v0 = vmov 0.0   ;;  %vm202_vm0 = vmmov 0   ;;  %vm144_vm1 = vcmask 523264   ;;  %s270_s1 = inlined_call_operand.vmem [shape: bf16[128,64], index: 1, kind: input, shape index: {}]   ;;  %s271_s0 = inlined_call_operand.vmem [shape: bf16[16,128], index: 0, kind: input, shape index: {}]   ;;  %s272_s2 = inlined_call_operand.vmem [shape: f32[1,64], index: 2, kind: input, shape index: {}]   ;;  %s273_s3 = inlined_call_operand.vmem [shape: f32[16,64], index: 3, kind: input, shape index: {}]   ;;  %s274_s4 = inlined_call_operand.vmem [shape: f32[16,64], index: 4, kind: output, shape index: {}]  }
   0x1   :  { %170 = vmatprep.subr.bf16.mxu0 %v201_v0  ;;  %v192_v1 = vld [vmem:[%s270_s1 + $0x38] sm:$0xff]   ;;  %186 = vmatprep.mubr.msk.bf16.mxu0 %vm202_vm0, %v201_v0  ;;  %v193_v2 = vld [vmem:[%s270_s1 + $0x30] sm:$0xff]   ;;  %v194_v3 = vld [vmem:[%s270_s1 + $0x28] sm:$0xff]  }
   0x2   :  { %171 = vmatpush3.bf16.msra.mxu0 %v192_v1  ;;  %v195_v4 = vld [vmem:[%s270_s1 + $0x20] sm:$0xff]   ;;  %v196_v5 = vld [vmem:[%s270_s1 + $0x18] sm:$0xff]   ;;  %v197_v6 = vld [vmem:[%s270_s1 + $0x10] sm:$0xff]  }
   0x3   :  { %172 = vmatprep.subr.bf16.mxu0 %v201_v0  ;;  %v198_v7 = vld [vmem:[%s270_s1 + $0x8] sm:$0xff]   ;;  %v199_v8 = vld [vmem:[%s270_s1] sm:$0xff]  }
   0x4   :  { %v200_v9 = vld [vmem:[%s271_s0] sm:$0xff]   ;;  %v139_v17 = vld [vmem:[%s273_s3 + $0x8] sm:$0xff] }
   0x5   :  { %v151_v10 = vld [vmem:[%s272_s2] ss:$0 sm:$0xff] }
   0x6   :  { %173 = vmatpush3.bf16.msra.mxu0 %v193_v2  ;;  %v138_v12 = vld [vmem:[%s273_s3] sm:$0xff] }
   0x7   :  { %174 = vmatprep.subr.bf16.mxu0 %v201_v0 }
   0xa   :  { %175 = vmatpush3.bf16.msra.mxu0 %v194_v3 }
   0xb   :  { %176 = vmatprep.subr.bf16.mxu0 %v201_v0 }
   0xe   :  { %177 = vmatpush3.bf16.msra.mxu0 %v195_v4 }
   0xf   :  { %178 = vmatprep.subr.bf16.mxu0 %v201_v0 }
  0x12   :  { %179 = vmatpush3.bf16.msra.mxu0 %v196_v5 }
  0x13   :  { %180 = vmatprep.subr.bf16.mxu0 %v201_v0 }
  0x16   :  { %181 = vmatpush3.bf16.msra.mxu0 %v197_v6 }
  0x17   :  { %182 = vmatprep.subr.bf16.mxu0 %v201_v0 }
  0x1a   :  { %183 = vmatpush3.bf16.msra.mxu0 %v198_v7 }
  0x1b   :  { %184 = vmatprep.subr.bf16.mxu0 %v201_v0 }
  0x1e   :  { %185 = vmatpush3.bf16.msra.mxu0 %v199_v8 }
  0x21   :  { %187 = vmatmul.mubr.bf16.vlgmr.msra.gmra.mxu0 %v200_v9 }
  0xe1   :  { %v131_v11 = vpop.f32.mrf.mxu0 }
  0xe2   :  { %v132_v13 = vadd.f32 %v151_v10, %v131_v11 }
  0xe3   :  { %v188_v14 = vpop.f32.mrf.mxu0 }
  0xe4   :  { %v140_v15 = vadd.f32 %v138_v12, %v132_v13 }
  0xe5   :  { %v134_v16 = vpop.f32.mrf.mxu0 }
  0xe6   :  { %v142_v18 = vmax.f32 %v140_v15, 0.0  ;;  %v135_v19 = vadd.f32 %v151_v10, %v134_v16 }
  0xe7   :  { %v189_v20 = vpop.f32.mrf.mxu0 }
  0xe8   :  { %145 = vst.msk [vmem:[%s274_s4] sm:$0xff] %vm144_vm1, %v142_v18  ;;  %v141_v21 = vadd.f32 %v139_v17, %v135_v19 }
  0xea   :  { %v143_v22 = vmax.f32 %v141_v21, 0.0 }
  0xec   :  { %146 = vst.msk [vmem:[%s274_s4 + $0x8] sm:$0xff] %vm144_vm1, %v143_v22 }

// kernel: tower_forward.23
= control target key start
LH: loop header
LB: loop body
LE: loop exit
PB: predicated region body
PF: predicated region fallthrough
CT: control target
= control target key end

     0   :  { %v152_v0 = vmov 0.0   ;;  %vm153_vm0 = vmmov 0   ;;  %vm64_vm1 = vcmask 523264   ;;  %s212_s1 = inlined_call_operand.vmem [shape: bf16[64,64], index: 1, kind: input, shape index: {}]   ;;  %s213_s0 = inlined_call_operand.vmem [shape: bf16[16,64], index: 0, kind: input, shape index: {}]   ;;  %s214_s2 = inlined_call_operand.vmem [shape: f32[1,64], index: 2, kind: input, shape index: {}]   ;;  %s215_s3 = inlined_call_operand.vmem [shape: f32[16,64], index: 3, kind: input, shape index: {}]   ;;  %s216_s4 = inlined_call_operand.vmem [shape: f32[16,64], index: 4, kind: output, shape index: {}]  }
   0x1   :  { %133 = vmatprep.subr.bf16.mxu0 %v152_v0  ;;  %v147_v1 = vld [vmem:[%s212_s1 + $0x18] sm:$0xff]   ;;  %141 = vmatprep.mubr.msk.bf16.mxu0 %vm153_vm0, %v152_v0  ;;  %v148_v2 = vld [vmem:[%s212_s1 + $0x10] sm:$0xff]   ;;  %v149_v3 = vld [vmem:[%s212_s1 + $0x8] sm:$0xff]  }
   0x2   :  { %134 = vmatpush3.bf16.msra.mxu0 %v147_v1  ;;  %v150_v4 = vld [vmem:[%s212_s1] sm:$0xff]   ;;  %v110_v13 = vld [vmem:[%s215_s3 + $0x8] sm:$0xff] }
   0x3   :  { %135 = vmatprep.subr.bf16.mxu0 %v152_v0  ;;  %v151_v5 = vld [vmem:[%s213_s0] sm:$0xff]  }
   0x4   :  { %v121_v6 = vld [vmem:[%s214_s2] ss:$0 sm:$0xff] }
   0x5   :  { %v109_v8 = vld [vmem:[%s215_s3] sm:$0xff] }
   0x6   :  { %136 = vmatpush3.bf16.msra.mxu0 %v148_v2 }
   0x7   :  { %137 = vmatprep.subr.bf16.mxu0 %v152_v0 }
   0xa   :  { %138 = vmatpush3.bf16.msra.mxu0 %v149_v3 }
   0xb   :  { %139 = vmatprep.subr.bf16.mxu0 %v152_v0 }
   0xe   :  { %140 = vmatpush3.bf16.msra.mxu0 %v150_v4 }
  0x11   :  { %142 = vmatmul.mubr.msk.bf16.vlgmr.msra.gmra.mxu0 %vm64_vm1, %v151_v5 }
  0xd1   :  { %v102_v7 = vpop.f32.mrf.mxu0 }
  0xd2   :  { %v103_v9 = vadd.f32 %v121_v6, %v102_v7 }
  0xd3   :  { %v143_v10 = vpop.f32.mrf.mxu0 }
  0xd4   :  { %v111_v11 = vadd.f32 %v109_v8, %v103_v9 }
  0xd5   :  { %v105_v12 = vpop.f32.mrf.mxu0 }
  0xd6   :  { %v113_v14 = vmax.f32 %v111_v11, 0.0  ;;  %v106_v15 = vadd.f32 %v121_v6, %v105_v12 }
  0xd7   :  { %v144_v16 = vpop.f32.mrf.mxu0 }
  0xd8   :  { %115 = vst.msk [vmem:[%s216_s4] sm:$0xff] %vm64_vm1, %v113_v14  ;;  %v112_v17 = vadd.f32 %v110_v13, %v106_v15 }
  0xda   :  { %v114_v18 = vmax.f32 %v112_v17, 0.0 }
  0xdc   :  { %116 = vst.msk [vmem:[%s216_s4 + $0x8] sm:$0xff] %vm64_vm1, %v114_v18 }

// kernel: tower_forward.24
= control target key start
LH: loop header
LB: loop body
LE: loop exit
PB: predicated region body
PF: predicated region fallthrough
CT: control target
= control target key end

     0   :  { %vm71_vm0 = vcmask 523264   ;;  %s256_s1 = inlined_call_operand.vmem [shape: bf16[64,64], index: 1, kind: input, shape index: {}]   ;;  %s257_s0 = inlined_call_operand.vmem [shape: bf16[32,64], index: 0, kind: input, shape index: {}]   ;;  %s258_s2 = inlined_call_operand.vmem [shape: f32[1,64], index: 2, kind: input, shape index: {}]   ;;  %s259_s3 = inlined_call_operand.vmem [shape: f32[32,64], index: 3, kind: input, shape index: {}]   ;;  %s260_s4 = inlined_call_operand.vmem [shape: f32[32,64], index: 4, kind: output, shape index: {}]  }
   0x1   :  { %v174_v0 = vld [vmem:[%s256_s1 + $0x18] sm:$0xff]   ;;  %v175_v1 = vld [vmem:[%s256_s1 + $0x10] sm:$0xff]   ;;  %v176_v2 = vld [vmem:[%s256_s1 + $0x8] sm:$0xff]  }
   0x2   :  { %162 = vmatprep.subr.bf16.mxu0 %v174_v0  ;;  %v178_v3 = vld [vmem:[%s257_s0] sm:$0xff]   ;;  %v179_v5 = vld [vmem:[%s257_s0 + $0x8] sm:$0xff]   ;;  %v129_v8 = vld [vmem:[%s259_s3 + $0x10] sm:$0xff] }
   0x3   :  { %163 = vmatpush3.bf16.msra.mxu0 %v174_v0  ;;  %170 = vmatprep.mubr.msk.bf16.mxu0 %vm71_vm0, %v178_v3  ;;  %v177_v4 = vld [vmem:[%s256_s1] sm:$0xff]   ;;  %v130_v15 = vld [vmem:[%s259_s3 + $0x18] sm:$0xff]  ;;  %v128_v20 = vld [vmem:[%s259_s3 + $0x8] sm:$0xff] }
   0x4   :  { %164 = vmatprep.subr.bf16.mxu0 %v175_v1  ;;  %v147_v6 = vld [vmem:[%s258_s2] ss:$0 sm:$0xff] }
   0x5   :  { %v127_v11 = vld [vmem:[%s259_s3] sm:$0xff] }
   0x7   :  { %165 = vmatpush3.bf16.msra.mxu0 %v175_v1 }
   0x8   :  { %166 = vmatprep.subr.bf16.mxu0 %v176_v2 }
   0xb   :  { %167 = vmatpush3.bf16.msra.mxu0 %v176_v2 }
   0xc   :  { %168 = vmatprep.subr.bf16.mxu0 %v177_v4 }
   0xf   :  { %169 = vmatpush3.bf16.msra.mxu0 %v177_v4 }
  0x12   :  { %171 = vmatmul.mubr.msk.bf16.vlgmr.msra.gmra.mxu0 %vm71_vm0, %v179_v5 }
  0xd2   :  { %v172_v7 = vpop.f32.mrf.mxu0 }
  0xd3   :  { %v121_v9 = vadd.f32 %v172_v7, %v147_v6 }
  0xd4   :  { %v112_v10 = vpop.f32.mrf.mxu0 }
  0xd5   :  { %v133_v12 = vadd.f32 %v129_v8, %v121_v9  ;;  %v113_v13 = vadd.f32 %v147_v6, %v112_v10 }
  0xd6   :  { %v173_v14 = vpop.f32.mrf.mxu0 }
  0xd7   :  { %v137_v16 = vmax.f32 %v133_v12, 0.0  ;;  %v131_v17 = vadd.f32 %v127_v11, %v113_v13  ;;  %v124_v18 = vadd.f32 %v173_v14, %v147_v6 }
  0xd8   :  { %v115_v19 = vpop.f32.mrf.mxu0 }
  0xd9   :  { %141 = vst.msk [vmem:[%s260_s4 + $0x10] sm:$0xff] %vm71_vm0, %v137_v16  ;;  %v135_v21 = vmax.f32 %v131_v17, 0.0  ;;  %v134_v22 = vadd.f32 %v130_v15, %v124_v18  ;;  %v116_v23 = vadd.f32 %v147_v6, %v115_v19 }
  0xdb   :  { %139 = vst.msk [vmem:[%s260_s4] sm:$0xff] %vm71_vm0, %v135_v21  ;;  %v138_v24 = vmax.f32 %v134_v22, 0.0  ;;  %v132_v25 = vadd.f32 %v128_v20, %v116_v23 }
  0xdd   :  { %142 = vst.msk [vmem:[%s260_s4 + $0x18] sm:$0xff] %vm71_vm0, %v138_v24  ;;  %v136_v26 = vmax.f32 %v132_v25, 0.0 }
  0xdf   :  { %140 = vst.msk [vmem:[%s260_s4 + $0x8] sm:$0xff] %vm71_vm0, %v136_v26 }

// kernel: tower_forward.25
= control target key start
LH: loop header
LB: loop body
LE: loop exit
PB: predicated region body
PF: predicated region fallthrough
CT: control target
= control target key end

     0   :  { %vm113_vm0 = vcmask 523264   ;;  %s582_s1 = inlined_call_operand.vmem [shape: bf16[64,64], index: 1, kind: input, shape index: {}]   ;;  %s583_s0 = inlined_call_operand.vmem [shape: bf16[128,64], index: 0, kind: input, shape index: {}]   ;;  %s584_s2 = inlined_call_operand.vmem [shape: f32[1,64], index: 2, kind: input, shape index: {}]   ;;  %s585_s3 = inlined_call_operand.vmem [shape: f32[128,64], index: 3, kind: input, shape index: {}]   ;;  %s586_s4 = inlined_call_operand.vmem [shape: f32[128,64], index: 4, kind: output, shape index: {}]  }
   0x1   :  { %v368_v0 = vld [vmem:[%s582_s1 + $0x18] sm:$0xff]   ;;  %v369_v1 = vld [vmem:[%s582_s1 + $0x10] sm:$0xff]   ;;  %v370_v2 = vld [vmem:[%s582_s1 + $0x8] sm:$0xff]  }
   0x2   :  { %336 = vmatprep.subr.bf16.mxu0 %v368_v0  ;;  %360 = vmatprep.subr.bf16.mxu1 %v368_v0  ;;  %v372_v3 = vld [vmem:[%s583_s0] sm:$0xff]   ;;  %v374_v6 = vld [vmem:[%s583_s0 + $0x8] sm:$0xff]   ;;  %v376_v8 = vld [vmem:[%s583_s0 + $0x10] sm:$0xff]  }
   0x3   :  { %337 = vmatpush3.bf16.msra.mxu0 %v368_v0  ;;  %364 = vmatpush3.bf16.msra.mxu1 %v368_v0  ;;  %v373_v4 = vld [vmem:[%s583_s0 + $0x20] sm:$0xff]   ;;  %v375_v7 = vld [vmem:[%s583_s0 + $0x28] sm:$0xff]   ;;  %v377_v9 = vld [vmem:[%s583_s0 + $0x30] sm:$0xff]  }
   0x4   :  { %338 = vmatprep.subr.bf16.mxu0 %v369_v1  ;;  %361 = vmatprep.subr.bf16.mxu1 %v369_v1  ;;  %v371_v5 = vld [vmem:[%s582_s1] sm:$0xff]   ;;  %v378_v10 = vld [vmem:[%s583_s0 + $0x18] sm:$0xff]   ;;  %v237_v14 = vld [vmem:[%s585_s3 + $0x10] sm:$0xff] }
   0x5   :  { %344 = vmatprep.mubr.msk.bf16.mxu0 %vm113_vm0, %v372_v3  ;;  %352 = vmatprep.mubr.msk.bf16.mxu1 %vm113_vm0, %v373_v4  ;;  %v379_v11 = vld [vmem:[%s583_s0 + $0x38] sm:$0xff]   ;;  %v452_v12 = vld [vmem:[%s584_s2] ss:$0 sm:$0xff]  ;;  %v245_v16 = vld [vmem:[%s585_s3 + $0x50] sm:$0xff] }
   0x6   :  { %v235_v20 = vld [vmem:[%s585_s3] sm:$0xff]  ;;  %v238_v33 = vld [vmem:[%s585_s3 + $0x18] sm:$0xff]  ;;  %v236_v38 = vld [vmem:[%s585_s3 + $0x8] sm:$0xff] }
   0x7   :  { %339 = vmatpush3.bf16.msra.mxu0 %v369_v1  ;;  %365 = vmatpush3.bf16.msra.mxu1 %v369_v1  ;;  %v243_v22 = vld [vmem:[%s585_s3 + $0x40] sm:$0xff]  ;;  %v246_v34 = vld [vmem:[%s585_s3 + $0x58] sm:$0xff]  ;;  %v244_v40 = vld [vmem:[%s585_s3 + $0x48] sm:$0xff] }
   0x8   :  { %340 = vmatprep.subr.bf16.mxu0 %v370_v2  ;;  %362 = vmatprep.subr.bf16.mxu1 %v370_v2  ;;  %v241_v48 = vld [vmem:[%s585_s3 + $0x30] sm:$0xff]  ;;  %v239_v63 = vld [vmem:[%s585_s3 + $0x20] sm:$0xff]  ;;  %v242_v4 = vld [vmem:[%s585_s3 + $0x38] sm:$0xff] }
   0x9   :  { %v249_v50 = vld [vmem:[%s585_s3 + $0x70] sm:$0xff]  ;;  %v247_v0 = vld [vmem:[%s585_s3 + $0x60] sm:$0xff] }
   0xb   :  { %341 = vmatpush3.bf16.msra.mxu0 %v370_v2  ;;  %366 = vmatpush3.bf16.msra.mxu1 %v370_v2 }
   0xc   :  { %342 = vmatprep.subr.bf16.mxu0 %v371_v5  ;;  %363 = vmatprep.subr.bf16.mxu1 %v371_v5 }
   0xf   :  { %343 = vmatpush3.bf16.msra.mxu0 %v371_v5  ;;  %367 = vmatpush3.bf16.msra.mxu1 %v371_v5 }
  0x12   :  { %345 = vmatmul.mubr.msk.bf16.vlgmr.msra.gmra.mxu0 %vm113_vm0, %v374_v6  ;;  %353 = vmatmul.mubr.msk.bf16.vlgmr.msra.gmra.mxu1 %vm113_vm0, %v375_v7  ;;  %v250_v6 = vld [vmem:[%s585_s3 + $0x78] sm:$0xff] }
  0x13   :  { %348 = vmatprep.mubr.msk.bf16.mxu0 %vm113_vm0, %v376_v8  ;;  %356 = vmatprep.mubr.msk.bf16.mxu1 %vm113_vm0, %v377_v9 }
  0x1a   :  { %349 = vmatmul.mubr.msk.bf16.gmra.mxu0 %vm113_vm0, %v378_v10  ;;  %357 = vmatmul.mubr.msk.bf16.gmra.mxu1 %vm113_vm0, %v379_v11 }
  0xd2   :  { %v346_v13 = vpop.f32.mrf.mxu0  ;;  %v354_v15 = vpop.f32.mrf.mxu1 }
  0xd3   :  { %v181_v17 = vadd.f32 %v346_v13, %v452_v12  ;;  %v213_v18 = vadd.f32 %v354_v15, %v452_v12  ;;  %v240_v15 = vld [vmem:[%s585_s3 + $0x28] sm:$0xff] }
  0xd4   :  { %v172_v19 = vpop.f32.mrf.mxu0  ;;  %v204_v21 = vpop.f32.mrf.mxu1 }
  0xd5   :  { %v253_v23 = vadd.f32 %v237_v14, %v181_v17  ;;  %v261_v24 = vadd.f32 %v245_v16, %v213_v18  ;;  %v173_v25 = vadd.f32 %v452_v12, %v172_v19  ;;  %v205_v26 = vadd.f32 %v452_v12, %v204_v21  ;;  %v248_v17 = vld [vmem:[%s585_s3 + $0x68] sm:$0xff] }
  0xd6   :  { %v347_v27 = vpop.f32.mrf.mxu0  ;;  %v355_v28 = vpop.f32.mrf.mxu1 }
  0xd7   :  { %v269_v29 = vmax.f32 %v253_v23, 0.0  ;;  %v277_v30 = vmax.f32 %v261_v24, 0.0  ;;  %v251_v31 = vadd.f32 %v235_v20, %v173_v25  ;;  %v259_v32 = vadd.f32 %v243_v22, %v205_v26 }
  0xd8   :  { %v184_v35 = vadd.f32 %v347_v27, %v452_v12  ;;  %v216_v36 = vadd.f32 %v355_v28, %v452_v12  ;;  %v175_v37 = vpop.f32.mrf.mxu0  ;;  %v207_v39 = vpop.f32.mrf.mxu1 }
  0xd9   :  { %285 = vst.msk [vmem:[%s586_s4 + $0x10] sm:$0xff] %vm113_vm0, %v269_v29  ;;  %293 = vst.msk [vmem:[%s586_s4 + $0x50] sm:$0xff] %vm113_vm0, %v277_v30  ;;  %v267_v41 = vmax.f32 %v251_v31, 0.0  ;;  %v275_v42 = vmax.f32 %v259_v32, 0.0  ;;  %v176_v43 = vadd.f32 %v452_v12, %v175_v37  ;;  %v208_v44 = vadd.f32 %v452_v12, %v207_v39 }
  0xda   :  { %v254_v45 = vadd.f32 %v238_v33, %v184_v35  ;;  %v262_v46 = vadd.f32 %v246_v34, %v216_v36  ;;  %v350_v47 = vpop.f32.mrf.mxu0  ;;  %v358_v49 = vpop.f32.mrf.mxu1 }
  0xdb   :  { %283 = vst.msk [vmem:[%s586_s4] sm:$0xff] %vm113_vm0, %v267_v41  ;;  %291 = vst.msk [vmem:[%s586_s4 + $0x40] sm:$0xff] %vm113_vm0, %v275_v42  ;;  %v252_v51 = vadd.f32 %v236_v38, %v176_v43  ;;  %v260_v52 = vadd.f32 %v244_v40, %v208_v44  ;;  %v197_v53 = vadd.f32 %v350_v47, %v452_v12 }
  0xdc   :  { %v229_v54 = vadd.f32 %v358_v49, %v452_v12  ;;  %v270_v55 = vmax.f32 %v254_v45, 0.0  ;;  %v278_v56 = vmax.f32 %v262_v46, 0.0  ;;  %v188_v57 = vpop.f32.mrf.mxu0  ;;  %v220_v58 = vpop.f32.mrf.mxu1 }
  0xdd   :  { %v268_v59 = vmax.f32 %v252_v51, 0.0  ;;  %v276_v60 = vmax.f32 %v260_v52, 0.0  ;;  %v257_v61 = vadd.f32 %v241_v48, %v197_v53  ;;  %v189_v1 = vadd.f32 %v452_v12, %v188_v57 }
  0xde   :  { %v265_v62 = vadd.f32 %v249_v50, %v229_v54  ;;  %286 = vst.msk [vmem:[%s586_s4 + $0x18] sm:$0xff] %vm113_vm0, %v270_v55  ;;  %294 = vst.msk [vmem:[%s586_s4 + $0x58] sm:$0xff] %vm113_vm0, %v278_v56  ;;  %v221_v2 = vadd.f32 %v452_v12, %v220_v58  ;;  %v351_v3 = vpop.f32.mrf.mxu0  ;;  %v359_v5 = vpop.f32.mrf.mxu1 }
  0xdf   :  { %284 = vst.msk [vmem:[%s586_s4 + $0x8] sm:$0xff] %vm113_vm0, %v268_v59  ;;  %292 = vst.msk [vmem:[%s586_s4 + $0x48] sm:$0xff] %vm113_vm0, %v276_v60  ;;  %v273_v7 = vmax.f32 %v257_v61, 0.0  ;;  %v200_v9 = vadd.f32 %v351_v3, %v452_v12  ;;  %v232_v10 = vadd.f32 %v359_v5, %v452_v12  ;;  %v255_v11 = vadd.f32 %v239_v63, %v189_v1 }
  0xe0   :  { %v281_v8 = vmax.f32 %v265_v62, 0.0  ;;  %v263_v13 = vadd.f32 %v247_v0, %v221_v2  ;;  %v191_v14 = vpop.f32.mrf.mxu0  ;;  %v223_v16 = vpop.f32.mrf.mxu1 }
  0xe1   :  { %289 = vst.msk [vmem:[%s586_s4 + $0x30] sm:$0xff] %vm113_vm0, %v273_v7  ;;  %v258_v18 = vadd.f32 %v242_v4, %v200_v9  ;;  %v266_v19 = vadd.f32 %v250_v6, %v232_v10  ;;  %v192_v20 = vadd.f32 %v452_v12, %v191_v14  ;;  %v224_v21 = vadd.f32 %v452_v12, %v223_v16 }
  0xe2   :  { %297 = vst.msk [vmem:[%s586_s4 + $0x70] sm:$0xff] %vm113_vm0, %v281_v8  ;;  %v271_v22 = vmax.f32 %v255_v11, 0.0  ;;  %v279_v23 = vmax.f32 %v263_v13, 0.0 }
  0xe3   :  { %v274_v24 = vmax.f32 %v258_v18, 0.0  ;;  %v282_v25 = vmax.f32 %v266_v19, 0.0  ;;  %v256_v26 = vadd.f32 %v240_v15, %v192_v20  ;;  %v264_v27 = vadd.f32 %v248_v17, %v224_v21 }
  0xe4   :  { %287 = vst.msk [vmem:[%s586_s4 + $0x20] sm:$0xff] %vm113_vm0, %v271_v22  ;;  %295 = vst.msk [vmem:[%s586_s4 + $0x60] sm:$0xff] %vm113_vm0, %v279_v23 }
  0xe5   :  { %290 = vst.msk [vmem:[%s586_s4 + $0x38] sm:$0xff] %vm113_vm0, %v274_v24  ;;  %298 = vst.msk [vmem:[%s586_s4 + $0x78] sm:$0xff] %vm113_vm0, %v282_v25  ;;  %v272_v12 = vmax.f32 %v256_v26, 0.0  ;;  %v280_v28 = vmax.f32 %v264_v27, 0.0 }
  0xe7   :  { %288 = vst.msk [vmem:[%s586_s4 + $0x28] sm:$0xff] %vm113_vm0, %v272_v12  ;;  %296 = vst.msk [vmem:[%s586_s4 + $0x68] sm:$0xff] %vm113_vm0, %v280_v28 }

// kernel: tower_forward.26
= control target key start
LH: loop header
LB: loop body
LE: loop exit
PB: predicated region body
PF: predicated region fallthrough
CT: control target
= control target key end

     0   :  { %s960_s15 = smov 0   ;;  %s1167_s0 = inlined_call_operand.vmem [shape: bf16[512,64], index: 0, kind: input, shape index: {}]   ;;  %s1168_s1 = inlined_call_operand.vmem [shape: bf16[64,64], index: 1, kind: input, shape index: {}]   ;;  %s1169_s2 = inlined_call_operand.vmem [shape: f32[1,64], index: 2, kind: input, shape index: {}]   ;;  %s1170_s3 = inlined_call_operand.vmem [shape: f32[512,64], index: 3, kind: input, shape index: {}]   ;;  %s1171_s4 = inlined_call_operand.vmem [shape: f32[512,64], index: 4, kind: output, shape index: {}]  }
   0x1 LB: > { %s781_s16 = sadd.s32 4294967295, %s933_s15   ;;  %p785_p0 = scmp.ge.s32.totalorder %s933_s15, 1  ;;  %s933_s15 = sphi %s960_s15, %s14_s15  }
   0x2   : > { %p174_p1 = scmp.lt.s32.totalorder %s933_s15, 3 }
   0x4   : > { %p175_p2 = pnand %p785_p0, %p174_p1 }
   0x5   : > { %s786_s19 = sshll.u32 (!%p175_p2), %s781_s16, 5 }
   0x6   : > { %178 = sbr.rel (%p175_p2) target bundleno = 258 (0x102), region = 36  ;;  %p206_p3 = scmp.lt.s32.totalorder (!%p175_p2), %s786_s19, 63 }
   0xb   : > { %v907_v0 = vld [vmem:[%s1168_s1 + $0x18] sm:$0xff]   ;;  %v908_v1 = vld [vmem:[%s1168_s1 + $0x10] sm:$0xff]   ;;  %s1173_s19 = smov (!%p206_p3, %s786_s19), 63  ;;  %v909_v2 = vld [vmem:[%s1168_s1 + $0x8] sm:$0xff]   ;;  %vm375_vm0 = vcmask 523264  }
   0xc   : > { %851 = vmatprep.subr.bf16.mxu0 %v907_v0  ;;  %891 = vmatprep.subr.bf16.mxu1 %v907_v0  ;;  %s787_s24 = sshll.u32 %s1173_s19, 2  ;;  %v910_v3 = vld [vmem:[%s1168_s1] sm:$0xff]   ;;  %s789_s30 = sshll.u32 %s1173_s19, 3 }
   0xd   : > { %852 = vmatpush3.bf16.msra.mxu0 %v907_v0  ;;  %895 = vmatpush3.bf16.msra.mxu1 %v907_v0  ;;  %s986_s29 = scalar_lea.vmem %s1167_s0, %s787_s24  ;;  %s1024_s7 = scalar_lea.vmem %s1170_s3, %s789_s30  ;;  %v1029_v20 = vld [vmem:[%s1169_s2] ss:$0 sm:$0xff] }
   0xe   : > { %853 = vmatprep.subr.bf16.mxu0 %v908_v1  ;;  %892 = vmatprep.subr.bf16.mxu1 %v908_v1  ;;  %v911_v4 = vld [vmem:[%s986_s29] sm:$0xff]   ;;  %v913_v6 = vld [vmem:[%s986_s29 + $0x8] sm:$0xff]   ;;  %v915_v8 = vld [vmem:[%s986_s29 + $0x10] sm:$0xff]   ;;  %s1042_s12 = scalar_lea.vmem %s1171_s4, %s789_s30 }
   0xf   : > { %v912_v5 = vld [vmem:[%s986_s29 + $0x40] sm:$0xff]   ;;  %859 = vmatprep.mubr.msk.bf16.mxu0 %vm375_vm0, %v911_v4  ;;  %v914_v7 = vld [vmem:[%s986_s29 + $0x48] sm:$0xff]   ;;  %v916_v9 = vld [vmem:[%s986_s29 + $0x50] sm:$0xff]  }
  0x10   : > { %875 = vmatprep.mubr.msk.bf16.mxu1 %vm375_vm0, %v912_v5  ;;  %v917_v10 = vld [vmem:[%s986_s29 + $0x18] sm:$0xff]   ;;  %v919_v12 = vld [vmem:[%s986_s29 + $0x20] sm:$0xff]   ;;  %v921_v14 = vld [vmem:[%s986_s29 + $0x28] sm:$0xff]  }
  0x11   : > { %854 = vmatpush3.bf16.msra.mxu0 %v908_v1  ;;  %896 = vmatpush3.bf16.msra.mxu1 %v908_v1  ;;  %v918_v11 = vld [vmem:[%s986_s29 + $0x58] sm:$0xff]   ;;  %v920_v13 = vld [vmem:[%s986_s29 + $0x60] sm:$0xff]   ;;  %v922_v15 = vld [vmem:[%s986_s29 + $0x68] sm:$0xff]  }
  0x12   : > { %855 = vmatprep.subr.bf16.mxu0 %v909_v2  ;;  %893 = vmatprep.subr.bf16.mxu1 %v909_v2  ;;  %v923_v16 = vld [vmem:[%s986_s29 + $0x30] sm:$0xff]   ;;  %v925_v18 = vld [vmem:[%s986_s29 + $0x38] sm:$0xff]   ;;  %v585_v28 = vld [vmem:[%s1024_s7] sm:$0xff] }
  0x13   : > { %v924_v17 = vld [vmem:[%s986_s29 + $0x70] sm:$0xff]   ;;  %v926_v19 = vld [vmem:[%s986_s29 + $0x78] sm:$0xff]   ;;  %v601_v30 = vld [vmem:[%s1024_s7 + $0x80] sm:$0xff] }
  0x14   : > { %v587_v22 = vld [vmem:[%s1024_s7 + $0x10] sm:$0xff]  ;;  %v588_v41 = vld [vmem:[%s1024_s7 + $0x18] sm:$0xff]  ;;  %v586_v46 = vld [vmem:[%s1024_s7 + $0x8] sm:$0xff] }
  0x15   : > { %856 = vmatpush3.bf16.msra.mxu0 %v909_v2  ;;  %897 = vmatpush3.bf16.msra.mxu1 %v909_v2  ;;  %v603_v24 = vld [vmem:[%s1024_s7 + $0x90] sm:$0xff]  ;;  %v604_v42 = vld [vmem:[%s1024_s7 + $0x98] sm:$0xff]  ;;  %v602_v48 = vld [vmem:[%s1024_s7 + $0x88] sm:$0xff] }
  0x16   : > { %857 = vmatprep.subr.bf16.mxu0 %v910_v3  ;;  %894 = vmatprep.subr.bf16.mxu1 %v910_v3  ;;  %v591_v56 = vld [vmem:[%s1024_s7 + $0x30] sm:$0xff] }
  0x17   : > { %v607_v58 = vld [vmem:[%s1024_s7 + $0xb0] sm:$0xff] }
  0x19   : > { %858 = vmatpush3.bf16.msra.mxu0 %v910_v3  ;;  %898 = vmatpush3.bf16.msra.mxu1 %v910_v3 }
  0x1c   : > { %860 = vmatmul.mubr.msk.bf16.vlgmr.msra.gmra.mxu0 %vm375_vm0, %v913_v6  ;;  %876 = vmatmul.mubr.msk.bf16.vlgmr.msra.gmra.mxu1 %vm375_vm0, %v914_v7  ;;  %v589_v7 = vld [vmem:[%s1024_s7 + $0x20] sm:$0xff] }
  0x1d   : > { %863 = vmatprep.mubr.msk.bf16.mxu0 %vm375_vm0, %v915_v8  ;;  %879 = vmatprep.mubr.msk.bf16.mxu1 %vm375_vm0, %v916_v9  ;;  %v605_v8 = vld [vmem:[%s1024_s7 + $0xa0] sm:$0xff] }
  0x24   : > { %864 = vmatmul.mubr.msk.bf16.gmra.mxu0 %vm375_vm0, %v917_v10  ;;  %880 = vmatmul.mubr.msk.bf16.gmra.mxu1 %vm375_vm0, %v918_v11 }
  0x25   : > { %867 = vmatprep.mubr.msk.bf16.mxu0 %vm375_vm0, %v919_v12  ;;  %883 = vmatprep.mubr.msk.bf16.mxu1 %vm375_vm0, %v920_v13  ;;  %v592_v12 = vld [vmem:[%s1024_s7 + $0x38] sm:$0xff] }
  0x2c   : > { %868 = vmatmul.mubr.msk.bf16.gmra.mxu0 %vm375_vm0, %v921_v14  ;;  %884 = vmatmul.mubr.msk.bf16.gmra.mxu1 %vm375_vm0, %v922_v15  ;;  %v608_v14 = vld [vmem:[%s1024_s7 + $0xb8] sm:$0xff] }
  0x2d   : > { %871 = vmatprep.mubr.msk.bf16.mxu0 %vm375_vm0, %v923_v16  ;;  %887 = vmatprep.mubr.msk.bf16.mxu1 %vm375_vm0, %v924_v17 }
  0x34   : > { %872 = vmatmul.mubr.msk.bf16.gmra.mxu0 %vm375_vm0, %v925_v18  ;;  %888 = vmatmul.mubr.msk.bf16.gmra.mxu1 %vm375_vm0, %v926_v19 }
  0xdc   : > { %v861_v21 = vpop.f32.mrf.mxu0  ;;  %v877_v23 = vpop.f32.mrf.mxu1 }
  0xdd   : > { %v467_v25 = vadd.f32 %v861_v21, %v1029_v20  ;;  %v531_v26 = vadd.f32 %v877_v23, %v1029_v20  ;;  %v590_v23 = vld [vmem:[%s1024_s7 + $0x28] sm:$0xff] }
  0xde   : > { %v458_v27 = vpop.f32.mrf.mxu0  ;;  %v522_v29 = vpop.f32.mrf.mxu1 }
  0xdf   : > { %v619_v31 = vadd.f32 %v587_v22, %v467_v25  ;;  %v635_v32 = vadd.f32 %v603_v24, %v531_v26  ;;  %v459_v33 = vadd.f32 %v1029_v20, %v458_v27  ;;  %v523_v34 = vadd.f32 %v1029_v20, %v522_v29  ;;  %v606_v25 = vld [vmem:[%s1024_s7 + $0xa8] sm:$0xff] }
  0xe0   : > { %v862_v35 = vpop.f32.mrf.mxu0  ;;  %v878_v36 = vpop.f32.mrf.mxu1 }
  0xe1   : > { %v651_v37 = vmax.f32 %v619_v31, 0.0  ;;  %v667_v38 = vmax.f32 %v635_v32, 0.0  ;;  %v617_v39 = vadd.f32 %v585_v28, %v459_v33  ;;  %v633_v40 = vadd.f32 %v601_v30, %v523_v34 }
  0xe2   : > { %v470_v43 = vadd.f32 %v862_v35, %v1029_v20  ;;  %v534_v44 = vadd.f32 %v878_v36, %v1029_v20  ;;  %v461_v45 = vpop.f32.mrf.mxu0  ;;  %v525_v47 = vpop.f32.mrf.mxu1 }
  0xe3   : > { %683 = vst.msk [vmem:[%s1042_s12 + $0x10] sm:$0xff] %vm375_vm0, %v651_v37  ;;  %699 = vst.msk [vmem:[%s1042_s12 + $0x90] sm:$0xff] %vm375_vm0, %v667_v38  ;;  %v649_v49 = vmax.f32 %v617_v39, 0.0  ;;  %v665_v50 = vmax.f32 %v633_v40, 0.0  ;;  %v462_v51 = vadd.f32 %v1029_v20, %v461_v45  ;;  %v526_v52 = vadd.f32 %v1029_v20, %v525_v47  ;;  %v595_v38 = vld [vmem:[%s1024_s7 + $0x50] sm:$0xff]  ;;  %v609_v45 = vld [vmem:[%s1024_s7 + $0xc0] sm:$0xff] }
  0xe4   : > { %v620_v53 = vadd.f32 %v588_v41, %v470_v43  ;;  %v636_v54 = vadd.f32 %v604_v42, %v534_v44  ;;  %v865_v55 = vpop.f32.mrf.mxu0  ;;  %v881_v57 = vpop.f32.mrf.mxu1  ;;  %v611_v39 = vld [vmem:[%s1024_s7 + $0xd0] sm:$0xff]  ;;  %v593_v43 = vld [vmem:[%s1024_s7 + $0x40] sm:$0xff] }
  0xe5   : > { %681 = vst.msk [vmem:[%s1042_s12] sm:$0xff] %vm375_vm0, %v649_v49  ;;  %697 = vst.msk [vmem:[%s1042_s12 + $0x80] sm:$0xff] %vm375_vm0, %v665_v50  ;;  %v618_v59 = vadd.f32 %v586_v46, %v462_v51  ;;  %v634_v60 = vadd.f32 %v602_v48, %v526_v52  ;;  %v483_v61 = vadd.f32 %v865_v55, %v1029_v20  ;;  %v612_v55 = vld [vmem:[%s1024_s7 + $0xd8] sm:$0xff] }
  0xe6   : > { %v547_v62 = vadd.f32 %v881_v57, %v1029_v20  ;;  %v652_v63 = vmax.f32 %v620_v53, 0.0  ;;  %v668_v0 = vmax.f32 %v636_v54, 0.0  ;;  %v474_v1 = vpop.f32.mrf.mxu0  ;;  %v538_v2 = vpop.f32.mrf.mxu1  ;;  %v596_v53 = vld [vmem:[%s1024_s7 + $0x58] sm:$0xff] }
  0xe7   : > { %v650_v3 = vmax.f32 %v618_v59, 0.0  ;;  %v666_v4 = vmax.f32 %v634_v60, 0.0  ;;  %v623_v5 = vadd.f32 %v591_v56, %v483_v61  ;;  %v475_v9 = vadd.f32 %v1029_v20, %v474_v1 }
  0xe8   : > { %v639_v6 = vadd.f32 %v607_v58, %v547_v62  ;;  %684 = vst.msk [vmem:[%s1042_s12 + $0x18] sm:$0xff] %vm375_vm0, %v652_v63  ;;  %700 = vst.msk [vmem:[%s1042_s12 + $0x98] sm:$0xff] %vm375_vm0, %v668_v0  ;;  %v539_v10 = vadd.f32 %v1029_v20, %v538_v2  ;;  %v866_v11 = vpop.f32.mrf.mxu0  ;;  %v882_v13 = vpop.f32.mrf.mxu1 }
  0xe9   : > { %682 = vst.msk [vmem:[%s1042_s12 + $0x8] sm:$0xff] %vm375_vm0, %v650_v3  ;;  %698 = vst.msk [vmem:[%s1042_s12 + $0x88] sm:$0xff] %vm375_vm0, %v666_v4  ;;  %v655_v15 = vmax.f32 %v623_v5, 0.0  ;;  %v486_v17 = vadd.f32 %v866_v11, %v1029_v20  ;;  %v550_v18 = vadd.f32 %v882_v13, %v1029_v20  ;;  %v621_v19 = vadd.f32 %v589_v7, %v475_v9  ;;  %v594_v4 = vld [vmem:[%s1024_s7 + $0x48] sm:$0xff]  ;;  %v599_v9 = vld [vmem:[%s1024_s7 + $0x70] sm:$0xff] }
  0xea   : > { %v671_v16 = vmax.f32 %v639_v6, 0.0  ;;  %v637_v21 = vadd.f32 %v605_v8, %v539_v10  ;;  %v477_v22 = vpop.f32.mrf.mxu0  ;;  %v541_v24 = vpop.f32.mrf.mxu1  ;;  %v610_v5 = vld [vmem:[%s1024_s7 + $0xc8] sm:$0xff]  ;;  %v615_v11 = vld [vmem:[%s1024_s7 + $0xf0] sm:$0xff] }
  0xeb   : > { %687 = vst.msk [vmem:[%s1042_s12 + $0x30] sm:$0xff] %vm375_vm0, %v655_v15  ;;  %v624_v26 = vadd.f32 %v592_v12, %v486_v17  ;;  %v640_v27 = vadd.f32 %v608_v14, %v550_v18  ;;  %v478_v28 = vadd.f32 %v1029_v20, %v477_v22  ;;  %v542_v29 = vadd.f32 %v1029_v20, %v541_v24  ;;  %v613_v22 = vld [vmem:[%s1024_s7 + $0xe0] sm:$0xff] }
  0xec   : > { %703 = vst.msk [vmem:[%s1042_s12 + $0xb0] sm:$0xff] %vm375_vm0, %v671_v16  ;;  %v653_v30 = vmax.f32 %v621_v19, 0.0  ;;  %v669_v31 = vmax.f32 %v637_v21, 0.0  ;;  %v869_v32 = vpop.f32.mrf.mxu0  ;;  %v885_v33 = vpop.f32.mrf.mxu1  ;;  %v597_v19 = vld [vmem:[%s1024_s7 + $0x60] sm:$0xff] }
  0xed   : > { %v656_v34 = vmax.f32 %v624_v26, 0.0  ;;  %v672_v35 = vmax.f32 %v640_v27, 0.0  ;;  %v622_v36 = vadd.f32 %v590_v23, %v478_v28  ;;  %v638_v37 = vadd.f32 %v606_v25, %v542_v29 }
  0xee   : > { %685 = vst.msk [vmem:[%s1042_s12 + $0x20] sm:$0xff] %vm375_vm0, %v653_v30  ;;  %701 = vst.msk [vmem:[%s1042_s12 + $0xa0] sm:$0xff] %vm375_vm0, %v669_v31  ;;  %v499_v40 = vadd.f32 %v869_v32, %v1029_v20  ;;  %v563_v41 = vadd.f32 %v885_v33, %v1029_v20  ;;  %v490_v42 = vpop.f32.mrf.mxu0  ;;  %v554_v44 = vpop.f32.mrf.mxu1 }
  0xef   : > { %688 = vst.msk [vmem:[%s1042_s12 + $0x38] sm:$0xff] %vm375_vm0, %v656_v34  ;;  %704 = vst.msk [vmem:[%s1042_s12 + $0xb8] sm:$0xff] %vm375_vm0, %v672_v35  ;;  %v654_v46 = vmax.f32 %v622_v36, 0.0  ;;  %v670_v47 = vmax.f32 %v638_v37, 0.0  ;;  %v491_v48 = vadd.f32 %v1029_v20, %v490_v42  ;;  %v555_v49 = vadd.f32 %v1029_v20, %v554_v44  ;;  %v600_v35 = vld [vmem:[%s1024_s7 + $0x78] sm:$0xff]  ;;  %v614_v42 = vld [vmem:[%s1024_s7 + $0xe8] sm:$0xff] }
  0xf0   : > { %v627_v50 = vadd.f32 %v595_v38, %v499_v40  ;;  %v643_v51 = vadd.f32 %v611_v39, %v563_v41  ;;  %v870_v52 = vpop.f32.mrf.mxu0  ;;  %v886_v54 = vpop.f32.mrf.mxu1  ;;  %v616_v36 = vld [vmem:[%s1024_s7 + $0xf8] sm:$0xff]  ;;  %v598_v40 = vld [vmem:[%s1024_s7 + $0x68] sm:$0xff] }
  0xf1   : > { %686 = vst.msk [vmem:[%s1042_s12 + $0x28] sm:$0xff] %vm375_vm0, %v654_v46  ;;  %702 = vst.msk [vmem:[%s1042_s12 + $0xa8] sm:$0xff] %vm375_vm0, %v670_v47  ;;  %v625_v56 = vadd.f32 %v593_v43, %v491_v48  ;;  %v641_v57 = vadd.f32 %v609_v45, %v555_v49  ;;  %v502_v58 = vadd.f32 %v870_v52, %v1029_v20 }
  0xf2   : > { %v566_v59 = vadd.f32 %v886_v54, %v1029_v20  ;;  %v659_v60 = vmax.f32 %v627_v50, 0.0  ;;  %v675_v61 = vmax.f32 %v643_v51, 0.0  ;;  %v493_v62 = vpop.f32.mrf.mxu0  ;;  %v557_v63 = vpop.f32.mrf.mxu1 }
  0xf3   : > { %v657_v0 = vmax.f32 %v625_v56, 0.0  ;;  %v673_v1 = vmax.f32 %v641_v57, 0.0  ;;  %v628_v2 = vadd.f32 %v596_v53, %v502_v58  ;;  %v494_v6 = vadd.f32 %v1029_v20, %v493_v62 }
  0xf4   : > { %v644_v3 = vadd.f32 %v612_v55, %v566_v59  ;;  %691 = vst.msk [vmem:[%s1042_s12 + $0x50] sm:$0xff] %vm375_vm0, %v659_v60  ;;  %707 = vst.msk [vmem:[%s1042_s12 + $0xd0] sm:$0xff] %vm375_vm0, %v675_v61  ;;  %v558_v7 = vadd.f32 %v1029_v20, %v557_v63  ;;  %v873_v8 = vpop.f32.mrf.mxu0  ;;  %v889_v10 = vpop.f32.mrf.mxu1 }
  0xf5   : > { %689 = vst.msk [vmem:[%s1042_s12 + $0x40] sm:$0xff] %vm375_vm0, %v657_v0  ;;  %705 = vst.msk [vmem:[%s1042_s12 + $0xc0] sm:$0xff] %vm375_vm0, %v673_v1  ;;  %v660_v12 = vmax.f32 %v628_v2, 0.0  ;;  %v515_v14 = vadd.f32 %v873_v8, %v1029_v20  ;;  %v579_v15 = vadd.f32 %v889_v10, %v1029_v20  ;;  %v626_v16 = vadd.f32 %v594_v4, %v494_v6 }
  0xf6   : > { %v676_v13 = vmax.f32 %v644_v3, 0.0  ;;  %v642_v17 = vadd.f32 %v610_v5, %v558_v7  ;;  %v506_v18 = vpop.f32.mrf.mxu0  ;;  %v570_v21 = vpop.f32.mrf.mxu1 }
  0xf7   : > { %692 = vst.msk [vmem:[%s1042_s12 + $0x58] sm:$0xff] %vm375_vm0, %v660_v12  ;;  %v631_v23 = vadd.f32 %v599_v9, %v515_v14  ;;  %v647_v24 = vadd.f32 %v615_v11, %v579_v15  ;;  %v507_v25 = vadd.f32 %v1029_v20, %v506_v18  ;;  %v571_v26 = vadd.f32 %v1029_v20, %v570_v21 }
  0xf8   : > { %708 = vst.msk [vmem:[%s1042_s12 + $0xd8] sm:$0xff] %vm375_vm0, %v676_v13  ;;  %v658_v27 = vmax.f32 %v626_v16, 0.0  ;;  %v674_v28 = vmax.f32 %v642_v17, 0.0  ;;  %v874_v29 = vpop.f32.mrf.mxu0  ;;  %v890_v30 = vpop.f32.mrf.mxu1 }
  0xf9   : > { %v663_v31 = vmax.f32 %v631_v23, 0.0  ;;  %v679_v32 = vmax.f32 %v647_v24, 0.0  ;;  %v629_v33 = vadd.f32 %v597_v19, %v507_v25  ;;  %v645_v34 = vadd.f32 %v613_v22, %v571_v26 }
  0xfa   : > { %690 = vst.msk [vmem:[%s1042_s12 + $0x48] sm:$0xff] %vm375_vm0, %v658_v27  ;;  %706 = vst.msk [vmem:[%s1042_s12 + $0xc8] sm:$0xff] %vm375_vm0, %v674_v28  ;;  %v518_v37 = vadd.f32 %v874_v29, %v1029_v20  ;;  %v582_v38 = vadd.f32 %v890_v30, %v1029_v20  ;;  %v509_v39 = vpop.f32.mrf.mxu0  ;;  %v573_v41 = vpop.f32.mrf.mxu1 }
  0xfb   : > { %695 = vst.msk [vmem:[%s1042_s12 + $0x70] sm:$0xff] %vm375_vm0, %v663_v31  ;;  %711 = vst.msk [vmem:[%s1042_s12 + $0xf0] sm:$0xff] %vm375_vm0, %v679_v32  ;;  %v661_v43 = vmax.f32 %v629_v33, 0.0  ;;  %v677_v44 = vmax.f32 %v645_v34, 0.0  ;;  %v510_v45 = vadd.f32 %v1029_v20, %v509_v39  ;;  %v574_v46 = vadd.f32 %v1029_v20, %v573_v41 }
  0xfc   : > { %v632_v47 = vadd.f32 %v600_v35, %v518_v37  ;;  %v648_v48 = vadd.f32 %v616_v36, %v582_v38 }
  0xfd   : > { %693 = vst.msk [vmem:[%s1042_s12 + $0x60] sm:$0xff] %vm375_vm0, %v661_v43  ;;  %709 = vst.msk [vmem:[%s1042_s12 + $0xe0] sm:$0xff] %vm375_vm0, %v677_v44  ;;  %v630_v49 = vadd.f32 %v598_v40, %v510_v45  ;;  %v646_v50 = vadd.f32 %v614_v42, %v574_v46 }
  0xfe   : > { %v664_v51 = vmax.f32 %v632_v47, 0.0  ;;  %v680_v52 = vmax.f32 %v648_v48, 0.0 }
  0xff   : > { %v662_v53 = vmax.f32 %v630_v49, 0.0  ;;  %v678_v54 = vmax.f32 %v646_v50, 0.0 }
 0x100   : > { %696 = vst.msk [vmem:[%s1042_s12 + $0x78] sm:$0xff] %vm375_vm0, %v664_v51  ;;  %712 = vst.msk [vmem:[%s1042_s12 + $0xf8] sm:$0xff] %vm375_vm0, %v680_v52 }
 0x101   : > { %694 = vst.msk [vmem:[%s1042_s12 + $0x68] sm:$0xff] %vm375_vm0, %v662_v53  ;;  %710 = vst.msk [vmem:[%s1042_s12 + $0xe8] sm:$0xff] %vm375_vm0, %v678_v54 }
 0x102 PF: > { %s14_s15 = sadd.s32 1, %s933_s15  }
 0x103   : > { %p11_p4 = scmp.ge.s32.totalorder %s14_s15, 4  }
 0x105   :  { %13 = sbr.rel (!%p11_p4) target bundleno = 1 (0x1), region = 69 }

// kernel: tower_forward.27
= control target key start
LH: loop header
LB: loop body
LE: loop exit
PB: predicated region body
PF: predicated region fallthrough
CT: control target
= control target key end

     0   :  { %s2370_s21 = smov 0   ;;  %s2898_s0 = inlined_call_operand.vmem [shape: bf16[2048,64], index: 0, kind: input, shape index: {}]   ;;  %s2899_s1 = inlined_call_operand.vmem [shape: bf16[64,64], index: 1, kind: input, shape index: {}]   ;;  %s2900_s2 = inlined_call_operand.vmem [shape: f32[1,64], index: 2, kind: input, shape index: {}]   ;;  %s2901_s3 = inlined_call_operand.vmem [shape: f32[64,48], index: 3, kind: input, shape index: {}]   ;;  %s2902_s4 = inlined_call_operand.vmem [shape: f32[1,48], index: 4, kind: input, shape index: {}]   ;;  %s2903_s5 = inlined_call_operand.vmem [shape: f32[2048,64], index: 5, kind: input, shape index: {}]   ;;  %s2904_s6 = inlined_call_operand.vmem [shape: f32[2048,48], index: 6, kind: output, shape index: {}]  }
   0x1 LB: > { %s1844_s22 = sadd.s32 4294967295, %s2333_s21   ;;  %p1848_p0 = scmp.ge.s32.totalorder %s2333_s21, 1  ;;  %s2333_s21 = sphi %s2370_s21, %s16_s21  }
   0x2   : > { %p224_p1 = scmp.lt.s32.totalorder %s2333_s21, 5 }
   0x4   : > { %p225_p2 = pnand %p1848_p0, %p224_p1 }
   0x5   : > { %s1849_s25 = sshll.u32 (!%p225_p2), %s1844_s22, 6 }
   0x6   : > { %228 = sbr.rel (%p225_p2) target bundleno = 555 (0x22b), region = 44  ;;  %p260_p3 = scmp.lt.s32.totalorder (!%p225_p2), %s1849_s25, 255 }
   0xb   : > { %v2291_v0 = vld [vmem:[%s2899_s1 + $0x18] sm:$0xff]   ;;  %v2292_v1 = vld [vmem:[%s2899_s1 + $0x10] sm:$0xff]   ;;  %s2906_s25 = smov (!%p260_p3, %s1849_s25), 255  ;;  %v2293_v2 = vld [vmem:[%s2899_s1 + $0x8] sm:$0xff]   ;;  %vm541_vm0 = vcmask 523264   ;;  %vm1711_vm1 = vcmask 392192  }
   0xc   : > { %2099 = vmatprep.subr.bf16.mxu0 %v2291_v0  ;;  %s1850_s30 = sshll.u32 %s2906_s25, 2  ;;  %v2294_v4 = vld [vmem:[%s2899_s1] sm:$0xff]   ;;  %v1126_v13 = vld [vmem:[%s2901_s3 + $0x38] sm:$0xff]  ;;  %v1125_v14 = vld [vmem:[%s2901_s3 + $0x30] sm:$0xff] }
   0xd   : > { %2100 = vmatpush3.bf16.msra.mxu0 %v2291_v0  ;;  %s2393_s9 = scalar_lea.vmem %s2898_s0, %s1850_s30  ;;  %2171 = vmatprep.subr.mxu1 %v1126_v13  ;;  %v1124_v25 = vld [vmem:[%s2901_s3 + $0x28] sm:$0xff]  ;;  %v1123_v26 = vld [vmem:[%s2901_s3 + $0x20] sm:$0xff]  ;;  %v1122_v28 = vld [vmem:[%s2901_s3 + $0x18] sm:$0xff]  ;;  %s1852_s30 = sshll.u32 %s2906_s25, 3 }
   0xe   : > { %2101 = vmatprep.subr.bf16.mxu0 %v2292_v1  ;;  %v2295_v3 = vld [vmem:[%s2393_s9] sm:$0xff]   ;;  %v2296_v5 = vld [vmem:[%s2393_s9 + $0x8] sm:$0xff]   ;;  %v2297_v6 = vld [vmem:[%s2393_s9 + $0x10] sm:$0xff]   ;;  %2172 = vmatpush3.msra.mxu1 %v1126_v13  ;;  %s2492_s10 = scalar_lea.vmem %s2903_s5, %s1852_s30  ;;  %s2701_s16 = scalar_lea.vmem %s2904_s6, %s1852_s30 }
   0xf   : > { %2107 = vmatprep.mubr.msk.bf16.mxu0 %vm541_vm0, %v2295_v3  ;;  %v2298_v7 = vld [vmem:[%s2393_s9 + $0x18] sm:$0xff]   ;;  %v2299_v8 = vld [vmem:[%s2393_s9 + $0x20] sm:$0xff]   ;;  %v2300_v9 = vld [vmem:[%s2393_s9 + $0x28] sm:$0xff]   ;;  %2173 = vmatprep.subr.mxu1 %v1125_v14 }
  0x10   : > { %v2301_v10 = vld [vmem:[%s2393_s9 + $0x30] sm:$0xff]   ;;  %v2302_v11 = vld [vmem:[%s2393_s9 + $0x38] sm:$0xff]   ;;  %v2303_v12 = vld [vmem:[%s2393_s9 + $0x40] sm:$0xff]   ;;  %2174 = vmatpush3.msra.mxu1 %v1125_v14 }
  0x11   : > { %2102 = vmatpush3.bf16.msra.mxu0 %v2292_v1  ;;  %v2304_v15 = vld [vmem:[%s2393_s9 + $0x48] sm:$0xff]   ;;  %v2305_v16 = vld [vmem:[%s2393_s9 + $0x50] sm:$0xff]   ;;  %v2306_v17 = vld [vmem:[%s2393_s9 + $0x58] sm:$0xff]   ;;  %2175 = vmatprep.subr.mxu1 %v1124_v25 }
  0x12   : > { %2103 = vmatprep.subr.bf16.mxu0 %v2293_v2  ;;  %v2307_v18 = vld [vmem:[%s2393_s9 + $0x60] sm:$0xff]   ;;  %v2308_v19 = vld [vmem:[%s2393_s9 + $0x68] sm:$0xff]   ;;  %v2309_v20 = vld [vmem:[%s2393_s9 + $0x70] sm:$0xff]   ;;  %2176 = vmatpush3.msra.mxu1 %v1124_v25 }
  0x13   : > { %v2310_v21 = vld [vmem:[%s2393_s9 + $0x78] sm:$0xff]   ;;  %v2311_v22 = vld [vmem:[%s2393_s9 + $0x80] sm:$0xff]   ;;  %v2312_v23 = vld [vmem:[%s2393_s9 + $0x88] sm:$0xff]   ;;  %2177 = vmatprep.subr.mxu1 %v1123_v26 }
  0x14   : > { %v2313_v24 = vld [vmem:[%s2393_s9 + $0x90] sm:$0xff]   ;;  %v2314_v27 = vld [vmem:[%s2393_s9 + $0x98] sm:$0xff]   ;;  %2178 = vmatpush3.msra.mxu1 %v1123_v26  ;;  %v2315_v29 = vld [vmem:[%s2393_s9 + $0xa0] sm:$0xff]  }
  0x15   : > { %2104 = vmatpush3.bf16.msra.mxu0 %v2293_v2  ;;  %2179 = vmatprep.subr.mxu1 %v1122_v28  ;;  %v1121_v30 = vld [vmem:[%s2901_s3 + $0x10] sm:$0xff]  ;;  %v1120_v31 = vld [vmem:[%s2901_s3 + $0x8] sm:$0xff]  ;;  %v1119_v32 = vld [vmem:[%s2901_s3] sm:$0xff] }
  0x16   : > { %2105 = vmatprep.subr.bf16.mxu0 %v2294_v4  ;;  %2180 = vmatpush3.msra.mxu1 %v1122_v28  ;;  %v2316_v33 = vld [vmem:[%s2393_s9 + $0xa8] sm:$0xff]   ;;  %v2317_v34 = vld [vmem:[%s2393_s9 + $0xb0] sm:$0xff]   ;;  %v2318_v35 = vld [vmem:[%s2393_s9 + $0xb8] sm:$0xff]  }
  0x17   : > { %2181 = vmatprep.subr.mxu1 %v1121_v30  ;;  %v2319_v36 = vld [vmem:[%s2393_s9 + $0xc0] sm:$0xff]   ;;  %v2320_v37 = vld [vmem:[%s2393_s9 + $0xc8] sm:$0xff]   ;;  %v2321_v38 = vld [vmem:[%s2393_s9 + $0xd0] sm:$0xff]  }
  0x18   : > { %2182 = vmatpush3.msra.mxu1 %v1121_v30  ;;  %v2322_v39 = vld [vmem:[%s2393_s9 + $0xd8] sm:$0xff]   ;;  %v2323_v40 = vld [vmem:[%s2393_s9 + $0xe0] sm:$0xff]   ;;  %v2324_v41 = vld [vmem:[%s2393_s9 + $0xe8] sm:$0xff]  }
  0x19   : > { %2106 = vmatpush3.bf16.msra.mxu0 %v2294_v4  ;;  %2183 = vmatprep.subr.mxu1 %v1120_v31  ;;  %v2325_v42 = vld [vmem:[%s2393_s9 + $0xf0] sm:$0xff]   ;;  %v2326_v43 = vld [vmem:[%s2393_s9 + $0xf8] sm:$0xff]   ;;  %v2497_v45 = vld [vmem:[%s2900_s2] ss:$0 sm:$0xff] }
  0x1a   : > { %2184 = vmatpush3.msra.mxu1 %v1120_v31  ;;  %v927_v47 = vld [vmem:[%s2492_s10] sm:$0xff]  ;;  %v929_v51 = vld [vmem:[%s2492_s10 + $0x10] sm:$0xff]  ;;  %v928_v54 = vld [vmem:[%s2492_s10 + $0x8] sm:$0xff] }
  0x1b   : > { %2185 = vmatprep.subr.mxu1 %v1119_v32  ;;  %v930_v59 = vld [vmem:[%s2492_s10 + $0x18] sm:$0xff]  ;;  %v931_v63 = vld [vmem:[%s2492_s10 + $0x20] sm:$0xff]  ;;  %v937_v26 = vld [vmem:[%s2492_s10 + $0x50] sm:$0xff] }
  0x1c   : > { %2108 = vmatmul.mubr.msk.bf16.vlgmr.msra.gmra.mxu0 %vm541_vm0, %v2296_v5  ;;  %2186 = vmatpush3.msra.mxu1 %v1119_v32 }
  0x1d   : > { %2111 = vmatprep.mubr.msk.bf16.mxu0 %vm541_vm0, %v2297_v6  ;;  %v933_v6 = vld [vmem:[%s2492_s10 + $0x30] sm:$0xff] }
  0x24   : > { %2112 = vmatmul.mubr.msk.bf16.gmra.mxu0 %vm541_vm0, %v2298_v7 }
  0x25   : > { %2115 = vmatprep.mubr.msk.bf16.mxu0 %vm541_vm0, %v2299_v8 }
  0x2c   : > { %2116 = vmatmul.mubr.msk.bf16.gmra.mxu0 %vm541_vm0, %v2300_v9  ;;  %v932_v9 = vld [vmem:[%s2492_s10 + $0x28] sm:$0xff] }
  0x2d   : > { %2119 = vmatprep.mubr.msk.bf16.mxu0 %vm541_vm0, %v2301_v10 }
  0x34   : > { %2120 = vmatmul.mubr.msk.bf16.gmra.mxu0 %vm541_vm0, %v2302_v11 }
  0x35   : > { %2123 = vmatprep.mubr.msk.bf16.mxu0 %vm541_vm0, %v2303_v12 }
  0x3c   : > { %2124 = vmatmul.mubr.msk.bf16.gmra.mxu0 %vm541_vm0, %v2304_v15  ;;  %v934_v15 = vld [vmem:[%s2492_s10 + $0x38] sm:$0xff] }
  0x3d   : > { %2127 = vmatprep.mubr.msk.bf16.mxu0 %vm541_vm0, %v2305_v16 }
  0x44   : > { %2128 = vmatmul.mubr.msk.bf16.gmra.mxu0 %vm541_vm0, %v2306_v17 }
  0x45   : > { %2131 = vmatprep.mubr.msk.bf16.mxu0 %vm541_vm0, %v2307_v18 }
  0x4c   : > { %2132 = vmatmul.mubr.msk.bf16.gmra.mxu0 %vm541_vm0, %v2308_v19  ;;  %v935_v19 = vld [vmem:[%s2492_s10 + $0x40] sm:$0xff] }
  0x4d   : > { %2135 = vmatprep.mubr.msk.bf16.mxu0 %vm541_vm0, %v2309_v20 }
  0x54   : > { %2136 = vmatmul.mubr.msk.bf16.gmra.mxu0 %vm541_vm0, %v2310_v21 }
  0x55   : > { %2139 = vmatprep.mubr.msk.bf16.mxu0 %vm541_vm0, %v2311_v22 }
  0x5c   : > { %2140 = vmatmul.mubr.msk.bf16.gmra.mxu0 %vm541_vm0, %v2312_v23 }
  0x5d   : > { %2143 = vmatprep.mubr.msk.bf16.mxu0 %vm541_vm0, %v2313_v24 }
  0x64   : > { %2144 = vmatmul.mubr.msk.bf16.gmra.mxu0 %vm541_vm0, %v2314_v27 }
  0x65   : > { %2147 = vmatprep.mubr.msk.bf16.mxu0 %vm541_vm0, %v2315_v29  ;;  %v936_v29 = vld [vmem:[%s2492_s10 + $0x48] sm:$0xff] }
  0x6c   : > { %2148 = vmatmul.mubr.msk.bf16.gmra.mxu0 %vm541_vm0, %v2316_v33 }
  0x6d   : > { %2151 = vmatprep.mubr.msk.bf16.mxu0 %vm541_vm0, %v2317_v34 }
  0x74   : > { %2152 = vmatmul.mubr.msk.bf16.gmra.mxu0 %vm541_vm0, %v2318_v35  ;;  %v938_v35 = vld [vmem:[%s2492_s10 + $0x58] sm:$0xff] }
  0x75   : > { %2155 = vmatprep.mubr.msk.bf16.mxu0 %vm541_vm0, %v2319_v36 }
  0x7c   : > { %2156 = vmatmul.mubr.msk.bf16.gmra.mxu0 %vm541_vm0, %v2320_v37 }
  0x7d   : > { %2159 = vmatprep.mubr.msk.bf16.mxu0 %vm541_vm0, %v2321_v38 }
  0x84   : > { %2160 = vmatmul.mubr.msk.bf16.gmra.mxu0 %vm541_vm0, %v2322_v39  ;;  %v939_v39 = vld [vmem:[%s2492_s10 + $0x60] sm:$0xff] }
  0x85   : > { %2163 = vmatprep.mubr.msk.bf16.mxu0 %vm541_vm0, %v2323_v40 }
  0x8c   : > { %2164 = vmatmul.mubr.msk.bf16.gmra.mxu0 %vm541_vm0, %v2324_v41 }
  0x8d   : > { %2167 = vmatprep.mubr.msk.bf16.mxu0 %vm541_vm0, %v2325_v42 }
  0x94   : > { %2168 = vmatmul.mubr.msk.bf16.gmra.mxu0 %vm541_vm0, %v2326_v43 }
  0xdc   : > { %v2109_v44 = vpop.f32.mrf.mxu0 }
  0xdd   : > { %v681_v49 = vadd.f32 %v2109_v44, %v2497_v45 }
  0xde   : > { %v672_v46 = vpop.f32.mrf.mxu0 }
  0xdf   : > { %v673_v48 = vadd.f32 %v2497_v45, %v672_v46  ;;  %v993_v58 = vadd.f32 %v929_v51, %v681_v49 }
  0xe0   : > { %v2110_v50 = vpop.f32.mrf.mxu0 }
  0xe1   : > { %v991_v52 = vadd.f32 %v927_v47, %v673_v48  ;;  %v684_v55 = vadd.f32 %v2110_v50, %v2497_v45  ;;  %v1057_v3 = vmax.f32 %v993_v58, 0.0  ;;  %v941_v47 = vld [vmem:[%s2492_s10 + $0x70] sm:$0xff]  ;;  %v940_v50 = vld [vmem:[%s2492_s10 + $0x68] sm:$0xff] }
  0xe2   : > { %v675_v53 = vpop.f32.mrf.mxu0 }
  0xe3   : > { %v676_v56 = vadd.f32 %v2497_v45, %v675_v53  ;;  %v1055_v57 = vmax.f32 %v991_v52, 0.0  ;;  %v994_v0 = vadd.f32 %v930_v59, %v684_v55 }
  0xe4   : > { %v2113_v60 = vpop.f32.mrf.mxu0 }
  0xe5   : > { %v992_v61 = vadd.f32 %v928_v54, %v676_v56  ;;  %2187 = vmatprep.mubr.msk.f32.mxu1 %vm541_vm0, %v1055_v57  ;;  %v697_v4 = vadd.f32 %v2113_v60, %v2497_v45  ;;  %v1058_v10 = vmax.f32 %v994_v0, 0.0  ;;  %v942_v56 = vld [vmem:[%s2492_s10 + $0x78] sm:$0xff]  ;;  %v943_v60 = vld [vmem:[%s2492_s10 + $0x80] sm:$0xff] }
  0xe6   : > { %v688_v62 = vpop.f32.mrf.mxu0 }
  0xe7   : > { %v1056_v1 = vmax.f32 %v992_v61, 0.0  ;;  %v689_v2 = vadd.f32 %v2497_v45, %v688_v62  ;;  %v997_v14 = vadd.f32 %v933_v6, %v697_v4  ;;  %v944_v6 = vld [vmem:[%s2492_s10 + $0x88] sm:$0xff] }
  0xe8   : > { %v2114_v5 = vpop.f32.mrf.mxu0 }
  0xe9   : > { %v995_v7 = vadd.f32 %v931_v63, %v689_v2  ;;  %2188 = vmatmul.mubr.msk.f32.vlgmr.msra.gmra.mxu1 %vm541_vm0, %v1056_v1  ;;  %v700_v12 = vadd.f32 %v2114_v5, %v2497_v45  ;;  %v1061_v23 = vmax.f32 %v997_v14, 0.0 }
  0xea   : > { %v691_v8 = vpop.f32.mrf.mxu0  ;;  %2190 = vmatprep.mubr.msk.f32.mxu1 %vm541_vm0, %v1057_v3  ;;  %v945_v3 = vld [vmem:[%s2492_s10 + $0x90] sm:$0xff] }
  0xeb   : > { %v1059_v11 = vmax.f32 %v995_v7, 0.0  ;;  %v692_v13 = vadd.f32 %v2497_v45, %v691_v8  ;;  %v998_v20 = vadd.f32 %v934_v15, %v700_v12  ;;  %v946_v12 = vld [vmem:[%s2492_s10 + $0x98] sm:$0xff] }
  0xec   : > { %v2117_v16 = vpop.f32.mrf.mxu0 }
  0xed   : > { %v996_v17 = vadd.f32 %v932_v9, %v692_v13  ;;  %2191 = vmatmul.mubr.msk.f32.gmra.mxu1 %vm541_vm0, %v1058_v10  ;;  %v713_v24 = vadd.f32 %v2117_v16, %v2497_v45  ;;  %v1062_v30 = vmax.f32 %v998_v20, 0.0  ;;  %v947_v16 = vld [vmem:[%s2492_s10 + $0xa0] sm:$0xff] }
  0xee   : > { %v704_v18 = vpop.f32.mrf.mxu0  ;;  %2193 = vmatprep.mubr.msk.f32.mxu1 %vm541_vm0, %v1059_v11 }
  0xef   : > { %v1060_v21 = vmax.f32 %v996_v17, 0.0  ;;  %v705_v22 = vadd.f32 %v2497_v45, %v704_v18  ;;  %v1001_v34 = vadd.f32 %v937_v26, %v713_v24  ;;  %v948_v26 = vld [vmem:[%s2492_s10 + $0xa8] sm:$0xff] }
  0xf0   : > { %v2118_v25 = vpop.f32.mrf.mxu0 }
  0xf1   : > { %v999_v27 = vadd.f32 %v935_v19, %v705_v22  ;;  %2194 = vmatmul.mubr.msk.f32.gmra.mxu1 %vm541_vm0, %v1060_v21  ;;  %v716_v32 = vadd.f32 %v2118_v25, %v2497_v45  ;;  %v1065_v43 = vmax.f32 %v1001_v34, 0.0 }
  0xf2   : > { %v707_v28 = vpop.f32.mrf.mxu0  ;;  %2196 = vmatprep.mubr.msk.f32.mxu1 %vm541_vm0, %v1061_v23  ;;  %v949_v23 = vld [vmem:[%s2492_s10 + $0xb0] sm:$0xff] }
  0xf3   : > { %v1063_v31 = vmax.f32 %v999_v27, 0.0  ;;  %v708_v33 = vadd.f32 %v2497_v45, %v707_v28  ;;  %v1002_v40 = vadd.f32 %v938_v35, %v716_v32  ;;  %v950_v32 = vld [vmem:[%s2492_s10 + $0xb8] sm:$0xff] }
  0xf4   : > { %v2121_v36 = vpop.f32.mrf.mxu0 }
  0xf5   : > { %v1000_v37 = vadd.f32 %v936_v29, %v708_v33  ;;  %2197 = vmatmul.mubr.msk.f32.gmra.mxu1 %vm541_vm0, %v1062_v30  ;;  %v729_v44 = vadd.f32 %v2121_v36, %v2497_v45  ;;  %v1066_v51 = vmax.f32 %v1002_v40, 0.0  ;;  %v951_v36 = vld [vmem:[%s2492_s10 + $0xc0] sm:$0xff] }
  0xf6   : > { %v720_v38 = vpop.f32.mrf.mxu0  ;;  %2199 = vmatprep.mubr.msk.f32.mxu1 %vm541_vm0, %v1063_v31 }
  0xf7   : > { %v1064_v41 = vmax.f32 %v1000_v37, 0.0  ;;  %v721_v42 = vadd.f32 %v2497_v45, %v720_v38  ;;  %v1005_v55 = vadd.f32 %v941_v47, %v729_v44  ;;  %v952_v47 = vld [vmem:[%s2492_s10 + $0xc8] sm:$0xff] }
  0xf8   : > { %v2122_v46 = vpop.f32.mrf.mxu0 }
  0xf9   : > { %v1003_v48 = vadd.f32 %v939_v39, %v721_v42  ;;  %2200 = vmatmul.mubr.msk.f32.gmra.mxu1 %vm541_vm0, %v1064_v41  ;;  %v732_v53 = vadd.f32 %v2122_v46, %v2497_v45  ;;  %v1069_v0 = vmax.f32 %v1005_v55, 0.0 }
  0xfa   : > { %v723_v49 = vpop.f32.mrf.mxu0  ;;  %2202 = vmatprep.mubr.msk.f32.mxu1 %vm541_vm0, %v1065_v43  ;;  %v953_v43 = vld [vmem:[%s2492_s10 + $0xd0] sm:$0xff] }
  0xfb   : > { %v1067_v52 = vmax.f32 %v1003_v48, 0.0  ;;  %v724_v54 = vadd.f32 %v2497_v45, %v723_v49  ;;  %v1006_v61 = vadd.f32 %v942_v56, %v732_v53  ;;  %v954_v53 = vld [vmem:[%s2492_s10 + $0xd8] sm:$0xff] }
  0xfc   : > { %v2125_v57 = vpop.f32.mrf.mxu0 }
  0xfd   : > { %v1004_v58 = vadd.f32 %v940_v50, %v724_v54  ;;  %2203 = vmatmul.mubr.msk.f32.gmra.mxu1 %vm541_vm0, %v1066_v51  ;;  %v745_v1 = vadd.f32 %v2125_v57, %v2497_v45  ;;  %v1070_v7 = vmax.f32 %v1006_v61, 0.0  ;;  %v955_v57 = vld [vmem:[%s2492_s10 + $0xe0] sm:$0xff] }
  0xfe   : > { %v736_v59 = vpop.f32.mrf.mxu0  ;;  %2205 = vmatprep.mubr.msk.f32.mxu1 %vm541_vm0, %v1067_v52 }
  0xff   : > { %v1068_v62 = vmax.f32 %v1004_v58, 0.0  ;;  %v737_v63 = vadd.f32 %v2497_v45, %v736_v59  ;;  %v1009_v11 = vadd.f32 %v945_v3, %v745_v1  ;;  %v956_v3 = vld [vmem:[%s2492_s10 + $0xe8] sm:$0xff] }
 0x100   : > { %v2126_v2 = vpop.f32.mrf.mxu0 }
 0x101   : > { %v1007_v4 = vadd.f32 %v943_v60, %v737_v63  ;;  %2206 = vmatmul.mubr.msk.f32.gmra.mxu1 %vm541_vm0, %v1068_v62  ;;  %v748_v9 = vadd.f32 %v2126_v2, %v2497_v45  ;;  %v1073_v20 = vmax.f32 %v1009_v11, 0.0 }
 0x102   : > { %v739_v5 = vpop.f32.mrf.mxu0  ;;  %2208 = vmatprep.mubr.msk.f32.mxu1 %vm541_vm0, %v1069_v0  ;;  %v957_v0 = vld [vmem:[%s2492_s10 + $0xf0] sm:$0xff] }
 0x103   : > { %v1071_v8 = vmax.f32 %v1007_v4, 0.0  ;;  %v740_v10 = vadd.f32 %v2497_v45, %v739_v5  ;;  %v1010_v17 = vadd.f32 %v946_v12, %v748_v9  ;;  %v958_v9 = vld [vmem:[%s2492_s10 + $0xf8] sm:$0xff] }
 0x104   : > { %v2129_v13 = vpop.f32.mrf.mxu0 }
 0x105   : > { %v1008_v14 = vadd.f32 %v944_v6, %v740_v10  ;;  %2209 = vmatmul.mubr.msk.f32.gmra.mxu1 %vm541_vm0, %v1070_v7  ;;  %v761_v21 = vadd.f32 %v2129_v13, %v2497_v45  ;;  %v1074_v27 = vmax.f32 %v1010_v17, 0.0  ;;  %v959_v13 = vld [vmem:[%s2492_s10 + $0x100] sm:$0xff] }
 0x106   : > { %v752_v15 = vpop.f32.mrf.mxu0  ;;  %2211 = vmatprep.mubr.msk.f32.mxu1 %vm541_vm0, %v1071_v8 }
 0x107   : > { %v1072_v18 = vmax.f32 %v1008_v14, 0.0  ;;  %v753_v19 = vadd.f32 %v2497_v45, %v752_v15  ;;  %v1013_v31 = vadd.f32 %v949_v23, %v761_v21  ;;  %v960_v23 = vld [vmem:[%s2492_s10 + $0x108] sm:$0xff] }
 0x108   : > { %v2130_v22 = vpop.f32.mrf.mxu0 }
 0x109   : > { %v1011_v24 = vadd.f32 %v947_v16, %v753_v19  ;;  %2212 = vmatmul.mubr.msk.f32.gmra.mxu1 %vm541_vm0, %v1072_v18  ;;  %v764_v29 = vadd.f32 %v2130_v22, %v2497_v45  ;;  %v1077_v40 = vmax.f32 %v1013_v31, 0.0 }
 0x10a   : > { %v755_v25 = vpop.f32.mrf.mxu0  ;;  %2214 = vmatprep.mubr.msk.f32.mxu1 %vm541_vm0, %v1073_v20  ;;  %v961_v20 = vld [vmem:[%s2492_s10 + $0x110] sm:$0xff] }
 0x10b   : > { %v1075_v28 = vmax.f32 %v1011_v24, 0.0  ;;  %v756_v30 = vadd.f32 %v2497_v45, %v755_v25  ;;  %v1014_v37 = vadd.f32 %v950_v32, %v764_v29  ;;  %v962_v29 = vld [vmem:[%s2492_s10 + $0x118] sm:$0xff] }
 0x10c   : > { %v2133_v33 = vpop.f32.mrf.mxu0 }
 0x10d   : > { %v1012_v34 = vadd.f32 %v948_v26, %v756_v30  ;;  %2215 = vmatmul.mubr.msk.f32.gmra.mxu1 %vm541_vm0, %v1074_v27  ;;  %v777_v41 = vadd.f32 %v2133_v33, %v2497_v45  ;;  %v1078_v48 = vmax.f32 %v1014_v37, 0.0  ;;  %v963_v33 = vld [vmem:[%s2492_s10 + $0x120] sm:$0xff] }
 0x10e   : > { %v768_v35 = vpop.f32.mrf.mxu0  ;;  %2217 = vmatprep.mubr.msk.f32.mxu1 %vm541_vm0, %v1075_v28 }
 0x10f   : > { %v1076_v38 = vmax.f32 %v1012_v34, 0.0  ;;  %v769_v39 = vadd.f32 %v2497_v45, %v768_v35  ;;  %v1017_v52 = vadd.f32 %v953_v43, %v777_v41  ;;  %v964_v43 = vld [vmem:[%s2492_s10 + $0x128] sm:$0xff] }
 0x110   : > { %v2134_v42 = vpop.f32.mrf.mxu0 }
 0x111   : > { %v1015_v44 = vadd.f32 %v951_v36, %v769_v39  ;;  %2218 = vmatmul.mubr.msk.f32.gmra.mxu1 %vm541_vm0, %v1076_v38  ;;  %v780_v50 = vadd.f32 %v2134_v42, %v2497_v45  ;;  %v1081_v61 = vmax.f32 %v1017_v52, 0.0 }
 0x112   : > { %v771_v46 = vpop.f32.mrf.mxu0  ;;  %2220 = vmatprep.mubr.msk.f32.mxu1 %vm541_vm0, %v1077_v40  ;;  %v965_v40 = vld [vmem:[%s2492_s10 + $0x130] sm:$0xff] }
 0x113   : > { %v1079_v49 = vmax.f32 %v1015_v44, 0.0  ;;  %v772_v51 = vadd.f32 %v2497_v45, %v771_v46  ;;  %v1018_v58 = vadd.f32 %v954_v53, %v780_v50  ;;  %v966_v50 = vld [vmem:[%s2492_s10 + $0x138] sm:$0xff] }
 0x114   : > { %v2137_v54 = vpop.f32.mrf.mxu0 }
 0x115   : > { %v1016_v55 = vadd.f32 %v952_v47, %v772_v51  ;;  %2221 = vmatmul.mubr.msk.f32.gmra.mxu1 %vm541_vm0, %v1078_v48  ;;  %v793_v62 = vadd.f32 %v2137_v54, %v2497_v45  ;;  %v1082_v4 = vmax.f32 %v1018_v58, 0.0  ;;  %v967_v54 = vld [vmem:[%s2492_s10 + $0x140] sm:$0xff] }
 0x116   : > { %v784_v56 = vpop.f32.mrf.mxu0  ;;  %2223 = vmatprep.mubr.msk.f32.mxu1 %vm541_vm0, %v1079_v49 }
 0x117   : > { %v1080_v59 = vmax.f32 %v1016_v55, 0.0  ;;  %v785_v60 = vadd.f32 %v2497_v45, %v784_v56  ;;  %v1021_v8 = vadd.f32 %v957_v0, %v793_v62  ;;  %v968_v0 = vld [vmem:[%s2492_s10 + $0x148] sm:$0xff] }
 0x118   : > { %v2138_v63 = vpop.f32.mrf.mxu0 }
 0x119   : > { %v1019_v1 = vadd.f32 %v955_v57, %v785_v60  ;;  %2224 = vmatmul.mubr.msk.f32.gmra.mxu1 %vm541_vm0, %v1080_v59  ;;  %v796_v6 = vadd.f32 %v2138_v63, %v2497_v45  ;;  %v1085_v17 = vmax.f32 %v1021_v8, 0.0 }
 0x11a   : > { %v787_v2 = vpop.f32.mrf.mxu0  ;;  %2226 = vmatprep.mubr.msk.f32.mxu1 %vm541_vm0, %v1081_v61  ;;  %v969_v61 = vld [vmem:[%s2492_s10 + $0x150] sm:$0xff] }
 0x11b   : > { %v1083_v5 = vmax.f32 %v1019_v1, 0.0  ;;  %v788_v7 = vadd.f32 %v2497_v45, %v787_v2  ;;  %v1022_v14 = vadd.f32 %v958_v9, %v796_v6  ;;  %v970_v6 = vld [vmem:[%s2492_s10 + $0x158] sm:$0xff] }
 0x11c   : > { %v2141_v10 = vpop.f32.mrf.mxu0 }
 0x11d   : > { %v1020_v11 = vadd.f32 %v956_v3, %v788_v7  ;;  %2227 = vmatmul.mubr.msk.f32.gmra.mxu1 %vm541_vm0, %v1082_v4  ;;  %v809_v18 = vadd.f32 %v2141_v10, %v2497_v45  ;;  %v1086_v24 = vmax.f32 %v1022_v14, 0.0  ;;  %v971_v10 = vld [vmem:[%s2492_s10 + $0x160] sm:$0xff] }
 0x11e   : > { %v800_v12 = vpop.f32.mrf.mxu0  ;;  %2229 = vmatprep.mubr.msk.f32.mxu1 %vm541_vm0, %v1083_v5 }
 0x11f   : > { %v1084_v15 = vmax.f32 %v1020_v11, 0.0  ;;  %v801_v16 = vadd.f32 %v2497_v45, %v800_v12  ;;  %v1025_v28 = vadd.f32 %v961_v20, %v809_v18  ;;  %v972_v20 = vld [vmem:[%s2492_s10 + $0x168] sm:$0xff] }
 0x120   : > { %v2142_v19 = vpop.f32.mrf.mxu0 }
 0x121   : > { %v1023_v21 = vadd.f32 %v959_v13, %v801_v16  ;;  %2230 = vmatmul.mubr.msk.f32.gmra.mxu1 %vm541_vm0, %v1084_v15  ;;  %v812_v26 = vadd.f32 %v2142_v19, %v2497_v45  ;;  %v1089_v37 = vmax.f32 %v1025_v28, 0.0 }
 0x122   : > { %v803_v22 = vpop.f32.mrf.mxu0  ;;  %2232 = vmatprep.mubr.msk.f32.mxu1 %vm541_vm0, %v1085_v17  ;;  %v973_v17 = vld [vmem:[%s2492_s10 + $0x170] sm:$0xff] }
 0x123   : > { %v1087_v25 = vmax.f32 %v1023_v21, 0.0  ;;  %v804_v27 = vadd.f32 %v2497_v45, %v803_v22  ;;  %v1026_v34 = vadd.f32 %v962_v29, %v812_v26  ;;  %v974_v26 = vld [vmem:[%s2492_s10 + $0x178] sm:$0xff] }
 0x124   : > { %v2145_v30 = vpop.f32.mrf.mxu0 }
 0x125   : > { %v1024_v31 = vadd.f32 %v960_v23, %v804_v27  ;;  %2233 = vmatmul.mubr.msk.f32.gmra.mxu1 %vm541_vm0, %v1086_v24  ;;  %v825_v38 = vadd.f32 %v2145_v30, %v2497_v45  ;;  %v1090_v44 = vmax.f32 %v1026_v34, 0.0  ;;  %v975_v30 = vld [vmem:[%s2492_s10 + $0x180] sm:$0xff] }
 0x126   : > { %v816_v32 = vpop.f32.mrf.mxu0  ;;  %2235 = vmatprep.mubr.msk.f32.mxu1 %vm541_vm0, %v1087_v25 }
 0x127   : > { %v1088_v35 = vmax.f32 %v1024_v31, 0.0  ;;  %v817_v36 = vadd.f32 %v2497_v45, %v816_v32  ;;  %v1029_v49 = vadd.f32 %v965_v40, %v825_v38  ;;  %v976_v40 = vld [vmem:[%s2492_s10 + $0x188] sm:$0xff] }
 0x128   : > { %v2146_v39 = vpop.f32.mrf.mxu0 }
 0x129   : > { %v1027_v41 = vadd.f32 %v963_v33, %v817_v36  ;;  %2236 = vmatmul.mubr.msk.f32.gmra.mxu1 %vm541_vm0, %v1088_v35  ;;  %v828_v47 = vadd.f32 %v2146_v39, %v2497_v45  ;;  %v1093_v58 = vmax.f32 %v1029_v49, 0.0 }
 0x12a   : > { %v819_v42 = vpop.f32.mrf.mxu0  ;;  %2238 = vmatprep.mubr.msk.f32.mxu1 %vm541_vm0, %v1089_v37  ;;  %v977_v37 = vld [vmem:[%s2492_s10 + $0x190] sm:$0xff] }
 0x12b   : > { %v1091_v46 = vmax.f32 %v1027_v41, 0.0  ;;  %v820_v48 = vadd.f32 %v2497_v45, %v819_v42  ;;  %v1030_v55 = vadd.f32 %v966_v50, %v828_v47  ;;  %v978_v47 = vld [vmem:[%s2492_s10 + $0x198] sm:$0xff] }
 0x12c   : > { %v2149_v51 = vpop.f32.mrf.mxu0 }
 0x12d   : > { %v1028_v52 = vadd.f32 %v964_v43, %v820_v48  ;;  %2239 = vmatmul.mubr.msk.f32.gmra.mxu1 %vm541_vm0, %v1090_v44  ;;  %v841_v59 = vadd.f32 %v2149_v51, %v2497_v45  ;;  %v1094_v1 = vmax.f32 %v1030_v55, 0.0  ;;  %v979_v51 = vld [vmem:[%s2492_s10 + $0x1a0] sm:$0xff] }
 0x12e   : > { %v832_v53 = vpop.f32.mrf.mxu0  ;;  %2241 = vmatprep.mubr.msk.f32.mxu1 %vm541_vm0, %v1091_v46 }
 0x12f   : > { %v1092_v56 = vmax.f32 %v1028_v52, 0.0  ;;  %v833_v57 = vadd.f32 %v2497_v45, %v832_v53  ;;  %v1033_v5 = vadd.f32 %v969_v61, %v841_v59  ;;  %v980_v61 = vld [vmem:[%s2492_s10 + $0x1a8] sm:$0xff] }
 0x130   : > { %v2150_v60 = vpop.f32.mrf.mxu0 }
 0x131   : > { %v1031_v62 = vadd.f32 %v967_v54, %v833_v57  ;;  %2242 = vmatmul.mubr.msk.f32.gmra.mxu1 %vm541_vm0, %v1092_v56  ;;  %v844_v3 = vadd.f32 %v2150_v60, %v2497_v45  ;;  %v1097_v14 = vmax.f32 %v1033_v5, 0.0 }
 0x132   : > { %v835_v63 = vpop.f32.mrf.mxu0  ;;  %2244 = vmatprep.mubr.msk.f32.mxu1 %vm541_vm0, %v1093_v58  ;;  %v981_v58 = vld [vmem:[%s2492_s10 + $0x1b0] sm:$0xff] }
 0x133   : > { %v1095_v2 = vmax.f32 %v1031_v62, 0.0  ;;  %v836_v4 = vadd.f32 %v2497_v45, %v835_v63  ;;  %v1034_v11 = vadd.f32 %v970_v6, %v844_v3  ;;  %v982_v3 = vld [vmem:[%s2492_s10 + $0x1b8] sm:$0xff] }
 0x134   : > { %v2153_v7 = vpop.f32.mrf.mxu0 }
 0x135   : > { %v1032_v8 = vadd.f32 %v968_v0, %v836_v4  ;;  %2245 = vmatmul.mubr.msk.f32.gmra.mxu1 %vm541_vm0, %v1094_v1  ;;  %v857_v15 = vadd.f32 %v2153_v7, %v2497_v45  ;;  %v1098_v21 = vmax.f32 %v1034_v11, 0.0  ;;  %v983_v7 = vld [vmem:[%s2492_s10 + $0x1c0] sm:$0xff] }
 0x136   : > { %v848_v9 = vpop.f32.mrf.mxu0  ;;  %2247 = vmatprep.mubr.msk.f32.mxu1 %vm541_vm0, %v1095_v2 }
 0x137   : > { %v1096_v12 = vmax.f32 %v1032_v8, 0.0  ;;  %v849_v13 = vadd.f32 %v2497_v45, %v848_v9  ;;  %v1037_v25 = vadd.f32 %v973_v17, %v857_v15  ;;  %v984_v17 = vld [vmem:[%s2492_s10 + $0x1c8] sm:$0xff] }
 0x138   : > { %v2154_v16 = vpop.f32.mrf.mxu0 }
 0x139   : > { %v1035_v18 = vadd.f32 %v971_v10, %v849_v13  ;;  %2248 = vmatmul.mubr.msk.f32.gmra.mxu1 %vm541_vm0, %v1096_v12  ;;  %v860_v23 = vadd.f32 %v2154_v16, %v2497_v45  ;;  %v1101_v34 = vmax.f32 %v1037_v25, 0.0 }
 0x13a   : > { %v851_v19 = vpop.f32.mrf.mxu0  ;;  %2250 = vmatprep.mubr.msk.f32.mxu1 %vm541_vm0, %v1097_v14  ;;  %v985_v14 = vld [vmem:[%s2492_s10 + $0x1d0] sm:$0xff] }
 0x13b   : > { %v1099_v22 = vmax.f32 %v1035_v18, 0.0  ;;  %v852_v24 = vadd.f32 %v2497_v45, %v851_v19  ;;  %v1038_v31 = vadd.f32 %v974_v26, %v860_v23  ;;  %v986_v23 = vld [vmem:[%s2492_s10 + $0x1d8] sm:$0xff] }
 0x13c   : > { %v2157_v27 = vpop.f32.mrf.mxu0 }
 0x13d   : > { %v1036_v28 = vadd.f32 %v972_v20, %v852_v24  ;;  %2251 = vmatmul.mubr.msk.f32.gmra.mxu1 %vm541_vm0, %v1098_v21  ;;  %v873_v35 = vadd.f32 %v2157_v27, %v2497_v45  ;;  %v1102_v41 = vmax.f32 %v1038_v31, 0.0  ;;  %v987_v27 = vld [vmem:[%s2492_s10 + $0x1e0] sm:$0xff] }
 0x13e   : > { %v864_v29 = vpop.f32.mrf.mxu0  ;;  %2253 = vmatprep.mubr.msk.f32.mxu1 %vm541_vm0, %v1099_v22 }
 0x13f   : > { %v1100_v32 = vmax.f32 %v1036_v28, 0.0  ;;  %v865_v33 = vadd.f32 %v2497_v45, %v864_v29  ;;  %v1041_v46 = vadd.f32 %v977_v37, %v873_v35  ;;  %v988_v37 = vld [vmem:[%s2492_s10 + $0x1e8] sm:$0xff] }
 0x140   : > { %v2158_v36 = vpop.f32.mrf.mxu0 }
 0x141   : > { %v1039_v38 = vadd.f32 %v975_v30, %v865_v33  ;;  %2254 = vmatmul.mubr.msk.f32.gmra.mxu1 %vm541_vm0, %v1100_v32  ;;  %v876_v43 = vadd.f32 %v2158_v36, %v2497_v45  ;;  %v1105_v55 = vmax.f32 %v1041_v46, 0.0 }
 0x142   : > { %v867_v39 = vpop.f32.mrf.mxu0  ;;  %2256 = vmatprep.mubr.msk.f32.mxu1 %vm541_vm0, %v1101_v34  ;;  %v989_v34 = vld [vmem:[%s2492_s10 + $0x1f0] sm:$0xff] }
 0x143   : > { %v1103_v42 = vmax.f32 %v1039_v38, 0.0  ;;  %v868_v44 = vadd.f32 %v2497_v45, %v867_v39  ;;  %v1042_v52 = vadd.f32 %v978_v47, %v876_v43  ;;  %v990_v43 = vld [vmem:[%s2492_s10 + $0x1f8] sm:$0xff] }
 0x144   : > { %v2161_v48 = vpop.f32.mrf.mxu0 }
 0x145   : > { %v1040_v49 = vadd.f32 %v976_v40, %v868_v44  ;;  %2257 = vmatmul.mubr.msk.f32.gmra.mxu1 %vm541_vm0, %v1102_v41  ;;  %v889_v56 = vadd.f32 %v2161_v48, %v2497_v45  ;;  %v1106_v62 = vmax.f32 %v1042_v52, 0.0 }
 0x146   : > { %v880_v50 = vpop.f32.mrf.mxu0  ;;  %2259 = vmatprep.mubr.msk.f32.mxu1 %vm541_vm0, %v1103_v42 }
 0x147   : > { %v1104_v53 = vmax.f32 %v1040_v49, 0.0  ;;  %v881_v54 = vadd.f32 %v2497_v45, %v880_v50  ;;  %v1045_v2 = vadd.f32 %v981_v58, %v889_v56 }
 0x148   : > { %v2162_v57 = vpop.f32.mrf.mxu0 }
 0x149   : > { %v1043_v59 = vadd.f32 %v979_v51, %v881_v54  ;;  %2260 = vmatmul.mubr.msk.f32.gmra.mxu1 %vm541_vm0, %v1104_v53  ;;  %v892_v0 = vadd.f32 %v2162_v57, %v2497_v45  ;;  %v1109_v11 = vmax.f32 %v1045_v2, 0.0 }
 0x14a   : > { %v883_v60 = vpop.f32.mrf.mxu0  ;;  %2262 = vmatprep.mubr.msk.f32.mxu1 %vm541_vm0, %v1105_v55 }
 0x14b   : > { %v1107_v63 = vmax.f32 %v1043_v59, 0.0  ;;  %v884_v1 = vadd.f32 %v2497_v45, %v883_v60  ;;  %v1046_v8 = vadd.f32 %v982_v3, %v892_v0 }
 0x14c   : > { %v2165_v4 = vpop.f32.mrf.mxu0 }
 0x14d   : > { %v1044_v5 = vadd.f32 %v980_v61, %v884_v1  ;;  %2263 = vmatmul.mubr.msk.f32.gmra.mxu1 %vm541_vm0, %v1106_v62  ;;  %v905_v12 = vadd.f32 %v2165_v4, %v2497_v45  ;;  %v1110_v18 = vmax.f32 %v1046_v8, 0.0 }
 0x14e   : > { %v896_v6 = vpop.f32.mrf.mxu0  ;;  %2265 = vmatprep.mubr.msk.f32.mxu1 %vm541_vm0, %v1107_v63 }
 0x14f   : > { %v1108_v9 = vmax.f32 %v1044_v5, 0.0  ;;  %v897_v10 = vadd.f32 %v2497_v45, %v896_v6  ;;  %v1049_v22 = vadd.f32 %v985_v14, %v905_v12 }
 0x150   : > { %v2166_v13 = vpop.f32.mrf.mxu0 }
 0x151   : > { %v1047_v15 = vadd.f32 %v983_v7, %v897_v10  ;;  %2266 = vmatmul.mubr.msk.f32.gmra.mxu1 %vm541_vm0, %v1108_v9  ;;  %v908_v20 = vadd.f32 %v2166_v13, %v2497_v45  ;;  %v1113_v31 = vmax.f32 %v1049_v22, 0.0 }
 0x152   : > { %v899_v16 = vpop.f32.mrf.mxu0  ;;  %2268 = vmatprep.mubr.msk.f32.mxu1 %vm541_vm0, %v1109_v11 }
 0x153   : > { %v1111_v19 = vmax.f32 %v1047_v15, 0.0  ;;  %v900_v21 = vadd.f32 %v2497_v45, %v899_v16  ;;  %v1050_v28 = vadd.f32 %v986_v23, %v908_v20 }
 0x154   : > { %v2169_v24 = vpop.f32.mrf.mxu0 }
 0x155   : > { %v1048_v25 = vadd.f32 %v984_v17, %v900_v21  ;;  %2269 = vmatmul.mubr.msk.f32.gmra.mxu1 %vm541_vm0, %v1110_v18  ;;  %v921_v32 = vadd.f32 %v2169_v24, %v2497_v45  ;;  %v1114_v38 = vmax.f32 %v1050_v28, 0.0 }
 0x156   : > { %v912_v26 = vpop.f32.mrf.mxu0  ;;  %2271 = vmatprep.mubr.msk.f32.mxu1 %vm541_vm0, %v1111_v19 }
 0x157   : > { %v1112_v29 = vmax.f32 %v1048_v25, 0.0  ;;  %v913_v30 = vadd.f32 %v2497_v45, %v912_v26  ;;  %v1053_v42 = vadd.f32 %v989_v34, %v921_v32 }
 0x158   : > { %v2170_v33 = vpop.f32.mrf.mxu0 }
 0x159   : > { %v1051_v35 = vadd.f32 %v987_v27, %v913_v30  ;;  %2272 = vmatmul.mubr.msk.f32.gmra.mxu1 %vm541_vm0, %v1112_v29  ;;  %v924_v40 = vadd.f32 %v2170_v33, %v2497_v45  ;;  %v1117_v48 = vmax.f32 %v1053_v42, 0.0 }
 0x15a   : > { %v915_v36 = vpop.f32.mrf.mxu0  ;;  %2274 = vmatprep.mubr.msk.f32.mxu1 %vm541_vm0, %v1113_v31 }
 0x15b   : > { %v1115_v39 = vmax.f32 %v1051_v35, 0.0  ;;  %v916_v41 = vadd.f32 %v2497_v45, %v915_v36  ;;  %v1054_v46 = vadd.f32 %v990_v43, %v924_v40  ;;  %v2694_v45 = vld [vmem:[%s2902_s4] ss:$0 sm:$0xff] }
 0x15d   : > { %v1052_v44 = vadd.f32 %v988_v37, %v916_v41  ;;  %2275 = vmatmul.mubr.msk.f32.gmra.mxu1 %vm541_vm0, %v1114_v38  ;;  %v1118_v49 = vmax.f32 %v1054_v46, 0.0 }
 0x15e   : > { %2277 = vmatprep.mubr.msk.f32.mxu1 %vm541_vm0, %v1115_v39 }
 0x15f   : > { %v1116_v47 = vmax.f32 %v1052_v44, 0.0 }
 0x161   : > { %2278 = vmatmul.mubr.msk.f32.gmra.mxu1 %vm541_vm0, %v1116_v47 }
 0x162   : > { %2280 = vmatprep.mubr.msk.f32.mxu1 %vm541_vm0, %v1117_v48 }
 0x165   : > { %2281 = vmatmul.mubr.msk.f32.gmra.mxu1 %vm541_vm0, %v1118_v49 }
 0x1a9   : > { %v2189_v50 = vpop.f32.mrf.mxu1 }
 0x1aa   : > { %v1398_v51 = vadd.f32 %v2189_v50, %v2694_v45 }
 0x1ab   : > { %v1392_v52 = vpop.f32.mrf.mxu1 }
 0x1ac   : > { %1713 = vst.msk [vmem:[%s2701_s16 + $0x8] sm:$0xff] %vm1711_vm1, %v1398_v51  ;;  %v1393_v53 = vadd.f32 %v2694_v45, %v1392_v52 }
 0x1ad   : > { %v2192_v54 = vpop.f32.mrf.mxu1 }
 0x1ae   : > { %1712 = vst.msk [vmem:[%s2701_s16] sm:$0xff] %vm1711_vm1, %v1393_v53  ;;  %v1408_v55 = vadd.f32 %v2192_v54, %v2694_v45 }
 0x1af   : > { %v1402_v56 = vpop.f32.mrf.mxu1 }
 0x1b0   : > { %1715 = vst.msk [vmem:[%s2701_s16 + $0x18] sm:$0xff] %vm1711_vm1, %v1408_v55  ;;  %v1403_v57 = vadd.f32 %v2694_v45, %v1402_v56 }
 0x1b1   : > { %v2195_v58 = vpop.f32.mrf.mxu1 }
 0x1b2   : > { %1714 = vst.msk [vmem:[%s2701_s16 + $0x10] sm:$0xff] %vm1711_vm1, %v1403_v57  ;;  %v1418_v59 = vadd.f32 %v2195_v58, %v2694_v45 }
 0x1b3   : > { %v1412_v60 = vpop.f32.mrf.mxu1 }
 0x1b4   : > { %1717 = vst.msk [vmem:[%s2701_s16 + $0x28] sm:$0xff] %vm1711_vm1, %v1418_v59  ;;  %v1413_v61 = vadd.f32 %v2694_v45, %v1412_v60 }
 0x1b5   : > { %v2198_v62 = vpop.f32.mrf.mxu1 }
 0x1b6   : > { %1716 = vst.msk [vmem:[%s2701_s16 + $0x20] sm:$0xff] %vm1711_vm1, %v1413_v61  ;;  %v1428_v63 = vadd.f32 %v2198_v62, %v2694_v45 }
 0x1b7   : > { %v1422_v0 = vpop.f32.mrf.mxu1 }
 0x1b8   : > { %1719 = vst.msk [vmem:[%s2701_s16 + $0x38] sm:$0xff] %vm1711_vm1, %v1428_v63  ;;  %v1423_v1 = vadd.f32 %v2694_v45, %v1422_v0 }
 0x1b9   : > { %v2201_v2 = vpop.f32.mrf.mxu1 }
 0x1ba   : > { %1718 = vst.msk [vmem:[%s2701_s16 + $0x30] sm:$0xff] %vm1711_vm1, %v1423_v1  ;;  %v1438_v3 = vadd.f32 %v2201_v2, %v2694_v45 }
 0x1bb   : > { %v1432_v4 = vpop.f32.mrf.mxu1 }
 0x1bc   : > { %1721 = vst.msk [vmem:[%s2701_s16 + $0x48] sm:$0xff] %vm1711_vm1, %v1438_v3  ;;  %v1433_v5 = vadd.f32 %v2694_v45, %v1432_v4 }
 0x1bd   : > { %v2204_v6 = vpop.f32.mrf.mxu1 }
 0x1be   : > { %1720 = vst.msk [vmem:[%s2701_s16 + $0x40] sm:$0xff] %vm1711_vm1, %v1433_v5  ;;  %v1448_v7 = vadd.f32 %v2204_v6, %v2694_v45 }
 0x1bf   : > { %v1442_v8 = vpop.f32.mrf.mxu1 }
 0x1c0   : > { %1723 = vst.msk [vmem:[%s2701_s16 + $0x58] sm:$0xff] %vm1711_vm1, %v1448_v7  ;;  %v1443_v9 = vadd.f32 %v2694_v45, %v1442_v8 }
 0x1c1   : > { %v2207_v10 = vpop.f32.mrf.mxu1 }
 0x1c2   : > { %1722 = vst.msk [vmem:[%s2701_s16 + $0x50] sm:$0xff] %vm1711_vm1, %v1443_v9  ;;  %v1458_v11 = vadd.f32 %v2207_v10, %v2694_v45 }
 0x1c3   : > { %v1452_v12 = vpop.f32.mrf.mxu1 }
 0x1c4   : > { %1725 = vst.msk [vmem:[%s2701_s16 + $0x68] sm:$0xff] %vm1711_vm1, %v1458_v11  ;;  %v1453_v13 = vadd.f32 %v2694_v45, %v1452_v12 }
 0x1c5   : > { %v2210_v14 = vpop.f32.mrf.mxu1 }
 0x1c6   : > { %1724 = vst.msk [vmem:[%s2701_s16 + $0x60] sm:$0xff] %vm1711_vm1, %v1453_v13  ;;  %v1468_v15 = vadd.f32 %v2210_v14, %v2694_v45 }
 0x1c7   : > { %v1462_v16 = vpop.f32.mrf.mxu1 }
 0x1c8   : > { %1727 = vst.msk [vmem:[%s2701_s16 + $0x78] sm:$0xff] %vm1711_vm1, %v1468_v15  ;;  %v1463_v17 = vadd.f32 %v2694_v45, %v1462_v16 }
 0x1c9   : > { %v2213_v18 = vpop.f32.mrf.mxu1 }
 0x1ca   : > { %1726 = vst.msk [vmem:[%s2701_s16 + $0x70] sm:$0xff] %vm1711_vm1, %v1463_v17  ;;  %v1478_v19 = vadd.f32 %v2213_v18, %v2694_v45 }
 0x1cb   : > { %v1472_v20 = vpop.f32.mrf.mxu1 }
 0x1cc   : > { %1729 = vst.msk [vmem:[%s2701_s16 + $0x88] sm:$0xff] %vm1711_vm1, %v1478_v19  ;;  %v1473_v21 = vadd.f32 %v2694_v45, %v1472_v20 }
 0x1cd   : > { %v2216_v22 = vpop.f32.mrf.mxu1 }
 0x1ce   : > { %1728 = vst.msk [vmem:[%s2701_s16 + $0x80] sm:$0xff] %vm1711_vm1, %v1473_v21  ;;  %v1488_v23 = vadd.f32 %v2216_v22, %v2694_v45 }
 0x1cf   : > { %v1482_v24 = vpop.f32.mrf.mxu1 }
 0x1d0   : > { %1731 = vst.msk [vmem:[%s2701_s16 + $0x98] sm:$0xff] %vm1711_vm1, %v1488_v23  ;;  %v1483_v25 = vadd.f32 %v2694_v45, %v1482_v24 }
 0x1d1   : > { %v2219_v26 = vpop.f32.mrf.mxu1 }
 0x1d2   : > { %1730 = vst.msk [vmem:[%s2701_s16 + $0x90] sm:$0xff] %vm1711_vm1, %v1483_v25  ;;  %v1498_v27 = vadd.f32 %v2219_v26, %v2694_v45 }
 0x1d3   : > { %v1492_v28 = vpop.f32.mrf.mxu1 }
 0x1d4   : > { %1733 = vst.msk [vmem:[%s2701_s16 + $0xa8] sm:$0xff] %vm1711_vm1, %v1498_v27  ;;  %v1493_v29 = vadd.f32 %v2694_v45, %v1492_v28 }
 0x1d5   : > { %v2222_v30 = vpop.f32.mrf.mxu1 }
 0x1d6   : > { %1732 = vst.msk [vmem:[%s2701_s16 + $0xa0] sm:$0xff] %vm1711_vm1, %v1493_v29  ;;  %v1508_v31 = vadd.f32 %v2222_v30, %v2694_v45 }
 0x1d7   : > { %v1502_v32 = vpop.f32.mrf.mxu1 }
 0x1d8   : > { %1735 = vst.msk [vmem:[%s2701_s16 + $0xb8] sm:$0xff] %vm1711_vm1, %v1508_v31  ;;  %v1503_v33 = vadd.f32 %v2694_v45, %v1502_v32 }
 0x1d9   : > { %v2225_v34 = vpop.f32.mrf.mxu1 }
 0x1da   : > { %1734 = vst.msk [vmem:[%s2701_s16 + $0xb0] sm:$0xff] %vm1711_vm1, %v1503_v33  ;;  %v1518_v35 = vadd.f32 %v2225_v34, %v2694_v45 }
 0x1db   : > { %v1512_v36 = vpop.f32.mrf.mxu1 }
 0x1dc   : > { %1737 = vst.msk [vmem:[%s2701_s16 + $0xc8] sm:$0xff] %vm1711_vm1, %v1518_v35  ;;  %v1513_v37 = vadd.f32 %v2694_v45, %v1512_v36 }
 0x1dd   : > { %v2228_v38 = vpop.f32.mrf.mxu1 }
 0x1de   : > { %1736 = vst.msk [vmem:[%s2701_s16 + $0xc0] sm:$0xff] %vm1711_vm1, %v1513_v37  ;;  %v1528_v39 = vadd.f32 %v2228_v38, %v2694_v45 }
 0x1df   : > { %v1522_v40 = vpop.f32.mrf.mxu1 }
 0x1e0   : > { %1739 = vst.msk [vmem:[%s2701_s16 + $0xd8] sm:$0xff] %vm1711_vm1, %v1528_v39  ;;  %v1523_v41 = vadd.f32 %v2694_v45, %v1522_v40 }
 0x1e1   : > { %v2231_v42 = vpop.f32.mrf.mxu1 }
 0x1e2   : > { %1738 = vst.msk [vmem:[%s2701_s16 + $0xd0] sm:$0xff] %vm1711_vm1, %v1523_v41  ;;  %v1538_v43 = vadd.f32 %v2231_v42, %v2694_v45 }
 0x1e3   : > { %v1532_v44 = vpop.f32.mrf.mxu1 }
 0x1e4   : > { %1741 = vst.msk [vmem:[%s2701_s16 + $0xe8] sm:$0xff] %vm1711_vm1, %v1538_v43  ;;  %v1533_v46 = vadd.f32 %v2694_v45, %v1532_v44 }
 0x1e5   : > { %v2234_v47 = vpop.f32.mrf.mxu1 }
 0x1e6   : > { %1740 = vst.msk [vmem:[%s2701_s16 + $0xe0] sm:$0xff] %vm1711_vm1, %v1533_v46  ;;  %v1548_v48 = vadd.f32 %v2234_v47, %v2694_v45 }
 0x1e7   : > { %v1542_v49 = vpop.f32.mrf.mxu1 }
 0x1e8   : > { %1743 = vst.msk [vmem:[%s2701_s16 + $0xf8] sm:$0xff] %vm1711_vm1, %v1548_v48  ;;  %v1543_v50 = vadd.f32 %v2694_v45, %v1542_v49 }
 0x1e9   : > { %v2237_v51 = vpop.f32.mrf.mxu1 }
 0x1ea   : > { %1742 = vst.msk [vmem:[%s2701_s16 + $0xf0] sm:$0xff] %vm1711_vm1, %v1543_v50  ;;  %v1558_v52 = vadd.f32 %v2237_v51, %v2694_v45 }
 0x1eb   : > { %v1552_v53 = vpop.f32.mrf.mxu1 }
 0x1ec   : > { %1745 = vst.msk [vmem:[%s2701_s16 + $0x108] sm:$0xff] %vm1711_vm1, %v1558_v52  ;;  %v1553_v54 = vadd.f32 %v2694_v45, %v1552_v53 }
 0x1ed   : > { %v2240_v55 = vpop.f32.mrf.mxu1 }
 0x1ee   : > { %1744 = vst.msk [vmem:[%s2701_s16 + $0x100] sm:$0xff] %vm1711_vm1, %v1553_v54  ;;  %v1568_v56 = vadd.f32 %v2240_v55, %v2694_v45 }
 0x1ef   : > { %v1562_v57 = vpop.f32.mrf.mxu1 }
 0x1f0   : > { %1747 = vst.msk [vmem:[%s2701_s16 + $0x118] sm:$0xff] %vm1711_vm1, %v1568_v56  ;;  %v1563_v58 = vadd.f32 %v2694_v45, %v1562_v57 }
 0x1f1   : > { %v2243_v59 = vpop.f32.mrf.mxu1 }
 0x1f2   : > { %1746 = vst.msk [vmem:[%s2701_s16 + $0x110] sm:$0xff] %vm1711_vm1, %v1563_v58  ;;  %v1578_v60 = vadd.f32 %v2243_v59, %v2694_v45 }
 0x1f3   : > { %v1572_v61 = vpop.f32.mrf.mxu1 }
 0x1f4   : > { %1749 = vst.msk [vmem:[%s2701_s16 + $0x128] sm:$0xff] %vm1711_vm1, %v1578_v60  ;;  %v1573_v62 = vadd.f32 %v2694_v45, %v1572_v61 }
 0x1f5   : > { %v2246_v63 = vpop.f32.mrf.mxu1 }
 0x1f6   : > { %1748 = vst.msk [vmem:[%s2701_s16 + $0x120] sm:$0xff] %vm1711_vm1, %v1573_v62  ;;  %v1588_v0 = vadd.f32 %v2246_v63, %v2694_v45 }
 0x1f7   : > { %v1582_v1 = vpop.f32.mrf.mxu1 }
 0x1f8   : > { %1751 = vst.msk [vmem:[%s2701_s16 + $0x138] sm:$0xff] %vm1711_vm1, %v1588_v0  ;;  %v1583_v2 = vadd.f32 %v2694_v45, %v1582_v1 }
 0x1f9   : > { %v2249_v3 = vpop.f32.mrf.mxu1 }
 0x1fa   : > { %1750 = vst.msk [vmem:[%s2701_s16 + $0x130] sm:$0xff] %vm1711_vm1, %v1583_v2  ;;  %v1598_v4 = vadd.f32 %v2249_v3, %v2694_v45 }
 0x1fb   : > { %v1592_v5 = vpop.f32.mrf.mxu1 }
 0x1fc   : > { %1753 = vst.msk [vmem:[%s2701_s16 + $0x148] sm:$0xff] %vm1711_vm1, %v1598_v4  ;;  %v1593_v6 = vadd.f32 %v2694_v45, %v1592_v5 }
 0x1fd   : > { %v2252_v7 = vpop.f32.mrf.mxu1 }
 0x1fe   : > { %1752 = vst.msk [vmem:[%s2701_s16 + $0x140] sm:$0xff] %vm1711_vm1, %v1593_v6  ;;  %v1608_v8 = vadd.f32 %v2252_v7, %v2694_v45 }
 0x1ff   : > { %v1602_v9 = vpop.f32.mrf.mxu1 }
 0x200   : > { %1755 = vst.msk [vmem:[%s2701_s16 + $0x158] sm:$0xff] %vm1711_vm1, %v1608_v8  ;;  %v1603_v10 = vadd.f32 %v2694_v45, %v1602_v9 }
 0x201   : > { %v2255_v11 = vpop.f32.mrf.mxu1 }
 0x202   : > { %1754 = vst.msk [vmem:[%s2701_s16 + $0x150] sm:$0xff] %vm1711_vm1, %v1603_v10  ;;  %v1618_v12 = vadd.f32 %v2255_v11, %v2694_v45 }
 0x203   : > { %v1612_v13 = vpop.f32.mrf.mxu1 }
 0x204   : > { %1757 = vst.msk [vmem:[%s2701_s16 + $0x168] sm:$0xff] %vm1711_vm1, %v1618_v12  ;;  %v1613_v14 = vadd.f32 %v2694_v45, %v1612_v13 }
 0x205   : > { %v2258_v15 = vpop.f32.mrf.mxu1 }
 0x206   : > { %1756 = vst.msk [vmem:[%s2701_s16 + $0x160] sm:$0xff] %vm1711_vm1, %v1613_v14  ;;  %v1628_v16 = vadd.f32 %v2258_v15, %v2694_v45 }
 0x207   : > { %v1622_v17 = vpop.f32.mrf.mxu1 }
 0x208   : > { %1759 = vst.msk [vmem:[%s2701_s16 + $0x178] sm:$0xff] %vm1711_vm1, %v1628_v16  ;;  %v1623_v18 = vadd.f32 %v2694_v45, %v1622_v17 }
 0x209   : > { %v2261_v19 = vpop.f32.mrf.mxu1 }
 0x20a   : > { %1758 = vst.msk [vmem:[%s2701_s16 + $0x170] sm:$0xff] %vm1711_vm1, %v1623_v18  ;;  %v1638_v20 = vadd.f32 %v2261_v19, %v2694_v45 }
 0x20b   : > { %v1632_v21 = vpop.f32.mrf.mxu1 }
 0x20c   : > { %1761 = vst.msk [vmem:[%s2701_s16 + $0x188] sm:$0xff] %vm1711_vm1, %v1638_v20  ;;  %v1633_v22 = vadd.f32 %v2694_v45, %v1632_v21 }
 0x20d   : > { %v2264_v23 = vpop.f32.mrf.mxu1 }
 0x20e   : > { %1760 = vst.msk [vmem:[%s2701_s16 + $0x180] sm:$0xff] %vm1711_vm1, %v1633_v22  ;;  %v1648_v24 = vadd.f32 %v2264_v23, %v2694_v45 }
 0x20f   : > { %v1642_v25 = vpop.f32.mrf.mxu1 }
 0x210   : > { %1763 = vst.msk [vmem:[%s2701_s16 + $0x198] sm:$0xff] %vm1711_vm1, %v1648_v24  ;;  %v1643_v26 = vadd.f32 %v2694_v45, %v1642_v25 }
 0x211   : > { %v2267_v27 = vpop.f32.mrf.mxu1 }
 0x212   : > { %1762 = vst.msk [vmem:[%s2701_s16 + $0x190] sm:$0xff] %vm1711_vm1, %v1643_v26  ;;  %v1658_v28 = vadd.f32 %v2267_v27, %v2694_v45 }
 0x213   : > { %v1652_v29 = vpop.f32.mrf.mxu1 }
 0x214   : > { %1765 = vst.msk [vmem:[%s2701_s16 + $0x1a8] sm:$0xff] %vm1711_vm1, %v1658_v28  ;;  %v1653_v30 = vadd.f32 %v2694_v45, %v1652_v29 }
 0x215   : > { %v2270_v31 = vpop.f32.mrf.mxu1 }
 0x216   : > { %1764 = vst.msk [vmem:[%s2701_s16 + $0x1a0] sm:$0xff] %vm1711_vm1, %v1653_v30  ;;  %v1668_v32 = vadd.f32 %v2270_v31, %v2694_v45 }
 0x217   : > { %v1662_v33 = vpop.f32.mrf.mxu1 }
 0x218   : > { %1767 = vst.msk [vmem:[%s2701_s16 + $0x1b8] sm:$0xff] %vm1711_vm1, %v1668_v32  ;;  %v1663_v34 = vadd.f32 %v2694_v45, %v1662_v33 }
 0x219   : > { %v2273_v35 = vpop.f32.mrf.mxu1 }
 0x21a   : > { %1766 = vst.msk [vmem:[%s2701_s16 + $0x1b0] sm:$0xff] %vm1711_vm1, %v1663_v34  ;;  %v1678_v36 = vadd.f32 %v2273_v35, %v2694_v45 }
 0x21b   : > { %v1672_v37 = vpop.f32.mrf.mxu1 }
 0x21c   : > { %1769 = vst.msk [vmem:[%s2701_s16 + $0x1c8] sm:$0xff] %vm1711_vm1, %v1678_v36  ;;  %v1673_v38 = vadd.f32 %v2694_v45, %v1672_v37 }
 0x21d   : > { %v2276_v39 = vpop.f32.mrf.mxu1 }
 0x21e   : > { %1768 = vst.msk [vmem:[%s2701_s16 + $0x1c0] sm:$0xff] %vm1711_vm1, %v1673_v38  ;;  %v1688_v40 = vadd.f32 %v2276_v39, %v2694_v45 }
 0x21f   : > { %v1682_v41 = vpop.f32.mrf.mxu1 }
 0x220   : > { %1771 = vst.msk [vmem:[%s2701_s16 + $0x1d8] sm:$0xff] %vm1711_vm1, %v1688_v40  ;;  %v1683_v42 = vadd.f32 %v2694_v45, %v1682_v41 }
 0x221   : > { %v2279_v43 = vpop.f32.mrf.mxu1 }
 0x222   : > { %1770 = vst.msk [vmem:[%s2701_s16 + $0x1d0] sm:$0xff] %vm1711_vm1, %v1683_v42  ;;  %v1698_v44 = vadd.f32 %v2279_v43, %v2694_v45 }
 0x223   : > { %v1692_v46 = vpop.f32.mrf.mxu1 }
 0x224   : > { %1773 = vst.msk [vmem:[%s2701_s16 + $0x1e8] sm:$0xff] %vm1711_vm1, %v1698_v44  ;;  %v1693_v47 = vadd.f32 %v2694_v45, %v1692_v46 }
 0x225   : > { %v2282_v48 = vpop.f32.mrf.mxu1 }
 0x226   : > { %1772 = vst.msk [vmem:[%s2701_s16 + $0x1e0] sm:$0xff] %vm1711_vm1, %v1693_v47  ;;  %v1708_v49 = vadd.f32 %v2282_v48, %v2694_v45 }
 0x227   : > { %v1702_v50 = vpop.f32.mrf.mxu1 }
 0x228   : > { %1775 = vst.msk [vmem:[%s2701_s16 + $0x1f8] sm:$0xff] %vm1711_vm1, %v1708_v49  ;;  %v1703_v51 = vadd.f32 %v2694_v45, %v1702_v50 }
 0x22a   : > { %1774 = vst.msk [vmem:[%s2701_s16 + $0x1f0] sm:$0xff] %vm1711_vm1, %v1703_v51 }
 0x22b PF: > { %s16_s21 = sadd.s32 1, %s2333_s21  }
 0x22c   : > { %p13_p4 = scmp.ge.s32.totalorder %s16_s21, 6  }
 0x22e   :  { %15 = sbr.rel (!%p13_p4) target bundleno = 1 (0x1), region = 77 }

</bundles_post_ra>
